<compile_context>
chip_gen: v7x
topology: tpu7x:2x2x1
jax: 0.10.0
libtpu: 0.0.40
codegen_flags: <defaults>
</compile_context>

<pallas_src>
import jax
import jax.numpy as jnp
from jax.experimental import pallas as pl
from jax.experimental.pallas import tpu as pltpu


# ----------------------------------------------------------------------------
# Kernel 1: per-image im2col conv = (tm, K) @ (K, 128) + bias, fused ReLU.
# Inputs are bf16, accumulation f32, output bf16 with a lane-dense N=128
# (extra columns are zero-padded weights and get sliced off in the glue).
# ----------------------------------------------------------------------------
def _conv_matmul_relu_kernel(x_ref, w_ref, b_ref, o_ref):
    x = x_ref[0]                                              # (tm, K) bf16
    acc = jnp.dot(x, w_ref[...], preferred_element_type=jnp.float32)
    acc = jnp.maximum(acc + b_ref[...], 0.0)                  # f32 epilogue
    o_ref[0] = acc.astype(o_ref.dtype)


def conv_matmul_relu(patches, w, b):
    """patches: (B, tm, K) bf16; w: (K, 128) bf16; b: (1, 128) f32."""
    B, tm, K = patches.shape
    N = w.shape[1]
    return pl.pallas_call(
        _conv_matmul_relu_kernel,
        out_shape=jax.ShapeDtypeStruct((B, tm, N), jnp.bfloat16),
        grid=(B,),
        in_specs=[
            pl.BlockSpec((1, tm, K), lambda i: (i, 0, 0)),
            pl.BlockSpec((K, N), lambda i: (0, 0)),
            pl.BlockSpec((1, N), lambda i: (0, 0)),
        ],
        out_specs=pl.BlockSpec((1, tm, N), lambda i: (i, 0, 0)),
        compiler_params=pltpu.CompilerParams(
            dimension_semantics=("parallel",)),
    )(patches, w, b)


# ----------------------------------------------------------------------------
# Kernel 2 ("head"): conv3 + ReLU + flatten + fc1 + ReLU + fc2 fused.
# patches3 is spatial-major: (49, Bp, 9*32).  For each spatial position p we
# compute the conv3 output (Bp, 64) and immediately accumulate its fc1
# contribution (Bp, 64) @ W1p[p] (64, 128), so the (C,H,W)-ordered flatten is
# folded into the pre-permuted fc1 weight and no reshape/transpose is needed.
# ----------------------------------------------------------------------------
def _head_kernel(p3_ref, w3_ref, b3_ref, w1_ref, b1_ref, w2_ref, b2_ref,
                 o_ref):
    P = p3_ref.shape[0]                                       # 49
    Bp = p3_ref.shape[1]
    w3 = w3_ref[...]                                          # (288, 64) bf16
    b3 = jnp.broadcast_to(b3_ref[...], (Bp, w3.shape[1]))     # hoisted bcast
    acc = jnp.zeros((Bp, w1_ref.shape[2]), jnp.float32)
    for p in range(P):                                        # static unroll
        xp = p3_ref[p]                                        # (Bp, 288) bf16
        y = jnp.dot(xp, w3, preferred_element_type=jnp.float32) + b3
        y = jnp.maximum(y, 0.0)                               # conv3 ReLU
        acc = acc + jnp.dot(y.astype(jnp.bfloat16), w1_ref[p],
                            preferred_element_type=jnp.float32)
    h = jnp.maximum(acc + b1_ref[...], 0.0)                   # fc1 ReLU
    out = jnp.dot(h.astype(jnp.bfloat16), w2_ref[...],
                  preferred_element_type=jnp.float32) + b2_ref[...]
    o_ref[...] = out


def head_forward(p3, w3, b3, w1, b1, w2, b2):
    P, Bp, K3 = p3.shape
    N = w2.shape[1]
    return pl.pallas_call(
        _head_kernel,
        out_shape=jax.ShapeDtypeStruct((Bp, N), jnp.float32),
        grid=(1,),
        in_specs=[
            pl.BlockSpec((P, Bp, K3), lambda i: (0, 0, 0)),
            pl.BlockSpec(w3.shape, lambda i: (0, 0)),
            pl.BlockSpec(b3.shape, lambda i: (0, 0)),
            pl.BlockSpec(w1.shape, lambda i: (0, 0, 0)),
            pl.BlockSpec(b1.shape, lambda i: (0, 0)),
            pl.BlockSpec(w2.shape, lambda i: (0, 0)),
            pl.BlockSpec(b2.shape, lambda i: (0, 0)),
        ],
        out_specs=pl.BlockSpec((Bp, N), lambda i: (0, 0)),
        compiler_params=pltpu.CompilerParams(
            dimension_semantics=("arbitrary",)),
    )(p3, w3, b3, w1, b1, w2, b2)


# ----------------------------------------------------------------------------
# XLA glue: im2col patch extraction and 2x2 max-pool (pure data movement on
# tiny bf16 tensors; the MAC hot paths all run inside the Pallas kernels).
# ----------------------------------------------------------------------------
def im2col_3x3(x_nhwc):
    B, H, W, C = x_nhwc.shape
    xp = jnp.pad(x_nhwc, ((0, 0), (1, 1), (1, 1), (0, 0)))
    cols = [xp[:, kh:kh + H, kw:kw + W, :] for kh in range(3) for kw in range(3)]
    return jnp.concatenate(cols, axis=-1).reshape(B, H * W, 9 * C)


def maxpool2x2(x_nhwc):
    B, H, W, C = x_nhwc.shape
    return x_nhwc.reshape(B, H // 2, 2, W // 2, 2, C).max(axis=(2, 4))


# ----------------------------------------------------------------------------
# One-time weight packing (bf16, im2col layout, lane-dense padded outputs,
# fc1 permuted to (spatial, channel, out) so the NCHW flatten is free).
# ----------------------------------------------------------------------------
def pack_params(params):
    def conv_pack(w_oihw, b, n_pad):
        cout, cin = w_oihw.shape[0], w_oihw.shape[1]
        wm = jnp.transpose(w_oihw, (2, 3, 1, 0)).reshape(9 * cin, cout)
        wm = jnp.pad(wm, ((0, 0), (0, n_pad - cout))).astype(jnp.bfloat16)
        bm = jnp.pad(b, (0, n_pad - cout)).astype(jnp.float32).reshape(1, n_pad)
        return wm, bm

    w1, b1 = conv_pack(params["conv1_w"], params["conv1_b"], 128)
    w2, b2 = conv_pack(params["conv2_w"], params["conv2_b"], 128)
    # conv3 output never leaves the head kernel -> no lane padding needed.
    w3 = jnp.transpose(params["conv3_w"], (2, 3, 1, 0)).reshape(288, 64)
    w3 = w3.astype(jnp.bfloat16)
    b3 = params["conv3_b"].astype(jnp.float32).reshape(1, 64)
    # fc1: torch feature index f = c*49 + p  ->  W1p[p, c, j] = fc1_w[j, f].
    wfc1 = params["fc1_w"].reshape(128, 64, 49).transpose(2, 1, 0)
    wfc1 = wfc1.astype(jnp.bfloat16)                           # (49, 64, 128)
    bfc1 = params["fc1_b"].astype(jnp.float32).reshape(1, 128)
    # fc2: pad N=9 -> 128 for lane-dense output, slice outside.
    wfc2 = jnp.pad(params["fc2_w"].T, ((0, 0), (0, 128 - 9))).astype(jnp.bfloat16)
    bfc2 = jnp.pad(params["fc2_b"], (0, 128 - 9)).astype(jnp.float32).reshape(1, 128)
    return dict(w1=w1, b1=b1, w2=w2, b2=b2, w3=w3, b3=b3,
                wfc1=wfc1, bfc1=bfc1, wfc2=wfc2, bfc2=bfc2)


# ----------------------------------------------------------------------------
# Full CNN2 forward (3 Pallas launches).
# ----------------------------------------------------------------------------
def cnn2_forward(packed, x_nchw):
    B = x_nchw.shape[0]
    x = jnp.transpose(x_nchw, (0, 2, 3, 1)).astype(jnp.bfloat16)   # NHWC bf16

    p1 = im2col_3x3(x)                                       # (B, 784, 27)
    y1 = conv_matmul_relu(p1, packed["w1"], packed["b1"])    # (B, 784, 128)
    y1 = maxpool2x2(y1[..., :16].reshape(B, 28, 28, 16))     # (B, 14, 14, 16)

    p2 = im2col_3x3(y1)                                      # (B, 196, 144)
    y2 = conv_matmul_relu(p2, packed["w2"], packed["b2"])    # (B, 196, 128)
    y2 = maxpool2x2(y2[..., :32].reshape(B, 14, 14, 32))     # (B, 7, 7, 32)

    p3 = im2col_3x3(y2)                                      # (B, 49, 288)
    p3 = jnp.transpose(p3, (1, 0, 2))                        # (49, B, 288)
    Bp = max(8, ((B + 7) // 8) * 8)                          # pad M to >= 8
    if Bp != B:
        p3 = jnp.pad(p3, ((0, 0), (0, Bp - B), (0, 0)))
    out = head_forward(p3, packed["w3"], packed["b3"],
                       packed["wfc1"], packed["bfc1"],
                       packed["wfc2"], packed["bfc2"])       # (Bp, 128) f32
    return out[:B, :9]


# ----------------------------------------------------------------------------
# Deterministic PyTorch-style (uniform +/- 1/sqrt(fan_in)) parameter init.
# ----------------------------------------------------------------------------
def init_params(key):
    def u(k, shape, fan_in):
        bound = 1.0 / jnp.sqrt(jnp.float32(fan_in))
        return jax.random.uniform(k, shape, jnp.float32, -bound, bound)

    ks = jax.random.split(key, 10)
    return {
        "conv1_w": u(ks[0], (16, 3, 3, 3), 3 * 9),
        "conv1_b": u(ks[1], (16,), 3 * 9),
        "conv2_w": u(ks[2], (32, 16, 3, 3), 16 * 9),
        "conv2_b": u(ks[3], (32,), 16 * 9),
        "conv3_w": u(ks[4], (64, 32, 3, 3), 32 * 9),
        "conv3_b": u(ks[5], (64,), 32 * 9),
        "fc1_w": u(ks[6], (128, 64 * 7 * 7), 64 * 7 * 7),
        "fc1_b": u(ks[7], (128,), 64 * 7 * 7),
        "fc2_w": u(ks[8], (9, 128), 128),
        "fc2_b": u(ks[9], (9,), 128),
    }


# ----------------------------------------------------------------------------
# Pure-JAX (XLA, f32) reference, used only to validate the Pallas path.
# ----------------------------------------------------------------------------
def cnn2_reference(params, x_nchw):
    def conv(x, w, b):
        y = jax.lax.conv_general_dilated(
            x, w, window_strides=(1, 1), padding="SAME",
            dimension_numbers=("NCHW", "OIHW", "NCHW"))
        return jax.nn.relu(y + b[None, :, None, None])

    def pool(x):
        return jax.lax.reduce_window(
            x, -jnp.inf, jax.lax.max, (1, 1, 2, 2), (1, 1, 2, 2), "VALID")

    x = pool(conv(x_nchw, params["conv1_w"], params["conv1_b"]))
    x = pool(conv(x, params["conv2_w"], params["conv2_b"]))
    x = conv(x, params["conv3_w"], params["conv3_b"])
    x = x.reshape(x.shape[0], 64 * 7 * 7)
    x = jax.nn.relu(x @ params["fc1_w"].T + params["fc1_b"])
    return x @ params["fc2_w"].T + params["fc2_b"]


if __name__ == "__main__":
    key = jax.random.PRNGKey(0)
    pkey, xkey = jax.random.split(key)
    params = init_params(pkey)
    packed = pack_params(params)
    x = jax.random.normal(xkey, (2, 3, 28, 28), dtype=jnp.float32)

    fwd = jax.jit(cnn2_forward)
    out = jax.block_until_ready(fwd(packed, x))
    assert out.shape == (2, 9), out.shape

    # bf16 matmul inputs with f32 accumulation vs. a pure-f32 XLA reference.
    ref = cnn2_reference(params, x)
    max_err = float(jnp.max(jnp.abs(out - ref)))
    assert jnp.allclose(out, ref, atol=5e-2, rtol=5e-2), max_err

    print("KERNEL_OK")
</pallas_src>

<mosaic_0001>
module attributes {stable_mosaic.version = 11 : i64} {
  func.func @_conv_matmul_relu_kernel(%arg0: i32, %arg1: memref<1x784x27xbf16, #tpu.memory_space<vmem>>, %arg2: memref<27x128xbf16, #tpu.memory_space<vmem>>, %arg3: memref<1x128xf32, #tpu.memory_space<vmem>>, %arg4: memref<1x784x128xbf16, #tpu.memory_space<vmem>>) attributes {dimension_semantics = [#tpu.dimension_semantics<parallel>], iteration_bounds = array<i64: 2>, scalar_prefetch = 0 : i64, scratch_operands = 0 : i64, tpu.core_type = #tpu.core_type<tc>, window_params = [{transform_indices = @transform_0, window_bounds = array<i64: 1, 784, 27>}, {pipeline_mode = #tpu.pipeline_mode<synchronous>, transform_indices = @transform_1, window_bounds = array<i64: 27, 128>}, {pipeline_mode = #tpu.pipeline_mode<synchronous>, transform_indices = @transform_2, window_bounds = array<i64: 1, 128>}, {transform_indices = @transform_3, window_bounds = array<i64: 1, 784, 128>}]} {
    %c0 = arith.constant 0 : index
    %c0_0 = arith.constant 0 : index
    %c0_1 = arith.constant 0 : index
    %0 = vector.load %arg1[%c0, %c0_0, %c0_1] : memref<1x784x27xbf16, #tpu.memory_space<vmem>>, vector<1x784x27xbf16>
    %1 = vector.shape_cast %0 : vector<1x784x27xbf16> to vector<784x27xbf16>
    %c0_2 = arith.constant 0 : index
    %c0_3 = arith.constant 0 : index
    %2 = vector.load %arg2[%c0_2, %c0_3] : memref<27x128xbf16, #tpu.memory_space<vmem>>, vector<27x128xbf16>
    %cst = arith.constant dense<0.000000e+00> : vector<784x128xf32>
    %3 = tpu.matmul %1, %2, %cst {dimension_numbers = #tpu.dot_dimension_numbers<[1], [0], [0], [1], [0, 0, 1, 1], [], []>} : vector<784x27xbf16>, vector<27x128xbf16>, vector<784x128xf32> -> vector<784x128xf32>
    %c0_4 = arith.constant 0 : index
    %c0_5 = arith.constant 0 : index
    %4 = vector.load %arg3[%c0_4, %c0_5] : memref<1x128xf32, #tpu.memory_space<vmem>>, vector<1x128xf32>
    %5 = vector.broadcast %4 : vector<1x128xf32> to vector<784x128xf32>
    %6 = arith.addf %3, %5 : vector<784x128xf32>
    %cst_6 = arith.constant 0.000000e+00 : f32
    %7 = vector.broadcast %cst_6 : f32 to vector<784x128xf32>
    %8 = arith.maximumf %6, %7 : vector<784x128xf32>
    %9 = arith.truncf %8 : vector<784x128xf32> to vector<784x128xbf16>
    %c0_7 = arith.constant 0 : index
    %c0_8 = arith.constant 0 : index
    %c0_9 = arith.constant 0 : index
    %10 = vector.load %arg4[%c0_7, %c0_8, %c0_9] : memref<1x784x128xbf16, #tpu.memory_space<vmem>>, vector<1x784x128xbf16>
    %11 = vector.shape_cast %10 : vector<1x784x128xbf16> to vector<784x128xbf16>
    %12 = vector.shape_cast %9 : vector<784x128xbf16> to vector<1x784x128xbf16>
    tpu.vector_store %arg4[%c0_7, %c0_8, %c0_9], %12 {strides = array<i32>} : memref<1x784x128xbf16, #tpu.memory_space<vmem>>, vector<1x784x128xbf16>,
    return
  }
  func.func @transform_0(%arg0: i32) -> (i32, i32, i32) {
    %c0_i32 = arith.constant 0 : i32
    %c0_i32_0 = arith.constant 0 : i32
    %c0_i32_1 = arith.constant 0 : i32
    return %arg0, %c0_i32, %c0_i32_0 : i32, i32, i32
  }
  func.func @transform_1(%arg0: i32) -> (i32, i32) {
    %c0_i32 = arith.constant 0 : i32
    %c0_i32_0 = arith.constant 0 : i32
    %c0_i32_1 = arith.constant 0 : i32
    return %c0_i32, %c0_i32_0 : i32, i32
  }
  func.func @transform_2(%arg0: i32) -> (i32, i32) {
    %c0_i32 = arith.constant 0 : i32
    %c0_i32_0 = arith.constant 0 : i32
    %c0_i32_1 = arith.constant 0 : i32
    return %c0_i32, %c0_i32_0 : i32, i32
  }
  func.func @transform_3(%arg0: i32) -> (i32, i32, i32) {
    %c0_i32 = arith.constant 0 : i32
    %c0_i32_0 = arith.constant 0 : i32
    %c0_i32_1 = arith.constant 0 : i32
    return %arg0, %c0_i32, %c0_i32_0 : i32, i32, i32
  }
}

module attributes {stable_mosaic.version = 11 : i64} {
  func.func @_conv_matmul_relu_kernel(%arg0: i32, %arg1: memref<1x196x144xbf16, #tpu.memory_space<vmem>>, %arg2: memref<144x128xbf16, #tpu.memory_space<vmem>>, %arg3: memref<1x128xf32, #tpu.memory_space<vmem>>, %arg4: memref<1x196x128xbf16, #tpu.memory_space<vmem>>) attributes {dimension_semantics = [#tpu.dimension_semantics<parallel>], iteration_bounds = array<i64: 2>, scalar_prefetch = 0 : i64, scratch_operands = 0 : i64, tpu.core_type = #tpu.core_type<tc>, window_params = [{transform_indices = @transform_0, window_bounds = array<i64: 1, 196, 144>}, {pipeline_mode = #tpu.pipeline_mode<synchronous>, transform_indices = @transform_1, window_bounds = array<i64: 144, 128>}, {pipeline_mode = #tpu.pipeline_mode<synchronous>, transform_indices = @transform_2, window_bounds = array<i64: 1, 128>}, {transform_indices = @transform_3, window_bounds = array<i64: 1, 196, 128>}]} {
    %c0 = arith.constant 0 : index
    %c0_0 = arith.constant 0 : index
    %c0_1 = arith.constant 0 : index
    %0 = vector.load %arg1[%c0, %c0_0, %c0_1] : memref<1x196x144xbf16, #tpu.memory_space<vmem>>, vector<1x196x144xbf16>
    %1 = vector.shape_cast %0 : vector<1x196x144xbf16> to vector<196x144xbf16>
    %c0_2 = arith.constant 0 : index
    %c0_3 = arith.constant 0 : index
    %2 = vector.load %arg2[%c0_2, %c0_3] : memref<144x128xbf16, #tpu.memory_space<vmem>>, vector<144x128xbf16>
    %cst = arith.constant dense<0.000000e+00> : vector<196x128xf32>
    %3 = tpu.matmul %1, %2, %cst {dimension_numbers = #tpu.dot_dimension_numbers<[1], [0], [0], [1], [0, 0, 1, 1], [], []>} : vector<196x144xbf16>, vector<144x128xbf16>, vector<196x128xf32> -> vector<196x128xf32>
    %c0_4 = arith.constant 0 : index
    %c0_5 = arith.constant 0 : index
    %4 = vector.load %arg3[%c0_4, %c0_5] : memref<1x128xf32, #tpu.memory_space<vmem>>, vector<1x128xf32>
    %5 = vector.broadcast %4 : vector<1x128xf32> to vector<196x128xf32>
    %6 = arith.addf %3, %5 : vector<196x128xf32>
    %cst_6 = arith.constant 0.000000e+00 : f32
    %7 = vector.broadcast %cst_6 : f32 to vector<196x128xf32>
    %8 = arith.maximumf %6, %7 : vector<196x128xf32>
    %9 = arith.truncf %8 : vector<196x128xf32> to vector<196x128xbf16>
    %c0_7 = arith.constant 0 : index
    %c0_8 = arith.constant 0 : index
    %c0_9 = arith.constant 0 : index
    %10 = vector.load %arg4[%c0_7, %c0_8, %c0_9] : memref<1x196x128xbf16, #tpu.memory_space<vmem>>, vector<1x196x128xbf16>
    %11 = vector.shape_cast %10 : vector<1x196x128xbf16> to vector<196x128xbf16>
    %12 = vector.shape_cast %9 : vector<196x128xbf16> to vector<1x196x128xbf16>
    tpu.vector_store %arg4[%c0_7, %c0_8, %c0_9], %12 {strides = array<i32>} : memref<1x196x128xbf16, #tpu.memory_space<vmem>>, vector<1x196x128xbf16>,
    return
  }
  func.func @transform_0(%arg0: i32) -> (i32, i32, i32) {
    %c0_i32 = arith.constant 0 : i32
    %c0_i32_0 = arith.constant 0 : i32
    %c0_i32_1 = arith.constant 0 : i32
    return %arg0, %c0_i32, %c0_i32_0 : i32, i32, i32
  }
  func.func @transform_1(%arg0: i32) -> (i32, i32) {
    %c0_i32 = arith.constant 0 : i32
    %c0_i32_0 = arith.constant 0 : i32
    %c0_i32_1 = arith.constant 0 : i32
    return %c0_i32, %c0_i32_0 : i32, i32
  }
  func.func @transform_2(%arg0: i32) -> (i32, i32) {
    %c0_i32 = arith.constant 0 : i32
    %c0_i32_0 = arith.constant 0 : i32
    %c0_i32_1 = arith.constant 0 : i32
    return %c0_i32, %c0_i32_0 : i32, i32
  }
  func.func @transform_3(%arg0: i32) -> (i32, i32, i32) {
    %c0_i32 = arith.constant 0 : i32
    %c0_i32_0 = arith.constant 0 : i32
    %c0_i32_1 = arith.constant 0 : i32
    return %arg0, %c0_i32, %c0_i32_0 : i32, i32, i32
  }
}

module attributes {stable_mosaic.version = 11 : i64} {
  func.func @_head_kernel(%arg0: i32, %arg1: memref<49x8x288xbf16, #tpu.memory_space<vmem>>, %arg2: memref<288x64xbf16, #tpu.memory_space<vmem>>, %arg3: memref<1x64xf32, #tpu.memory_space<vmem>>, %arg4: memref<49x64x128xbf16, #tpu.memory_space<vmem>>, %arg5: memref<1x128xf32, #tpu.memory_space<vmem>>, %arg6: memref<128x128xbf16, #tpu.memory_space<vmem>>, %arg7: memref<1x128xf32, #tpu.memory_space<vmem>>, %arg8: memref<8x128xf32, #tpu.memory_space<vmem>>) attributes {dimension_semantics = [#tpu.dimension_semantics<arbitrary>], iteration_bounds = array<i64: 1>, scalar_prefetch = 0 : i64, scratch_operands = 0 : i64, tpu.core_type = #tpu.core_type<tc>, window_params = [{pipeline_mode = #tpu.pipeline_mode<synchronous>, transform_indices = @transform_0, window_bounds = array<i64: 49, 8, 288>}, {pipeline_mode = #tpu.pipeline_mode<synchronous>, transform_indices = @transform_1, window_bounds = array<i64: 288, 64>}, {pipeline_mode = #tpu.pipeline_mode<synchronous>, transform_indices = @transform_2, window_bounds = array<i64: 1, 64>}, {pipeline_mode = #tpu.pipeline_mode<synchronous>, transform_indices = @transform_3, window_bounds = array<i64: 49, 64, 128>}, {pipeline_mode = #tpu.pipeline_mode<synchronous>, transform_indices = @transform_4, window_bounds = array<i64: 1, 128>}, {pipeline_mode = #tpu.pipeline_mode<synchronous>, transform_indices = @transform_5, window_bounds = array<i64: 128, 128>}, {pipeline_mode = #tpu.pipeline_mode<synchronous>, transform_indices = @transform_6, window_bounds = array<i64: 1, 128>}, {pipeline_mode = #tpu.pipeline_mode<synchronous>, transform_indices = @transform_7, window_bounds = array<i64: 8, 128>}]} {
    %c0 = arith.constant 0 : index
    %c0_0 = arith.constant 0 : index
    %0 = vector.load %arg2[%c0, %c0_0] : memref<288x64xbf16, #tpu.memory_space<vmem>>, vector<288x64xbf16>
    %c0_1 = arith.constant 0 : index
    %c0_2 = arith.constant 0 : index
    %1 = vector.load %arg3[%c0_1, %c0_2] : memref<1x64xf32, #tpu.memory_space<vmem>>, vector<1x64xf32>
    %2 = vector.shape_cast %1 : vector<1x64xf32> to vector<1x64xf32>
    %3 = vector.broadcast %2 : vector<1x64xf32> to vector<8x64xf32>
    %cst = arith.constant 0.000000e+00 : f32
    %4 = vector.broadcast %cst : f32 to vector<8x128xf32>
    %c0_3 = arith.constant 0 : index
    %c0_4 = arith.constant 0 : index
    %c0_5 = arith.constant 0 : index
    %5 = vector.load %arg1[%c0_3, %c0_4, %c0_5] : memref<49x8x288xbf16, #tpu.memory_space<vmem>>, vector<1x8x288xbf16>
    %6 = vector.shape_cast %5 : vector<1x8x288xbf16> to vector<8x288xbf16>
    %cst_6 = arith.constant dense<0.000000e+00> : vector<8x64xf32>
    %7 = tpu.matmul %6, %0, %cst_6 {dimension_numbers = #tpu.dot_dimension_numbers<[1], [0], [0], [1], [0, 0, 1, 1], [], []>} : vector<8x288xbf16>, vector<288x64xbf16>, vector<8x64xf32> -> vector<8x64xf32>
    %8 = arith.addf %7, %3 : vector<8x64xf32>
    %cst_7 = arith.constant 0.000000e+00 : f32
    %9 = vector.broadcast %cst_7 : f32 to vector<8x64xf32>
    %10 = arith.maximumf %8, %9 : vector<8x64xf32>
    %11 = arith.truncf %10 : vector<8x64xf32> to vector<8x64xbf16>
    %c0_8 = arith.constant 0 : index
    %c0_9 = arith.constant 0 : index
    %c0_10 = arith.constant 0 : index
    %12 = vector.load %arg4[%c0_8, %c0_9, %c0_10] : memref<49x64x128xbf16, #tpu.memory_space<vmem>>, vector<1x64x128xbf16>
    %13 = vector.shape_cast %12 : vector<1x64x128xbf16> to vector<64x128xbf16>
    %cst_11 = arith.constant dense<0.000000e+00> : vector<8x128xf32>
    %14 = tpu.matmul %11, %13, %cst_11 {dimension_numbers = #tpu.dot_dimension_numbers<[1], [0], [0], [1], [0, 0, 1, 1], [], []>} : vector<8x64xbf16>, vector<64x128xbf16>, vector<8x128xf32> -> vector<8x128xf32>
    %15 = arith.addf %4, %14 : vector<8x128xf32>
    %c1 = arith.constant 1 : index
    %c0_12 = arith.constant 0 : index
    %c0_13 = arith.constant 0 : index
    %16 = vector.load %arg1[%c1, %c0_12, %c0_13] : memref<49x8x288xbf16, #tpu.memory_space<vmem>>, vector<1x8x288xbf16>
    %17 = vector.shape_cast %16 : vector<1x8x288xbf16> to vector<8x288xbf16>
    %cst_14 = arith.constant dense<0.000000e+00> : vector<8x64xf32>
    %18 = tpu.matmul %17, %0, %cst_14 {dimension_numbers = #tpu.dot_dimension_numbers<[1], [0], [0], [1], [0, 0, 1, 1], [], []>} : vector<8x288xbf16>, vector<288x64xbf16>, vector<8x64xf32> -> vector<8x64xf32>
    %19 = arith.addf %18, %3 : vector<8x64xf32>
    %cst_15 = arith.constant 0.000000e+00 : f32
    %20 = vector.broadcast %cst_15 : f32 to vector<8x64xf32>
    %21 = arith.maximumf %19, %20 : vector<8x64xf32>
    %22 = arith.truncf %21 : vector<8x64xf32> to vector<8x64xbf16>
    %c1_16 = arith.constant 1 : index
    %c0_17 = arith.constant 0 : index
    %c0_18 = arith.constant 0 : index
    %23 = vector.load %arg4[%c1_16, %c0_17, %c0_18] : memref<49x64x128xbf16, #tpu.memory_space<vmem>>, vector<1x64x128xbf16>
    %24 = vector.shape_cast %23 : vector<1x64x128xbf16> to vector<64x128xbf16>
    %cst_19 = arith.constant dense<0.000000e+00> : vector<8x128xf32>
    %25 = tpu.matmul %22, %24, %cst_19 {dimension_numbers = #tpu.dot_dimension_numbers<[1], [0], [0], [1], [0, 0, 1, 1], [], []>} : vector<8x64xbf16>, vector<64x128xbf16>, vector<8x128xf32> -> vector<8x128xf32>
    %26 = arith.addf %15, %25 : vector<8x128xf32>
    %c2 = arith.constant 2 : index
    %c0_20 = arith.constant 0 : index
    %c0_21 = arith.constant 0 : index
    %27 = vector.load %arg1[%c2, %c0_20, %c0_21] : memref<49x8x288xbf16, #tpu.memory_space<vmem>>, vector<1x8x288xbf16>
    %28 = vector.shape_cast %27 : vector<1x8x288xbf16> to vector<8x288xbf16>
    %cst_22 = arith.constant dense<0.000000e+00> : vector<8x64xf32>
    %29 = tpu.matmul %28, %0, %cst_22 {dimension_numbers = #tpu.dot_dimension_numbers<[1], [0], [0], [1], [0, 0, 1, 1], [], []>} : vector<8x288xbf16>, vector<288x64xbf16>, vector<8x64xf32> -> vector<8x64xf32>
    %30 = arith.addf %29, %3 : vector<8x64xf32>
    %cst_23 = arith.constant 0.000000e+00 : f32
    %31 = vector.broadcast %cst_23 : f32 to vector<8x64xf32>
    %32 = arith.maximumf %30, %31 : vector<8x64xf32>
    %33 = arith.truncf %32 : vector<8x64xf32> to vector<8x64xbf16>
    %c2_24 = arith.constant 2 : index
    %c0_25 = arith.constant 0 : index
    %c0_26 = arith.constant 0 : index
    %34 = vector.load %arg4[%c2_24, %c0_25, %c0_26] : memref<49x64x128xbf16, #tpu.memory_space<vmem>>, vector<1x64x128xbf16>
    %35 = vector.shape_cast %34 : vector<1x64x128xbf16> to vector<64x128xbf16>
    %cst_27 = arith.constant dense<0.000000e+00> : vector<8x128xf32>
    %36 = tpu.matmul %33, %35, %cst_27 {dimension_numbers = #tpu.dot_dimension_numbers<[1], [0], [0], [1], [0, 0, 1, 1], [], []>} : vector<8x64xbf16>, vector<64x128xbf16>, vector<8x128xf32> -> vector<8x128xf32>
    %37 = arith.addf %26, %36 : vector<8x128xf32>
    %c3 = arith.constant 3 : index
    %c0_28 = arith.constant 0 : index
    %c0_29 = arith.constant 0 : index
    %38 = vector.load %arg1[%c3, %c0_28, %c0_29] : memref<49x8x288xbf16, #tpu.memory_space<vmem>>, vector<1x8x288xbf16>
    %39 = vector.shape_cast %38 : vector<1x8x288xbf16> to vector<8x288xbf16>
    %cst_30 = arith.constant dense<0.000000e+00> : vector<8x64xf32>
    %40 = tpu.matmul %39, %0, %cst_30 {dimension_numbers = #tpu.dot_dimension_numbers<[1], [0], [0], [1], [0, 0, 1, 1], [], []>} : vector<8x288xbf16>, vector<288x64xbf16>, vector<8x64xf32> -> vector<8x64xf32>
    %41 = arith.addf %40, %3 : vector<8x64xf32>
    %cst_31 = arith.constant 0.000000e+00 : f32
    %42 = vector.broadcast %cst_31 : f32 to vector<8x64xf32>
    %43 = arith.maximumf %41, %42 : vector<8x64xf32>
    %44 = arith.truncf %43 : vector<8x64xf32> to vector<8x64xbf16>
    %c3_32 = arith.constant 3 : index
    %c0_33 = arith.constant 0 : index
    %c0_34 = arith.constant 0 : index
    %45 = vector.load %arg4[%c3_32, %c0_33, %c0_34] : memref<49x64x128xbf16, #tpu.memory_space<vmem>>, vector<1x64x128xbf16>
    %46 = vector.shape_cast %45 : vector<1x64x128xbf16> to vector<64x128xbf16>
    %cst_35 = arith.constant dense<0.000000e+00> : vector<8x128xf32>
    %47 = tpu.matmul %44, %46, %cst_35 {dimension_numbers = #tpu.dot_dimension_numbers<[1], [0], [0], [1], [0, 0, 1, 1], [], []>} : vector<8x64xbf16>, vector<64x128xbf16>, vector<8x128xf32> -> vector<8x128xf32>
    %48 = arith.addf %37, %47 : vector<8x128xf32>
    %c4 = arith.constant 4 : index
    %c0_36 = arith.constant 0 : index
    %c0_37 = arith.constant 0 : index
    %49 = vector.load %arg1[%c4, %c0_36, %c0_37] : memref<49x8x288xbf16, #tpu.memory_space<vmem>>, vector<1x8x288xbf16>
    %50 = vector.shape_cast %49 : vector<1x8x288xbf16> to vector<8x288xbf16>
    %cst_38 = arith.constant dense<0.000000e+00> : vector<8x64xf32>
    %51 = tpu.matmul %50, %0, %cst_38 {dimension_numbers = #tpu.dot_dimension_numbers<[1], [0], [0], [1], [0, 0, 1, 1], [], []>} : vector<8x288xbf16>, vector<288x64xbf16>, vector<8x64xf32> -> vector<8x64xf32>
    %52 = arith.addf %51, %3 : vector<8x64xf32>
    %cst_39 = arith.constant 0.000000e+00 : f32
    %53 = vector.broadcast %cst_39 : f32 to vector<8x64xf32>
    %54 = arith.maximumf %52, %53 : vector<8x64xf32>
    %55 = arith.truncf %54 : vector<8x64xf32> to vector<8x64xbf16>
    %c4_40 = arith.constant 4 : index
    %c0_41 = arith.constant 0 : index
    %c0_42 = arith.constant 0 : index
    %56 = vector.load %arg4[%c4_40, %c0_41, %c0_42] : memref<49x64x128xbf16, #tpu.memory_space<vmem>>, vector<1x64x128xbf16>
    %57 = vector.shape_cast %56 : vector<1x64x128xbf16> to vector<64x128xbf16>
    %cst_43 = arith.constant dense<0.000000e+00> : vector<8x128xf32>
    %58 = tpu.matmul %55, %57, %cst_43 {dimension_numbers = #tpu.dot_dimension_numbers<[1], [0], [0], [1], [0, 0, 1, 1], [], []>} : vector<8x64xbf16>, vector<64x128xbf16>, vector<8x128xf32> -> vector<8x128xf32>
    %59 = arith.addf %48, %58 : vector<8x128xf32>
    %c5 = arith.constant 5 : index
    %c0_44 = arith.constant 0 : index
    %c0_45 = arith.constant 0 : index
    %60 = vector.load %arg1[%c5, %c0_44, %c0_45] : memref<49x8x288xbf16, #tpu.memory_space<vmem>>, vector<1x8x288xbf16>
    %61 = vector.shape_cast %60 : vector<1x8x288xbf16> to vector<8x288xbf16>
    %cst_46 = arith.constant dense<0.000000e+00> : vector<8x64xf32>
    %62 = tpu.matmul %61, %0, %cst_46 {dimension_numbers = #tpu.dot_dimension_numbers<[1], [0], [0], [1], [0, 0, 1, 1], [], []>} : vector<8x288xbf16>, vector<288x64xbf16>, vector<8x64xf32> -> vector<8x64xf32>
    %63 = arith.addf %62, %3 : vector<8x64xf32>
    %cst_47 = arith.constant 0.000000e+00 : f32
    %64 = vector.broadcast %cst_47 : f32 to vector<8x64xf32>
    %65 = arith.maximumf %63, %64 : vector<8x64xf32>
    %66 = arith.truncf %65 : vector<8x64xf32> to vector<8x64xbf16>
    %c5_48 = arith.constant 5 : index
    %c0_49 = arith.constant 0 : index
    %c0_50 = arith.constant 0 : index
    %67 = vector.load %arg4[%c5_48, %c0_49, %c0_50] : memref<49x64x128xbf16, #tpu.memory_space<vmem>>, vector<1x64x128xbf16>
    %68 = vector.shape_cast %67 : vector<1x64x128xbf16> to vector<64x128xbf16>
    %cst_51 = arith.constant dense<0.000000e+00> : vector<8x128xf32>
    %69 = tpu.matmul %66, %68, %cst_51 {dimension_numbers = #tpu.dot_dimension_numbers<[1], [0], [0], [1], [0, 0, 1, 1], [], []>} : vector<8x64xbf16>, vector<64x128xbf16>, vector<8x128xf32> -> vector<8x128xf32>
    %70 = arith.addf %59, %69 : vector<8x128xf32>
    %c6 = arith.constant 6 : index
    %c0_52 = arith.constant 0 : index
    %c0_53 = arith.constant 0 : index
    %71 = vector.load %arg1[%c6, %c0_52, %c0_53] : memref<49x8x288xbf16, #tpu.memory_space<vmem>>, vector<1x8x288xbf16>
    %72 = vector.shape_cast %71 : vector<1x8x288xbf16> to vector<8x288xbf16>
    %cst_54 = arith.constant dense<0.000000e+00> : vector<8x64xf32>
    %73 = tpu.matmul %72, %0, %cst_54 {dimension_numbers = #tpu.dot_dimension_numbers<[1], [0], [0], [1], [0, 0, 1, 1], [], []>} : vector<8x288xbf16>, vector<288x64xbf16>, vector<8x64xf32> -> vector<8x64xf32>
    %74 = arith.addf %73, %3 : vector<8x64xf32>
    %cst_55 = arith.constant 0.000000e+00 : f32
    %75 = vector.broadcast %cst_55 : f32 to vector<8x64xf32>
    %76 = arith.maximumf %74, %75 : vector<8x64xf32>
    %77 = arith.truncf %76 : vector<8x64xf32> to vector<8x64xbf16>
    %c6_56 = arith.constant 6 : index
    %c0_57 = arith.constant 0 : index
    %c0_58 = arith.constant 0 : index
    %78 = vector.load %arg4[%c6_56, %c0_57, %c0_58] : memref<49x64x128xbf16, #tpu.memory_space<vmem>>, vector<1x64x128xbf16>
    %79 = vector.shape_cast %78 : vector<1x64x128xbf16> to vector<64x128xbf16>
    %cst_59 = arith.constant dense<0.000000e+00> : vector<8x128xf32>
    %80 = tpu.matmul %77, %79, %cst_59 {dimension_numbers = #tpu.dot_dimension_numbers<[1], [0], [0], [1], [0, 0, 1, 1], [], []>} : vector<8x64xbf16>, vector<64x128xbf16>, vector<8x128xf32> -> vector<8x128xf32>
    %81 = arith.addf %70, %80 : vector<8x128xf32>
    %c7 = arith.constant 7 : index
    %c0_60 = arith.constant 0 : index
    %c0_61 = arith.constant 0 : index
    %82 = vector.load %arg1[%c7, %c0_60, %c0_61] : memref<49x8x288xbf16, #tpu.memory_space<vmem>>, vector<1x8x288xbf16>
    %83 = vector.shape_cast %82 : vector<1x8x288xbf16> to vector<8x288xbf16>
    %cst_62 = arith.constant dense<0.000000e+00> : vector<8x64xf32>
    %84 = tpu.matmul %83, %0, %cst_62 {dimension_numbers = #tpu.dot_dimension_numbers<[1], [0], [0], [1], [0, 0, 1, 1], [], []>} : vector<8x288xbf16>, vector<288x64xbf16>, vector<8x64xf32> -> vector<8x64xf32>
    %85 = arith.addf %84, %3 : vector<8x64xf32>
    %cst_63 = arith.constant 0.000000e+00 : f32
    %86 = vector.broadcast %cst_63 : f32 to vector<8x64xf32>
    %87 = arith.maximumf %85, %86 : vector<8x64xf32>
    %88 = arith.truncf %87 : vector<8x64xf32> to vector<8x64xbf16>
    %c7_64 = arith.constant 7 : index
    %c0_65 = arith.constant 0 : index
    %c0_66 = arith.constant 0 : index
    %89 = vector.load %arg4[%c7_64, %c0_65, %c0_66] : memref<49x64x128xbf16, #tpu.memory_space<vmem>>, vector<1x64x128xbf16>
    %90 = vector.shape_cast %89 : vector<1x64x128xbf16> to vector<64x128xbf16>
    %cst_67 = arith.constant dense<0.000000e+00> : vector<8x128xf32>
    %91 = tpu.matmul %88, %90, %cst_67 {dimension_numbers = #tpu.dot_dimension_numbers<[1], [0], [0], [1], [0, 0, 1, 1], [], []>} : vector<8x64xbf16>, vector<64x128xbf16>, vector<8x128xf32> -> vector<8x128xf32>
    %92 = arith.addf %81, %91 : vector<8x128xf32>
    %c8 = arith.constant 8 : index
    %c0_68 = arith.constant 0 : index
    %c0_69 = arith.constant 0 : index
    %93 = vector.load %arg1[%c8, %c0_68, %c0_69] : memref<49x8x288xbf16, #tpu.memory_space<vmem>>, vector<1x8x288xbf16>
    %94 = vector.shape_cast %93 : vector<1x8x288xbf16> to vector<8x288xbf16>
    %cst_70 = arith.constant dense<0.000000e+00> : vector<8x64xf32>
    %95 = tpu.matmul %94, %0, %cst_70 {dimension_numbers = #tpu.dot_dimension_numbers<[1], [0], [0], [1], [0, 0, 1, 1], [], []>} : vector<8x288xbf16>, vector<288x64xbf16>, vector<8x64xf32> -> vector<8x64xf32>
    %96 = arith.addf %95, %3 : vector<8x64xf32>
    %cst_71 = arith.constant 0.000000e+00 : f32
    %97 = vector.broadcast %cst_71 : f32 to vector<8x64xf32>
    %98 = arith.maximumf %96, %97 : vector<8x64xf32>
    %99 = arith.truncf %98 : vector<8x64xf32> to vector<8x64xbf16>
    %c8_72 = arith.constant 8 : index
    %c0_73 = arith.constant 0 : index
    %c0_74 = arith.constant 0 : index
    %100 = vector.load %arg4[%c8_72, %c0_73, %c0_74] : memref<49x64x128xbf16, #tpu.memory_space<vmem>>, vector<1x64x128xbf16>
    %101 = vector.shape_cast %100 : vector<1x64x128xbf16> to vector<64x128xbf16>
    %cst_75 = arith.constant dense<0.000000e+00> : vector<8x128xf32>
    %102 = tpu.matmul %99, %101, %cst_75 {dimension_numbers = #tpu.dot_dimension_numbers<[1], [0], [0], [1], [0, 0, 1, 1], [], []>} : vector<8x64xbf16>, vector<64x128xbf16>, vector<8x128xf32> -> vector<8x128xf32>
    %103 = arith.addf %92, %102 : vector<8x128xf32>
    %c9 = arith.constant 9 : index
    %c0_76 = arith.constant 0 : index
    %c0_77 = arith.constant 0 : index
    %104 = vector.load %arg1[%c9, %c0_76, %c0_77] : memref<49x8x288xbf16, #tpu.memory_space<vmem>>, vector<1x8x288xbf16>
    %105 = vector.shape_cast %104 : vector<1x8x288xbf16> to vector<8x288xbf16>
    %cst_78 = arith.constant dense<0.000000e+00> : vector<8x64xf32>
    %106 = tpu.matmul %105, %0, %cst_78 {dimension_numbers = #tpu.dot_dimension_numbers<[1], [0], [0], [1], [0, 0, 1, 1], [], []>} : vector<8x288xbf16>, vector<288x64xbf16>, vector<8x64xf32> -> vector<8x64xf32>
    %107 = arith.addf %106, %3 : vector<8x64xf32>
    %cst_79 = arith.constant 0.000000e+00 : f32
    %108 = vector.broadcast %cst_79 : f32 to vector<8x64xf32>
    %109 = arith.maximumf %107, %108 : vector<8x64xf32>
    %110 = arith.truncf %109 : vector<8x64xf32> to vector<8x64xbf16>
    %c9_80 = arith.constant 9 : index
    %c0_81 = arith.constant 0 : index
    %c0_82 = arith.constant 0 : index
    %111 = vector.load %arg4[%c9_80, %c0_81, %c0_82] : memref<49x64x128xbf16, #tpu.memory_space<vmem>>, vector<1x64x128xbf16>
    %112 = vector.shape_cast %111 : vector<1x64x128xbf16> to vector<64x128xbf16>
    %cst_83 = arith.constant dense<0.000000e+00> : vector<8x128xf32>
    %113 = tpu.matmul %110, %112, %cst_83 {dimension_numbers = #tpu.dot_dimension_numbers<[1], [0], [0], [1], [0, 0, 1, 1], [], []>} : vector<8x64xbf16>, vector<64x128xbf16>, vector<8x128xf32> -> vector<8x128xf32>
    %114 = arith.addf %103, %113 : vector<8x128xf32>
    %c10 = arith.constant 10 : index
    %c0_84 = arith.constant 0 : index
    %c0_85 = arith.constant 0 : index
    %115 = vector.load %arg1[%c10, %c0_84, %c0_85] : memref<49x8x288xbf16, #tpu.memory_space<vmem>>, vector<1x8x288xbf16>
    %116 = vector.shape_cast %115 : vector<1x8x288xbf16> to vector<8x288xbf16>
    %cst_86 = arith.constant dense<0.000000e+00> : vector<8x64xf32>
    %117 = tpu.matmul %116, %0, %cst_86 {dimension_numbers = #tpu.dot_dimension_numbers<[1], [0], [0], [1], [0, 0, 1, 1], [], []>} : vector<8x288xbf16>, vector<288x64xbf16>, vector<8x64xf32> -> vector<8x64xf32>
    %118 = arith.addf %117, %3 : vector<8x64xf32>
    %cst_87 = arith.constant 0.000000e+00 : f32
    %119 = vector.broadcast %cst_87 : f32 to vector<8x64xf32>
    %120 = arith.maximumf %118, %119 : vector<8x64xf32>
    %121 = arith.truncf %120 : vector<8x64xf32> to vector<8x64xbf16>
    %c10_88 = arith.constant 10 : index
    %c0_89 = arith.constant 0 : index
    %c0_90 = arith.constant 0 : index
    %122 = vector.load %arg4[%c10_88, %c0_89, %c0_90] : memref<49x64x128xbf16, #tpu.memory_space<vmem>>, vector<1x64x128xbf16>
    %123 = vector.shape_cast %122 : vector<1x64x128xbf16> to vector<64x128xbf16>
    %cst_91 = arith.constant dense<0.000000e+00> : vector<8x128xf32>
    %124 = tpu.matmul %121, %123, %cst_91 {dimension_numbers = #tpu.dot_dimension_numbers<[1], [0], [0], [1], [0, 0, 1, 1], [], []>} : vector<8x64xbf16>, vector<64x128xbf16>, vector<8x128xf32> -> vector<8x128xf32>
    %125 = arith.addf %114, %124 : vector<8x128xf32>
    %c11 = arith.constant 11 : index
    %c0_92 = arith.constant 0 : index
    %c0_93 = arith.constant 0 : index
    %126 = vector.load %arg1[%c11, %c0_92, %c0_93] : memref<49x8x288xbf16, #tpu.memory_space<vmem>>, vector<1x8x288xbf16>
    %127 = vector.shape_cast %126 : vector<1x8x288xbf16> to vector<8x288xbf16>
    %cst_94 = arith.constant dense<0.000000e+00> : vector<8x64xf32>
    %128 = tpu.matmul %127, %0, %cst_94 {dimension_numbers = #tpu.dot_dimension_numbers<[1], [0], [0], [1], [0, 0, 1, 1], [], []>} : vector<8x288xbf16>, vector<288x64xbf16>, vector<8x64xf32> -> vector<8x64xf32>
    %129 = arith.addf %128, %3 : vector<8x64xf32>
    %cst_95 = arith.constant 0.000000e+00 : f32
    %130 = vector.broadcast %cst_95 : f32 to vector<8x64xf32>
    %131 = arith.maximumf %129, %130 : vector<8x64xf32>
    %132 = arith.truncf %131 : vector<8x64xf32> to vector<8x64xbf16>
    %c11_96 = arith.constant 11 : index
    %c0_97 = arith.constant 0 : index
    %c0_98 = arith.constant 0 : index
    %133 = vector.load %arg4[%c11_96, %c0_97, %c0_98] : memref<49x64x128xbf16, #tpu.memory_space<vmem>>, vector<1x64x128xbf16>
    %134 = vector.shape_cast %133 : vector<1x64x128xbf16> to vector<64x128xbf16>
    %cst_99 = arith.constant dense<0.000000e+00> : vector<8x128xf32>
    %135 = tpu.matmul %132, %134, %cst_99 {dimension_numbers = #tpu.dot_dimension_numbers<[1], [0], [0], [1], [0, 0, 1, 1], [], []>} : vector<8x64xbf16>, vector<64x128xbf16>, vector<8x128xf32> -> vector<8x128xf32>
    %136 = arith.addf %125, %135 : vector<8x128xf32>
    %c12 = arith.constant 12 : index
    %c0_100 = arith.constant 0 : index
    %c0_101 = arith.constant 0 : index
    %137 = vector.load %arg1[%c12, %c0_100, %c0_101] : memref<49x8x288xbf16, #tpu.memory_space<vmem>>, vector<1x8x288xbf16>
    %138 = vector.shape_cast %137 : vector<1x8x288xbf16> to vector<8x288xbf16>
    %cst_102 = arith.constant dense<0.000000e+00> : vector<8x64xf32>
    %139 = tpu.matmul %138, %0, %cst_102 {dimension_numbers = #tpu.dot_dimension_numbers<[1], [0], [0], [1], [0, 0, 1, 1], [], []>} : vector<8x288xbf16>, vector<288x64xbf16>, vector<8x64xf32> -> vector<8x64xf32>
    %140 = arith.addf %139, %3 : vector<8x64xf32>
    %cst_103 = arith.constant 0.000000e+00 : f32
    %141 = vector.broadcast %cst_103 : f32 to vector<8x64xf32>
    %142 = arith.maximumf %140, %141 : vector<8x64xf32>
    %143 = arith.truncf %142 : vector<8x64xf32> to vector<8x64xbf16>
    %c12_104 = arith.constant 12 : index
    %c0_105 = arith.constant 0 : index
    %c0_106 = arith.constant 0 : index
    %144 = vector.load %arg4[%c12_104, %c0_105, %c0_106] : memref<49x64x128xbf16, #tpu.memory_space<vmem>>, vector<1x64x128xbf16>
    %145 = vector.shape_cast %144 : vector<1x64x128xbf16> to vector<64x128xbf16>
    %cst_107 = arith.constant dense<0.000000e+00> : vector<8x128xf32>
    %146 = tpu.matmul %143, %145, %cst_107 {dimension_numbers = #tpu.dot_dimension_numbers<[1], [0], [0], [1], [0, 0, 1, 1], [], []>} : vector<8x64xbf16>, vector<64x128xbf16>, vector<8x128xf32> -> vector<8x128xf32>
    %147 = arith.addf %136, %146 : vector<8x128xf32>
    %c13 = arith.constant 13 : index
    %c0_108 = arith.constant 0 : index
    %c0_109 = arith.constant 0 : index
    %148 = vector.load %arg1[%c13, %c0_108, %c0_109] : memref<49x8x288xbf16, #tpu.memory_space<vmem>>, vector<1x8x288xbf16>
    %149 = vector.shape_cast %148 : vector<1x8x288xbf16> to vector<8x288xbf16>
    %cst_110 = arith.constant dense<0.000000e+00> : vector<8x64xf32>
    %150 = tpu.matmul %149, %0, %cst_110 {dimension_numbers = #tpu.dot_dimension_numbers<[1], [0], [0], [1], [0, 0, 1, 1], [], []>} : vector<8x288xbf16>, vector<288x64xbf16>, vector<8x64xf32> -> vector<8x64xf32>
    %151 = arith.addf %150, %3 : vector<8x64xf32>
    %cst_111 = arith.constant 0.000000e+00 : f32
    %152 = vector.broadcast %cst_111 : f32 to vector<8x64xf32>
    %153 = arith.maximumf %151, %152 : vector<8x64xf32>
    %154 = arith.truncf %153 : vector<8x64xf32> to vector<8x64xbf16>
    %c13_112 = arith.constant 13 : index
    %c0_113 = arith.constant 0 : index
    %c0_114 = arith.constant 0 : index
    %155 = vector.load %arg4[%c13_112, %c0_113, %c0_114] : memref<49x64x128xbf16, #tpu.memory_space<vmem>>, vector<1x64x128xbf16>
    %156 = vector.shape_cast %155 : vector<1x64x128xbf16> to vector<64x128xbf16>
    %cst_115 = arith.constant dense<0.000000e+00> : vector<8x128xf32>
    %157 = tpu.matmul %154, %156, %cst_115 {dimension_numbers = #tpu.dot_dimension_numbers<[1], [0], [0], [1], [0, 0, 1, 1], [], []>} : vector<8x64xbf16>, vector<64x128xbf16>, vector<8x128xf32> -> vector<8x128xf32>
    %158 = arith.addf %147, %157 : vector<8x128xf32>
    %c14 = arith.constant 14 : index
    %c0_116 = arith.constant 0 : index
    %c0_117 = arith.constant 0 : index
    %159 = vector.load %arg1[%c14, %c0_116, %c0_117] : memref<49x8x288xbf16, #tpu.memory_space<vmem>>, vector<1x8x288xbf16>
    %160 = vector.shape_cast %159 : vector<1x8x288xbf16> to vector<8x288xbf16>
    %cst_118 = arith.constant dense<0.000000e+00> : vector<8x64xf32>
    %161 = tpu.matmul %160, %0, %cst_118 {dimension_numbers = #tpu.dot_dimension_numbers<[1], [0], [0], [1], [0, 0, 1, 1], [], []>} : vector<8x288xbf16>, vector<288x64xbf16>, vector<8x64xf32> -> vector<8x64xf32>
    %162 = arith.addf %161, %3 : vector<8x64xf32>
    %cst_119 = arith.constant 0.000000e+00 : f32
    %163 = vector.broadcast %cst_119 : f32 to vector<8x64xf32>
    %164 = arith.maximumf %162, %163 : vector<8x64xf32>
    %165 = arith.truncf %164 : vector<8x64xf32> to vector<8x64xbf16>
    %c14_120 = arith.constant 14 : index
    %c0_121 = arith.constant 0 : index
    %c0_122 = arith.constant 0 : index
    %166 = vector.load %arg4[%c14_120, %c0_121, %c0_122] : memref<49x64x128xbf16, #tpu.memory_space<vmem>>, vector<1x64x128xbf16>
    %167 = vector.shape_cast %166 : vector<1x64x128xbf16> to vector<64x128xbf16>
    %cst_123 = arith.constant dense<0.000000e+00> : vector<8x128xf32>
    %168 = tpu.matmul %165, %167, %cst_123 {dimension_numbers = #tpu.dot_dimension_numbers<[1], [0], [0], [1], [0, 0, 1, 1], [], []>} : vector<8x64xbf16>, vector<64x128xbf16>, vector<8x128xf32> -> vector<8x128xf32>
    %169 = arith.addf %158, %168 : vector<8x128xf32>
    %c15 = arith.constant 15 : index
    %c0_124 = arith.constant 0 : index
    %c0_125 = arith.constant 0 : index
    %170 = vector.load %arg1[%c15, %c0_124, %c0_125] : memref<49x8x288xbf16, #tpu.memory_space<vmem>>, vector<1x8x288xbf16>
    %171 = vector.shape_cast %170 : vector<1x8x288xbf16> to vector<8x288xbf16>
    %cst_126 = arith.constant dense<0.000000e+00> : vector<8x64xf32>
    %172 = tpu.matmul %171, %0, %cst_126 {dimension_numbers = #tpu.dot_dimension_numbers<[1], [0], [0], [1], [0, 0, 1, 1], [], []>} : vector<8x288xbf16>, vector<288x64xbf16>, vector<8x64xf32> -> vector<8x64xf32>
    %173 = arith.addf %172, %3 : vector<8x64xf32>
    %cst_127 = arith.constant 0.000000e+00 : f32
    %174 = vector.broadcast %cst_127 : f32 to vector<8x64xf32>
    %175 = arith.maximumf %173, %174 : vector<8x64xf32>
    %176 = arith.truncf %175 : vector<8x64xf32> to vector<8x64xbf16>
    %c15_128 = arith.constant 15 : index
    %c0_129 = arith.constant 0 : index
    %c0_130 = arith.constant 0 : index
    %177 = vector.load %arg4[%c15_128, %c0_129, %c0_130] : memref<49x64x128xbf16, #tpu.memory_space<vmem>>, vector<1x64x128xbf16>
    %178 = vector.shape_cast %177 : vector<1x64x128xbf16> to vector<64x128xbf16>
    %cst_131 = arith.constant dense<0.000000e+00> : vector<8x128xf32>
    %179 = tpu.matmul %176, %178, %cst_131 {dimension_numbers = #tpu.dot_dimension_numbers<[1], [0], [0], [1], [0, 0, 1, 1], [], []>} : vector<8x64xbf16>, vector<64x128xbf16>, vector<8x128xf32> -> vector<8x128xf32>
    %180 = arith.addf %169, %179 : vector<8x128xf32>
    %c16 = arith.constant 16 : index
    %c0_132 = arith.constant 0 : index
    %c0_133 = arith.constant 0 : index
    %181 = vector.load %arg1[%c16, %c0_132, %c0_133] : memref<49x8x288xbf16, #tpu.memory_space<vmem>>, vector<1x8x288xbf16>
    %182 = vector.shape_cast %181 : vector<1x8x288xbf16> to vector<8x288xbf16>
    %cst_134 = arith.constant dense<0.000000e+00> : vector<8x64xf32>
    %183 = tpu.matmul %182, %0, %cst_134 {dimension_numbers = #tpu.dot_dimension_numbers<[1], [0], [0], [1], [0, 0, 1, 1], [], []>} : vector<8x288xbf16>, vector<288x64xbf16>, vector<8x64xf32> -> vector<8x64xf32>
    %184 = arith.addf %183, %3 : vector<8x64xf32>
    %cst_135 = arith.constant 0.000000e+00 : f32
    %185 = vector.broadcast %cst_135 : f32 to vector<8x64xf32>
    %186 = arith.maximumf %184, %185 : vector<8x64xf32>
    %187 = arith.truncf %186 : vector<8x64xf32> to vector<8x64xbf16>
    %c16_136 = arith.constant 16 : index
    %c0_137 = arith.constant 0 : index
    %c0_138 = arith.constant 0 : index
    %188 = vector.load %arg4[%c16_136, %c0_137, %c0_138] : memref<49x64x128xbf16, #tpu.memory_space<vmem>>, vector<1x64x128xbf16>
    %189 = vector.shape_cast %188 : vector<1x64x128xbf16> to vector<64x128xbf16>
    %cst_139 = arith.constant dense<0.000000e+00> : vector<8x128xf32>
    %190 = tpu.matmul %187, %189, %cst_139 {dimension_numbers = #tpu.dot_dimension_numbers<[1], [0], [0], [1], [0, 0, 1, 1], [], []>} : vector<8x64xbf16>, vector<64x128xbf16>, vector<8x128xf32> -> vector<8x128xf32>
    %191 = arith.addf %180, %190 : vector<8x128xf32>
    %c17 = arith.constant 17 : index
    %c0_140 = arith.constant 0 : index
    %c0_141 = arith.constant 0 : index
    %192 = vector.load %arg1[%c17, %c0_140, %c0_141] : memref<49x8x288xbf16, #tpu.memory_space<vmem>>, vector<1x8x288xbf16>
    %193 = vector.shape_cast %192 : vector<1x8x288xbf16> to vector<8x288xbf16>
    %cst_142 = arith.constant dense<0.000000e+00> : vector<8x64xf32>
    %194 = tpu.matmul %193, %0, %cst_142 {dimension_numbers = #tpu.dot_dimension_numbers<[1], [0], [0], [1], [0, 0, 1, 1], [], []>} : vector<8x288xbf16>, vector<288x64xbf16>, vector<8x64xf32> -> vector<8x64xf32>
    %195 = arith.addf %194, %3 : vector<8x64xf32>
    %cst_143 = arith.constant 0.000000e+00 : f32
    %196 = vector.broadcast %cst_143 : f32 to vector<8x64xf32>
    %197 = arith.maximumf %195, %196 : vector<8x64xf32>
    %198 = arith.truncf %197 : vector<8x64xf32> to vector<8x64xbf16>
    %c17_144 = arith.constant 17 : index
    %c0_145 = arith.constant 0 : index
    %c0_146 = arith.constant 0 : index
    %199 = vector.load %arg4[%c17_144, %c0_145, %c0_146] : memref<49x64x128xbf16, #tpu.memory_space<vmem>>, vector<1x64x128xbf16>
    %200 = vector.shape_cast %199 : vector<1x64x128xbf16> to vector<64x128xbf16>
    %cst_147 = arith.constant dense<0.000000e+00> : vector<8x128xf32>
    %201 = tpu.matmul %198, %200, %cst_147 {dimension_numbers = #tpu.dot_dimension_numbers<[1], [0], [0], [1], [0, 0, 1, 1], [], []>} : vector<8x64xbf16>, vector<64x128xbf16>, vector<8x128xf32> -> vector<8x128xf32>
    %202 = arith.addf %191, %201 : vector<8x128xf32>
    %c18 = arith.constant 18 : index
    %c0_148 = arith.constant 0 : index
    %c0_149 = arith.constant 0 : index
    %203 = vector.load %arg1[%c18, %c0_148, %c0_149] : memref<49x8x288xbf16, #tpu.memory_space<vmem>>, vector<1x8x288xbf16>
    %204 = vector.shape_cast %203 : vector<1x8x288xbf16> to vector<8x288xbf16>
    %cst_150 = arith.constant dense<0.000000e+00> : vector<8x64xf32>
    %205 = tpu.matmul %204, %0, %cst_150 {dimension_numbers = #tpu.dot_dimension_numbers<[1], [0], [0], [1], [0, 0, 1, 1], [], []>} : vector<8x288xbf16>, vector<288x64xbf16>, vector<8x64xf32> -> vector<8x64xf32>
    %206 = arith.addf %205, %3 : vector<8x64xf32>
    %cst_151 = arith.constant 0.000000e+00 : f32
    %207 = vector.broadcast %cst_151 : f32 to vector<8x64xf32>
    %208 = arith.maximumf %206, %207 : vector<8x64xf32>
    %209 = arith.truncf %208 : vector<8x64xf32> to vector<8x64xbf16>
    %c18_152 = arith.constant 18 : index
    %c0_153 = arith.constant 0 : index
    %c0_154 = arith.constant 0 : index
    %210 = vector.load %arg4[%c18_152, %c0_153, %c0_154] : memref<49x64x128xbf16, #tpu.memory_space<vmem>>, vector<1x64x128xbf16>
    %211 = vector.shape_cast %210 : vector<1x64x128xbf16> to vector<64x128xbf16>
    %cst_155 = arith.constant dense<0.000000e+00> : vector<8x128xf32>
    %212 = tpu.matmul %209, %211, %cst_155 {dimension_numbers = #tpu.dot_dimension_numbers<[1], [0], [0], [1], [0, 0, 1, 1], [], []>} : vector<8x64xbf16>, vector<64x128xbf16>, vector<8x128xf32> -> vector<8x128xf32>
    %213 = arith.addf %202, %212 : vector<8x128xf32>
    %c19 = arith.constant 19 : index
    %c0_156 = arith.constant 0 : index
    %c0_157 = arith.constant 0 : index
    %214 = vector.load %arg1[%c19, %c0_156, %c0_157] : memref<49x8x288xbf16, #tpu.memory_space<vmem>>, vector<1x8x288xbf16>
    %215 = vector.shape_cast %214 : vector<1x8x288xbf16> to vector<8x288xbf16>
    %cst_158 = arith.constant dense<0.000000e+00> : vector<8x64xf32>
    %216 = tpu.matmul %215, %0, %cst_158 {dimension_numbers = #tpu.dot_dimension_numbers<[1], [0], [0], [1], [0, 0, 1, 1], [], []>} : vector<8x288xbf16>, vector<288x64xbf16>, vector<8x64xf32> -> vector<8x64xf32>
    %217 = arith.addf %216, %3 : vector<8x64xf32>
    %cst_159 = arith.constant 0.000000e+00 : f32
    %218 = vector.broadcast %cst_159 : f32 to vector<8x64xf32>
    %219 = arith.maximumf %217, %218 : vector<8x64xf32>
    %220 = arith.truncf %219 : vector<8x64xf32> to vector<8x64xbf16>
    %c19_160 = arith.constant 19 : index
    %c0_161 = arith.constant 0 : index
    %c0_162 = arith.constant 0 : index
    %221 = vector.load %arg4[%c19_160, %c0_161, %c0_162] : memref<49x64x128xbf16, #tpu.memory_space<vmem>>, vector<1x64x128xbf16>
    %222 = vector.shape_cast %221 : vector<1x64x128xbf16> to vector<64x128xbf16>
    %cst_163 = arith.constant dense<0.000000e+00> : vector<8x128xf32>
    %223 = tpu.matmul %220, %222, %cst_163 {dimension_numbers = #tpu.dot_dimension_numbers<[1], [0], [0], [1], [0, 0, 1, 1], [], []>} : vector<8x64xbf16>, vector<64x128xbf16>, vector<8x128xf32> -> vector<8x128xf32>
    %224 = arith.addf %213, %223 : vector<8x128xf32>
    %c20 = arith.constant 20 : index
    %c0_164 = arith.constant 0 : index
    %c0_165 = arith.constant 0 : index
    %225 = vector.load %arg1[%c20, %c0_164, %c0_165] : memref<49x8x288xbf16, #tpu.memory_space<vmem>>, vector<1x8x288xbf16>
    %226 = vector.shape_cast %225 : vector<1x8x288xbf16> to vector<8x288xbf16>
    %cst_166 = arith.constant dense<0.000000e+00> : vector<8x64xf32>
    %227 = tpu.matmul %226, %0, %cst_166 {dimension_numbers = #tpu.dot_dimension_numbers<[1], [0], [0], [1], [0, 0, 1, 1], [], []>} : vector<8x288xbf16>, vector<288x64xbf16>, vector<8x64xf32> -> vector<8x64xf32>
    %228 = arith.addf %227, %3 : vector<8x64xf32>
    %cst_167 = arith.constant 0.000000e+00 : f32
    %229 = vector.broadcast %cst_167 : f32 to vector<8x64xf32>
    %230 = arith.maximumf %228, %229 : vector<8x64xf32>
    %231 = arith.truncf %230 : vector<8x64xf32> to vector<8x64xbf16>
    %c20_168 = arith.constant 20 : index
    %c0_169 = arith.constant 0 : index
    %c0_170 = arith.constant 0 : index
    %232 = vector.load %arg4[%c20_168, %c0_169, %c0_170] : memref<49x64x128xbf16, #tpu.memory_space<vmem>>, vector<1x64x128xbf16>
    %233 = vector.shape_cast %232 : vector<1x64x128xbf16> to vector<64x128xbf16>
    %cst_171 = arith.constant dense<0.000000e+00> : vector<8x128xf32>
    %234 = tpu.matmul %231, %233, %cst_171 {dimension_numbers = #tpu.dot_dimension_numbers<[1], [0], [0], [1], [0, 0, 1, 1], [], []>} : vector<8x64xbf16>, vector<64x128xbf16>, vector<8x128xf32> -> vector<8x128xf32>
    %235 = arith.addf %224, %234 : vector<8x128xf32>
    %c21 = arith.constant 21 : index
    %c0_172 = arith.constant 0 : index
    %c0_173 = arith.constant 0 : index
    %236 = vector.load %arg1[%c21, %c0_172, %c0_173] : memref<49x8x288xbf16, #tpu.memory_space<vmem>>, vector<1x8x288xbf16>
    %237 = vector.shape_cast %236 : vector<1x8x288xbf16> to vector<8x288xbf16>
    %cst_174 = arith.constant dense<0.000000e+00> : vector<8x64xf32>
    %238 = tpu.matmul %237, %0, %cst_174 {dimension_numbers = #tpu.dot_dimension_numbers<[1], [0], [0], [1], [0, 0, 1, 1], [], []>} : vector<8x288xbf16>, vector<288x64xbf16>, vector<8x64xf32> -> vector<8x64xf32>
    %239 = arith.addf %238, %3 : vector<8x64xf32>
    %cst_175 = arith.constant 0.000000e+00 : f32
    %240 = vector.broadcast %cst_175 : f32 to vector<8x64xf32>
    %241 = arith.maximumf %239, %240 : vector<8x64xf32>
    %242 = arith.truncf %241 : vector<8x64xf32> to vector<8x64xbf16>
    %c21_176 = arith.constant 21 : index
    %c0_177 = arith.constant 0 : index
    %c0_178 = arith.constant 0 : index
    %243 = vector.load %arg4[%c21_176, %c0_177, %c0_178] : memref<49x64x128xbf16, #tpu.memory_space<vmem>>, vector<1x64x128xbf16>
    %244 = vector.shape_cast %243 : vector<1x64x128xbf16> to vector<64x128xbf16>
    %cst_179 = arith.constant dense<0.000000e+00> : vector<8x128xf32>
    %245 = tpu.matmul %242, %244, %cst_179 {dimension_numbers = #tpu.dot_dimension_numbers<[1], [0], [0], [1], [0, 0, 1, 1], [], []>} : vector<8x64xbf16>, vector<64x128xbf16>, vector<8x128xf32> -> vector<8x128xf32>
    %246 = arith.addf %235, %245 : vector<8x128xf32>
    %c22 = arith.constant 22 : index
    %c0_180 = arith.constant 0 : index
    %c0_181 = arith.constant 0 : index
    %247 = vector.load %arg1[%c22, %c0_180, %c0_181] : memref<49x8x288xbf16, #tpu.memory_space<vmem>>, vector<1x8x288xbf16>
    %248 = vector.shape_cast %247 : vector<1x8x288xbf16> to vector<8x288xbf16>
    %cst_182 = arith.constant dense<0.000000e+00> : vector<8x64xf32>
    %249 = tpu.matmul %248, %0, %cst_182 {dimension_numbers = #tpu.dot_dimension_numbers<[1], [0], [0], [1], [0, 0, 1, 1], [], []>} : vector<8x288xbf16>, vector<288x64xbf16>, vector<8x64xf32> -> vector<8x64xf32>
    %250 = arith.addf %249, %3 : vector<8x64xf32>
    %cst_183 = arith.constant 0.000000e+00 : f32
    %251 = vector.broadcast %cst_183 : f32 to vector<8x64xf32>
    %252 = arith.maximumf %250, %251 : vector<8x64xf32>
    %253 = arith.truncf %252 : vector<8x64xf32> to vector<8x64xbf16>
    %c22_184 = arith.constant 22 : index
    %c0_185 = arith.constant 0 : index
    %c0_186 = arith.constant 0 : index
    %254 = vector.load %arg4[%c22_184, %c0_185, %c0_186] : memref<49x64x128xbf16, #tpu.memory_space<vmem>>, vector<1x64x128xbf16>
    %255 = vector.shape_cast %254 : vector<1x64x128xbf16> to vector<64x128xbf16>
    %cst_187 = arith.constant dense<0.000000e+00> : vector<8x128xf32>
    %256 = tpu.matmul %253, %255, %cst_187 {dimension_numbers = #tpu.dot_dimension_numbers<[1], [0], [0], [1], [0, 0, 1, 1], [], []>} : vector<8x64xbf16>, vector<64x128xbf16>, vector<8x128xf32> -> vector<8x128xf32>
    %257 = arith.addf %246, %256 : vector<8x128xf32>
    %c23 = arith.constant 23 : index
    %c0_188 = arith.constant 0 : index
    %c0_189 = arith.constant 0 : index
    %258 = vector.load %arg1[%c23, %c0_188, %c0_189] : memref<49x8x288xbf16, #tpu.memory_space<vmem>>, vector<1x8x288xbf16>
    %259 = vector.shape_cast %258 : vector<1x8x288xbf16> to vector<8x288xbf16>
    %cst_190 = arith.constant dense<0.000000e+00> : vector<8x64xf32>
    %260 = tpu.matmul %259, %0, %cst_190 {dimension_numbers = #tpu.dot_dimension_numbers<[1], [0], [0], [1], [0, 0, 1, 1], [], []>} : vector<8x288xbf16>, vector<288x64xbf16>, vector<8x64xf32> -> vector<8x64xf32>
    %261 = arith.addf %260, %3 : vector<8x64xf32>
    %cst_191 = arith.constant 0.000000e+00 : f32
    %262 = vector.broadcast %cst_191 : f32 to vector<8x64xf32>
    %263 = arith.maximumf %261, %262 : vector<8x64xf32>
    %264 = arith.truncf %263 : vector<8x64xf32> to vector<8x64xbf16>
    %c23_192 = arith.constant 23 : index
    %c0_193 = arith.constant 0 : index
    %c0_194 = arith.constant 0 : index
    %265 = vector.load %arg4[%c23_192, %c0_193, %c0_194] : memref<49x64x128xbf16, #tpu.memory_space<vmem>>, vector<1x64x128xbf16>
    %266 = vector.shape_cast %265 : vector<1x64x128xbf16> to vector<64x128xbf16>
    %cst_195 = arith.constant dense<0.000000e+00> : vector<8x128xf32>
    %267 = tpu.matmul %264, %266, %cst_195 {dimension_numbers = #tpu.dot_dimension_numbers<[1], [0], [0], [1], [0, 0, 1, 1], [], []>} : vector<8x64xbf16>, vector<64x128xbf16>, vector<8x128xf32> -> vector<8x128xf32>
    %268 = arith.addf %257, %267 : vector<8x128xf32>
    %c24 = arith.constant 24 : index
    %c0_196 = arith.constant 0 : index
    %c0_197 = arith.constant 0 : index
    %269 = vector.load %arg1[%c24, %c0_196, %c0_197] : memref<49x8x288xbf16, #tpu.memory_space<vmem>>, vector<1x8x288xbf16>
    %270 = vector.shape_cast %269 : vector<1x8x288xbf16> to vector<8x288xbf16>
    %cst_198 = arith.constant dense<0.000000e+00> : vector<8x64xf32>
    %271 = tpu.matmul %270, %0, %cst_198 {dimension_numbers = #tpu.dot_dimension_numbers<[1], [0], [0], [1], [0, 0, 1, 1], [], []>} : vector<8x288xbf16>, vector<288x64xbf16>, vector<8x64xf32> -> vector<8x64xf32>
    %272 = arith.addf %271, %3 : vector<8x64xf32>
    %cst_199 = arith.constant 0.000000e+00 : f32
    %273 = vector.broadcast %cst_199 : f32 to vector<8x64xf32>
    %274 = arith.maximumf %272, %273 : vector<8x64xf32>
    %275 = arith.truncf %274 : vector<8x64xf32> to vector<8x64xbf16>
    %c24_200 = arith.constant 24 : index
    %c0_201 = arith.constant 0 : index
    %c0_202 = arith.constant 0 : index
    %276 = vector.load %arg4[%c24_200, %c0_201, %c0_202] : memref<49x64x128xbf16, #tpu.memory_space<vmem>>, vector<1x64x128xbf16>
    %277 = vector.shape_cast %276 : vector<1x64x128xbf16> to vector<64x128xbf16>
    %cst_203 = arith.constant dense<0.000000e+00> : vector<8x128xf32>
    %278 = tpu.matmul %275, %277, %cst_203 {dimension_numbers = #tpu.dot_dimension_numbers<[1], [0], [0], [1], [0, 0, 1, 1], [], []>} : vector<8x64xbf16>, vector<64x128xbf16>, vector<8x128xf32> -> vector<8x128xf32>
    %279 = arith.addf %268, %278 : vector<8x128xf32>
    %c25 = arith.constant 25 : index
    %c0_204 = arith.constant 0 : index
    %c0_205 = arith.constant 0 : index
    %280 = vector.load %arg1[%c25, %c0_204, %c0_205] : memref<49x8x288xbf16, #tpu.memory_space<vmem>>, vector<1x8x288xbf16>
    %281 = vector.shape_cast %280 : vector<1x8x288xbf16> to vector<8x288xbf16>
    %cst_206 = arith.constant dense<0.000000e+00> : vector<8x64xf32>
    %282 = tpu.matmul %281, %0, %cst_206 {dimension_numbers = #tpu.dot_dimension_numbers<[1], [0], [0], [1], [0, 0, 1, 1], [], []>} : vector<8x288xbf16>, vector<288x64xbf16>, vector<8x64xf32> -> vector<8x64xf32>
    %283 = arith.addf %282, %3 : vector<8x64xf32>
    %cst_207 = arith.constant 0.000000e+00 : f32
    %284 = vector.broadcast %cst_207 : f32 to vector<8x64xf32>
    %285 = arith.maximumf %283, %284 : vector<8x64xf32>
    %286 = arith.truncf %285 : vector<8x64xf32> to vector<8x64xbf16>
    %c25_208 = arith.constant 25 : index
    %c0_209 = arith.constant 0 : index
    %c0_210 = arith.constant 0 : index
    %287 = vector.load %arg4[%c25_208, %c0_209, %c0_210] : memref<49x64x128xbf16, #tpu.memory_space<vmem>>, vector<1x64x128xbf16>
    %288 = vector.shape_cast %287 : vector<1x64x128xbf16> to vector<64x128xbf16>
    %cst_211 = arith.constant dense<0.000000e+00> : vector<8x128xf32>
    %289 = tpu.matmul %286, %288, %cst_211 {dimension_numbers = #tpu.dot_dimension_numbers<[1], [0], [0], [1], [0, 0, 1, 1], [], []>} : vector<8x64xbf16>, vector<64x128xbf16>, vector<8x128xf32> -> vector<8x128xf32>
    %290 = arith.addf %279, %289 : vector<8x128xf32>
    %c26 = arith.constant 26 : index
    %c0_212 = arith.constant 0 : index
    %c0_213 = arith.constant 0 : index
    %291 = vector.load %arg1[%c26, %c0_212, %c0_213] : memref<49x8x288xbf16, #tpu.memory_space<vmem>>, vector<1x8x288xbf16>
    %292 = vector.shape_cast %291 : vector<1x8x288xbf16> to vector<8x288xbf16>
    %cst_214 = arith.constant dense<0.000000e+00> : vector<8x64xf32>
    %293 = tpu.matmul %292, %0, %cst_214 {dimension_numbers = #tpu.dot_dimension_numbers<[1], [0], [0], [1], [0, 0, 1, 1], [], []>} : vector<8x288xbf16>, vector<288x64xbf16>, vector<8x64xf32> -> vector<8x64xf32>
    %294 = arith.addf %293, %3 : vector<8x64xf32>
    %cst_215 = arith.constant 0.000000e+00 : f32
    %295 = vector.broadcast %cst_215 : f32 to vector<8x64xf32>
    %296 = arith.maximumf %294, %295 : vector<8x64xf32>
    %297 = arith.truncf %296 : vector<8x64xf32> to vector<8x64xbf16>
    %c26_216 = arith.constant 26 : index
    %c0_217 = arith.constant 0 : index
    %c0_218 = arith.constant 0 : index
    %298 = vector.load %arg4[%c26_216, %c0_217, %c0_218] : memref<49x64x128xbf16, #tpu.memory_space<vmem>>, vector<1x64x128xbf16>
    %299 = vector.shape_cast %298 : vector<1x64x128xbf16> to vector<64x128xbf16>
    %cst_219 = arith.constant dense<0.000000e+00> : vector<8x128xf32>
    %300 = tpu.matmul %297, %299, %cst_219 {dimension_numbers = #tpu.dot_dimension_numbers<[1], [0], [0], [1], [0, 0, 1, 1], [], []>} : vector<8x64xbf16>, vector<64x128xbf16>, vector<8x128xf32> -> vector<8x128xf32>
    %301 = arith.addf %290, %300 : vector<8x128xf32>
    %c27 = arith.constant 27 : index
    %c0_220 = arith.constant 0 : index
    %c0_221 = arith.constant 0 : index
    %302 = vector.load %arg1[%c27, %c0_220, %c0_221] : memref<49x8x288xbf16, #tpu.memory_space<vmem>>, vector<1x8x288xbf16>
    %303 = vector.shape_cast %302 : vector<1x8x288xbf16> to vector<8x288xbf16>
    %cst_222 = arith.constant dense<0.000000e+00> : vector<8x64xf32>
    %304 = tpu.matmul %303, %0, %cst_222 {dimension_numbers = #tpu.dot_dimension_numbers<[1], [0], [0], [1], [0, 0, 1, 1], [], []>} : vector<8x288xbf16>, vector<288x64xbf16>, vector<8x64xf32> -> vector<8x64xf32>
    %305 = arith.addf %304, %3 : vector<8x64xf32>
    %cst_223 = arith.constant 0.000000e+00 : f32
    %306 = vector.broadcast %cst_223 : f32 to vector<8x64xf32>
    %307 = arith.maximumf %305, %306 : vector<8x64xf32>
    %308 = arith.truncf %307 : vector<8x64xf32> to vector<8x64xbf16>
    %c27_224 = arith.constant 27 : index
    %c0_225 = arith.constant 0 : index
    %c0_226 = arith.constant 0 : index
    %309 = vector.load %arg4[%c27_224, %c0_225, %c0_226] : memref<49x64x128xbf16, #tpu.memory_space<vmem>>, vector<1x64x128xbf16>
    %310 = vector.shape_cast %309 : vector<1x64x128xbf16> to vector<64x128xbf16>
    %cst_227 = arith.constant dense<0.000000e+00> : vector<8x128xf32>
    %311 = tpu.matmul %308, %310, %cst_227 {dimension_numbers = #tpu.dot_dimension_numbers<[1], [0], [0], [1], [0, 0, 1, 1], [], []>} : vector<8x64xbf16>, vector<64x128xbf16>, vector<8x128xf32> -> vector<8x128xf32>
    %312 = arith.addf %301, %311 : vector<8x128xf32>
    %c28 = arith.constant 28 : index
    %c0_228 = arith.constant 0 : index
    %c0_229 = arith.constant 0 : index
    %313 = vector.load %arg1[%c28, %c0_228, %c0_229] : memref<49x8x288xbf16, #tpu.memory_space<vmem>>, vector<1x8x288xbf16>
    %314 = vector.shape_cast %313 : vector<1x8x288xbf16> to vector<8x288xbf16>
    %cst_230 = arith.constant dense<0.000000e+00> : vector<8x64xf32>
    %315 = tpu.matmul %314, %0, %cst_230 {dimension_numbers = #tpu.dot_dimension_numbers<[1], [0], [0], [1], [0, 0, 1, 1], [], []>} : vector<8x288xbf16>, vector<288x64xbf16>, vector<8x64xf32> -> vector<8x64xf32>
    %316 = arith.addf %315, %3 : vector<8x64xf32>
    %cst_231 = arith.constant 0.000000e+00 : f32
    %317 = vector.broadcast %cst_231 : f32 to vector<8x64xf32>
    %318 = arith.maximumf %316, %317 : vector<8x64xf32>
    %319 = arith.truncf %318 : vector<8x64xf32> to vector<8x64xbf16>
    %c28_232 = arith.constant 28 : index
    %c0_233 = arith.constant 0 : index
    %c0_234 = arith.constant 0 : index
    %320 = vector.load %arg4[%c28_232, %c0_233, %c0_234] : memref<49x64x128xbf16, #tpu.memory_space<vmem>>, vector<1x64x128xbf16>
    %321 = vector.shape_cast %320 : vector<1x64x128xbf16> to vector<64x128xbf16>
    %cst_235 = arith.constant dense<0.000000e+00> : vector<8x128xf32>
    %322 = tpu.matmul %319, %321, %cst_235 {dimension_numbers = #tpu.dot_dimension_numbers<[1], [0], [0], [1], [0, 0, 1, 1], [], []>} : vector<8x64xbf16>, vector<64x128xbf16>, vector<8x128xf32> -> vector<8x128xf32>
    %323 = arith.addf %312, %322 : vector<8x128xf32>
    %c29 = arith.constant 29 : index
    %c0_236 = arith.constant 0 : index
    %c0_237 = arith.constant 0 : index
    %324 = vector.load %arg1[%c29, %c0_236, %c0_237] : memref<49x8x288xbf16, #tpu.memory_space<vmem>>, vector<1x8x288xbf16>
    %325 = vector.shape_cast %324 : vector<1x8x288xbf16> to vector<8x288xbf16>
    %cst_238 = arith.constant dense<0.000000e+00> : vector<8x64xf32>
    %326 = tpu.matmul %325, %0, %cst_238 {dimension_numbers = #tpu.dot_dimension_numbers<[1], [0], [0], [1], [0, 0, 1, 1], [], []>} : vector<8x288xbf16>, vector<288x64xbf16>, vector<8x64xf32> -> vector<8x64xf32>
    %327 = arith.addf %326, %3 : vector<8x64xf32>
    %cst_239 = arith.constant 0.000000e+00 : f32
    %328 = vector.broadcast %cst_239 : f32 to vector<8x64xf32>
    %329 = arith.maximumf %327, %328 : vector<8x64xf32>
    %330 = arith.truncf %329 : vector<8x64xf32> to vector<8x64xbf16>
    %c29_240 = arith.constant 29 : index
    %c0_241 = arith.constant 0 : index
    %c0_242 = arith.constant 0 : index
    %331 = vector.load %arg4[%c29_240, %c0_241, %c0_242] : memref<49x64x128xbf16, #tpu.memory_space<vmem>>, vector<1x64x128xbf16>
    %332 = vector.shape_cast %331 : vector<1x64x128xbf16> to vector<64x128xbf16>
    %cst_243 = arith.constant dense<0.000000e+00> : vector<8x128xf32>
    %333 = tpu.matmul %330, %332, %cst_243 {dimension_numbers = #tpu.dot_dimension_numbers<[1], [0], [0], [1], [0, 0, 1, 1], [], []>} : vector<8x64xbf16>, vector<64x128xbf16>, vector<8x128xf32> -> vector<8x128xf32>
    %334 = arith.addf %323, %333 : vector<8x128xf32>
    %c30 = arith.constant 30 : index
    %c0_244 = arith.constant 0 : index
    %c0_245 = arith.constant 0 : index
    %335 = vector.load %arg1[%c30, %c0_244, %c0_245] : memref<49x8x288xbf16, #tpu.memory_space<vmem>>, vector<1x8x288xbf16>
    %336 = vector.shape_cast %335 : vector<1x8x288xbf16> to vector<8x288xbf16>
    %cst_246 = arith.constant dense<0.000000e+00> : vector<8x64xf32>
    %337 = tpu.matmul %336, %0, %cst_246 {dimension_numbers = #tpu.dot_dimension_numbers<[1], [0], [0], [1], [0, 0, 1, 1], [], []>} : vector<8x288xbf16>, vector<288x64xbf16>, vector<8x64xf32> -> vector<8x64xf32>
    %338 = arith.addf %337, %3 : vector<8x64xf32>
    %cst_247 = arith.constant 0.000000e+00 : f32
    %339 = vector.broadcast %cst_247 : f32 to vector<8x64xf32>
    %340 = arith.maximumf %338, %339 : vector<8x64xf32>
    %341 = arith.truncf %340 : vector<8x64xf32> to vector<8x64xbf16>
    %c30_248 = arith.constant 30 : index
    %c0_249 = arith.constant 0 : index
    %c0_250 = arith.constant 0 : index
    %342 = vector.load %arg4[%c30_248, %c0_249, %c0_250] : memref<49x64x128xbf16, #tpu.memory_space<vmem>>, vector<1x64x128xbf16>
    %343 = vector.shape_cast %342 : vector<1x64x128xbf16> to vector<64x128xbf16>
    %cst_251 = arith.constant dense<0.000000e+00> : vector<8x128xf32>
    %344 = tpu.matmul %341, %343, %cst_251 {dimension_numbers = #tpu.dot_dimension_numbers<[1], [0], [0], [1], [0, 0, 1, 1], [], []>} : vector<8x64xbf16>, vector<64x128xbf16>, vector<8x128xf32> -> vector<8x128xf32>
    %345 = arith.addf %334, %344 : vector<8x128xf32>
    %c31 = arith.constant 31 : index
    %c0_252 = arith.constant 0 : index
    %c0_253 = arith.constant 0 : index
    %346 = vector.load %arg1[%c31, %c0_252, %c0_253] : memref<49x8x288xbf16, #tpu.memory_space<vmem>>, vector<1x8x288xbf16>
    %347 = vector.shape_cast %346 : vector<1x8x288xbf16> to vector<8x288xbf16>
    %cst_254 = arith.constant dense<0.000000e+00> : vector<8x64xf32>
    %348 = tpu.matmul %347, %0, %cst_254 {dimension_numbers = #tpu.dot_dimension_numbers<[1], [0], [0], [1], [0, 0, 1, 1], [], []>} : vector<8x288xbf16>, vector<288x64xbf16>, vector<8x64xf32> -> vector<8x64xf32>
    %349 = arith.addf %348, %3 : vector<8x64xf32>
    %cst_255 = arith.constant 0.000000e+00 : f32
    %350 = vector.broadcast %cst_255 : f32 to vector<8x64xf32>
    %351 = arith.maximumf %349, %350 : vector<8x64xf32>
    %352 = arith.truncf %351 : vector<8x64xf32> to vector<8x64xbf16>
    %c31_256 = arith.constant 31 : index
    %c0_257 = arith.constant 0 : index
    %c0_258 = arith.constant 0 : index
    %353 = vector.load %arg4[%c31_256, %c0_257, %c0_258] : memref<49x64x128xbf16, #tpu.memory_space<vmem>>, vector<1x64x128xbf16>
    %354 = vector.shape_cast %353 : vector<1x64x128xbf16> to vector<64x128xbf16>
    %cst_259 = arith.constant dense<0.000000e+00> : vector<8x128xf32>
    %355 = tpu.matmul %352, %354, %cst_259 {dimension_numbers = #tpu.dot_dimension_numbers<[1], [0], [0], [1], [0, 0, 1, 1], [], []>} : vector<8x64xbf16>, vector<64x128xbf16>, vector<8x128xf32> -> vector<8x128xf32>
    %356 = arith.addf %345, %355 : vector<8x128xf32>
    %c32 = arith.constant 32 : index
    %c0_260 = arith.constant 0 : index
    %c0_261 = arith.constant 0 : index
    %357 = vector.load %arg1[%c32, %c0_260, %c0_261] : memref<49x8x288xbf16, #tpu.memory_space<vmem>>, vector<1x8x288xbf16>
    %358 = vector.shape_cast %357 : vector<1x8x288xbf16> to vector<8x288xbf16>
    %cst_262 = arith.constant dense<0.000000e+00> : vector<8x64xf32>
    %359 = tpu.matmul %358, %0, %cst_262 {dimension_numbers = #tpu.dot_dimension_numbers<[1], [0], [0], [1], [0, 0, 1, 1], [], []>} : vector<8x288xbf16>, vector<288x64xbf16>, vector<8x64xf32> -> vector<8x64xf32>
    %360 = arith.addf %359, %3 : vector<8x64xf32>
    %cst_263 = arith.constant 0.000000e+00 : f32
    %361 = vector.broadcast %cst_263 : f32 to vector<8x64xf32>
    %362 = arith.maximumf %360, %361 : vector<8x64xf32>
    %363 = arith.truncf %362 : vector<8x64xf32> to vector<8x64xbf16>
    %c32_264 = arith.constant 32 : index
    %c0_265 = arith.constant 0 : index
    %c0_266 = arith.constant 0 : index
    %364 = vector.load %arg4[%c32_264, %c0_265, %c0_266] : memref<49x64x128xbf16, #tpu.memory_space<vmem>>, vector<1x64x128xbf16>
    %365 = vector.shape_cast %364 : vector<1x64x128xbf16> to vector<64x128xbf16>
    %cst_267 = arith.constant dense<0.000000e+00> : vector<8x128xf32>
    %366 = tpu.matmul %363, %365, %cst_267 {dimension_numbers = #tpu.dot_dimension_numbers<[1], [0], [0], [1], [0, 0, 1, 1], [], []>} : vector<8x64xbf16>, vector<64x128xbf16>, vector<8x128xf32> -> vector<8x128xf32>
    %367 = arith.addf %356, %366 : vector<8x128xf32>
    %c33 = arith.constant 33 : index
    %c0_268 = arith.constant 0 : index
    %c0_269 = arith.constant 0 : index
    %368 = vector.load %arg1[%c33, %c0_268, %c0_269] : memref<49x8x288xbf16, #tpu.memory_space<vmem>>, vector<1x8x288xbf16>
    %369 = vector.shape_cast %368 : vector<1x8x288xbf16> to vector<8x288xbf16>
    %cst_270 = arith.constant dense<0.000000e+00> : vector<8x64xf32>
    %370 = tpu.matmul %369, %0, %cst_270 {dimension_numbers = #tpu.dot_dimension_numbers<[1], [0], [0], [1], [0, 0, 1, 1], [], []>} : vector<8x288xbf16>, vector<288x64xbf16>, vector<8x64xf32> -> vector<8x64xf32>
    %371 = arith.addf %370, %3 : vector<8x64xf32>
    %cst_271 = arith.constant 0.000000e+00 : f32
    %372 = vector.broadcast %cst_271 : f32 to vector<8x64xf32>
    %373 = arith.maximumf %371, %372 : vector<8x64xf32>
    %374 = arith.truncf %373 : vector<8x64xf32> to vector<8x64xbf16>
    %c33_272 = arith.constant 33 : index
    %c0_273 = arith.constant 0 : index
    %c0_274 = arith.constant 0 : index
    %375 = vector.load %arg4[%c33_272, %c0_273, %c0_274] : memref<49x64x128xbf16, #tpu.memory_space<vmem>>, vector<1x64x128xbf16>
    %376 = vector.shape_cast %375 : vector<1x64x128xbf16> to vector<64x128xbf16>
    %cst_275 = arith.constant dense<0.000000e+00> : vector<8x128xf32>
    %377 = tpu.matmul %374, %376, %cst_275 {dimension_numbers = #tpu.dot_dimension_numbers<[1], [0], [0], [1], [0, 0, 1, 1], [], []>} : vector<8x64xbf16>, vector<64x128xbf16>, vector<8x128xf32> -> vector<8x128xf32>
    %378 = arith.addf %367, %377 : vector<8x128xf32>
    %c34 = arith.constant 34 : index
    %c0_276 = arith.constant 0 : index
    %c0_277 = arith.constant 0 : index
    %379 = vector.load %arg1[%c34, %c0_276, %c0_277] : memref<49x8x288xbf16, #tpu.memory_space<vmem>>, vector<1x8x288xbf16>
    %380 = vector.shape_cast %379 : vector<1x8x288xbf16> to vector<8x288xbf16>
    %cst_278 = arith.constant dense<0.000000e+00> : vector<8x64xf32>
    %381 = tpu.matmul %380, %0, %cst_278 {dimension_numbers = #tpu.dot_dimension_numbers<[1], [0], [0], [1], [0, 0, 1, 1], [], []>} : vector<8x288xbf16>, vector<288x64xbf16>, vector<8x64xf32> -> vector<8x64xf32>
    %382 = arith.addf %381, %3 : vector<8x64xf32>
    %cst_279 = arith.constant 0.000000e+00 : f32
    %383 = vector.broadcast %cst_279 : f32 to vector<8x64xf32>
    %384 = arith.maximumf %382, %383 : vector<8x64xf32>
    %385 = arith.truncf %384 : vector<8x64xf32> to vector<8x64xbf16>
    %c34_280 = arith.constant 34 : index
    %c0_281 = arith.constant 0 : index
    %c0_282 = arith.constant 0 : index
    %386 = vector.load %arg4[%c34_280, %c0_281, %c0_282] : memref<49x64x128xbf16, #tpu.memory_space<vmem>>, vector<1x64x128xbf16>
    %387 = vector.shape_cast %386 : vector<1x64x128xbf16> to vector<64x128xbf16>
    %cst_283 = arith.constant dense<0.000000e+00> : vector<8x128xf32>
    %388 = tpu.matmul %385, %387, %cst_283 {dimension_numbers = #tpu.dot_dimension_numbers<[1], [0], [0], [1], [0, 0, 1, 1], [], []>} : vector<8x64xbf16>, vector<64x128xbf16>, vector<8x128xf32> -> vector<8x128xf32>
    %389 = arith.addf %378, %388 : vector<8x128xf32>
    %c35 = arith.constant 35 : index
    %c0_284 = arith.constant 0 : index
    %c0_285 = arith.constant 0 : index
    %390 = vector.load %arg1[%c35, %c0_284, %c0_285] : memref<49x8x288xbf16, #tpu.memory_space<vmem>>, vector<1x8x288xbf16>
    %391 = vector.shape_cast %390 : vector<1x8x288xbf16> to vector<8x288xbf16>
    %cst_286 = arith.constant dense<0.000000e+00> : vector<8x64xf32>
    %392 = tpu.matmul %391, %0, %cst_286 {dimension_numbers = #tpu.dot_dimension_numbers<[1], [0], [0], [1], [0, 0, 1, 1], [], []>} : vector<8x288xbf16>, vector<288x64xbf16>, vector<8x64xf32> -> vector<8x64xf32>
    %393 = arith.addf %392, %3 : vector<8x64xf32>
    %cst_287 = arith.constant 0.000000e+00 : f32
    %394 = vector.broadcast %cst_287 : f32 to vector<8x64xf32>
    %395 = arith.maximumf %393, %394 : vector<8x64xf32>
    %396 = arith.truncf %395 : vector<8x64xf32> to vector<8x64xbf16>
    %c35_288 = arith.constant 35 : index
    %c0_289 = arith.constant 0 : index
    %c0_290 = arith.constant 0 : index
    %397 = vector.load %arg4[%c35_288, %c0_289, %c0_290] : memref<49x64x128xbf16, #tpu.memory_space<vmem>>, vector<1x64x128xbf16>
    %398 = vector.shape_cast %397 : vector<1x64x128xbf16> to vector<64x128xbf16>
    %cst_291 = arith.constant dense<0.000000e+00> : vector<8x128xf32>
    %399 = tpu.matmul %396, %398, %cst_291 {dimension_numbers = #tpu.dot_dimension_numbers<[1], [0], [0], [1], [0, 0, 1, 1], [], []>} : vector<8x64xbf16>, vector<64x128xbf16>, vector<8x128xf32> -> vector<8x128xf32>
    %400 = arith.addf %389, %399 : vector<8x128xf32>
    %c36 = arith.constant 36 : index
    %c0_292 = arith.constant 0 : index
    %c0_293 = arith.constant 0 : index
    %401 = vector.load %arg1[%c36, %c0_292, %c0_293] : memref<49x8x288xbf16, #tpu.memory_space<vmem>>, vector<1x8x288xbf16>
    %402 = vector.shape_cast %401 : vector<1x8x288xbf16> to vector<8x288xbf16>
    %cst_294 = arith.constant dense<0.000000e+00> : vector<8x64xf32>
    %403 = tpu.matmul %402, %0, %cst_294 {dimension_numbers = #tpu.dot_dimension_numbers<[1], [0], [0], [1], [0, 0, 1, 1], [], []>} : vector<8x288xbf16>, vector<288x64xbf16>, vector<8x64xf32> -> vector<8x64xf32>
    %404 = arith.addf %403, %3 : vector<8x64xf32>
    %cst_295 = arith.constant 0.000000e+00 : f32
    %405 = vector.broadcast %cst_295 : f32 to vector<8x64xf32>
    %406 = arith.maximumf %404, %405 : vector<8x64xf32>
    %407 = arith.truncf %406 : vector<8x64xf32> to vector<8x64xbf16>
    %c36_296 = arith.constant 36 : index
    %c0_297 = arith.constant 0 : index
    %c0_298 = arith.constant 0 : index
    %408 = vector.load %arg4[%c36_296, %c0_297, %c0_298] : memref<49x64x128xbf16, #tpu.memory_space<vmem>>, vector<1x64x128xbf16>
    %409 = vector.shape_cast %408 : vector<1x64x128xbf16> to vector<64x128xbf16>
    %cst_299 = arith.constant dense<0.000000e+00> : vector<8x128xf32>
    %410 = tpu.matmul %407, %409, %cst_299 {dimension_numbers = #tpu.dot_dimension_numbers<[1], [0], [0], [1], [0, 0, 1, 1], [], []>} : vector<8x64xbf16>, vector<64x128xbf16>, vector<8x128xf32> -> vector<8x128xf32>
    %411 = arith.addf %400, %410 : vector<8x128xf32>
    %c37 = arith.constant 37 : index
    %c0_300 = arith.constant 0 : index
    %c0_301 = arith.constant 0 : index
    %412 = vector.load %arg1[%c37, %c0_300, %c0_301] : memref<49x8x288xbf16, #tpu.memory_space<vmem>>, vector<1x8x288xbf16>
    %413 = vector.shape_cast %412 : vector<1x8x288xbf16> to vector<8x288xbf16>
    %cst_302 = arith.constant dense<0.000000e+00> : vector<8x64xf32>
    %414 = tpu.matmul %413, %0, %cst_302 {dimension_numbers = #tpu.dot_dimension_numbers<[1], [0], [0], [1], [0, 0, 1, 1], [], []>} : vector<8x288xbf16>, vector<288x64xbf16>, vector<8x64xf32> -> vector<8x64xf32>
    %415 = arith.addf %414, %3 : vector<8x64xf32>
    %cst_303 = arith.constant 0.000000e+00 : f32
    %416 = vector.broadcast %cst_303 : f32 to vector<8x64xf32>
    %417 = arith.maximumf %415, %416 : vector<8x64xf32>
    %418 = arith.truncf %417 : vector<8x64xf32> to vector<8x64xbf16>
    %c37_304 = arith.constant 37 : index
    %c0_305 = arith.constant 0 : index
    %c0_306 = arith.constant 0 : index
    %419 = vector.load %arg4[%c37_304, %c0_305, %c0_306] : memref<49x64x128xbf16, #tpu.memory_space<vmem>>, vector<1x64x128xbf16>
    %420 = vector.shape_cast %419 : vector<1x64x128xbf16> to vector<64x128xbf16>
    %cst_307 = arith.constant dense<0.000000e+00> : vector<8x128xf32>
    %421 = tpu.matmul %418, %420, %cst_307 {dimension_numbers = #tpu.dot_dimension_numbers<[1], [0], [0], [1], [0, 0, 1, 1], [], []>} : vector<8x64xbf16>, vector<64x128xbf16>, vector<8x128xf32> -> vector<8x128xf32>
    %422 = arith.addf %411, %421 : vector<8x128xf32>
    %c38 = arith.constant 38 : index
    %c0_308 = arith.constant 0 : index
    %c0_309 = arith.constant 0 : index
    %423 = vector.load %arg1[%c38, %c0_308, %c0_309] : memref<49x8x288xbf16, #tpu.memory_space<vmem>>, vector<1x8x288xbf16>
    %424 = vector.shape_cast %423 : vector<1x8x288xbf16> to vector<8x288xbf16>
    %cst_310 = arith.constant dense<0.000000e+00> : vector<8x64xf32>
    %425 = tpu.matmul %424, %0, %cst_310 {dimension_numbers = #tpu.dot_dimension_numbers<[1], [0], [0], [1], [0, 0, 1, 1], [], []>} : vector<8x288xbf16>, vector<288x64xbf16>, vector<8x64xf32> -> vector<8x64xf32>
    %426 = arith.addf %425, %3 : vector<8x64xf32>
    %cst_311 = arith.constant 0.000000e+00 : f32
    %427 = vector.broadcast %cst_311 : f32 to vector<8x64xf32>
    %428 = arith.maximumf %426, %427 : vector<8x64xf32>
    %429 = arith.truncf %428 : vector<8x64xf32> to vector<8x64xbf16>
    %c38_312 = arith.constant 38 : index
    %c0_313 = arith.constant 0 : index
    %c0_314 = arith.constant 0 : index
    %430 = vector.load %arg4[%c38_312, %c0_313, %c0_314] : memref<49x64x128xbf16, #tpu.memory_space<vmem>>, vector<1x64x128xbf16>
    %431 = vector.shape_cast %430 : vector<1x64x128xbf16> to vector<64x128xbf16>
    %cst_315 = arith.constant dense<0.000000e+00> : vector<8x128xf32>
    %432 = tpu.matmul %429, %431, %cst_315 {dimension_numbers = #tpu.dot_dimension_numbers<[1], [0], [0], [1], [0, 0, 1, 1], [], []>} : vector<8x64xbf16>, vector<64x128xbf16>, vector<8x128xf32> -> vector<8x128xf32>
    %433 = arith.addf %422, %432 : vector<8x128xf32>
    %c39 = arith.constant 39 : index
    %c0_316 = arith.constant 0 : index
    %c0_317 = arith.constant 0 : index
    %434 = vector.load %arg1[%c39, %c0_316, %c0_317] : memref<49x8x288xbf16, #tpu.memory_space<vmem>>, vector<1x8x288xbf16>
    %435 = vector.shape_cast %434 : vector<1x8x288xbf16> to vector<8x288xbf16>
    %cst_318 = arith.constant dense<0.000000e+00> : vector<8x64xf32>
    %436 = tpu.matmul %435, %0, %cst_318 {dimension_numbers = #tpu.dot_dimension_numbers<[1], [0], [0], [1], [0, 0, 1, 1], [], []>} : vector<8x288xbf16>, vector<288x64xbf16>, vector<8x64xf32> -> vector<8x64xf32>
    %437 = arith.addf %436, %3 : vector<8x64xf32>
    %cst_319 = arith.constant 0.000000e+00 : f32
    %438 = vector.broadcast %cst_319 : f32 to vector<8x64xf32>
    %439 = arith.maximumf %437, %438 : vector<8x64xf32>
    %440 = arith.truncf %439 : vector<8x64xf32> to vector<8x64xbf16>
    %c39_320 = arith.constant 39 : index
    %c0_321 = arith.constant 0 : index
    %c0_322 = arith.constant 0 : index
    %441 = vector.load %arg4[%c39_320, %c0_321, %c0_322] : memref<49x64x128xbf16, #tpu.memory_space<vmem>>, vector<1x64x128xbf16>
    %442 = vector.shape_cast %441 : vector<1x64x128xbf16> to vector<64x128xbf16>
    %cst_323 = arith.constant dense<0.000000e+00> : vector<8x128xf32>
    %443 = tpu.matmul %440, %442, %cst_323 {dimension_numbers = #tpu.dot_dimension_numbers<[1], [0], [0], [1], [0, 0, 1, 1], [], []>} : vector<8x64xbf16>, vector<64x128xbf16>, vector<8x128xf32> -> vector<8x128xf32>
    %444 = arith.addf %433, %443 : vector<8x128xf32>
    %c40 = arith.constant 40 : index
    %c0_324 = arith.constant 0 : index
    %c0_325 = arith.constant 0 : index
    %445 = vector.load %arg1[%c40, %c0_324, %c0_325] : memref<49x8x288xbf16, #tpu.memory_space<vmem>>, vector<1x8x288xbf16>
    %446 = vector.shape_cast %445 : vector<1x8x288xbf16> to vector<8x288xbf16>
    %cst_326 = arith.constant dense<0.000000e+00> : vector<8x64xf32>
    %447 = tpu.matmul %446, %0, %cst_326 {dimension_numbers = #tpu.dot_dimension_numbers<[1], [0], [0], [1], [0, 0, 1, 1], [], []>} : vector<8x288xbf16>, vector<288x64xbf16>, vector<8x64xf32> -> vector<8x64xf32>
    %448 = arith.addf %447, %3 : vector<8x64xf32>
    %cst_327 = arith.constant 0.000000e+00 : f32
    %449 = vector.broadcast %cst_327 : f32 to vector<8x64xf32>
    %450 = arith.maximumf %448, %449 : vector<8x64xf32>
    %451 = arith.truncf %450 : vector<8x64xf32> to vector<8x64xbf16>
    %c40_328 = arith.constant 40 : index
    %c0_329 = arith.constant 0 : index
    %c0_330 = arith.constant 0 : index
    %452 = vector.load %arg4[%c40_328, %c0_329, %c0_330] : memref<49x64x128xbf16, #tpu.memory_space<vmem>>, vector<1x64x128xbf16>
    %453 = vector.shape_cast %452 : vector<1x64x128xbf16> to vector<64x128xbf16>
    %cst_331 = arith.constant dense<0.000000e+00> : vector<8x128xf32>
    %454 = tpu.matmul %451, %453, %cst_331 {dimension_numbers = #tpu.dot_dimension_numbers<[1], [0], [0], [1], [0, 0, 1, 1], [], []>} : vector<8x64xbf16>, vector<64x128xbf16>, vector<8x128xf32> -> vector<8x128xf32>
    %455 = arith.addf %444, %454 : vector<8x128xf32>
    %c41 = arith.constant 41 : index
    %c0_332 = arith.constant 0 : index
    %c0_333 = arith.constant 0 : index
    %456 = vector.load %arg1[%c41, %c0_332, %c0_333] : memref<49x8x288xbf16, #tpu.memory_space<vmem>>, vector<1x8x288xbf16>
    %457 = vector.shape_cast %456 : vector<1x8x288xbf16> to vector<8x288xbf16>
    %cst_334 = arith.constant dense<0.000000e+00> : vector<8x64xf32>
    %458 = tpu.matmul %457, %0, %cst_334 {dimension_numbers = #tpu.dot_dimension_numbers<[1], [0], [0], [1], [0, 0, 1, 1], [], []>} : vector<8x288xbf16>, vector<288x64xbf16>, vector<8x64xf32> -> vector<8x64xf32>
    %459 = arith.addf %458, %3 : vector<8x64xf32>
    %cst_335 = arith.constant 0.000000e+00 : f32
    %460 = vector.broadcast %cst_335 : f32 to vector<8x64xf32>
    %461 = arith.maximumf %459, %460 : vector<8x64xf32>
    %462 = arith.truncf %461 : vector<8x64xf32> to vector<8x64xbf16>
    %c41_336 = arith.constant 41 : index
    %c0_337 = arith.constant 0 : index
    %c0_338 = arith.constant 0 : index
    %463 = vector.load %arg4[%c41_336, %c0_337, %c0_338] : memref<49x64x128xbf16, #tpu.memory_space<vmem>>, vector<1x64x128xbf16>
    %464 = vector.shape_cast %463 : vector<1x64x128xbf16> to vector<64x128xbf16>
    %cst_339 = arith.constant dense<0.000000e+00> : vector<8x128xf32>
    %465 = tpu.matmul %462, %464, %cst_339 {dimension_numbers = #tpu.dot_dimension_numbers<[1], [0], [0], [1], [0, 0, 1, 1], [], []>} : vector<8x64xbf16>, vector<64x128xbf16>, vector<8x128xf32> -> vector<8x128xf32>
    %466 = arith.addf %455, %465 : vector<8x128xf32>
    %c42 = arith.constant 42 : index
    %c0_340 = arith.constant 0 : index
    %c0_341 = arith.constant 0 : index
    %467 = vector.load %arg1[%c42, %c0_340, %c0_341] : memref<49x8x288xbf16, #tpu.memory_space<vmem>>, vector<1x8x288xbf16>
    %468 = vector.shape_cast %467 : vector<1x8x288xbf16> to vector<8x288xbf16>
    %cst_342 = arith.constant dense<0.000000e+00> : vector<8x64xf32>
    %469 = tpu.matmul %468, %0, %cst_342 {dimension_numbers = #tpu.dot_dimension_numbers<[1], [0], [0], [1], [0, 0, 1, 1], [], []>} : vector<8x288xbf16>, vector<288x64xbf16>, vector<8x64xf32> -> vector<8x64xf32>
    %470 = arith.addf %469, %3 : vector<8x64xf32>
    %cst_343 = arith.constant 0.000000e+00 : f32
    %471 = vector.broadcast %cst_343 : f32 to vector<8x64xf32>
    %472 = arith.maximumf %470, %471 : vector<8x64xf32>
    %473 = arith.truncf %472 : vector<8x64xf32> to vector<8x64xbf16>
    %c42_344 = arith.constant 42 : index
    %c0_345 = arith.constant 0 : index
    %c0_346 = arith.constant 0 : index
    %474 = vector.load %arg4[%c42_344, %c0_345, %c0_346] : memref<49x64x128xbf16, #tpu.memory_space<vmem>>, vector<1x64x128xbf16>
    %475 = vector.shape_cast %474 : vector<1x64x128xbf16> to vector<64x128xbf16>
    %cst_347 = arith.constant dense<0.000000e+00> : vector<8x128xf32>
    %476 = tpu.matmul %473, %475, %cst_347 {dimension_numbers = #tpu.dot_dimension_numbers<[1], [0], [0], [1], [0, 0, 1, 1], [], []>} : vector<8x64xbf16>, vector<64x128xbf16>, vector<8x128xf32> -> vector<8x128xf32>
    %477 = arith.addf %466, %476 : vector<8x128xf32>
    %c43 = arith.constant 43 : index
    %c0_348 = arith.constant 0 : index
    %c0_349 = arith.constant 0 : index
    %478 = vector.load %arg1[%c43, %c0_348, %c0_349] : memref<49x8x288xbf16, #tpu.memory_space<vmem>>, vector<1x8x288xbf16>
    %479 = vector.shape_cast %478 : vector<1x8x288xbf16> to vector<8x288xbf16>
    %cst_350 = arith.constant dense<0.000000e+00> : vector<8x64xf32>
    %480 = tpu.matmul %479, %0, %cst_350 {dimension_numbers = #tpu.dot_dimension_numbers<[1], [0], [0], [1], [0, 0, 1, 1], [], []>} : vector<8x288xbf16>, vector<288x64xbf16>, vector<8x64xf32> -> vector<8x64xf32>
    %481 = arith.addf %480, %3 : vector<8x64xf32>
    %cst_351 = arith.constant 0.000000e+00 : f32
    %482 = vector.broadcast %cst_351 : f32 to vector<8x64xf32>
    %483 = arith.maximumf %481, %482 : vector<8x64xf32>
    %484 = arith.truncf %483 : vector<8x64xf32> to vector<8x64xbf16>
    %c43_352 = arith.constant 43 : index
    %c0_353 = arith.constant 0 : index
    %c0_354 = arith.constant 0 : index
    %485 = vector.load %arg4[%c43_352, %c0_353, %c0_354] : memref<49x64x128xbf16, #tpu.memory_space<vmem>>, vector<1x64x128xbf16>
    %486 = vector.shape_cast %485 : vector<1x64x128xbf16> to vector<64x128xbf16>
    %cst_355 = arith.constant dense<0.000000e+00> : vector<8x128xf32>
    %487 = tpu.matmul %484, %486, %cst_355 {dimension_numbers = #tpu.dot_dimension_numbers<[1], [0], [0], [1], [0, 0, 1, 1], [], []>} : vector<8x64xbf16>, vector<64x128xbf16>, vector<8x128xf32> -> vector<8x128xf32>
    %488 = arith.addf %477, %487 : vector<8x128xf32>
    %c44 = arith.constant 44 : index
    %c0_356 = arith.constant 0 : index
    %c0_357 = arith.constant 0 : index
    %489 = vector.load %arg1[%c44, %c0_356, %c0_357] : memref<49x8x288xbf16, #tpu.memory_space<vmem>>, vector<1x8x288xbf16>
    %490 = vector.shape_cast %489 : vector<1x8x288xbf16> to vector<8x288xbf16>
    %cst_358 = arith.constant dense<0.000000e+00> : vector<8x64xf32>
    %491 = tpu.matmul %490, %0, %cst_358 {dimension_numbers = #tpu.dot_dimension_numbers<[1], [0], [0], [1], [0, 0, 1, 1], [], []>} : vector<8x288xbf16>, vector<288x64xbf16>, vector<8x64xf32> -> vector<8x64xf32>
    %492 = arith.addf %491, %3 : vector<8x64xf32>
    %cst_359 = arith.constant 0.000000e+00 : f32
    %493 = vector.broadcast %cst_359 : f32 to vector<8x64xf32>
    %494 = arith.maximumf %492, %493 : vector<8x64xf32>
    %495 = arith.truncf %494 : vector<8x64xf32> to vector<8x64xbf16>
    %c44_360 = arith.constant 44 : index
    %c0_361 = arith.constant 0 : index
    %c0_362 = arith.constant 0 : index
    %496 = vector.load %arg4[%c44_360, %c0_361, %c0_362] : memref<49x64x128xbf16, #tpu.memory_space<vmem>>, vector<1x64x128xbf16>
    %497 = vector.shape_cast %496 : vector<1x64x128xbf16> to vector<64x128xbf16>
    %cst_363 = arith.constant dense<0.000000e+00> : vector<8x128xf32>
    %498 = tpu.matmul %495, %497, %cst_363 {dimension_numbers = #tpu.dot_dimension_numbers<[1], [0], [0], [1], [0, 0, 1, 1], [], []>} : vector<8x64xbf16>, vector<64x128xbf16>, vector<8x128xf32> -> vector<8x128xf32>
    %499 = arith.addf %488, %498 : vector<8x128xf32>
    %c45 = arith.constant 45 : index
    %c0_364 = arith.constant 0 : index
    %c0_365 = arith.constant 0 : index
    %500 = vector.load %arg1[%c45, %c0_364, %c0_365] : memref<49x8x288xbf16, #tpu.memory_space<vmem>>, vector<1x8x288xbf16>
    %501 = vector.shape_cast %500 : vector<1x8x288xbf16> to vector<8x288xbf16>
    %cst_366 = arith.constant dense<0.000000e+00> : vector<8x64xf32>
    %502 = tpu.matmul %501, %0, %cst_366 {dimension_numbers = #tpu.dot_dimension_numbers<[1], [0], [0], [1], [0, 0, 1, 1], [], []>} : vector<8x288xbf16>, vector<288x64xbf16>, vector<8x64xf32> -> vector<8x64xf32>
    %503 = arith.addf %502, %3 : vector<8x64xf32>
    %cst_367 = arith.constant 0.000000e+00 : f32
    %504 = vector.broadcast %cst_367 : f32 to vector<8x64xf32>
    %505 = arith.maximumf %503, %504 : vector<8x64xf32>
    %506 = arith.truncf %505 : vector<8x64xf32> to vector<8x64xbf16>
    %c45_368 = arith.constant 45 : index
    %c0_369 = arith.constant 0 : index
    %c0_370 = arith.constant 0 : index
    %507 = vector.load %arg4[%c45_368, %c0_369, %c0_370] : memref<49x64x128xbf16, #tpu.memory_space<vmem>>, vector<1x64x128xbf16>
    %508 = vector.shape_cast %507 : vector<1x64x128xbf16> to vector<64x128xbf16>
    %cst_371 = arith.constant dense<0.000000e+00> : vector<8x128xf32>
    %509 = tpu.matmul %506, %508, %cst_371 {dimension_numbers = #tpu.dot_dimension_numbers<[1], [0], [0], [1], [0, 0, 1, 1], [], []>} : vector<8x64xbf16>, vector<64x128xbf16>, vector<8x128xf32> -> vector<8x128xf32>
    %510 = arith.addf %499, %509 : vector<8x128xf32>
    %c46 = arith.constant 46 : index
    %c0_372 = arith.constant 0 : index
    %c0_373 = arith.constant 0 : index
    %511 = vector.load %arg1[%c46, %c0_372, %c0_373] : memref<49x8x288xbf16, #tpu.memory_space<vmem>>, vector<1x8x288xbf16>
    %512 = vector.shape_cast %511 : vector<1x8x288xbf16> to vector<8x288xbf16>
    %cst_374 = arith.constant dense<0.000000e+00> : vector<8x64xf32>
    %513 = tpu.matmul %512, %0, %cst_374 {dimension_numbers = #tpu.dot_dimension_numbers<[1], [0], [0], [1], [0, 0, 1, 1], [], []>} : vector<8x288xbf16>, vector<288x64xbf16>, vector<8x64xf32> -> vector<8x64xf32>
    %514 = arith.addf %513, %3 : vector<8x64xf32>
    %cst_375 = arith.constant 0.000000e+00 : f32
    %515 = vector.broadcast %cst_375 : f32 to vector<8x64xf32>
    %516 = arith.maximumf %514, %515 : vector<8x64xf32>
    %517 = arith.truncf %516 : vector<8x64xf32> to vector<8x64xbf16>
    %c46_376 = arith.constant 46 : index
    %c0_377 = arith.constant 0 : index
    %c0_378 = arith.constant 0 : index
    %518 = vector.load %arg4[%c46_376, %c0_377, %c0_378] : memref<49x64x128xbf16, #tpu.memory_space<vmem>>, vector<1x64x128xbf16>
    %519 = vector.shape_cast %518 : vector<1x64x128xbf16> to vector<64x128xbf16>
    %cst_379 = arith.constant dense<0.000000e+00> : vector<8x128xf32>
    %520 = tpu.matmul %517, %519, %cst_379 {dimension_numbers = #tpu.dot_dimension_numbers<[1], [0], [0], [1], [0, 0, 1, 1], [], []>} : vector<8x64xbf16>, vector<64x128xbf16>, vector<8x128xf32> -> vector<8x128xf32>
    %521 = arith.addf %510, %520 : vector<8x128xf32>
    %c47 = arith.constant 47 : index
    %c0_380 = arith.constant 0 : index
    %c0_381 = arith.constant 0 : index
    %522 = vector.load %arg1[%c47, %c0_380, %c0_381] : memref<49x8x288xbf16, #tpu.memory_space<vmem>>, vector<1x8x288xbf16>
    %523 = vector.shape_cast %522 : vector<1x8x288xbf16> to vector<8x288xbf16>
    %cst_382 = arith.constant dense<0.000000e+00> : vector<8x64xf32>
    %524 = tpu.matmul %523, %0, %cst_382 {dimension_numbers = #tpu.dot_dimension_numbers<[1], [0], [0], [1], [0, 0, 1, 1], [], []>} : vector<8x288xbf16>, vector<288x64xbf16>, vector<8x64xf32> -> vector<8x64xf32>
    %525 = arith.addf %524, %3 : vector<8x64xf32>
    %cst_383 = arith.constant 0.000000e+00 : f32
    %526 = vector.broadcast %cst_383 : f32 to vector<8x64xf32>
    %527 = arith.maximumf %525, %526 : vector<8x64xf32>
    %528 = arith.truncf %527 : vector<8x64xf32> to vector<8x64xbf16>
    %c47_384 = arith.constant 47 : index
    %c0_385 = arith.constant 0 : index
    %c0_386 = arith.constant 0 : index
    %529 = vector.load %arg4[%c47_384, %c0_385, %c0_386] : memref<49x64x128xbf16, #tpu.memory_space<vmem>>, vector<1x64x128xbf16>
    %530 = vector.shape_cast %529 : vector<1x64x128xbf16> to vector<64x128xbf16>
    %cst_387 = arith.constant dense<0.000000e+00> : vector<8x128xf32>
    %531 = tpu.matmul %528, %530, %cst_387 {dimension_numbers = #tpu.dot_dimension_numbers<[1], [0], [0], [1], [0, 0, 1, 1], [], []>} : vector<8x64xbf16>, vector<64x128xbf16>, vector<8x128xf32> -> vector<8x128xf32>
    %532 = arith.addf %521, %531 : vector<8x128xf32>
    %c48 = arith.constant 48 : index
    %c0_388 = arith.constant 0 : index
    %c0_389 = arith.constant 0 : index
    %533 = vector.load %arg1[%c48, %c0_388, %c0_389] : memref<49x8x288xbf16, #tpu.memory_space<vmem>>, vector<1x8x288xbf16>
    %534 = vector.shape_cast %533 : vector<1x8x288xbf16> to vector<8x288xbf16>
    %cst_390 = arith.constant dense<0.000000e+00> : vector<8x64xf32>
    %535 = tpu.matmul %534, %0, %cst_390 {dimension_numbers = #tpu.dot_dimension_numbers<[1], [0], [0], [1], [0, 0, 1, 1], [], []>} : vector<8x288xbf16>, vector<288x64xbf16>, vector<8x64xf32> -> vector<8x64xf32>
    %536 = arith.addf %535, %3 : vector<8x64xf32>
    %cst_391 = arith.constant 0.000000e+00 : f32
    %537 = vector.broadcast %cst_391 : f32 to vector<8x64xf32>
    %538 = arith.maximumf %536, %537 : vector<8x64xf32>
    %539 = arith.truncf %538 : vector<8x64xf32> to vector<8x64xbf16>
    %c48_392 = arith.constant 48 : index
    %c0_393 = arith.constant 0 : index
    %c0_394 = arith.constant 0 : index
    %540 = vector.load %arg4[%c48_392, %c0_393, %c0_394] : memref<49x64x128xbf16, #tpu.memory_space<vmem>>, vector<1x64x128xbf16>
    %541 = vector.shape_cast %540 : vector<1x64x128xbf16> to vector<64x128xbf16>
    %cst_395 = arith.constant dense<0.000000e+00> : vector<8x128xf32>
    %542 = tpu.matmul %539, %541, %cst_395 {dimension_numbers = #tpu.dot_dimension_numbers<[1], [0], [0], [1], [0, 0, 1, 1], [], []>} : vector<8x64xbf16>, vector<64x128xbf16>, vector<8x128xf32> -> vector<8x128xf32>
    %543 = arith.addf %532, %542 : vector<8x128xf32>
    %c0_396 = arith.constant 0 : index
    %c0_397 = arith.constant 0 : index
    %544 = vector.load %arg5[%c0_396, %c0_397] : memref<1x128xf32, #tpu.memory_space<vmem>>, vector<1x128xf32>
    %545 = vector.broadcast %544 : vector<1x128xf32> to vector<8x128xf32>
    %546 = arith.addf %543, %545 : vector<8x128xf32>
    %cst_398 = arith.constant 0.000000e+00 : f32
    %547 = vector.broadcast %cst_398 : f32 to vector<8x128xf32>
    %548 = arith.maximumf %546, %547 : vector<8x128xf32>
    %549 = arith.truncf %548 : vector<8x128xf32> to vector<8x128xbf16>
    %c0_399 = arith.constant 0 : index
    %c0_400 = arith.constant 0 : index
    %550 = vector.load %arg6[%c0_399, %c0_400] : memref<128x128xbf16, #tpu.memory_space<vmem>>, vector<128x128xbf16>
    %cst_401 = arith.constant dense<0.000000e+00> : vector<8x128xf32>
    %551 = tpu.matmul %549, %550, %cst_401 {dimension_numbers = #tpu.dot_dimension_numbers<[1], [0], [0], [1], [0, 0, 1, 1], [], []>} : vector<8x128xbf16>, vector<128x128xbf16>, vector<8x128xf32> -> vector<8x128xf32>
    %c0_402 = arith.constant 0 : index
    %c0_403 = arith.constant 0 : index
    %552 = vector.load %arg7[%c0_402, %c0_403] : memref<1x128xf32, #tpu.memory_space<vmem>>, vector<1x128xf32>
    %553 = vector.broadcast %552 : vector<1x128xf32> to vector<8x128xf32>
    %554 = arith.addf %551, %553 : vector<8x128xf32>
    %c0_404 = arith.constant 0 : index
    %c0_405 = arith.constant 0 : index
    %555 = vector.load %arg8[%c0_404, %c0_405] : memref<8x128xf32, #tpu.memory_space<vmem>>, vector<8x128xf32>
    tpu.vector_store %arg8[%c0_404, %c0_405], %554 {strides = array<i32>} : memref<8x128xf32, #tpu.memory_space<vmem>>, vector<8x128xf32>,
    return
  }
  func.func @transform_0(%arg0: i32) -> (i32, i32, i32) {
    %c0_i32 = arith.constant 0 : i32
    %c0_i32_0 = arith.constant 0 : i32
    %c0_i32_1 = arith.constant 0 : i32
    %c0_i32_2 = arith.constant 0 : i32
    return %c0_i32, %c0_i32_0, %c0_i32_1 : i32, i32, i32
  }
  func.func @transform_1(%arg0: i32) -> (i32, i32) {
    %c0_i32 = arith.constant 0 : i32
    %c0_i32_0 = arith.constant 0 : i32
    %c0_i32_1 = arith.constant 0 : i32
    return %c0_i32, %c0_i32_0 : i32, i32
  }
  func.func @transform_2(%arg0: i32) -> (i32, i32) {
    %c0_i32 = arith.constant 0 : i32
    %c0_i32_0 = arith.constant 0 : i32
    %c0_i32_1 = arith.constant 0 : i32
    return %c0_i32, %c0_i32_0 : i32, i32
  }
  func.func @transform_3(%arg0: i32) -> (i32, i32, i32) {
    %c0_i32 = arith.constant 0 : i32
    %c0_i32_0 = arith.constant 0 : i32
    %c0_i32_1 = arith.constant 0 : i32
    %c0_i32_2 = arith.constant 0 : i32
    return %c0_i32, %c0_i32_0, %c0_i32_1 : i32, i32, i32
  }
  func.func @transform_4(%arg0: i32) -> (i32, i32) {
    %c0_i32 = arith.constant 0 : i32
    %c0_i32_0 = arith.constant 0 : i32
    %c0_i32_1 = arith.constant 0 : i32
    return %c0_i32, %c0_i32_0 : i32, i32
  }
  func.func @transform_5(%arg0: i32) -> (i32, i32) {
    %c0_i32 = arith.constant 0 : i32
    %c0_i32_0 = arith.constant 0 : i32
    %c0_i32_1 = arith.constant 0 : i32
    return %c0_i32, %c0_i32_0 : i32, i32
  }
  func.func @transform_6(%arg0: i32) -> (i32, i32) {
    %c0_i32 = arith.constant 0 : i32
    %c0_i32_0 = arith.constant 0 : i32
    %c0_i32_1 = arith.constant 0 : i32
    return %c0_i32, %c0_i32_0 : i32, i32
  }
  func.func @transform_7(%arg0: i32) -> (i32, i32) {
    %c0_i32 = arith.constant 0 : i32
    %c0_i32_0 = arith.constant 0 : i32
    %c0_i32_1 = arith.constant 0 : i32
    return %c0_i32, %c0_i32_0 : i32, i32
  }
}

</mosaic_0001>

<bundles_post_ra>
// kernel: cnn2_forward.3
= control target key start
LH: loop header
LB: loop body
LE: loop exit
PB: predicated region body
PF: predicated region fallthrough
CT: control target
= control target key end

     0   :  { %s2708_s12 = smov 0   ;;  %s3094_s0 = inlined_call_operand.vmem [shape: bf16[2,784,27], index: 0, kind: input, shape index: {}]   ;;  %s3095_s1 = inlined_call_operand.vmem [shape: bf16[27,128], index: 1, kind: input, shape index: {}]   ;;  %s3096_s2 = inlined_call_operand.vmem [shape: f32[1,128], index: 2, kind: input, shape index: {}]   ;;  %s3097_s3 = inlined_call_operand.vmem [shape: bf16[2,784,128], index: 3, kind: output, shape index: {}]  }
   0x1 LB: > { %s1760_s13 = sadd.s32 4294967295, %s2683_s12   ;;  %p1764_p0 = scmp.ge.s32.totalorder %s2683_s12, 1  ;;  %s2683_s12 = sphi %s2708_s12, %s13_s12  }
   0x2   : > { %p137_p1 = scmp.lt.s32.totalorder %s2683_s12, 3 }
   0x4   : > { %p138_p2 = pnand %p1764_p0, %p137_p1 }
   0x5   : > { %v2626_v0 = vld [vmem:[%s3095_s1] sm:$0xff] (!%p138_p2)   ;;  %v2685_v1 = vmov (!%p138_p2), 0.0   ;;  %v2627_v2 = vld [vmem:[%s3095_s1 + $0x8] sm:$0x3f] (!%p138_p2)   ;;  %vm685_vm0 = vcmask (!%p138_p2), 1044480   ;;  %vm686_vm1 = vcmask (!%p138_p2), 1045504  }
   0x6   : > { %141 = sbr.rel (%p138_p2) target bundleno = 431 (0x1af), region = 32  ;;  %2410 = vmatprep.subr.bf16.mxu0 (!%p138_p2), %v2685_v1  ;;  %2610 = vmatprep.subr.bf16.mxu1 (!%p138_p2), %v2685_v1  ;;  %p161_p3 = scmp.lt.s32.totalorder (!%p138_p2), %s1760_s13, 1  ;;  %v2686_v3 = vmov (!%p138_p2), 65535   ;;  %vm2687_vm2 = vmmov (!%p138_p2), 0   ;;  %vm537_vm3 = vcmask (!%p138_p2), 220160  }
   0x7   : > { %2411 = vmatpush3.bf16.msra.mxu0 (!%p138_p2), %v2626_v0  ;;  %2612 = vmatpush3.bf16.msra.mxu1 (!%p138_p2), %v2626_v0  ;;  %v687_v4 = vsel (!%p138_p2), %vm685_vm0, 4294967295, %v2686_v3  ;;  %v2935_v56 = vld [vmem:[%s3096_s2] ss:$0 sm:$0xff] (!%p138_p2) }
   0x8   : > { %2412 = vmatprep.subr.bf16.mxu0 (!%p138_p2), %v2685_v1  ;;  %2414 = vmatprep.mubr.msk.bf16.mxu0 (!%p138_p2), %vm2687_vm2, %v2685_v1  ;;  %v688_v5 = vsel (!%p138_p2), %vm686_vm1, %v687_v4, 0 }
   0x9   : > { %2611 = vmatprep.subr.bf16.mxu1 (!%p138_p2), %v2685_v1  ;;  %2514 = vmatprep.mubr.msk.bf16.mxu1 (!%p138_p2), %vm2687_vm2, %v2685_v1  ;;  %v690_v6 = vand.u32 (!%p138_p2), %v2627_v2, %v688_v5 }
   0xb   : > { %2413 = vmatpush3.bf16.msra.mxu0 (!%p138_p2), %v690_v6  ;;  %2613 = vmatpush3.bf16.msra.mxu1 (!%p138_p2), %v690_v6 }
   0xd   : > { %s3099_s13 = smov (!%p161_p3, %s1760_s13), 1 }
   0xe   : > { %s2614_s18 = smul.u32 392, %s3099_s13 }
  0x10   : > { %s2738_s21 = scalar_lea.vmem %s3094_s0, %s2614_s18  ;;  %s2946_s26 = scalar_lea.vmem %s3097_s3, %s2614_s18 }
  0x11   : > { %v2628_v7 = vld [vmem:[%s2738_s21] sm:$0xff]   ;;  %v2629_v8 = vld [vmem:[%s2738_s21 + $0xc8] sm:$0xff]   ;;  %v2631_v10 = vld [vmem:[%s2738_s21 + $0xd0] sm:$0xff]  }
  0x12   : > { %2415 = vmatmul.mubr.msk.bf16.vlgmr.msra.gmra.mrb[0].mxu0 %vm537_vm3, %v2628_v7  ;;  %2515 = vmatmul.mubr.msk.bf16.vlgmr.msra.gmra.mrb[0].mxu1 %vm537_vm3, %v2629_v8  ;;  %v2630_v9 = vld [vmem:[%s2738_s21 + $0x8] sm:$0xff]   ;;  %v2632_v11 = vld [vmem:[%s2738_s21 + $0x10] sm:$0xff]   ;;  %v2633_v12 = vld [vmem:[%s2738_s21 + $0xd8] sm:$0xff]  }
  0x13   : > { %2418 = vmatprep.mubr.msk.bf16.mxu0 %vm2687_vm2, %v2685_v1  ;;  %2518 = vmatprep.mubr.msk.bf16.mxu1 %vm2687_vm2, %v2685_v1  ;;  %v2634_v13 = vld [vmem:[%s2738_s21 + $0x18] sm:$0xff]   ;;  %v2635_v14 = vld [vmem:[%s2738_s21 + $0xe0] sm:$0xff]   ;;  %v2637_v16 = vld [vmem:[%s2738_s21 + $0xe8] sm:$0xff]  }
  0x14   : > { %v2636_v15 = vld [vmem:[%s2738_s21 + $0x20] sm:$0xff]   ;;  %v2638_v17 = vld [vmem:[%s2738_s21 + $0x28] sm:$0xff]   ;;  %v2639_v18 = vld [vmem:[%s2738_s21 + $0xf0] sm:$0xff]  }
  0x15   : > { %v2640_v19 = vld [vmem:[%s2738_s21 + $0x30] sm:$0xff]   ;;  %v2641_v20 = vld [vmem:[%s2738_s21 + $0xf8] sm:$0xff]   ;;  %v2643_v22 = vld [vmem:[%s2738_s21 + $0x100] sm:$0xff]  }
  0x16   : > { %v2642_v21 = vld [vmem:[%s2738_s21 + $0x38] sm:$0xff]   ;;  %v2644_v23 = vld [vmem:[%s2738_s21 + $0x40] sm:$0xff]   ;;  %v2645_v24 = vld [vmem:[%s2738_s21 + $0x108] sm:$0xff]  }
  0x17   : > { %v2646_v25 = vld [vmem:[%s2738_s21 + $0x48] sm:$0xff]   ;;  %v2647_v26 = vld [vmem:[%s2738_s21 + $0x110] sm:$0xff]   ;;  %v2649_v28 = vld [vmem:[%s2738_s21 + $0x118] sm:$0xff]  }
  0x18   : > { %v2648_v27 = vld [vmem:[%s2738_s21 + $0x50] sm:$0xff]   ;;  %v2650_v29 = vld [vmem:[%s2738_s21 + $0x58] sm:$0xff]   ;;  %v2651_v30 = vld [vmem:[%s2738_s21 + $0x120] sm:$0xff]  }
  0x19   : > { %v2652_v31 = vld [vmem:[%s2738_s21 + $0x60] sm:$0xff]   ;;  %v2653_v32 = vld [vmem:[%s2738_s21 + $0x128] sm:$0xff]   ;;  %v2655_v34 = vld [vmem:[%s2738_s21 + $0x130] sm:$0xff]  }
  0x1a   : > { %2419 = vmatmul.mubr.msk.bf16.gmra.mrb[4].mxu0 %vm537_vm3, %v2630_v9  ;;  %2519 = vmatmul.mubr.msk.bf16.gmra.mrb[4].mxu1 %vm537_vm3, %v2631_v10  ;;  %v2654_v33 = vld [vmem:[%s2738_s21 + $0x68] sm:$0xff]   ;;  %v2656_v35 = vld [vmem:[%s2738_s21 + $0x70] sm:$0xff]   ;;  %v2657_v36 = vld [vmem:[%s2738_s21 + $0x138] sm:$0xff]  }
  0x1b   : > { %2422 = vmatprep.mubr.msk.bf16.mxu0 %vm2687_vm2, %v2685_v1  ;;  %2522 = vmatprep.mubr.msk.bf16.mxu1 %vm2687_vm2, %v2685_v1  ;;  %v2658_v37 = vld [vmem:[%s2738_s21 + $0x78] sm:$0xff]   ;;  %v2659_v38 = vld [vmem:[%s2738_s21 + $0x140] sm:$0xff]   ;;  %v2661_v40 = vld [vmem:[%s2738_s21 + $0x148] sm:$0xff]  }
  0x1c   : > { %v2660_v39 = vld [vmem:[%s2738_s21 + $0x80] sm:$0xff]   ;;  %v2662_v41 = vld [vmem:[%s2738_s21 + $0x88] sm:$0xff]   ;;  %v2663_v42 = vld [vmem:[%s2738_s21 + $0x150] sm:$0xff]  }
  0x1d   : > { %v2664_v43 = vld [vmem:[%s2738_s21 + $0x90] sm:$0xff]   ;;  %v2665_v44 = vld [vmem:[%s2738_s21 + $0x158] sm:$0xff]   ;;  %v2667_v46 = vld [vmem:[%s2738_s21 + $0x160] sm:$0xff]  }
  0x1e   : > { %v2666_v45 = vld [vmem:[%s2738_s21 + $0x98] sm:$0xff]   ;;  %v2668_v47 = vld [vmem:[%s2738_s21 + $0xa0] sm:$0xff]   ;;  %v2669_v48 = vld [vmem:[%s2738_s21 + $0x168] sm:$0xff]  }
  0x1f   : > { %v2670_v49 = vld [vmem:[%s2738_s21 + $0xa8] sm:$0xff]   ;;  %v2671_v50 = vld [vmem:[%s2738_s21 + $0x170] sm:$0xff]   ;;  %v2673_v52 = vld [vmem:[%s2738_s21 + $0x178] sm:$0xff]  }
  0x20   : > { %v2672_v51 = vld [vmem:[%s2738_s21 + $0xb0] sm:$0xff]   ;;  %v2674_v53 = vld [vmem:[%s2738_s21 + $0xb8] sm:$0xff]   ;;  %v2675_v54 = vld [vmem:[%s2738_s21 + $0x180] sm:$0xff]  }
  0x21   : > { %v2676_v55 = vld [vmem:[%s2738_s21 + $0xc0] sm:$0xff]  }
  0x22   : > { %2423 = vmatmul.mubr.msk.bf16.gmra.mrb[8].mxu0 %vm537_vm3, %v2632_v11  ;;  %2523 = vmatmul.mubr.msk.bf16.gmra.mrb[8].mxu1 %vm537_vm3, %v2633_v12 }
  0x23   : > { %2426 = vmatprep.mubr.msk.bf16.mxu0 %vm2687_vm2, %v2685_v1  ;;  %2526 = vmatprep.mubr.msk.bf16.mxu1 %vm2687_vm2, %v2685_v1 }
  0x2a   : > { %2427 = vmatmul.mubr.msk.bf16.gmra.mrb[12].mxu0 %vm537_vm3, %v2634_v13  ;;  %2527 = vmatmul.mubr.msk.bf16.gmra.mrb[12].mxu1 %vm537_vm3, %v2635_v14 }
  0x2b   : > { %2430 = vmatprep.mubr.msk.bf16.mxu0 %vm2687_vm2, %v2685_v1  ;;  %2530 = vmatprep.mubr.msk.bf16.mxu1 %vm2687_vm2, %v2685_v1 }
  0x32   : > { %2431 = vmatmul.mubr.msk.bf16.gmra.mrb[16].mxu0 %vm537_vm3, %v2636_v15  ;;  %2531 = vmatmul.mubr.msk.bf16.gmra.mrb[16].mxu1 %vm537_vm3, %v2637_v16 }
  0x33   : > { %2434 = vmatprep.mubr.msk.bf16.mxu0 %vm2687_vm2, %v2685_v1  ;;  %2534 = vmatprep.mubr.msk.bf16.mxu1 %vm2687_vm2, %v2685_v1 }
  0x3a   : > { %2435 = vmatmul.mubr.msk.bf16.gmra.mrb[20].mxu0 %vm537_vm3, %v2638_v17  ;;  %2535 = vmatmul.mubr.msk.bf16.gmra.mrb[20].mxu1 %vm537_vm3, %v2639_v18 }
  0x3b   : > { %2438 = vmatprep.mubr.msk.bf16.mxu0 %vm2687_vm2, %v2685_v1  ;;  %2538 = vmatprep.mubr.msk.bf16.mxu1 %vm2687_vm2, %v2685_v1 }
  0x42   : > { %2439 = vmatmul.mubr.msk.bf16.gmra.mrb[24].mxu0 %vm537_vm3, %v2640_v19  ;;  %2539 = vmatmul.mubr.msk.bf16.gmra.mrb[24].mxu1 %vm537_vm3, %v2641_v20 }
  0x43   : > { %2442 = vmatprep.mubr.msk.bf16.mxu0 %vm2687_vm2, %v2685_v1  ;;  %2542 = vmatprep.mubr.msk.bf16.mxu1 %vm2687_vm2, %v2685_v1 }
  0x4a   : > { %2443 = vmatmul.mubr.msk.bf16.gmra.mrb[28].mxu0 %vm537_vm3, %v2642_v21  ;;  %2543 = vmatmul.mubr.msk.bf16.gmra.mrb[28].mxu1 %vm537_vm3, %v2643_v22 }
  0x4b   : > { %2446 = vmatprep.mubr.msk.bf16.mxu0 %vm2687_vm2, %v2685_v1  ;;  %2546 = vmatprep.mubr.msk.bf16.mxu1 %vm2687_vm2, %v2685_v1 }
  0x52   : > { %2447 = vmatmul.mubr.msk.bf16.gmra.mrb[32].mxu0 %vm537_vm3, %v2644_v23  ;;  %2547 = vmatmul.mubr.msk.bf16.gmra.mrb[32].mxu1 %vm537_vm3, %v2645_v24 }
  0x53   : > { %2450 = vmatprep.mubr.msk.bf16.mxu0 %vm2687_vm2, %v2685_v1  ;;  %2550 = vmatprep.mubr.msk.bf16.mxu1 %vm2687_vm2, %v2685_v1 }
  0x5a   : > { %2451 = vmatmul.mubr.msk.bf16.gmra.mrb[36].mxu0 %vm537_vm3, %v2646_v25  ;;  %2551 = vmatmul.mubr.msk.bf16.gmra.mrb[36].mxu1 %vm537_vm3, %v2647_v26 }
  0x5b   : > { %2454 = vmatprep.mubr.msk.bf16.mxu0 %vm2687_vm2, %v2685_v1  ;;  %2554 = vmatprep.mubr.msk.bf16.mxu1 %vm2687_vm2, %v2685_v1 }
  0x62   : > { %2455 = vmatmul.mubr.msk.bf16.gmra.mrb[40].mxu0 %vm537_vm3, %v2648_v27  ;;  %2555 = vmatmul.mubr.msk.bf16.gmra.mrb[40].mxu1 %vm537_vm3, %v2649_v28 }
  0x63   : > { %2458 = vmatprep.mubr.msk.bf16.mxu0 %vm2687_vm2, %v2685_v1  ;;  %2558 = vmatprep.mubr.msk.bf16.mxu1 %vm2687_vm2, %v2685_v1 }
  0x6a   : > { %2459 = vmatmul.mubr.msk.bf16.gmra.mrb[44].mxu0 %vm537_vm3, %v2650_v29  ;;  %2559 = vmatmul.mubr.msk.bf16.gmra.mrb[44].mxu1 %vm537_vm3, %v2651_v30 }
  0x6b   : > { %2462 = vmatprep.mubr.msk.bf16.mxu0 %vm2687_vm2, %v2685_v1  ;;  %2562 = vmatprep.mubr.msk.bf16.mxu1 %vm2687_vm2, %v2685_v1 }
  0x72   : > { %2463 = vmatmul.mubr.msk.bf16.gmra.mrb[48].mxu0 %vm537_vm3, %v2652_v31  ;;  %2563 = vmatmul.mubr.msk.bf16.gmra.mrb[48].mxu1 %vm537_vm3, %v2653_v32 }
  0x73   : > { %2466 = vmatprep.mubr.msk.bf16.mxu0 %vm2687_vm2, %v2685_v1  ;;  %2566 = vmatprep.mubr.msk.bf16.mxu1 %vm2687_vm2, %v2685_v1 }
  0x7a   : > { %2467 = vmatmul.mubr.msk.bf16.gmra.mrb[52].mxu0 %vm537_vm3, %v2654_v33  ;;  %2567 = vmatmul.mubr.msk.bf16.gmra.mrb[52].mxu1 %vm537_vm3, %v2655_v34 }
  0x7b   : > { %2470 = vmatprep.mubr.msk.bf16.mxu0 %vm2687_vm2, %v2685_v1  ;;  %2570 = vmatprep.mubr.msk.bf16.mxu1 %vm2687_vm2, %v2685_v1 }
  0x82   : > { %2471 = vmatmul.mubr.msk.bf16.gmra.mrb[56].mxu0 %vm537_vm3, %v2656_v35  ;;  %2571 = vmatmul.mubr.msk.bf16.gmra.mrb[56].mxu1 %vm537_vm3, %v2657_v36 }
  0x83   : > { %2474 = vmatprep.mubr.msk.bf16.mxu0 %vm2687_vm2, %v2685_v1  ;;  %2574 = vmatprep.mubr.msk.bf16.mxu1 %vm2687_vm2, %v2685_v1 }
  0x8a   : > { %2475 = vmatmul.mubr.msk.bf16.gmra.mrb[60].mxu0 %vm537_vm3, %v2658_v37  ;;  %2575 = vmatmul.mubr.msk.bf16.gmra.mrb[60].mxu1 %vm537_vm3, %v2659_v38 }
  0x8b   : > { %2478 = vmatprep.mubr.msk.bf16.mxu0 %vm2687_vm2, %v2685_v1  ;;  %2578 = vmatprep.mubr.msk.bf16.mxu1 %vm2687_vm2, %v2685_v1 }
  0x92   : > { %2479 = vmatmul.mubr.msk.bf16.gmra.mrb[64].mxu0 %vm537_vm3, %v2660_v39  ;;  %2579 = vmatmul.mubr.msk.bf16.gmra.mrb[64].mxu1 %vm537_vm3, %v2661_v40 }
  0x93   : > { %2482 = vmatprep.mubr.msk.bf16.mxu0 %vm2687_vm2, %v2685_v1  ;;  %2582 = vmatprep.mubr.msk.bf16.mxu1 %vm2687_vm2, %v2685_v1 }
  0x9a   : > { %2483 = vmatmul.mubr.msk.bf16.gmra.mrb[68].mxu0 %vm537_vm3, %v2662_v41  ;;  %2583 = vmatmul.mubr.msk.bf16.gmra.mrb[68].mxu1 %vm537_vm3, %v2663_v42 }
  0x9b   : > { %2486 = vmatprep.mubr.msk.bf16.mxu0 %vm2687_vm2, %v2685_v1  ;;  %2586 = vmatprep.mubr.msk.bf16.mxu1 %vm2687_vm2, %v2685_v1 }
  0xa2   : > { %2487 = vmatmul.mubr.msk.bf16.gmra.mrb[72].mxu0 %vm537_vm3, %v2664_v43  ;;  %2587 = vmatmul.mubr.msk.bf16.gmra.mrb[72].mxu1 %vm537_vm3, %v2665_v44 }
  0xa3   : > { %2490 = vmatprep.mubr.msk.bf16.mxu0 %vm2687_vm2, %v2685_v1  ;;  %2590 = vmatprep.mubr.msk.bf16.mxu1 %vm2687_vm2, %v2685_v1 }
  0xaa   : > { %2491 = vmatmul.mubr.msk.bf16.gmra.mrb[76].mxu0 %vm537_vm3, %v2666_v45  ;;  %2591 = vmatmul.mubr.msk.bf16.gmra.mrb[76].mxu1 %vm537_vm3, %v2667_v46 }
  0xab   : > { %2494 = vmatprep.mubr.msk.bf16.mxu0 %vm2687_vm2, %v2685_v1  ;;  %2594 = vmatprep.mubr.msk.bf16.mxu1 %vm2687_vm2, %v2685_v1 }
  0xb2   : > { %2495 = vmatmul.mubr.msk.bf16.gmra.mrb[80].mxu0 %vm537_vm3, %v2668_v47  ;;  %2595 = vmatmul.mubr.msk.bf16.gmra.mrb[80].mxu1 %vm537_vm3, %v2669_v48 }
  0xb3   : > { %2498 = vmatprep.mubr.msk.bf16.mxu0 %vm2687_vm2, %v2685_v1  ;;  %2598 = vmatprep.mubr.msk.bf16.mxu1 %vm2687_vm2, %v2685_v1 }
  0xba   : > { %2499 = vmatmul.mubr.msk.bf16.gmra.mrb[84].mxu0 %vm537_vm3, %v2670_v49  ;;  %2599 = vmatmul.mubr.msk.bf16.gmra.mrb[84].mxu1 %vm537_vm3, %v2671_v50 }
  0xbb   : > { %2502 = vmatprep.mubr.msk.bf16.mxu0 %vm2687_vm2, %v2685_v1  ;;  %2602 = vmatprep.mubr.msk.bf16.mxu1 %vm2687_vm2, %v2685_v1 }
  0xc2   : > { %2503 = vmatmul.mubr.msk.bf16.gmra.mrb[88].mxu0 %vm537_vm3, %v2672_v51  ;;  %2603 = vmatmul.mubr.msk.bf16.gmra.mrb[88].mxu1 %vm537_vm3, %v2673_v52 }
  0xc3   : > { %2506 = vmatprep.mubr.msk.bf16.mxu0 %vm2687_vm2, %v2685_v1  ;;  %2606 = vmatprep.mubr.msk.bf16.mxu1 %vm2687_vm2, %v2685_v1 }
  0xca   : > { %2507 = vmatmul.mubr.msk.bf16.gmra.mrb[92].mxu0 %vm537_vm3, %v2674_v53  ;;  %2607 = vmatmul.mubr.msk.bf16.gmra.mrb[92].mxu1 %vm537_vm3, %v2675_v54 }
  0xcb   : > { %2510 = vmatprep.mubr.msk.bf16.mxu0 %vm2687_vm2, %v2685_v1 }
  0xd2   : > { %2511 = vmatmul.mubr.msk.bf16.gmra.mrb[96].mxu0 %vm537_vm3, %v2676_v55 }
  0xe5   : > { %v726_v57 = vpop.f32.mrb[0].mxu0  ;;  %v926_v60 = vpop.f32.mrb[0].mxu1 }
  0xe6   : > { %v727_v58 = vadd.f32 %v2935_v56, %v726_v57  ;;  %v2416_v59 = vpop.f32.mrb[1].mxu0  ;;  %v927_v62 = vadd.f32 %v2935_v56, %v926_v60  ;;  %v2516_v63 = vpop.f32.mrb[1].mxu1 }
  0xe7   : > { %v729_v61 = vpop.f32.mrb[2].mxu0  ;;  %v929_v2 = vpop.f32.mrb[2].mxu1 }
  0xe8   : > { %v730_v0 = vadd.f32 %v2935_v56, %v729_v61  ;;  %v2417_v1 = vpop.f32.mrb[3].mxu0  ;;  %v1167_v3 = vmax.f32 %v927_v62, 0.0  ;;  %v930_v4 = vadd.f32 %v2935_v56, %v929_v2  ;;  %v2517_v5 = vpop.f32.mrb[3].mxu1  ;;  %v1117_v6 = vmax.f32 %v727_v58, 0.0 }
  0xea   : > { %v1118_v7 = vmax.f32 %v730_v0, 0.0  ;;  %v1168_v8 = vmax.f32 %v930_v4, 0.0 }
  0xec   : > { %v2069_v9 = vpack.c.bf16 %v1118_v7, %v1117_v6  ;;  %v2194_v10 = vpack.c.bf16 %v1168_v8, %v1167_v3 }
  0xed   : > { %v734_v11 = vpop.f32.mrb[4].mxu0  ;;  %v934_v14 = vpop.f32.mrb[4].mxu1 }
  0xee   : > { %2070 = vst [vmem:[%s2946_s26] sm:$0xff] %v2069_v9   ;;  %v735_v12 = vadd.f32 %v2935_v56, %v734_v11  ;;  %v2420_v13 = vpop.f32.mrb[5].mxu0  ;;  %2335 = vst [vmem:[%s2946_s26 + $0xc8] sm:$0xff] %v2194_v10   ;;  %v935_v16 = vadd.f32 %v2935_v56, %v934_v14  ;;  %v2520_v17 = vpop.f32.mrb[5].mxu1 }
  0xef   : > { %v737_v15 = vpop.f32.mrb[6].mxu0  ;;  %v937_v20 = vpop.f32.mrb[6].mxu1 }
  0xf0   : > { %v738_v18 = vadd.f32 %v2935_v56, %v737_v15  ;;  %v2421_v19 = vpop.f32.mrb[7].mxu0  ;;  %v1169_v21 = vmax.f32 %v935_v16, 0.0  ;;  %v938_v22 = vadd.f32 %v2935_v56, %v937_v20  ;;  %v2521_v23 = vpop.f32.mrb[7].mxu1  ;;  %v1119_v24 = vmax.f32 %v735_v12, 0.0 }
  0xf2   : > { %v1120_v25 = vmax.f32 %v738_v18, 0.0  ;;  %v1170_v26 = vmax.f32 %v938_v22, 0.0 }
  0xf4   : > { %v2074_v27 = vpack.c.bf16 %v1120_v25, %v1119_v24  ;;  %v2199_v28 = vpack.c.bf16 %v1170_v26, %v1169_v21 }
  0xf5   : > { %v742_v29 = vpop.f32.mrb[8].mxu0  ;;  %v942_v32 = vpop.f32.mrb[8].mxu1 }
  0xf6   : > { %2311 = vst [vmem:[%s2946_s26 + $0x8] sm:$0xff] %v2074_v27   ;;  %v743_v30 = vadd.f32 %v2935_v56, %v742_v29  ;;  %v2424_v31 = vpop.f32.mrb[9].mxu0  ;;  %2336 = vst [vmem:[%s2946_s26 + $0xd0] sm:$0xff] %v2199_v28   ;;  %v943_v34 = vadd.f32 %v2935_v56, %v942_v32  ;;  %v2524_v35 = vpop.f32.mrb[9].mxu1 }
  0xf7   : > { %v745_v33 = vpop.f32.mrb[10].mxu0  ;;  %v945_v38 = vpop.f32.mrb[10].mxu1 }
  0xf8   : > { %v746_v36 = vadd.f32 %v2935_v56, %v745_v33  ;;  %v2425_v37 = vpop.f32.mrb[11].mxu0  ;;  %v1171_v39 = vmax.f32 %v943_v34, 0.0  ;;  %v946_v40 = vadd.f32 %v2935_v56, %v945_v38  ;;  %v2525_v41 = vpop.f32.mrb[11].mxu1  ;;  %v1121_v42 = vmax.f32 %v743_v30, 0.0 }
  0xfa   : > { %v1122_v43 = vmax.f32 %v746_v36, 0.0  ;;  %v1172_v44 = vmax.f32 %v946_v40, 0.0 }
  0xfc   : > { %v2079_v45 = vpack.c.bf16 %v1122_v43, %v1121_v42  ;;  %v2204_v46 = vpack.c.bf16 %v1172_v44, %v1171_v39 }
  0xfd   : > { %v750_v47 = vpop.f32.mrb[12].mxu0  ;;  %v950_v50 = vpop.f32.mrb[12].mxu1 }
  0xfe   : > { %2312 = vst [vmem:[%s2946_s26 + $0x10] sm:$0xff] %v2079_v45   ;;  %v751_v48 = vadd.f32 %v2935_v56, %v750_v47  ;;  %v2428_v49 = vpop.f32.mrb[13].mxu0  ;;  %2337 = vst [vmem:[%s2946_s26 + $0xd8] sm:$0xff] %v2204_v46   ;;  %v951_v52 = vadd.f32 %v2935_v56, %v950_v50  ;;  %v2528_v53 = vpop.f32.mrb[13].mxu1 }
  0xff   : > { %v753_v51 = vpop.f32.mrb[14].mxu0  ;;  %v953_v57 = vpop.f32.mrb[14].mxu1 }
 0x100   : > { %v754_v54 = vadd.f32 %v2935_v56, %v753_v51  ;;  %v2429_v55 = vpop.f32.mrb[15].mxu0  ;;  %v1173_v58 = vmax.f32 %v951_v52, 0.0  ;;  %v954_v59 = vadd.f32 %v2935_v56, %v953_v57  ;;  %v2529_v60 = vpop.f32.mrb[15].mxu1  ;;  %v1123_v61 = vmax.f32 %v751_v48, 0.0 }
 0x102   : > { %v1124_v62 = vmax.f32 %v754_v54, 0.0  ;;  %v1174_v63 = vmax.f32 %v954_v59, 0.0 }
 0x104   : > { %v2084_v0 = vpack.c.bf16 %v1124_v62, %v1123_v61  ;;  %v2209_v1 = vpack.c.bf16 %v1174_v63, %v1173_v58 }
 0x105   : > { %v758_v2 = vpop.f32.mrb[16].mxu0  ;;  %v958_v5 = vpop.f32.mrb[16].mxu1 }
 0x106   : > { %2313 = vst [vmem:[%s2946_s26 + $0x18] sm:$0xff] %v2084_v0   ;;  %v759_v3 = vadd.f32 %v2935_v56, %v758_v2  ;;  %v2432_v4 = vpop.f32.mrb[17].mxu0  ;;  %2338 = vst [vmem:[%s2946_s26 + $0xe0] sm:$0xff] %v2209_v1   ;;  %v959_v7 = vadd.f32 %v2935_v56, %v958_v5  ;;  %v2532_v8 = vpop.f32.mrb[17].mxu1 }
 0x107   : > { %v761_v6 = vpop.f32.mrb[18].mxu0  ;;  %v961_v11 = vpop.f32.mrb[18].mxu1 }
 0x108   : > { %v762_v9 = vadd.f32 %v2935_v56, %v761_v6  ;;  %v2433_v10 = vpop.f32.mrb[19].mxu0  ;;  %v1175_v12 = vmax.f32 %v959_v7, 0.0  ;;  %v962_v13 = vadd.f32 %v2935_v56, %v961_v11  ;;  %v2533_v14 = vpop.f32.mrb[19].mxu1  ;;  %v1125_v15 = vmax.f32 %v759_v3, 0.0 }
 0x10a   : > { %v1126_v16 = vmax.f32 %v762_v9, 0.0  ;;  %v1176_v17 = vmax.f32 %v962_v13, 0.0 }
 0x10c   : > { %v2089_v18 = vpack.c.bf16 %v1126_v16, %v1125_v15  ;;  %v2214_v19 = vpack.c.bf16 %v1176_v17, %v1175_v12 }
 0x10d   : > { %v766_v20 = vpop.f32.mrb[20].mxu0  ;;  %v966_v23 = vpop.f32.mrb[20].mxu1 }
 0x10e   : > { %2314 = vst [vmem:[%s2946_s26 + $0x20] sm:$0xff] %v2089_v18   ;;  %v767_v21 = vadd.f32 %v2935_v56, %v766_v20  ;;  %v2436_v22 = vpop.f32.mrb[21].mxu0  ;;  %2339 = vst [vmem:[%s2946_s26 + $0xe8] sm:$0xff] %v2214_v19   ;;  %v967_v25 = vadd.f32 %v2935_v56, %v966_v23  ;;  %v2536_v26 = vpop.f32.mrb[21].mxu1 }
 0x10f   : > { %v769_v24 = vpop.f32.mrb[22].mxu0  ;;  %v969_v29 = vpop.f32.mrb[22].mxu1 }
 0x110   : > { %v770_v27 = vadd.f32 %v2935_v56, %v769_v24  ;;  %v2437_v28 = vpop.f32.mrb[23].mxu0  ;;  %v1177_v30 = vmax.f32 %v967_v25, 0.0  ;;  %v970_v31 = vadd.f32 %v2935_v56, %v969_v29  ;;  %v2537_v32 = vpop.f32.mrb[23].mxu1  ;;  %v1127_v33 = vmax.f32 %v767_v21, 0.0 }
 0x112   : > { %v1128_v34 = vmax.f32 %v770_v27, 0.0  ;;  %v1178_v35 = vmax.f32 %v970_v31, 0.0 }
 0x114   : > { %v2094_v36 = vpack.c.bf16 %v1128_v34, %v1127_v33  ;;  %v2219_v37 = vpack.c.bf16 %v1178_v35, %v1177_v30 }
 0x115   : > { %v774_v38 = vpop.f32.mrb[24].mxu0  ;;  %v974_v41 = vpop.f32.mrb[24].mxu1 }
 0x116   : > { %2315 = vst [vmem:[%s2946_s26 + $0x28] sm:$0xff] %v2094_v36   ;;  %v775_v39 = vadd.f32 %v2935_v56, %v774_v38  ;;  %v2440_v40 = vpop.f32.mrb[25].mxu0  ;;  %2340 = vst [vmem:[%s2946_s26 + $0xf0] sm:$0xff] %v2219_v37   ;;  %v975_v43 = vadd.f32 %v2935_v56, %v974_v41  ;;  %v2540_v44 = vpop.f32.mrb[25].mxu1 }
 0x117   : > { %v777_v42 = vpop.f32.mrb[26].mxu0  ;;  %v977_v47 = vpop.f32.mrb[26].mxu1 }
 0x118   : > { %v778_v45 = vadd.f32 %v2935_v56, %v777_v42  ;;  %v2441_v46 = vpop.f32.mrb[27].mxu0  ;;  %v1179_v48 = vmax.f32 %v975_v43, 0.0  ;;  %v978_v49 = vadd.f32 %v2935_v56, %v977_v47  ;;  %v2541_v50 = vpop.f32.mrb[27].mxu1  ;;  %v1129_v51 = vmax.f32 %v775_v39, 0.0 }
 0x11a   : > { %v1130_v52 = vmax.f32 %v778_v45, 0.0  ;;  %v1180_v53 = vmax.f32 %v978_v49, 0.0 }
 0x11c   : > { %v2099_v54 = vpack.c.bf16 %v1130_v52, %v1129_v51  ;;  %v2224_v55 = vpack.c.bf16 %v1180_v53, %v1179_v48 }
 0x11d   : > { %v782_v57 = vpop.f32.mrb[28].mxu0  ;;  %v982_v60 = vpop.f32.mrb[28].mxu1 }
 0x11e   : > { %2316 = vst [vmem:[%s2946_s26 + $0x30] sm:$0xff] %v2099_v54   ;;  %v783_v58 = vadd.f32 %v2935_v56, %v782_v57  ;;  %v2444_v59 = vpop.f32.mrb[29].mxu0  ;;  %2341 = vst [vmem:[%s2946_s26 + $0xf8] sm:$0xff] %v2224_v55   ;;  %v983_v62 = vadd.f32 %v2935_v56, %v982_v60  ;;  %v2544_v63 = vpop.f32.mrb[29].mxu1 }
 0x11f   : > { %v785_v61 = vpop.f32.mrb[30].mxu0  ;;  %v985_v2 = vpop.f32.mrb[30].mxu1 }
 0x120   : > { %v786_v0 = vadd.f32 %v2935_v56, %v785_v61  ;;  %v2445_v1 = vpop.f32.mrb[31].mxu0  ;;  %v1181_v3 = vmax.f32 %v983_v62, 0.0  ;;  %v986_v4 = vadd.f32 %v2935_v56, %v985_v2  ;;  %v2545_v5 = vpop.f32.mrb[31].mxu1  ;;  %v1131_v6 = vmax.f32 %v783_v58, 0.0 }
 0x122   : > { %v1132_v7 = vmax.f32 %v786_v0, 0.0  ;;  %v1182_v8 = vmax.f32 %v986_v4, 0.0 }
 0x124   : > { %v2104_v9 = vpack.c.bf16 %v1132_v7, %v1131_v6  ;;  %v2229_v10 = vpack.c.bf16 %v1182_v8, %v1181_v3 }
 0x125   : > { %v790_v11 = vpop.f32.mrb[32].mxu0  ;;  %v990_v14 = vpop.f32.mrb[32].mxu1 }
 0x126   : > { %2317 = vst [vmem:[%s2946_s26 + $0x38] sm:$0xff] %v2104_v9   ;;  %v791_v12 = vadd.f32 %v2935_v56, %v790_v11  ;;  %v2448_v13 = vpop.f32.mrb[33].mxu0  ;;  %2342 = vst [vmem:[%s2946_s26 + $0x100] sm:$0xff] %v2229_v10   ;;  %v991_v16 = vadd.f32 %v2935_v56, %v990_v14  ;;  %v2548_v17 = vpop.f32.mrb[33].mxu1 }
 0x127   : > { %v793_v15 = vpop.f32.mrb[34].mxu0  ;;  %v993_v20 = vpop.f32.mrb[34].mxu1 }
 0x128   : > { %v794_v18 = vadd.f32 %v2935_v56, %v793_v15  ;;  %v2449_v19 = vpop.f32.mrb[35].mxu0  ;;  %v1183_v21 = vmax.f32 %v991_v16, 0.0  ;;  %v994_v22 = vadd.f32 %v2935_v56, %v993_v20  ;;  %v2549_v23 = vpop.f32.mrb[35].mxu1  ;;  %v1133_v24 = vmax.f32 %v791_v12, 0.0 }
 0x12a   : > { %v1134_v25 = vmax.f32 %v794_v18, 0.0  ;;  %v1184_v26 = vmax.f32 %v994_v22, 0.0 }
 0x12c   : > { %v2109_v27 = vpack.c.bf16 %v1134_v25, %v1133_v24  ;;  %v2234_v28 = vpack.c.bf16 %v1184_v26, %v1183_v21 }
 0x12d   : > { %v798_v29 = vpop.f32.mrb[36].mxu0  ;;  %v998_v32 = vpop.f32.mrb[36].mxu1 }
 0x12e   : > { %2318 = vst [vmem:[%s2946_s26 + $0x40] sm:$0xff] %v2109_v27   ;;  %v799_v30 = vadd.f32 %v2935_v56, %v798_v29  ;;  %v2452_v31 = vpop.f32.mrb[37].mxu0  ;;  %2343 = vst [vmem:[%s2946_s26 + $0x108] sm:$0xff] %v2234_v28   ;;  %v999_v34 = vadd.f32 %v2935_v56, %v998_v32  ;;  %v2552_v35 = vpop.f32.mrb[37].mxu1 }
 0x12f   : > { %v801_v33 = vpop.f32.mrb[38].mxu0  ;;  %v1001_v38 = vpop.f32.mrb[38].mxu1 }
 0x130   : > { %v802_v36 = vadd.f32 %v2935_v56, %v801_v33  ;;  %v2453_v37 = vpop.f32.mrb[39].mxu0  ;;  %v1185_v39 = vmax.f32 %v999_v34, 0.0  ;;  %v1002_v40 = vadd.f32 %v2935_v56, %v1001_v38  ;;  %v2553_v41 = vpop.f32.mrb[39].mxu1  ;;  %v1135_v42 = vmax.f32 %v799_v30, 0.0 }
 0x132   : > { %v1136_v43 = vmax.f32 %v802_v36, 0.0  ;;  %v1186_v44 = vmax.f32 %v1002_v40, 0.0 }
 0x134   : > { %v2114_v45 = vpack.c.bf16 %v1136_v43, %v1135_v42  ;;  %v2239_v46 = vpack.c.bf16 %v1186_v44, %v1185_v39 }
 0x135   : > { %v806_v47 = vpop.f32.mrb[40].mxu0  ;;  %v1006_v50 = vpop.f32.mrb[40].mxu1 }
 0x136   : > { %2319 = vst [vmem:[%s2946_s26 + $0x48] sm:$0xff] %v2114_v45   ;;  %v807_v48 = vadd.f32 %v2935_v56, %v806_v47  ;;  %v2456_v49 = vpop.f32.mrb[41].mxu0  ;;  %2344 = vst [vmem:[%s2946_s26 + $0x110] sm:$0xff] %v2239_v46   ;;  %v1007_v52 = vadd.f32 %v2935_v56, %v1006_v50  ;;  %v2556_v53 = vpop.f32.mrb[41].mxu1 }
 0x137   : > { %v809_v51 = vpop.f32.mrb[42].mxu0  ;;  %v1009_v57 = vpop.f32.mrb[42].mxu1 }
 0x138   : > { %v810_v54 = vadd.f32 %v2935_v56, %v809_v51  ;;  %v2457_v55 = vpop.f32.mrb[43].mxu0  ;;  %v1187_v58 = vmax.f32 %v1007_v52, 0.0  ;;  %v1010_v59 = vadd.f32 %v2935_v56, %v1009_v57  ;;  %v2557_v60 = vpop.f32.mrb[43].mxu1  ;;  %v1137_v61 = vmax.f32 %v807_v48, 0.0 }
 0x13a   : > { %v1138_v62 = vmax.f32 %v810_v54, 0.0  ;;  %v1188_v63 = vmax.f32 %v1010_v59, 0.0 }
 0x13c   : > { %v2119_v0 = vpack.c.bf16 %v1138_v62, %v1137_v61  ;;  %v2244_v1 = vpack.c.bf16 %v1188_v63, %v1187_v58 }
 0x13d   : > { %v814_v2 = vpop.f32.mrb[44].mxu0  ;;  %v1014_v5 = vpop.f32.mrb[44].mxu1 }
 0x13e   : > { %2320 = vst [vmem:[%s2946_s26 + $0x50] sm:$0xff] %v2119_v0   ;;  %v815_v3 = vadd.f32 %v2935_v56, %v814_v2  ;;  %v2460_v4 = vpop.f32.mrb[45].mxu0  ;;  %2345 = vst [vmem:[%s2946_s26 + $0x118] sm:$0xff] %v2244_v1   ;;  %v1015_v7 = vadd.f32 %v2935_v56, %v1014_v5  ;;  %v2560_v8 = vpop.f32.mrb[45].mxu1 }
 0x13f   : > { %v817_v6 = vpop.f32.mrb[46].mxu0  ;;  %v1017_v11 = vpop.f32.mrb[46].mxu1 }
 0x140   : > { %v818_v9 = vadd.f32 %v2935_v56, %v817_v6  ;;  %v2461_v10 = vpop.f32.mrb[47].mxu0  ;;  %v1189_v12 = vmax.f32 %v1015_v7, 0.0  ;;  %v1018_v13 = vadd.f32 %v2935_v56, %v1017_v11  ;;  %v2561_v14 = vpop.f32.mrb[47].mxu1  ;;  %v1139_v15 = vmax.f32 %v815_v3, 0.0 }
 0x142   : > { %v1140_v16 = vmax.f32 %v818_v9, 0.0  ;;  %v1190_v17 = vmax.f32 %v1018_v13, 0.0 }
 0x144   : > { %v2124_v18 = vpack.c.bf16 %v1140_v16, %v1139_v15  ;;  %v2249_v19 = vpack.c.bf16 %v1190_v17, %v1189_v12 }
 0x145   : > { %v822_v20 = vpop.f32.mrb[48].mxu0  ;;  %v1022_v23 = vpop.f32.mrb[48].mxu1 }
 0x146   : > { %2321 = vst [vmem:[%s2946_s26 + $0x58] sm:$0xff] %v2124_v18   ;;  %v823_v21 = vadd.f32 %v2935_v56, %v822_v20  ;;  %v2464_v22 = vpop.f32.mrb[49].mxu0  ;;  %2346 = vst [vmem:[%s2946_s26 + $0x120] sm:$0xff] %v2249_v19   ;;  %v1023_v25 = vadd.f32 %v2935_v56, %v1022_v23  ;;  %v2564_v26 = vpop.f32.mrb[49].mxu1 }
 0x147   : > { %v825_v24 = vpop.f32.mrb[50].mxu0  ;;  %v1025_v29 = vpop.f32.mrb[50].mxu1 }
 0x148   : > { %v826_v27 = vadd.f32 %v2935_v56, %v825_v24  ;;  %v2465_v28 = vpop.f32.mrb[51].mxu0  ;;  %v1191_v30 = vmax.f32 %v1023_v25, 0.0  ;;  %v1026_v31 = vadd.f32 %v2935_v56, %v1025_v29  ;;  %v2565_v32 = vpop.f32.mrb[51].mxu1  ;;  %v1141_v33 = vmax.f32 %v823_v21, 0.0 }
 0x14a   : > { %v1142_v34 = vmax.f32 %v826_v27, 0.0  ;;  %v1192_v35 = vmax.f32 %v1026_v31, 0.0 }
 0x14c   : > { %v2129_v36 = vpack.c.bf16 %v1142_v34, %v1141_v33  ;;  %v2254_v37 = vpack.c.bf16 %v1192_v35, %v1191_v30 }
 0x14d   : > { %v830_v38 = vpop.f32.mrb[52].mxu0  ;;  %v1030_v41 = vpop.f32.mrb[52].mxu1 }
 0x14e   : > { %2322 = vst [vmem:[%s2946_s26 + $0x60] sm:$0xff] %v2129_v36   ;;  %v831_v39 = vadd.f32 %v2935_v56, %v830_v38  ;;  %v2468_v40 = vpop.f32.mrb[53].mxu0  ;;  %2347 = vst [vmem:[%s2946_s26 + $0x128] sm:$0xff] %v2254_v37   ;;  %v1031_v43 = vadd.f32 %v2935_v56, %v1030_v41  ;;  %v2568_v44 = vpop.f32.mrb[53].mxu1 }
 0x14f   : > { %v833_v42 = vpop.f32.mrb[54].mxu0  ;;  %v1033_v47 = vpop.f32.mrb[54].mxu1 }
 0x150   : > { %v834_v45 = vadd.f32 %v2935_v56, %v833_v42  ;;  %v2469_v46 = vpop.f32.mrb[55].mxu0  ;;  %v1193_v48 = vmax.f32 %v1031_v43, 0.0  ;;  %v1034_v49 = vadd.f32 %v2935_v56, %v1033_v47  ;;  %v2569_v50 = vpop.f32.mrb[55].mxu1  ;;  %v1143_v51 = vmax.f32 %v831_v39, 0.0 }
 0x152   : > { %v1144_v52 = vmax.f32 %v834_v45, 0.0  ;;  %v1194_v53 = vmax.f32 %v1034_v49, 0.0 }
 0x154   : > { %v2134_v54 = vpack.c.bf16 %v1144_v52, %v1143_v51  ;;  %v2259_v55 = vpack.c.bf16 %v1194_v53, %v1193_v48 }
 0x155   : > { %v838_v57 = vpop.f32.mrb[56].mxu0  ;;  %v1038_v60 = vpop.f32.mrb[56].mxu1 }
 0x156   : > { %2323 = vst [vmem:[%s2946_s26 + $0x68] sm:$0xff] %v2134_v54   ;;  %v839_v58 = vadd.f32 %v2935_v56, %v838_v57  ;;  %v2472_v59 = vpop.f32.mrb[57].mxu0  ;;  %2348 = vst [vmem:[%s2946_s26 + $0x130] sm:$0xff] %v2259_v55   ;;  %v1039_v62 = vadd.f32 %v2935_v56, %v1038_v60  ;;  %v2572_v63 = vpop.f32.mrb[57].mxu1 }
 0x157   : > { %v841_v61 = vpop.f32.mrb[58].mxu0  ;;  %v1041_v2 = vpop.f32.mrb[58].mxu1 }
 0x158   : > { %v842_v0 = vadd.f32 %v2935_v56, %v841_v61  ;;  %v2473_v1 = vpop.f32.mrb[59].mxu0  ;;  %v1195_v3 = vmax.f32 %v1039_v62, 0.0  ;;  %v1042_v4 = vadd.f32 %v2935_v56, %v1041_v2  ;;  %v2573_v5 = vpop.f32.mrb[59].mxu1  ;;  %v1145_v6 = vmax.f32 %v839_v58, 0.0 }
 0x15a   : > { %v1146_v7 = vmax.f32 %v842_v0, 0.0  ;;  %v1196_v8 = vmax.f32 %v1042_v4, 0.0 }
 0x15c   : > { %v2139_v9 = vpack.c.bf16 %v1146_v7, %v1145_v6  ;;  %v2264_v10 = vpack.c.bf16 %v1196_v8, %v1195_v3 }
 0x15d   : > { %v846_v11 = vpop.f32.mrb[60].mxu0  ;;  %v1046_v14 = vpop.f32.mrb[60].mxu1 }
 0x15e   : > { %2324 = vst [vmem:[%s2946_s26 + $0x70] sm:$0xff] %v2139_v9   ;;  %v847_v12 = vadd.f32 %v2935_v56, %v846_v11  ;;  %v2476_v13 = vpop.f32.mrb[61].mxu0  ;;  %2349 = vst [vmem:[%s2946_s26 + $0x138] sm:$0xff] %v2264_v10   ;;  %v1047_v16 = vadd.f32 %v2935_v56, %v1046_v14  ;;  %v2576_v17 = vpop.f32.mrb[61].mxu1 }
 0x15f   : > { %v849_v15 = vpop.f32.mrb[62].mxu0  ;;  %v1049_v20 = vpop.f32.mrb[62].mxu1 }
 0x160   : > { %v850_v18 = vadd.f32 %v2935_v56, %v849_v15  ;;  %v2477_v19 = vpop.f32.mrb[63].mxu0  ;;  %v1197_v21 = vmax.f32 %v1047_v16, 0.0  ;;  %v1050_v22 = vadd.f32 %v2935_v56, %v1049_v20  ;;  %v2577_v23 = vpop.f32.mrb[63].mxu1  ;;  %v1147_v24 = vmax.f32 %v847_v12, 0.0 }
 0x162   : > { %v1148_v25 = vmax.f32 %v850_v18, 0.0  ;;  %v1198_v26 = vmax.f32 %v1050_v22, 0.0 }
 0x164   : > { %v2144_v27 = vpack.c.bf16 %v1148_v25, %v1147_v24  ;;  %v2269_v28 = vpack.c.bf16 %v1198_v26, %v1197_v21 }
 0x165   : > { %v854_v29 = vpop.f32.mrb[64].mxu0  ;;  %v1054_v32 = vpop.f32.mrb[64].mxu1 }
 0x166   : > { %2325 = vst [vmem:[%s2946_s26 + $0x78] sm:$0xff] %v2144_v27   ;;  %v855_v30 = vadd.f32 %v2935_v56, %v854_v29  ;;  %v2480_v31 = vpop.f32.mrb[65].mxu0  ;;  %2350 = vst [vmem:[%s2946_s26 + $0x140] sm:$0xff] %v2269_v28   ;;  %v1055_v34 = vadd.f32 %v2935_v56, %v1054_v32  ;;  %v2580_v35 = vpop.f32.mrb[65].mxu1 }
 0x167   : > { %v857_v33 = vpop.f32.mrb[66].mxu0  ;;  %v1057_v38 = vpop.f32.mrb[66].mxu1 }
 0x168   : > { %v858_v36 = vadd.f32 %v2935_v56, %v857_v33  ;;  %v2481_v37 = vpop.f32.mrb[67].mxu0  ;;  %v1199_v39 = vmax.f32 %v1055_v34, 0.0  ;;  %v1058_v40 = vadd.f32 %v2935_v56, %v1057_v38  ;;  %v2581_v41 = vpop.f32.mrb[67].mxu1  ;;  %v1149_v42 = vmax.f32 %v855_v30, 0.0 }
 0x16a   : > { %v1150_v43 = vmax.f32 %v858_v36, 0.0  ;;  %v1200_v44 = vmax.f32 %v1058_v40, 0.0 }
 0x16c   : > { %v2149_v45 = vpack.c.bf16 %v1150_v43, %v1149_v42  ;;  %v2274_v46 = vpack.c.bf16 %v1200_v44, %v1199_v39 }
 0x16d   : > { %v862_v47 = vpop.f32.mrb[68].mxu0  ;;  %v1062_v50 = vpop.f32.mrb[68].mxu1 }
 0x16e   : > { %2326 = vst [vmem:[%s2946_s26 + $0x80] sm:$0xff] %v2149_v45   ;;  %v863_v48 = vadd.f32 %v2935_v56, %v862_v47  ;;  %v2484_v49 = vpop.f32.mrb[69].mxu0  ;;  %2351 = vst [vmem:[%s2946_s26 + $0x148] sm:$0xff] %v2274_v46   ;;  %v1063_v52 = vadd.f32 %v2935_v56, %v1062_v50  ;;  %v2584_v53 = vpop.f32.mrb[69].mxu1 }
 0x16f   : > { %v865_v51 = vpop.f32.mrb[70].mxu0  ;;  %v1065_v57 = vpop.f32.mrb[70].mxu1 }
 0x170   : > { %v866_v54 = vadd.f32 %v2935_v56, %v865_v51  ;;  %v2485_v55 = vpop.f32.mrb[71].mxu0  ;;  %v1201_v58 = vmax.f32 %v1063_v52, 0.0  ;;  %v1066_v59 = vadd.f32 %v2935_v56, %v1065_v57  ;;  %v2585_v60 = vpop.f32.mrb[71].mxu1  ;;  %v1151_v61 = vmax.f32 %v863_v48, 0.0 }
 0x172   : > { %v1152_v62 = vmax.f32 %v866_v54, 0.0  ;;  %v1202_v63 = vmax.f32 %v1066_v59, 0.0 }
 0x174   : > { %v2154_v0 = vpack.c.bf16 %v1152_v62, %v1151_v61  ;;  %v2279_v1 = vpack.c.bf16 %v1202_v63, %v1201_v58 }
 0x175   : > { %v870_v2 = vpop.f32.mrb[72].mxu0  ;;  %v1070_v5 = vpop.f32.mrb[72].mxu1 }
 0x176   : > { %2327 = vst [vmem:[%s2946_s26 + $0x88] sm:$0xff] %v2154_v0   ;;  %v871_v3 = vadd.f32 %v2935_v56, %v870_v2  ;;  %v2488_v4 = vpop.f32.mrb[73].mxu0  ;;  %2352 = vst [vmem:[%s2946_s26 + $0x150] sm:$0xff] %v2279_v1   ;;  %v1071_v7 = vadd.f32 %v2935_v56, %v1070_v5  ;;  %v2588_v8 = vpop.f32.mrb[73].mxu1 }
 0x177   : > { %v873_v6 = vpop.f32.mrb[74].mxu0  ;;  %v1073_v11 = vpop.f32.mrb[74].mxu1 }
 0x178   : > { %v874_v9 = vadd.f32 %v2935_v56, %v873_v6  ;;  %v2489_v10 = vpop.f32.mrb[75].mxu0  ;;  %v1203_v12 = vmax.f32 %v1071_v7, 0.0  ;;  %v1074_v13 = vadd.f32 %v2935_v56, %v1073_v11  ;;  %v2589_v14 = vpop.f32.mrb[75].mxu1  ;;  %v1153_v15 = vmax.f32 %v871_v3, 0.0 }
 0x17a   : > { %v1154_v16 = vmax.f32 %v874_v9, 0.0  ;;  %v1204_v17 = vmax.f32 %v1074_v13, 0.0 }
 0x17c   : > { %v2159_v18 = vpack.c.bf16 %v1154_v16, %v1153_v15  ;;  %v2284_v19 = vpack.c.bf16 %v1204_v17, %v1203_v12 }
 0x17d   : > { %v878_v20 = vpop.f32.mrb[76].mxu0  ;;  %v1078_v23 = vpop.f32.mrb[76].mxu1 }
 0x17e   : > { %2328 = vst [vmem:[%s2946_s26 + $0x90] sm:$0xff] %v2159_v18   ;;  %v879_v21 = vadd.f32 %v2935_v56, %v878_v20  ;;  %v2492_v22 = vpop.f32.mrb[77].mxu0  ;;  %2353 = vst [vmem:[%s2946_s26 + $0x158] sm:$0xff] %v2284_v19   ;;  %v1079_v25 = vadd.f32 %v2935_v56, %v1078_v23  ;;  %v2592_v26 = vpop.f32.mrb[77].mxu1 }
 0x17f   : > { %v881_v24 = vpop.f32.mrb[78].mxu0  ;;  %v1081_v29 = vpop.f32.mrb[78].mxu1 }
 0x180   : > { %v882_v27 = vadd.f32 %v2935_v56, %v881_v24  ;;  %v2493_v28 = vpop.f32.mrb[79].mxu0  ;;  %v1205_v30 = vmax.f32 %v1079_v25, 0.0  ;;  %v1082_v31 = vadd.f32 %v2935_v56, %v1081_v29  ;;  %v2593_v32 = vpop.f32.mrb[79].mxu1  ;;  %v1155_v33 = vmax.f32 %v879_v21, 0.0 }
 0x182   : > { %v1156_v34 = vmax.f32 %v882_v27, 0.0  ;;  %v1206_v35 = vmax.f32 %v1082_v31, 0.0 }
 0x184   : > { %v2164_v36 = vpack.c.bf16 %v1156_v34, %v1155_v33  ;;  %v2289_v37 = vpack.c.bf16 %v1206_v35, %v1205_v30 }
 0x185   : > { %v886_v38 = vpop.f32.mrb[80].mxu0  ;;  %v1086_v41 = vpop.f32.mrb[80].mxu1 }
 0x186   : > { %2329 = vst [vmem:[%s2946_s26 + $0x98] sm:$0xff] %v2164_v36   ;;  %v887_v39 = vadd.f32 %v2935_v56, %v886_v38  ;;  %v2496_v40 = vpop.f32.mrb[81].mxu0  ;;  %2354 = vst [vmem:[%s2946_s26 + $0x160] sm:$0xff] %v2289_v37   ;;  %v1087_v43 = vadd.f32 %v2935_v56, %v1086_v41  ;;  %v2596_v44 = vpop.f32.mrb[81].mxu1 }
 0x187   : > { %v889_v42 = vpop.f32.mrb[82].mxu0  ;;  %v1089_v47 = vpop.f32.mrb[82].mxu1 }
 0x188   : > { %v890_v45 = vadd.f32 %v2935_v56, %v889_v42  ;;  %v2497_v46 = vpop.f32.mrb[83].mxu0  ;;  %v1207_v48 = vmax.f32 %v1087_v43, 0.0  ;;  %v1090_v49 = vadd.f32 %v2935_v56, %v1089_v47  ;;  %v2597_v50 = vpop.f32.mrb[83].mxu1  ;;  %v1157_v51 = vmax.f32 %v887_v39, 0.0 }
 0x18a   : > { %v1158_v52 = vmax.f32 %v890_v45, 0.0  ;;  %v1208_v53 = vmax.f32 %v1090_v49, 0.0 }
 0x18c   : > { %v2169_v54 = vpack.c.bf16 %v1158_v52, %v1157_v51  ;;  %v2294_v55 = vpack.c.bf16 %v1208_v53, %v1207_v48 }
 0x18d   : > { %v894_v57 = vpop.f32.mrb[84].mxu0  ;;  %v1094_v60 = vpop.f32.mrb[84].mxu1 }
 0x18e   : > { %2330 = vst [vmem:[%s2946_s26 + $0xa0] sm:$0xff] %v2169_v54   ;;  %v895_v58 = vadd.f32 %v2935_v56, %v894_v57  ;;  %v2500_v59 = vpop.f32.mrb[85].mxu0  ;;  %2355 = vst [vmem:[%s2946_s26 + $0x168] sm:$0xff] %v2294_v55   ;;  %v1095_v62 = vadd.f32 %v2935_v56, %v1094_v60  ;;  %v2600_v63 = vpop.f32.mrb[85].mxu1 }
 0x18f   : > { %v897_v61 = vpop.f32.mrb[86].mxu0  ;;  %v1097_v2 = vpop.f32.mrb[86].mxu1 }
 0x190   : > { %v898_v0 = vadd.f32 %v2935_v56, %v897_v61  ;;  %v2501_v1 = vpop.f32.mrb[87].mxu0  ;;  %v1209_v3 = vmax.f32 %v1095_v62, 0.0  ;;  %v1098_v4 = vadd.f32 %v2935_v56, %v1097_v2  ;;  %v2601_v5 = vpop.f32.mrb[87].mxu1  ;;  %v1159_v6 = vmax.f32 %v895_v58, 0.0 }
 0x192   : > { %v1160_v7 = vmax.f32 %v898_v0, 0.0  ;;  %v1210_v8 = vmax.f32 %v1098_v4, 0.0 }
 0x194   : > { %v2174_v9 = vpack.c.bf16 %v1160_v7, %v1159_v6  ;;  %v2299_v10 = vpack.c.bf16 %v1210_v8, %v1209_v3 }
 0x195   : > { %v902_v11 = vpop.f32.mrb[88].mxu0  ;;  %v1102_v14 = vpop.f32.mrb[88].mxu1 }
 0x196   : > { %2331 = vst [vmem:[%s2946_s26 + $0xa8] sm:$0xff] %v2174_v9   ;;  %v903_v12 = vadd.f32 %v2935_v56, %v902_v11  ;;  %v2504_v13 = vpop.f32.mrb[89].mxu0  ;;  %2356 = vst [vmem:[%s2946_s26 + $0x170] sm:$0xff] %v2299_v10   ;;  %v1103_v16 = vadd.f32 %v2935_v56, %v1102_v14  ;;  %v2604_v17 = vpop.f32.mrb[89].mxu1 }
 0x197   : > { %v905_v15 = vpop.f32.mrb[90].mxu0  ;;  %v1105_v20 = vpop.f32.mrb[90].mxu1 }
 0x198   : > { %v906_v18 = vadd.f32 %v2935_v56, %v905_v15  ;;  %v2505_v19 = vpop.f32.mrb[91].mxu0  ;;  %v1211_v21 = vmax.f32 %v1103_v16, 0.0  ;;  %v1106_v22 = vadd.f32 %v2935_v56, %v1105_v20  ;;  %v2605_v23 = vpop.f32.mrb[91].mxu1  ;;  %v1161_v24 = vmax.f32 %v903_v12, 0.0 }
 0x19a   : > { %v1162_v25 = vmax.f32 %v906_v18, 0.0  ;;  %v1212_v26 = vmax.f32 %v1106_v22, 0.0 }
 0x19c   : > { %v2179_v27 = vpack.c.bf16 %v1162_v25, %v1161_v24  ;;  %v2304_v28 = vpack.c.bf16 %v1212_v26, %v1211_v21 }
 0x19d   : > { %v910_v29 = vpop.f32.mrb[92].mxu0  ;;  %v1110_v32 = vpop.f32.mrb[92].mxu1 }
 0x19e   : > { %2332 = vst [vmem:[%s2946_s26 + $0xb0] sm:$0xff] %v2179_v27   ;;  %v911_v30 = vadd.f32 %v2935_v56, %v910_v29  ;;  %v2508_v31 = vpop.f32.mrb[93].mxu0  ;;  %2357 = vst [vmem:[%s2946_s26 + $0x178] sm:$0xff] %v2304_v28   ;;  %v1111_v34 = vadd.f32 %v2935_v56, %v1110_v32  ;;  %v2608_v35 = vpop.f32.mrb[93].mxu1 }
 0x19f   : > { %v913_v33 = vpop.f32.mrb[94].mxu0  ;;  %v1113_v38 = vpop.f32.mrb[94].mxu1 }
 0x1a0   : > { %v914_v36 = vadd.f32 %v2935_v56, %v913_v33  ;;  %v2509_v37 = vpop.f32.mrb[95].mxu0  ;;  %v1213_v39 = vmax.f32 %v1111_v34, 0.0  ;;  %v1114_v40 = vadd.f32 %v2935_v56, %v1113_v38  ;;  %v2609_v41 = vpop.f32.mrb[95].mxu1  ;;  %v1163_v42 = vmax.f32 %v911_v30, 0.0 }
 0x1a2   : > { %v1164_v43 = vmax.f32 %v914_v36, 0.0  ;;  %v1214_v44 = vmax.f32 %v1114_v40, 0.0 }
 0x1a4   : > { %v2184_v45 = vpack.c.bf16 %v1164_v43, %v1163_v42  ;;  %v2309_v46 = vpack.c.bf16 %v1214_v44, %v1213_v39 }
 0x1a5   : > { %v918_v47 = vpop.f32.mrb[96].mxu0 }
 0x1a6   : > { %2333 = vst [vmem:[%s2946_s26 + $0xb8] sm:$0xff] %v2184_v45   ;;  %v919_v48 = vadd.f32 %v2935_v56, %v918_v47  ;;  %v2512_v49 = vpop.f32.mrb[97].mxu0  ;;  %2358 = vst [vmem:[%s2946_s26 + $0x180] sm:$0xff] %v2309_v46  }
 0x1a7   : > { %v921_v50 = vpop.f32.mrb[98].mxu0 }
 0x1a8   : > { %v922_v51 = vadd.f32 %v2935_v56, %v921_v50  ;;  %v2513_v52 = vpop.f32.mrb[99].mxu0  ;;  %v1165_v53 = vmax.f32 %v919_v48, 0.0 }
 0x1aa   : > { %v1166_v54 = vmax.f32 %v922_v51, 0.0 }
 0x1ac   : > { %v2189_v55 = vpack.c.bf16 %v1166_v54, %v1165_v53 }
 0x1ae   : > { %2334 = vst [vmem:[%s2946_s26 + $0xc0] sm:$0xff] %v2189_v55  }
 0x1af PF: > { %s13_s12 = sadd.s32 1, %s2683_s12  }
 0x1b0   : > { %p10_p4 = scmp.ge.s32.totalorder %s13_s12, 4  }
 0x1b2   :  { %12 = sbr.rel (!%p10_p4) target bundleno = 1 (0x1), region = 62 }

// kernel: cnn2_forward.4
= control target key start
LH: loop header
LB: loop body
LE: loop exit
PB: predicated region body
PF: predicated region fallthrough
CT: control target
= control target key end

     0   :  { %s1056_s12 = smov 0   ;;  %s1189_s0 = inlined_call_operand.vmem [shape: bf16[2,196,144], index: 0, kind: input, shape index: {}]   ;;  %s1190_s1 = inlined_call_operand.vmem [shape: bf16[144,128], index: 1, kind: input, shape index: {}]   ;;  %s1191_s2 = inlined_call_operand.vmem [shape: f32[1,128], index: 2, kind: input, shape index: {}]   ;;  %s1192_s3 = inlined_call_operand.vmem [shape: bf16[2,196,128], index: 3, kind: output, shape index: {}]  }
   0x1 LB: > { %s772_s13 = sadd.s32 4294967295, %s1033_s12   ;;  %p776_p0 = scmp.ge.s32.totalorder %s1033_s12, 1  ;;  %s1033_s12 = sphi %s1056_s12, %s13_s12  }
   0x2   : > { %p137_p1 = scmp.lt.s32.totalorder %s1033_s12, 3 }
   0x4   : > { %p138_p2 = pnand %p776_p0, %p137_p1 }
   0x5   : > { %v980_v0 = vld [vmem:[%s1190_s1] sm:$0xff] (!%p138_p2)   ;;  %v1035_v1 = vmov (!%p138_p2), 0   ;;  %p161_p3 = scmp.lt.s32.totalorder (!%p138_p2), %s772_s13, 1  ;;  %v981_v2 = vld [vmem:[%s1190_s1 + $0x8] sm:$0xff] (!%p138_p2)   ;;  %v982_v3 = vld [vmem:[%s1190_s1 + $0x10] sm:$0xff] (!%p138_p2)   ;;  %vm390_vm0 = vcmask (!%p138_p2), 130048  }
   0x6   : > { %141 = sbr.rel (%p138_p2) target bundleno = 311 (0x137), region = 32  ;;  %430 = vmatprep.subr.bf16.mxu0 (!%p138_p2), %v1035_v1  ;;  %951 = vmatprep.subr.bf16.mxu1 (!%p138_p2), %v1035_v1  ;;  %v983_v4 = vld [vmem:[%s1190_s1 + $0x18] sm:$0xff] (!%p138_p2)   ;;  %v984_v7 = vld [vmem:[%s1190_s1 + $0x20] sm:$0xff] (!%p138_p2)   ;;  %v985_v8 = vld [vmem:[%s1190_s1 + $0x28] sm:$0xff] (!%p138_p2)  }
   0x7   : > { %431 = vmatpush1.bf16.msra.mxu0 (!%p138_p2), %v980_v0  ;;  %960 = vmatpush1.bf16.msra.mxu1 (!%p138_p2), %v980_v0  ;;  %v986_v9 = vld [vmem:[%s1190_s1 + $0x30] sm:$0xff] (!%p138_p2)   ;;  %v987_v10 = vld [vmem:[%s1190_s1 + $0x38] sm:$0xff] (!%p138_p2)   ;;  %v988_v11 = vld [vmem:[%s1190_s1 + $0x40] sm:$0xff] (!%p138_p2)  }
   0x8   : > { %432 = vmatprep.subr.bf16.mxu0 (!%p138_p2), %v1035_v1  ;;  %952 = vmatprep.subr.bf16.mxu1 (!%p138_p2), %v1035_v1  ;;  %v1140_v37 = vld [vmem:[%s1191_s2] ss:$0 sm:$0xff] (!%p138_p2) }
   0xb   : > { %433 = vmatpush1.bf16.msra.mxu0 (!%p138_p2), %v981_v2  ;;  %961 = vmatpush1.bf16.msra.mxu1 (!%p138_p2), %v981_v2 }
   0xc   : > { %434 = vmatprep.subr.bf16.mxu0 (!%p138_p2), %v1035_v1  ;;  %953 = vmatprep.subr.bf16.mxu1 (!%p138_p2), %v1035_v1 }
   0xd   : > { %s1194_s13 = smov (!%p161_p3, %s772_s13), 1 }
   0xe   : > { %s969_s18 = smul.u32 200, %s1194_s13 }
   0xf   : > { %435 = vmatpush1.bf16.msra.mxu0 %v982_v3  ;;  %962 = vmatpush1.bf16.msra.mxu1 %v982_v3  ;;  %s970_s11 = smul.u32 100, %s1194_s13 }
  0x10   : > { %s1079_s23 = scalar_lea.vmem %s1189_s0, %s969_s18  ;;  %436 = vmatprep.subr.bf16.mxu0 %v1035_v1  ;;  %954 = vmatprep.subr.bf16.mxu1 %v1035_v1 }
  0x11   : > { %v991_v5 = vld [vmem:[%s1079_s23 + $0x4] ss:$8 sps:$4 sm:$0xff]   ;;  %v994_v6 = vld [vmem:[%s1079_s23 + $0x74] ss:$8 sps:$4 sm:$0xff]   ;;  %v989_v12 = vld [vmem:[%s1079_s23] ss:$8 sps:$4 sm:$0xff]   ;;  %s1150_s16 = scalar_lea.vmem %s1192_s3, %s970_s11 }
  0x12   : > { %815 = vmatprep.mubr.msk.bf16.mxu0 %vm390_vm0, %v991_v5  ;;  %822 = vmatprep.mubr.msk.bf16.mxu1 %vm390_vm0, %v994_v6  ;;  %v992_v13 = vld [vmem:[%s1079_s23 + $0x70] ss:$8 sps:$4 sm:$0xff]   ;;  %v995_v14 = vld [vmem:[%s1079_s23 + $0x14] ss:$8 sps:$4 sm:$0xff]   ;;  %v998_v15 = vld [vmem:[%s1079_s23 + $0x84] ss:$8 sps:$4 sm:$0xff]  }
  0x13   : > { %437 = vmatpush1.bf16.msra.mxu0 %v983_v4  ;;  %963 = vmatpush1.bf16.msra.mxu1 %v983_v4  ;;  %v997_v16 = vld [vmem:[%s1079_s23 + $0x10] ss:$8 sps:$4 sm:$0xff]   ;;  %v1002_v17 = vld [vmem:[%s1079_s23 + $0x80] ss:$8 sps:$4 sm:$0xff]   ;;  %v1000_v18 = vld [vmem:[%s1079_s23 + $0x24] ss:$8 sps:$4 sm:$0xff]  }
  0x14   : > { %438 = vmatprep.subr.bf16.mxu0 %v1035_v1  ;;  %955 = vmatprep.subr.bf16.mxu1 %v1035_v1  ;;  %v1004_v19 = vld [vmem:[%s1079_s23 + $0x94] ss:$8 sps:$4 sm:$0xff]   ;;  %v1003_v20 = vld [vmem:[%s1079_s23 + $0x20] ss:$8 sps:$4 sm:$0xff]   ;;  %v1008_v21 = vld [vmem:[%s1079_s23 + $0x90] ss:$8 sps:$4 sm:$0xff]  }
  0x15   : > { %v1006_v22 = vld [vmem:[%s1079_s23 + $0x34] ss:$8 sps:$4 sm:$0xff]   ;;  %v1010_v23 = vld [vmem:[%s1079_s23 + $0xa4] ss:$8 sps:$4 sm:$0xff]   ;;  %v1009_v24 = vld [vmem:[%s1079_s23 + $0x30] ss:$8 sps:$4 sm:$0xff]  }
  0x16   : > { %v1014_v25 = vld [vmem:[%s1079_s23 + $0xa0] ss:$8 sps:$4 sm:$0xff]   ;;  %v1012_v26 = vld [vmem:[%s1079_s23 + $0x44] ss:$8 sps:$4 sm:$0xff]   ;;  %v1016_v27 = vld [vmem:[%s1079_s23 + $0xb4] ss:$8 sps:$4 sm:$0xff]  }
  0x17   : > { %439 = vmatpush1.bf16.msra.mxu0 %v984_v7  ;;  %964 = vmatpush1.bf16.msra.mxu1 %v984_v7  ;;  %v196_v28 = vld [vmem:[%s1079_s23 + $0xc0] sm:$0x33]  ;;  %v1020_v30 = vld [vmem:[%s1079_s23 + $0xb0] ss:$8 sps:$4 sm:$0xff]   ;;  %v1018_v31 = vld [vmem:[%s1079_s23 + $0x54] ss:$8 sps:$4 sm:$0xff]  }
  0x18   : > { %440 = vmatprep.subr.bf16.mxu0 %v1035_v1  ;;  %956 = vmatprep.subr.bf16.mxu1 %v1035_v1  ;;  %v1015_v29 = vld [vmem:[%s1079_s23 + $0x40] ss:$8 sps:$4 sm:$0xff]   ;;  %v805_v32 = vcombine.high %v196_v28, %v196_v28  ;;  %v1021_v33 = vld [vmem:[%s1079_s23 + $0x50] ss:$8 sps:$4 sm:$0xff]   ;;  %v804_v34 = vcombine.low %v196_v28, %v196_v28  ;;  %v1023_v35 = vld [vmem:[%s1079_s23 + $0x64] ss:$8 sps:$4 sm:$0xff]  }
  0x19   : > { %v1026_v36 = vld [vmem:[%s1079_s23 + $0x60] ss:$8 sps:$4 sm:$0xff]  }
  0x1b   : > { %441 = vmatpush1.bf16.msra.mxu0 %v985_v8  ;;  %965 = vmatpush1.bf16.msra.mxu1 %v985_v8 }
  0x1c   : > { %442 = vmatprep.subr.bf16.mxu0 %v1035_v1  ;;  %957 = vmatprep.subr.bf16.mxu1 %v1035_v1 }
  0x1f   : > { %443 = vmatpush1.bf16.msra.mxu0 %v986_v9  ;;  %966 = vmatpush1.bf16.msra.mxu1 %v986_v9 }
  0x20   : > { %444 = vmatprep.subr.bf16.mxu0 %v1035_v1  ;;  %958 = vmatprep.subr.bf16.mxu1 %v1035_v1 }
  0x23   : > { %445 = vmatpush1.bf16.msra.mxu0 %v987_v10  ;;  %967 = vmatpush1.bf16.msra.mxu1 %v987_v10 }
  0x24   : > { %446 = vmatprep.subr.bf16.mxu0 %v1035_v1  ;;  %959 = vmatprep.subr.bf16.mxu1 %v1035_v1 }
  0x27   : > { %447 = vmatpush1.bf16.msra.mxu0 %v988_v11  ;;  %968 = vmatpush1.bf16.msra.mxu1 %v988_v11 }
  0x2a   : > { %463 = vmatmul.mubr.bf16.vlgmr.msra.gmra.mrb[0].mxu0 %v989_v12  ;;  %519 = vmatmul.mubr.bf16.vlgmr.msra.gmra.mrb[0].mxu1 %v992_v13 }
  0x2b   : > { %816 = vmatprep.mubr.msk.bf16.mxu0 %vm390_vm0, %v995_v14  ;;  %823 = vmatprep.mubr.msk.bf16.mxu1 %vm390_vm0, %v998_v15 }
  0x32   : > { %471 = vmatmul.mubr.bf16.gmra.mrb[4].mxu0 %v997_v16  ;;  %527 = vmatmul.mubr.bf16.gmra.mrb[4].mxu1 %v1002_v17 }
  0x33   : > { %817 = vmatprep.mubr.msk.bf16.mxu0 %vm390_vm0, %v1000_v18  ;;  %824 = vmatprep.mubr.msk.bf16.mxu1 %vm390_vm0, %v1004_v19 }
  0x3a   : > { %479 = vmatmul.mubr.bf16.gmra.mrb[8].mxu0 %v1003_v20  ;;  %535 = vmatmul.mubr.bf16.gmra.mrb[8].mxu1 %v1008_v21 }
  0x3b   : > { %818 = vmatprep.mubr.msk.bf16.mxu0 %vm390_vm0, %v1006_v22  ;;  %825 = vmatprep.mubr.msk.bf16.mxu1 %vm390_vm0, %v1010_v23 }
  0x42   : > { %487 = vmatmul.mubr.bf16.gmra.mrb[12].mxu0 %v1009_v24  ;;  %543 = vmatmul.mubr.bf16.gmra.mrb[12].mxu1 %v1014_v25 }
  0x43   : > { %819 = vmatprep.mubr.msk.bf16.mxu0 %vm390_vm0, %v1012_v26  ;;  %826 = vmatprep.mubr.msk.bf16.mxu1 %vm390_vm0, %v1016_v27 }
  0x4a   : > { %495 = vmatmul.mubr.bf16.gmra.mrb[16].mxu0 %v1015_v29  ;;  %551 = vmatmul.mubr.bf16.gmra.mrb[16].mxu1 %v1020_v30 }
  0x4b   : > { %820 = vmatprep.mubr.msk.bf16.mxu0 %vm390_vm0, %v1018_v31  ;;  %827 = vmatprep.mubr.msk.bf16.mxu1 %vm390_vm0, %v805_v32 }
  0x52   : > { %503 = vmatmul.mubr.bf16.gmra.mrb[20].mxu0 %v1021_v33  ;;  %559 = vmatmul.mubr.bf16.gmra.mrb[20].mxu1 %v804_v34 }
  0x53   : > { %821 = vmatprep.mubr.msk.bf16.mxu0 %vm390_vm0, %v1023_v35 }
  0x5a   : > { %511 = vmatmul.mubr.bf16.gmra.mrb[24].mxu0 %v1026_v36 }
  0xfd   : > { %v464_v38 = vpop.f32.mrb[0].mxu0  ;;  %v520_v39 = vpop.f32.mrb[0].mxu1 }
  0xfe   : > { %v465_v40 = vadd.f32 %v1140_v37, %v464_v38  ;;  %v466_v41 = vpop.f32.mrb[1].mxu0  ;;  %v521_v42 = vadd.f32 %v1140_v37, %v520_v39  ;;  %v522_v43 = vpop.f32.mrb[1].mxu1 }
  0xff   : > { %v467_v44 = vpop.f32.mrb[2].mxu0  ;;  %v523_v45 = vpop.f32.mrb[2].mxu1 }
 0x100   : > { %v468_v46 = vadd.f32 %v1140_v37, %v467_v44  ;;  %v469_v47 = vpop.f32.mrb[3].mxu0  ;;  %v580_v48 = vmax.f32 %v521_v42, 0.0  ;;  %v524_v49 = vadd.f32 %v1140_v37, %v523_v45  ;;  %v525_v50 = vpop.f32.mrb[3].mxu1  ;;  %v566_v51 = vmax.f32 %v465_v40, 0.0 }
 0x102   : > { %v567_v52 = vmax.f32 %v468_v46, 0.0  ;;  %v581_v53 = vmax.f32 %v524_v49, 0.0 }
 0x104   : > { %v883_v54 = vpack.c.bf16 %v567_v52, %v566_v51  ;;  %v918_v55 = vpack.c.bf16 %v581_v53, %v580_v48 }
 0x105   : > { %v472_v56 = vpop.f32.mrb[4].mxu0  ;;  %v528_v57 = vpop.f32.mrb[4].mxu1 }
 0x106   : > { %884 = vst [vmem:[%s1150_s16] sm:$0xff] %v883_v54   ;;  %v473_v58 = vadd.f32 %v1140_v37, %v472_v56  ;;  %v474_v59 = vpop.f32.mrb[5].mxu0  ;;  %946 = vst [vmem:[%s1150_s16 + $0x38] sm:$0xff] %v918_v55   ;;  %v529_v60 = vadd.f32 %v1140_v37, %v528_v57  ;;  %v530_v61 = vpop.f32.mrb[5].mxu1 }
 0x107   : > { %v475_v62 = vpop.f32.mrb[6].mxu0  ;;  %v531_v63 = vpop.f32.mrb[6].mxu1 }
 0x108   : > { %v476_v0 = vadd.f32 %v1140_v37, %v475_v62  ;;  %v477_v1 = vpop.f32.mrb[7].mxu0  ;;  %v582_v2 = vmax.f32 %v529_v60, 0.0  ;;  %v532_v3 = vadd.f32 %v1140_v37, %v531_v63  ;;  %v533_v4 = vpop.f32.mrb[7].mxu1  ;;  %v568_v5 = vmax.f32 %v473_v58, 0.0 }
 0x10a   : > { %v569_v6 = vmax.f32 %v476_v0, 0.0  ;;  %v583_v7 = vmax.f32 %v532_v3, 0.0 }
 0x10c   : > { %v888_v8 = vpack.c.bf16 %v569_v6, %v568_v5  ;;  %v923_v9 = vpack.c.bf16 %v583_v7, %v582_v2 }
 0x10d   : > { %v480_v10 = vpop.f32.mrb[8].mxu0  ;;  %v536_v11 = vpop.f32.mrb[8].mxu1 }
 0x10e   : > { %940 = vst [vmem:[%s1150_s16 + $0x8] sm:$0xff] %v888_v8   ;;  %v481_v12 = vadd.f32 %v1140_v37, %v480_v10  ;;  %v482_v13 = vpop.f32.mrb[9].mxu0  ;;  %947 = vst [vmem:[%s1150_s16 + $0x40] sm:$0xff] %v923_v9   ;;  %v537_v14 = vadd.f32 %v1140_v37, %v536_v11  ;;  %v538_v15 = vpop.f32.mrb[9].mxu1 }
 0x10f   : > { %v483_v16 = vpop.f32.mrb[10].mxu0  ;;  %v539_v17 = vpop.f32.mrb[10].mxu1 }
 0x110   : > { %v484_v18 = vadd.f32 %v1140_v37, %v483_v16  ;;  %v485_v19 = vpop.f32.mrb[11].mxu0  ;;  %v584_v20 = vmax.f32 %v537_v14, 0.0  ;;  %v540_v21 = vadd.f32 %v1140_v37, %v539_v17  ;;  %v541_v22 = vpop.f32.mrb[11].mxu1  ;;  %v570_v23 = vmax.f32 %v481_v12, 0.0 }
 0x112   : > { %v571_v24 = vmax.f32 %v484_v18, 0.0  ;;  %v585_v25 = vmax.f32 %v540_v21, 0.0 }
 0x114   : > { %v893_v26 = vpack.c.bf16 %v571_v24, %v570_v23  ;;  %v928_v27 = vpack.c.bf16 %v585_v25, %v584_v20 }
 0x115   : > { %v488_v28 = vpop.f32.mrb[12].mxu0  ;;  %v544_v29 = vpop.f32.mrb[12].mxu1 }
 0x116   : > { %941 = vst [vmem:[%s1150_s16 + $0x10] sm:$0xff] %v893_v26   ;;  %v489_v30 = vadd.f32 %v1140_v37, %v488_v28  ;;  %v490_v31 = vpop.f32.mrb[13].mxu0  ;;  %948 = vst [vmem:[%s1150_s16 + $0x48] sm:$0xff] %v928_v27   ;;  %v545_v32 = vadd.f32 %v1140_v37, %v544_v29  ;;  %v546_v33 = vpop.f32.mrb[13].mxu1 }
 0x117   : > { %v491_v34 = vpop.f32.mrb[14].mxu0  ;;  %v547_v35 = vpop.f32.mrb[14].mxu1 }
 0x118   : > { %v492_v36 = vadd.f32 %v1140_v37, %v491_v34  ;;  %v493_v38 = vpop.f32.mrb[15].mxu0  ;;  %v586_v39 = vmax.f32 %v545_v32, 0.0  ;;  %v548_v40 = vadd.f32 %v1140_v37, %v547_v35  ;;  %v549_v41 = vpop.f32.mrb[15].mxu1  ;;  %v572_v42 = vmax.f32 %v489_v30, 0.0 }
 0x11a   : > { %v573_v43 = vmax.f32 %v492_v36, 0.0  ;;  %v587_v44 = vmax.f32 %v548_v40, 0.0 }
 0x11c   : > { %v898_v45 = vpack.c.bf16 %v573_v43, %v572_v42  ;;  %v933_v46 = vpack.c.bf16 %v587_v44, %v586_v39 }
 0x11d   : > { %v496_v47 = vpop.f32.mrb[16].mxu0  ;;  %v552_v48 = vpop.f32.mrb[16].mxu1 }
 0x11e   : > { %942 = vst [vmem:[%s1150_s16 + $0x18] sm:$0xff] %v898_v45   ;;  %v497_v49 = vadd.f32 %v1140_v37, %v496_v47  ;;  %v498_v50 = vpop.f32.mrb[17].mxu0  ;;  %949 = vst [vmem:[%s1150_s16 + $0x50] sm:$0xff] %v933_v46   ;;  %v553_v51 = vadd.f32 %v1140_v37, %v552_v48  ;;  %v554_v52 = vpop.f32.mrb[17].mxu1 }
 0x11f   : > { %v499_v53 = vpop.f32.mrb[18].mxu0  ;;  %v555_v54 = vpop.f32.mrb[18].mxu1 }
 0x120   : > { %v500_v55 = vadd.f32 %v1140_v37, %v499_v53  ;;  %v501_v56 = vpop.f32.mrb[19].mxu0  ;;  %v588_v57 = vmax.f32 %v553_v51, 0.0  ;;  %v556_v58 = vadd.f32 %v1140_v37, %v555_v54  ;;  %v557_v59 = vpop.f32.mrb[19].mxu1  ;;  %v574_v60 = vmax.f32 %v497_v49, 0.0 }
 0x122   : > { %v575_v61 = vmax.f32 %v500_v55, 0.0  ;;  %v589_v62 = vmax.f32 %v556_v58, 0.0 }
 0x124   : > { %v903_v63 = vpack.c.bf16 %v575_v61, %v574_v60  ;;  %v938_v0 = vpack.c.bf16 %v589_v62, %v588_v57 }
 0x125   : > { %v504_v1 = vpop.f32.mrb[20].mxu0  ;;  %v560_v2 = vpop.f32.mrb[20].mxu1 }
 0x126   : > { %943 = vst [vmem:[%s1150_s16 + $0x20] sm:$0xff] %v903_v63   ;;  %v505_v3 = vadd.f32 %v1140_v37, %v504_v1  ;;  %v506_v4 = vpop.f32.mrb[21].mxu0  ;;  %950 = vst [vmem:[%s1150_s16 + $0x58] sm:$0xff] %v938_v0   ;;  %v561_v5 = vadd.f32 %v1140_v37, %v560_v2  ;;  %v562_v6 = vpop.f32.mrb[21].mxu1 }
 0x127   : > { %v507_v7 = vpop.f32.mrb[22].mxu0  ;;  %v563_v8 = vpop.f32.mrb[22].mxu1 }
 0x128   : > { %v508_v9 = vadd.f32 %v1140_v37, %v507_v7  ;;  %v509_v10 = vpop.f32.mrb[23].mxu0  ;;  %v590_v11 = vmax.f32 %v561_v5, 0.0  ;;  %v564_v12 = vpop.f32.mrb[23].mxu1  ;;  %v576_v13 = vmax.f32 %v505_v3, 0.0 }
 0x12a   : > { %v577_v14 = vmax.f32 %v508_v9, 0.0  ;;  %v879_v15 = vpack.c.bf16 %v590_v11, %v590_v11 }
 0x12c   : > { %v908_v16 = vpack.c.bf16 %v577_v14, %v576_v13  ;;  %716 = vst [vmem:[%s1150_s16 + $0x60] sm:$0x3] %v879_v15 }
 0x12d   : > { %v512_v17 = vpop.f32.mrb[24].mxu0 }
 0x12e   : > { %944 = vst [vmem:[%s1150_s16 + $0x28] sm:$0xff] %v908_v16   ;;  %v513_v18 = vadd.f32 %v1140_v37, %v512_v17  ;;  %v514_v19 = vpop.f32.mrb[25].mxu0 }
 0x12f   : > { %v515_v20 = vpop.f32.mrb[26].mxu0 }
 0x130   : > { %v516_v21 = vadd.f32 %v1140_v37, %v515_v20  ;;  %v517_v22 = vpop.f32.mrb[27].mxu0  ;;  %v578_v23 = vmax.f32 %v513_v18, 0.0 }
 0x132   : > { %v579_v24 = vmax.f32 %v516_v21, 0.0 }
 0x134   : > { %v913_v25 = vpack.c.bf16 %v579_v24, %v578_v23 }
 0x136   : > { %945 = vst [vmem:[%s1150_s16 + $0x30] sm:$0xff] %v913_v25  }
 0x137 PF: > { %s13_s12 = sadd.s32 1, %s1033_s12  }
 0x138   : > { %p10_p4 = scmp.ge.s32.totalorder %s13_s12, 4  }
 0x13a   :  { %12 = sbr.rel (!%p10_p4) target bundleno = 1 (0x1), region = 62 }

// kernel: cnn2_forward.5
= control target key start
LH: loop header
LB: loop body
LE: loop exit
PB: predicated region body
PF: predicated region fallthrough
CT: control target
= control target key end

     0   :  { %v12789_v23 = vmov 0.0   ;;  %vm12790_vm0 = vmmov 0   ;;  %vm190_vm1 = vcmask 261120   ;;  %vm415_vm2 = vcmask 523264   ;;  %s15882_s1 = inlined_call_operand.vmem [shape: bf16[288,64], index: 1, kind: input, shape index: {}]   ;;  %s15883_s0 = inlined_call_operand.vmem [shape: bf16[49,8,288], index: 0, kind: input, shape index: {}]   ;;  %s15884_s3 = inlined_call_operand.vmem [shape: bf16[49,64,128], index: 3, kind: input, shape index: {}]   ;;  %s15885_s2 = inlined_call_operand.vmem [shape: f32[1,64], index: 2, kind: input, shape index: {}]   ;;  %s15886_s5 = inlined_call_operand.vmem [shape: bf16[128,128], index: 5, kind: input, shape index: {}]   ;;  %s15887_s4 = inlined_call_operand.vmem [shape: f32[1,128], index: 4, kind: input, shape index: {}]   ;;  %s15888_s6 = inlined_call_operand.vmem [shape: f32[1,128], index: 6, kind: input, shape index: {}]   ;;  %s15889_s7 = inlined_call_operand.vmem [shape: f32[8,128], index: 7, kind: output, shape index: {}]  }
   0x1   :  { %v12834_v0 = vld [vmem:[%s15882_s1 + $0x40] sm:$0xff]   ;;  %v12310_v2 = vld [vmem:[%s15882_s1 + $0x48] sm:$0xff]   ;;  %v12312_v4 = vld [vmem:[%s15882_s1 + $0x50] sm:$0xff]  }
   0x2   :  { %v12309_v1 = vld [vmem:[%s15882_s1] sm:$0xff]   ;;  %9827 = vmatprep.subr.bf16.mxu0 %v12834_v0  ;;  %9852 = vmatprep.subr.bf16.mxu1 %v12834_v0  ;;  %v12311_v3 = vld [vmem:[%s15882_s1 + $0x8] sm:$0xff]   ;;  %v12313_v5 = vld [vmem:[%s15882_s1 + $0x10] sm:$0xff]  }
   0x3   :  { %9828 = vmatpush3.bf16.msra.mxu0 %v12309_v1  ;;  %9853 = vmatpush3.bf16.msra.mxu1 %v12309_v1  ;;  %v12314_v6 = vld [vmem:[%s15882_s1 + $0x58] sm:$0xff]   ;;  %v12316_v8 = vld [vmem:[%s15882_s1 + $0x60] sm:$0xff]   ;;  %v12318_v10 = vld [vmem:[%s15882_s1 + $0x68] sm:$0xff]  }
   0x4   :  { %9829 = vmatprep.subr.bf16.mxu0 %v12310_v2  ;;  %9854 = vmatprep.subr.bf16.mxu1 %v12310_v2  ;;  %v12315_v7 = vld [vmem:[%s15882_s1 + $0x18] sm:$0xff]   ;;  %v12317_v9 = vld [vmem:[%s15882_s1 + $0x20] sm:$0xff]   ;;  %v12319_v13 = vld [vmem:[%s15882_s1 + $0x28] sm:$0xff]  }
   0x5   :  { %v70_v11 = vld [vmem:[%s15883_s0] sm:$0xff]  ;;  %v12320_v14 = vld [vmem:[%s15882_s1 + $0x70] sm:$0xff]   ;;  %v12322_v18 = vld [vmem:[%s15882_s1 + $0x78] sm:$0xff]  }
   0x6   :  { %v8879_v12 = vcombine.high %v70_v11, %v70_v11  ;;  %v8900_v15 = vld [vmem:[%s15883_s0 + $0xc] sm:$0xff]  ;;  %v12323_v19 = vld [vmem:[%s15882_s1 + $0x38] sm:$0xff]   ;;  %v12892_v20 = vld [vmem:[%s15882_s1 + $0x80] sm:$0xff]   ;;  %v8878_v21 = vcombine.low %v70_v11, %v70_v11 }
   0x7   :  { %9830 = vmatpush3.bf16.msra.mxu0 %v12311_v3  ;;  %9855 = vmatpush3.bf16.msra.mxu1 %v12311_v3  ;;  %v8903_v16 = vcombine.high %v8900_v15, %v8900_v15  ;;  %v12321_v17 = vld [vmem:[%s15882_s1 + $0x30] sm:$0xff]   ;;  %v8902_v22 = vcombine.low %v8900_v15, %v8900_v15  ;;  %v12900_v24 = vld [vmem:[%s15882_s1 + $0x88] sm:$0xff]   ;;  %v12332_v27 = vld [vmem:[%s15884_s3] sm:$0xff]  }
   0x8   :  { %9831 = vmatprep.subr.bf16.mxu0 %v12312_v4  ;;  %9856 = vmatprep.subr.bf16.mxu1 %v12312_v4  ;;  %v12328_v25 = vld [vmem:[%s15883_s0 + $0x8] ss:$0 sps:$4 sm:$0xff]   ;;  %v12331_v26 = vld [vmem:[%s15883_s0 + $0x14] ss:$0 sps:$4 sm:$0xff]   ;;  %v12334_v29 = vld [vmem:[%s15884_s3 + $0x20] sm:$0xff]  }
   0x9   :  { %226 = vmatprep.mubr.bf16.mxu0 %v8879_v12  ;;  %332 = vmatprep.mubr.bf16.mxu1 %v8903_v16  ;;  %v12333_v28 = vld [vmem:[%s15884_s3 + $0x8] sm:$0xff]   ;;  %v12335_v30 = vld [vmem:[%s15884_s3 + $0x10] sm:$0xff]   ;;  %v12337_v32 = vld [vmem:[%s15884_s3 + $0x18] sm:$0xff]  }
   0xa   :  { %v12336_v31 = vld [vmem:[%s15884_s3 + $0x28] sm:$0xff]   ;;  %v12338_v33 = vld [vmem:[%s15884_s3 + $0x30] sm:$0xff]   ;;  %v12339_v34 = vld [vmem:[%s15884_s3 + $0x38] sm:$0xff]  }
   0xb   :  { %9832 = vmatpush3.bf16.msra.mxu0 %v12313_v5  ;;  %9857 = vmatpush3.bf16.msra.mxu1 %v12313_v5  ;;  %v12960_v41 = vld [vmem:[%s15885_s2] ss:$0 sm:$0xff]  ;;  %v8924_v58 = vld [vmem:[%s15883_s0 + $0x18] sm:$0xff]  ;;  %v12988_v2 = vld [vmem:[%s15882_s1 + $0x48] sm:$0xff]  }
   0xc   :  { %9833 = vmatprep.subr.bf16.mxu0 %v12314_v6  ;;  %9858 = vmatprep.subr.bf16.mxu1 %v12314_v6  ;;  %v12342_v62 = vld [vmem:[%s15883_s0 + $0x20] ss:$0 sps:$4 sm:$0xff]   ;;  %v8927_v63 = vcombine.high %v8924_v58, %v8924_v58  ;;  %v12996_v3 = vld [vmem:[%s15882_s1 + $0x8] sm:$0xff]   ;;  %v13002_v4 = vld [vmem:[%s15882_s1 + $0x50] sm:$0xff]   ;;  %v8926_v15 = vcombine.low %v8924_v58, %v8924_v58 }
   0xd   :  { %v12982_v1 = vld [vmem:[%s15882_s1] sm:$0xff]   ;;  %v13008_v5 = vld [vmem:[%s15882_s1 + $0x10] sm:$0xff]   ;;  %v13014_v6 = vld [vmem:[%s15882_s1 + $0x58] sm:$0xff]  }
   0xe   :  { %v13044_v11 = vld [vmem:[%s15882_s1 + $0x28] sm:$0xff]   ;;  %v13050_v12 = vld [vmem:[%s15882_s1 + $0x70] sm:$0xff]   ;;  %v13068_v16 = vld [vmem:[%s15882_s1 + $0x38] sm:$0xff]  }
   0xf   :  { %9834 = vmatpush3.bf16.msra.mxu0 %v12315_v7  ;;  %9859 = vmatpush3.bf16.msra.mxu1 %v12315_v7  ;;  %v13020_v7 = vld [vmem:[%s15882_s1 + $0x18] sm:$0xff]  }
  0x10   :  { %9835 = vmatprep.subr.bf16.mxu0 %v12316_v8  ;;  %9860 = vmatprep.subr.bf16.mxu1 %v12316_v8  ;;  %v13026_v8 = vld [vmem:[%s15882_s1 + $0x60] sm:$0xff]  }
  0x13   :  { %9836 = vmatpush3.bf16.msra.mxu0 %v12317_v9  ;;  %9861 = vmatpush3.bf16.msra.mxu1 %v12317_v9  ;;  %v13032_v9 = vld [vmem:[%s15882_s1 + $0x20] sm:$0xff]  }
  0x14   :  { %9837 = vmatprep.subr.bf16.mxu0 %v12318_v10  ;;  %9862 = vmatprep.subr.bf16.mxu1 %v12318_v10  ;;  %v13038_v10 = vld [vmem:[%s15882_s1 + $0x68] sm:$0xff]  }
  0x17   :  { %9838 = vmatpush3.bf16.msra.mxu0 %v12319_v13  ;;  %9863 = vmatpush3.bf16.msra.mxu1 %v12319_v13  ;;  %v13056_v13 = vld [vmem:[%s15882_s1 + $0x30] sm:$0xff]  }
  0x18   :  { %9839 = vmatprep.subr.bf16.mxu0 %v12320_v14  ;;  %9864 = vmatprep.subr.bf16.mxu1 %v12320_v14  ;;  %v13062_v14 = vld [vmem:[%s15882_s1 + $0x78] sm:$0xff]  }
  0x1b   :  { %9840 = vmatpush3.bf16.msra.mxu0 %v12321_v17  ;;  %9865 = vmatpush3.bf16.msra.mxu1 %v12321_v17  ;;  %v13075_v17 = vld [vmem:[%s15882_s1 + $0x80] sm:$0xff]  }
  0x1c   :  { %9841 = vmatprep.subr.bf16.mxu0 %v12322_v18  ;;  %9866 = vmatprep.subr.bf16.mxu1 %v12322_v18  ;;  %v12343_v18 = vld [vmem:[%s15884_s3 + $0x40] sm:$0xff]  }
  0x1f   :  { %9842 = vmatpush3.bf16.msra.mxu0 %v12323_v19  ;;  %9867 = vmatpush3.bf16.msra.mxu1 %v12323_v19  ;;  %v12344_v19 = vld [vmem:[%s15884_s3 + $0x48] sm:$0xff]  }
  0x20   :  { %11306 = vmatprep.subr.bf16.mxu0 %v12789_v23  ;;  %11334 = vmatprep.subr.bf16.mxu1 %v12789_v23 }
  0x22   :  { %227 = vmatmul.mubr.bf16.vlgmr.msra.gmra.mrb[0].mxu0 %v8878_v21  ;;  %333 = vmatmul.mubr.bf16.vlgmr.msra.gmra.mrb[0].mxu1 %v8902_v22  ;;  %v12346_v21 = vld [vmem:[%s15884_s3 + $0x58] sm:$0xff]   ;;  %v13101_v22 = vld [vmem:[%s15882_s1 + $0x40] sm:$0xff]  }
  0x23   :  { %11307 = vmatpush3.bf16.msra.mxu0 %v12892_v20  ;;  %11310 = vmatprep.mubr.msk.bf16.mxu0 %vm12790_vm0, %v12789_v23 }
  0x24   :  { %11308 = vmatprep.subr.bf16.mxu0 %v12789_v23  ;;  %11342 = vmatprep.mubr.msk.bf16.mxu1 %vm12790_vm0, %v12789_v23 }
  0x25   :  { %11335 = vmatpush3.bf16.msra.mxu1 %v12332_v27 }
  0x26   :  { %11336 = vmatprep.subr.bf16.mxu1 %v12789_v23 }
  0x27   :  { %11309 = vmatpush3.bf16.msra.mxu0 %v12900_v24 }
  0x28   :  { %11314 = vmatprep.subr.bf16.mxu0 %v12789_v23 }
  0x29   :  { %11337 = vmatpush3.bf16.msra.mxu1 %v12333_v28 }
  0x2a   :  { %11311 = vmatmul.mubr.msk.bf16.vlgmr.msra.gmra.mrb[4].mxu0 %vm190_vm1, %v12328_v25  ;;  %11338 = vmatprep.subr.bf16.mxu1 %v12789_v23 }
  0x2b   :  { %11315 = vmatpush3.bf16.msra.mxu0 %v12892_v20  ;;  %11318 = vmatprep.mubr.msk.bf16.mxu0 %vm12790_vm0, %v12789_v23 }
  0x2c   :  { %11316 = vmatprep.subr.bf16.mxu0 %v12789_v23 }
  0x2d   :  { %11339 = vmatpush3.bf16.msra.mxu1 %v12335_v30 }
  0x2e   :  { %11340 = vmatprep.subr.bf16.mxu1 %v12789_v23 }
  0x2f   :  { %11317 = vmatpush3.bf16.msra.mxu0 %v12900_v24 }
  0x30   :  { %11322 = vmatprep.subr.bf16.mxu0 %v12789_v23 }
  0x31   :  { %11341 = vmatpush3.bf16.msra.mxu1 %v12337_v32 }
  0x32   :  { %11319 = vmatmul.mubr.msk.bf16.vlgmr.msra.gmra.mrb[8].mxu0 %vm190_vm1, %v12331_v26  ;;  %11346 = vmatprep.subr.bf16.mxu1 %v12789_v23 }
  0x33   :  { %11330 = vmatprep.mubr.msk.bf16.mxu0 %vm12790_vm0, %v12789_v23  ;;  %11323 = vmatpush3.bf16.msra.mxu0 %v12334_v29 }
  0x34   :  { %11324 = vmatprep.subr.bf16.mxu0 %v12789_v23 }
  0x37   :  { %11325 = vmatpush3.bf16.msra.mxu0 %v12336_v31 }
  0x38   :  { %11326 = vmatprep.subr.bf16.mxu0 %v12789_v23 }
  0x3b   :  { %11327 = vmatpush3.bf16.msra.mxu0 %v12338_v33 }
  0x3c   :  { %11328 = vmatprep.subr.bf16.mxu0 %v12789_v23 }
  0x3f   :  { %11329 = vmatpush3.bf16.msra.mxu0 %v12339_v34 }
  0x40   :  { %9887 = vmatprep.subr.bf16.mxu0 %v12834_v0 }
  0xf5   :  { %v9843_v35 = vpop.f32.mrb[0].mxu0  ;;  %v9868_v36 = vpop.f32.mrb[0].mxu1 }
  0xf6   :  { %v9844_v37 = vpop.f32.mrb[1].mxu0  ;;  %v9869_v38 = vpop.f32.mrb[1].mxu1 }
  0xf7   :  { %v9845_v39 = vadd.f32 %v9844_v37, %v9843_v35  ;;  %v9846_v40 = vpop.f32.mrb[2].mxu0  ;;  %v9870_v42 = vadd.f32 %v9869_v38, %v9868_v36  ;;  %v9871_v43 = vpop.f32.mrb[2].mxu1 }
  0xf8   :  { %v9847_v44 = vpop.f32.mrb[3].mxu0  ;;  %v9872_v45 = vpop.f32.mrb[3].mxu1 }
  0xf9   :  { %v229_v46 = vadd.f32 %v9845_v39, %v12960_v41  ;;  %v335_v54 = vadd.f32 %v9870_v42, %v12960_v41 }
  0xfd   :  { %v268_v47 = vpop.f32.mrb[4].mxu0 }
  0xfe   :  { %v269_v48 = vadd.f32 %v268_v47, %v229_v46  ;;  %v11312_v49 = vpop.f32.mrb[5].mxu0  ;;  %v8943_v46 = vld [vmem:[%s15883_s0 + $0x24] sm:$0xff] }
  0xff   :  { %v271_v50 = vpop.f32.mrb[6].mxu0 }
 0x100   :  { %v274_v51 = vmax.f32 %v269_v48, 0.0  ;;  %v11313_v52 = vpop.f32.mrb[7].mxu0  ;;  %v8946_v48 = vcombine.high %v8943_v46, %v8943_v46  ;;  %v8945_v50 = vcombine.low %v8943_v46, %v8943_v46 }
 0x101   :  { %v12350_v52 = vld [vmem:[%s15884_s3 + $0x60] sm:$0xff]  }
 0x102   :  { %v275_v53 = vpack.c.bf16 %v274_v51, %v274_v51  ;;  %v13140_v51 = vld [vmem:[%s15882_s1 + $0x88] sm:$0xff]  }
 0x104   :  { %11343 = vmatmul.mubr.msk.bf16.vlgmr.msra.gmra.mrb[4].mxu1 %vm415_vm2, %v275_v53  ;;  %v12351_v53 = vld [vmem:[%s15884_s3 + $0x68] sm:$0xff]  }
 0x105   :  { %v374_v55 = vpop.f32.mrb[8].mxu0  ;;  %11347 = vmatpush3.bf16.msra.mxu1 %v12892_v20  ;;  %11350 = vmatprep.mubr.msk.bf16.mxu1 %vm12790_vm0, %v12789_v23  ;;  %v12345_v20 = vld [vmem:[%s15884_s3 + $0x50] sm:$0xff]  }
 0x106   :  { %v375_v56 = vadd.f32 %v374_v55, %v335_v54  ;;  %v11320_v57 = vpop.f32.mrb[9].mxu0  ;;  %11348 = vmatprep.subr.bf16.mxu1 %v12789_v23  ;;  %v12352_v55 = vld [vmem:[%s15884_s3 + $0x70] sm:$0xff]  }
 0x107   :  { %v377_v59 = vpop.f32.mrb[10].mxu0 }
 0x108   :  { %v380_v60 = vmax.f32 %v375_v56, 0.0  ;;  %v11321_v61 = vpop.f32.mrb[11].mxu0  ;;  %v12353_v59 = vld [vmem:[%s15884_s3 + $0x78] sm:$0xff]  }
 0x109   :  { %11349 = vmatpush3.bf16.msra.mxu1 %v12900_v24 }
 0x10a   :  { %v381_v0 = vpack.c.bf16 %v380_v60, %v380_v60  ;;  %11354 = vmatprep.subr.bf16.mxu1 %v12789_v23  ;;  %v12356_v60 = vld [vmem:[%s15883_s0 + $0x38] ss:$0 sps:$4 sm:$0xff]  }
 0x10c   :  { %11331 = vmatmul.mubr.msk.bf16.vlgmr.msra.gmra.mrb[12].mxu0 %vm415_vm2, %v381_v0  ;;  %11351 = vmatmul.mubr.msk.bf16.vlgmr.msra.gmra.mrb[8].mxu1 %vm190_vm1, %v12342_v62 }
 0x10d   :  { %9888 = vmatpush3.bf16.msra.mxu0 %v12982_v1  ;;  %574 = vmatprep.mubr.bf16.mxu0 %v8927_v63 }
 0x10e   :  { %9889 = vmatprep.subr.bf16.mxu0 %v12988_v2  ;;  %11362 = vmatprep.mubr.msk.bf16.mxu1 %vm12790_vm0, %v12789_v23 }
 0x10f   :  { %11355 = vmatpush3.bf16.msra.mxu1 %v12343_v18 }
 0x110   :  { %11356 = vmatprep.subr.bf16.mxu1 %v12789_v23 }
 0x111   :  { %9890 = vmatpush3.bf16.msra.mxu0 %v12996_v3 }
 0x112   :  { %9891 = vmatprep.subr.bf16.mxu0 %v13002_v4 }
 0x113   :  { %11357 = vmatpush3.bf16.msra.mxu1 %v12344_v19 }
 0x114   :  { %11358 = vmatprep.subr.bf16.mxu1 %v12789_v23 }
 0x115   :  { %9892 = vmatpush3.bf16.msra.mxu0 %v13008_v5 }
 0x116   :  { %9893 = vmatprep.subr.bf16.mxu0 %v13014_v6 }
 0x117   :  { %11359 = vmatpush3.bf16.msra.mxu1 %v12345_v20 }
 0x118   :  { %11360 = vmatprep.subr.bf16.mxu1 %v12789_v23 }
 0x119   :  { %9894 = vmatpush3.bf16.msra.mxu0 %v13020_v7 }
 0x11a   :  { %9895 = vmatprep.subr.bf16.mxu0 %v13026_v8 }
 0x11b   :  { %11361 = vmatpush3.bf16.msra.mxu1 %v12346_v21 }
 0x11c   :  { %9917 = vmatprep.subr.bf16.mxu1 %v13101_v22 }
 0x11d   :  { %9896 = vmatpush3.bf16.msra.mxu0 %v13032_v9 }
 0x11e   :  { %9897 = vmatprep.subr.bf16.mxu0 %v13038_v10 }
 0x121   :  { %9898 = vmatpush3.bf16.msra.mxu0 %v13044_v11 }
 0x122   :  { %9899 = vmatprep.subr.bf16.mxu0 %v13050_v12 }
 0x125   :  { %9900 = vmatpush3.bf16.msra.mxu0 %v13056_v13 }
 0x126   :  { %9901 = vmatprep.subr.bf16.mxu0 %v13062_v14 }
 0x129   :  { %9902 = vmatpush3.bf16.msra.mxu0 %v13068_v16 }
 0x12a   :  { %11366 = vmatprep.subr.bf16.mxu0 %v12789_v23 }
 0x12c   :  { %575 = vmatmul.mubr.bf16.vlgmr.msra.gmra.mrb[16].mxu0 %v8926_v15 }
 0x12d   :  { %11367 = vmatpush3.bf16.msra.mxu0 %v13075_v17  ;;  %11370 = vmatprep.mubr.msk.bf16.mxu0 %vm12790_vm0, %v12789_v23 }
 0x12e   :  { %11368 = vmatprep.subr.bf16.mxu0 %v12789_v23 }
 0x131   :  { %11369 = vmatpush3.bf16.msra.mxu0 %v12900_v24  ;;  %v12349_v24 = vld [vmem:[%s15883_s0 + $0x2c] ss:$0 sps:$4 sm:$0xff]  }
 0x132   :  { %11374 = vmatprep.subr.bf16.mxu0 %v12789_v23 }
 0x134   :  { %11371 = vmatmul.mubr.msk.bf16.vlgmr.msra.gmra.mrb[20].mxu0 %vm190_vm1, %v12349_v24 }
 0x135   :  { %11382 = vmatprep.mubr.msk.bf16.mxu0 %vm12790_vm0, %v12789_v23  ;;  %11375 = vmatpush3.bf16.msra.mxu0 %v12350_v52 }
 0x136   :  { %11376 = vmatprep.subr.bf16.mxu0 %v12789_v23 }
 0x139   :  { %11377 = vmatpush3.bf16.msra.mxu0 %v12351_v53 }
 0x13a   :  { %11378 = vmatprep.subr.bf16.mxu0 %v12789_v23 }
 0x13d   :  { %11379 = vmatpush3.bf16.msra.mxu0 %v12352_v55  ;;  %v8981_v55 = vld [vmem:[%s15883_s0 + $0x3c] sm:$0xff] }
 0x13e   :  { %11380 = vmatprep.subr.bf16.mxu0 %v12789_v23 }
 0x141   :  { %11381 = vmatpush3.bf16.msra.mxu0 %v12353_v59  ;;  %v8983_v59 = vcombine.low %v8981_v55, %v8981_v55 }
 0x142   :  { %9947 = vmatprep.subr.bf16.mxu0 %v13101_v22 }
 0x1d7   :  { %v520_v25 = vpop.f32.mrb[4].mxu1 }
 0x1d8   :  { %v11344_v26 = vpop.f32.mrb[5].mxu1 }
 0x1d9   :  { %v523_v27 = vpop.f32.mrb[6].mxu1 }
 0x1da   :  { %v11345_v28 = vpop.f32.mrb[7].mxu1  ;;  %v8962_v27 = vld [vmem:[%s15883_s0 + $0x30] sm:$0xff] }
 0x1df   :  { %v453_v29 = vpop.f32.mrb[12].mxu0  ;;  %v616_v30 = vpop.f32.mrb[8].mxu1 }
 0x1e0   :  { %v13110_v31 = vadd.f32 %v520_v25, %v453_v29  ;;  %v11332_v32 = vpop.f32.mrb[13].mxu0  ;;  %v11352_v33 = vpop.f32.mrb[9].mxu1  ;;  %v8965_v29 = vcombine.high %v8962_v27, %v8962_v27 }
 0x1e1   :  { %v456_v34 = vpop.f32.mrb[14].mxu0  ;;  %v619_v35 = vpop.f32.mrb[10].mxu1  ;;  %v12357_v32 = vld [vmem:[%s15884_s3 + $0x80] sm:$0xff]   ;;  %v12358_v33 = vld [vmem:[%s15884_s3 + $0x88] sm:$0xff]  }
 0x1e2   :  { %v11333_v36 = vpop.f32.mrb[15].mxu0  ;;  %v11353_v37 = vpop.f32.mrb[11].mxu1  ;;  %v12359_v35 = vld [vmem:[%s15884_s3 + $0x90] sm:$0xff]  }
 0x1ff   :  { %v9903_v38 = vpop.f32.mrb[16].mxu0 }
 0x200   :  { %v9904_v39 = vpop.f32.mrb[17].mxu0 }
 0x201   :  { %v9905_v40 = vadd.f32 %v9904_v39, %v9903_v38  ;;  %v9906_v42 = vpop.f32.mrb[18].mxu0  ;;  %v12360_v39 = vld [vmem:[%s15884_s3 + $0x98] sm:$0xff]  }
 0x202   :  { %v9907_v43 = vpop.f32.mrb[19].mxu0 }
 0x203   :  { %v577_v44 = vadd.f32 %v9905_v40, %v12960_v41  ;;  %v12363_v40 = vld [vmem:[%s15883_s0 + $0x44] ss:$0 sps:$4 sm:$0xff]  }
 0x205   :  { %v617_v45 = vadd.f32 %v616_v30, %v577_v44 }
 0x207   :  { %v622_v47 = vmax.f32 %v617_v45, 0.0  ;;  %v791_v54 = vpop.f32.mrb[20].mxu0 }
 0x208   :  { %v11372_v56 = vpop.f32.mrb[21].mxu0 }
 0x209   :  { %v623_v49 = vpack.c.bf16 %v622_v47, %v622_v47  ;;  %v794_v57 = vpop.f32.mrb[22].mxu0 }
 0x20a   :  { %v11373_v58 = vpop.f32.mrb[23].mxu0  ;;  %v8984_v57 = vcombine.high %v8981_v55, %v8981_v55 }
 0x20b   :  { %11363 = vmatmul.mubr.msk.bf16.vlgmr.msra.gmra.mrb[12].mxu1 %vm415_vm2, %v623_v49 }
 0x20c   :  { %9918 = vmatpush3.bf16.msra.mxu1 %v12982_v1  ;;  %749 = vmatprep.mubr.bf16.mxu1 %v8946_v48 }
 0x20d   :  { %9919 = vmatprep.subr.bf16.mxu1 %v12988_v2 }
 0x210   :  { %9920 = vmatpush3.bf16.msra.mxu1 %v12996_v3 }
 0x211   :  { %9921 = vmatprep.subr.bf16.mxu1 %v13002_v4 }
 0x214   :  { %9922 = vmatpush3.bf16.msra.mxu1 %v13008_v5 }
 0x215   :  { %9923 = vmatprep.subr.bf16.mxu1 %v13014_v6 }
 0x218   :  { %9924 = vmatpush3.bf16.msra.mxu1 %v13020_v7 }
 0x219   :  { %9925 = vmatprep.subr.bf16.mxu1 %v13026_v8 }
 0x21c   :  { %9926 = vmatpush3.bf16.msra.mxu1 %v13032_v9 }
 0x21d   :  { %9927 = vmatprep.subr.bf16.mxu1 %v13038_v10 }
 0x220   :  { %9928 = vmatpush3.bf16.msra.mxu1 %v13044_v11 }
 0x221   :  { %9929 = vmatprep.subr.bf16.mxu1 %v13050_v12 }
 0x224   :  { %9930 = vmatpush3.bf16.msra.mxu1 %v13056_v13 }
 0x225   :  { %9931 = vmatprep.subr.bf16.mxu1 %v13062_v14 }
 0x228   :  { %9932 = vmatpush3.bf16.msra.mxu1 %v13068_v16 }
 0x229   :  { %11386 = vmatprep.subr.bf16.mxu1 %v12789_v23 }
 0x22b   :  { %750 = vmatmul.mubr.bf16.vlgmr.msra.gmra.mrb[16].mxu1 %v8945_v50 }
 0x22c   :  { %11387 = vmatpush3.bf16.msra.mxu1 %v13075_v17  ;;  %11390 = vmatprep.mubr.msk.bf16.mxu1 %vm12790_vm0, %v12789_v23 }
 0x22d   :  { %11388 = vmatprep.subr.bf16.mxu1 %v12789_v23 }
 0x230   :  { %11389 = vmatpush3.bf16.msra.mxu1 %v13140_v51 }
 0x231   :  { %11394 = vmatprep.subr.bf16.mxu1 %v12789_v23 }
 0x233   :  { %11391 = vmatmul.mubr.msk.bf16.vlgmr.msra.gmra.mrb[20].mxu1 %vm190_vm1, %v12356_v60  ;;  %v12364_v60 = vld [vmem:[%s15884_s3 + $0xa0] sm:$0xff]  }
 0x234   :  { %11402 = vmatprep.mubr.msk.bf16.mxu1 %vm12790_vm0, %v12789_v23  ;;  %11395 = vmatpush3.bf16.msra.mxu1 %v12357_v32 }
 0x235   :  { %11396 = vmatprep.subr.bf16.mxu1 %v12789_v23 }
 0x238   :  { %11397 = vmatpush3.bf16.msra.mxu1 %v12358_v33 }
 0x239   :  { %11398 = vmatprep.subr.bf16.mxu1 %v12789_v23 }
 0x23c   :  { %11399 = vmatpush3.bf16.msra.mxu1 %v12359_v35  ;;  %v9000_v35 = vld [vmem:[%s15883_s0 + $0x48] sm:$0xff] }
 0x23d   :  { %11400 = vmatprep.subr.bf16.mxu1 %v12789_v23 }
 0x240   :  { %11401 = vmatpush3.bf16.msra.mxu1 %v12360_v39  ;;  %v9002_v39 = vcombine.low %v9000_v35, %v9000_v35 }
 0x241   :  { %9977 = vmatprep.subr.bf16.mxu1 %v13101_v22 }
 0x2de   :  { %v694_v61 = vpop.f32.mrb[12].mxu1 }
 0x2df   :  { %v700_v62 = vadd.f32 %v694_v61, %v13110_v31  ;;  %v11364_v63 = vpop.f32.mrb[13].mxu1  ;;  %v8964_v31 = vcombine.low %v8962_v27, %v8962_v27  ;;  %v12365_v61 = vld [vmem:[%s15884_s3 + $0xa8] sm:$0xff]  }
 0x2e0   :  { %v697_v0 = vpop.f32.mrb[14].mxu1  ;;  %v12366_v63 = vld [vmem:[%s15884_s3 + $0xb0] sm:$0xff]  }
 0x2e1   :  { %v11365_v15 = vpop.f32.mrb[15].mxu1 }
 0x2fe   :  { %v9933_v18 = vpop.f32.mrb[16].mxu1 }
 0x2ff   :  { %v9934_v19 = vpop.f32.mrb[17].mxu1 }
 0x300   :  { %v9935_v20 = vadd.f32 %v9934_v19, %v9933_v18  ;;  %v9936_v21 = vpop.f32.mrb[18].mxu1  ;;  %v12367_v19 = vld [vmem:[%s15884_s3 + $0xb8] sm:$0xff]  }
 0x301   :  { %v9937_v24 = vpop.f32.mrb[19].mxu1 }
 0x302   :  { %v752_v25 = vadd.f32 %v9935_v20, %v12960_v41  ;;  %v12370_v20 = vld [vmem:[%s15883_s0 + $0x50] ss:$0 sps:$4 sm:$0xff]  }
 0x304   :  { %v792_v26 = vadd.f32 %v791_v54, %v752_v25 }
 0x306   :  { %v797_v28 = vmax.f32 %v792_v26, 0.0  ;;  %v966_v34 = vpop.f32.mrb[20].mxu1 }
 0x307   :  { %v11392_v36 = vpop.f32.mrb[21].mxu1 }
 0x308   :  { %v798_v30 = vpack.c.bf16 %v797_v28, %v797_v28  ;;  %v969_v37 = vpop.f32.mrb[22].mxu1 }
 0x309   :  { %v11393_v38 = vpop.f32.mrb[23].mxu1  ;;  %v9003_v37 = vcombine.high %v9000_v35, %v9000_v35 }
 0x30a   :  { %11383 = vmatmul.mubr.msk.bf16.vlgmr.msra.gmra.mrb[24].mxu0 %vm415_vm2, %v798_v30 }
 0x30b   :  { %9948 = vmatpush3.bf16.msra.mxu0 %v12982_v1  ;;  %924 = vmatprep.mubr.bf16.mxu0 %v8965_v29 }
 0x30c   :  { %9949 = vmatprep.subr.bf16.mxu0 %v12988_v2 }
 0x30f   :  { %9950 = vmatpush3.bf16.msra.mxu0 %v12996_v3 }
 0x310   :  { %9951 = vmatprep.subr.bf16.mxu0 %v13002_v4 }
 0x313   :  { %9952 = vmatpush3.bf16.msra.mxu0 %v13008_v5 }
 0x314   :  { %9953 = vmatprep.subr.bf16.mxu0 %v13014_v6 }
 0x317   :  { %9954 = vmatpush3.bf16.msra.mxu0 %v13020_v7 }
 0x318   :  { %9955 = vmatprep.subr.bf16.mxu0 %v13026_v8 }
 0x31b   :  { %9956 = vmatpush3.bf16.msra.mxu0 %v13032_v9 }
 0x31c   :  { %9957 = vmatprep.subr.bf16.mxu0 %v13038_v10 }
 0x31f   :  { %9958 = vmatpush3.bf16.msra.mxu0 %v13044_v11 }
 0x320   :  { %9959 = vmatprep.subr.bf16.mxu0 %v13050_v12 }
 0x323   :  { %9960 = vmatpush3.bf16.msra.mxu0 %v13056_v13 }
 0x324   :  { %9961 = vmatprep.subr.bf16.mxu0 %v13062_v14 }
 0x327   :  { %9962 = vmatpush3.bf16.msra.mxu0 %v13068_v16 }
 0x328   :  { %11406 = vmatprep.subr.bf16.mxu0 %v12789_v23 }
 0x32a   :  { %925 = vmatmul.mubr.bf16.vlgmr.msra.gmra.mrb[28].mxu0 %v8964_v31 }
 0x32b   :  { %11407 = vmatpush3.bf16.msra.mxu0 %v13075_v17  ;;  %11410 = vmatprep.mubr.msk.bf16.mxu0 %vm12790_vm0, %v12789_v23 }
 0x32c   :  { %11408 = vmatprep.subr.bf16.mxu0 %v12789_v23 }
 0x32f   :  { %11409 = vmatpush3.bf16.msra.mxu0 %v13140_v51 }
 0x330   :  { %11414 = vmatprep.subr.bf16.mxu0 %v12789_v23 }
 0x332   :  { %11411 = vmatmul.mubr.msk.bf16.vlgmr.msra.gmra.mrb[32].mxu0 %vm190_vm1, %v12363_v40  ;;  %v12371_v40 = vld [vmem:[%s15884_s3 + $0xc0] sm:$0xff]  }
 0x333   :  { %11422 = vmatprep.mubr.msk.bf16.mxu0 %vm12790_vm0, %v12789_v23  ;;  %11415 = vmatpush3.bf16.msra.mxu0 %v12364_v60 }
 0x334   :  { %11416 = vmatprep.subr.bf16.mxu0 %v12789_v23 }
 0x337   :  { %11417 = vmatpush3.bf16.msra.mxu0 %v12365_v61 }
 0x338   :  { %11418 = vmatprep.subr.bf16.mxu0 %v12789_v23 }
 0x33b   :  { %11419 = vmatpush3.bf16.msra.mxu0 %v12366_v63  ;;  %v9019_v63 = vld [vmem:[%s15883_s0 + $0x54] sm:$0xff] }
 0x33c   :  { %11420 = vmatprep.subr.bf16.mxu0 %v12789_v23 }
 0x33f   :  { %11421 = vmatpush3.bf16.msra.mxu0 %v12367_v19  ;;  %v9021_v19 = vcombine.low %v9019_v63, %v9019_v63 }
 0x340   :  { %10007 = vmatprep.subr.bf16.mxu0 %v13101_v22 }
 0x3dd   :  { %v869_v42 = vpop.f32.mrb[24].mxu0 }
 0x3de   :  { %v875_v43 = vadd.f32 %v869_v42, %v700_v62  ;;  %v11384_v44 = vpop.f32.mrb[25].mxu0  ;;  %v12372_v42 = vld [vmem:[%s15884_s3 + $0xc8] sm:$0xff]  }
 0x3df   :  { %v872_v45 = vpop.f32.mrb[26].mxu0  ;;  %v12373_v44 = vld [vmem:[%s15884_s3 + $0xd0] sm:$0xff]  }
 0x3e0   :  { %v11385_v46 = vpop.f32.mrb[27].mxu0 }
 0x3fd   :  { %v9963_v47 = vpop.f32.mrb[28].mxu0 }
 0x3fe   :  { %v9964_v48 = vpop.f32.mrb[29].mxu0 }
 0x3ff   :  { %v9965_v49 = vadd.f32 %v9964_v48, %v9963_v47  ;;  %v9966_v50 = vpop.f32.mrb[30].mxu0  ;;  %v12374_v48 = vld [vmem:[%s15884_s3 + $0xd8] sm:$0xff]  }
 0x400   :  { %v9967_v52 = vpop.f32.mrb[31].mxu0 }
 0x401   :  { %v927_v53 = vadd.f32 %v9965_v49, %v12960_v41  ;;  %v12377_v49 = vld [vmem:[%s15883_s0 + $0x5c] ss:$0 sps:$4 sm:$0xff]  }
 0x403   :  { %v967_v54 = vadd.f32 %v966_v34, %v927_v53 }
 0x405   :  { %v972_v56 = vmax.f32 %v967_v54, 0.0  ;;  %v1141_v62 = vpop.f32.mrb[32].mxu0 }
 0x406   :  { %v11412_v0 = vpop.f32.mrb[33].mxu0 }
 0x407   :  { %v973_v58 = vpack.c.bf16 %v972_v56, %v972_v56  ;;  %v1144_v15 = vpop.f32.mrb[34].mxu0 }
 0x408   :  { %v11413_v18 = vpop.f32.mrb[35].mxu0  ;;  %v9022_v15 = vcombine.high %v9019_v63, %v9019_v63 }
 0x409   :  { %11403 = vmatmul.mubr.msk.bf16.vlgmr.msra.gmra.mrb[24].mxu1 %vm415_vm2, %v973_v58 }
 0x40a   :  { %9978 = vmatpush3.bf16.msra.mxu1 %v12982_v1  ;;  %1099 = vmatprep.mubr.bf16.mxu1 %v8984_v57 }
 0x40b   :  { %9979 = vmatprep.subr.bf16.mxu1 %v12988_v2 }
 0x40e   :  { %9980 = vmatpush3.bf16.msra.mxu1 %v12996_v3 }
 0x40f   :  { %9981 = vmatprep.subr.bf16.mxu1 %v13002_v4 }
 0x412   :  { %9982 = vmatpush3.bf16.msra.mxu1 %v13008_v5 }
 0x413   :  { %9983 = vmatprep.subr.bf16.mxu1 %v13014_v6 }
 0x416   :  { %9984 = vmatpush3.bf16.msra.mxu1 %v13020_v7 }
 0x417   :  { %9985 = vmatprep.subr.bf16.mxu1 %v13026_v8 }
 0x41a   :  { %9986 = vmatpush3.bf16.msra.mxu1 %v13032_v9 }
 0x41b   :  { %9987 = vmatprep.subr.bf16.mxu1 %v13038_v10 }
 0x41e   :  { %9988 = vmatpush3.bf16.msra.mxu1 %v13044_v11 }
 0x41f   :  { %9989 = vmatprep.subr.bf16.mxu1 %v13050_v12 }
 0x422   :  { %9990 = vmatpush3.bf16.msra.mxu1 %v13056_v13 }
 0x423   :  { %9991 = vmatprep.subr.bf16.mxu1 %v13062_v14 }
 0x426   :  { %9992 = vmatpush3.bf16.msra.mxu1 %v13068_v16 }
 0x427   :  { %11426 = vmatprep.subr.bf16.mxu1 %v12789_v23 }
 0x429   :  { %1100 = vmatmul.mubr.bf16.vlgmr.msra.gmra.mrb[28].mxu1 %v8983_v59 }
 0x42a   :  { %11427 = vmatpush3.bf16.msra.mxu1 %v13075_v17  ;;  %11430 = vmatprep.mubr.msk.bf16.mxu1 %vm12790_vm0, %v12789_v23 }
 0x42b   :  { %11428 = vmatprep.subr.bf16.mxu1 %v12789_v23 }
 0x42e   :  { %11429 = vmatpush3.bf16.msra.mxu1 %v13140_v51 }
 0x42f   :  { %11434 = vmatprep.subr.bf16.mxu1 %v12789_v23 }
 0x431   :  { %11431 = vmatmul.mubr.msk.bf16.vlgmr.msra.gmra.mrb[32].mxu1 %vm190_vm1, %v12370_v20  ;;  %v12378_v20 = vld [vmem:[%s15884_s3 + $0xe0] sm:$0xff]  }
 0x432   :  { %11442 = vmatprep.mubr.msk.bf16.mxu1 %vm12790_vm0, %v12789_v23  ;;  %11435 = vmatpush3.bf16.msra.mxu1 %v12371_v40 }
 0x433   :  { %11436 = vmatprep.subr.bf16.mxu1 %v12789_v23 }
 0x436   :  { %11437 = vmatpush3.bf16.msra.mxu1 %v12372_v42 }
 0x437   :  { %11438 = vmatprep.subr.bf16.mxu1 %v12789_v23 }
 0x43a   :  { %11439 = vmatpush3.bf16.msra.mxu1 %v12373_v44  ;;  %v9038_v44 = vld [vmem:[%s15883_s0 + $0x60] sm:$0xff] }
 0x43b   :  { %11440 = vmatprep.subr.bf16.mxu1 %v12789_v23 }
 0x43e   :  { %11441 = vmatpush3.bf16.msra.mxu1 %v12374_v48  ;;  %v9040_v48 = vcombine.low %v9038_v44, %v9038_v44 }
 0x43f   :  { %10037 = vmatprep.subr.bf16.mxu1 %v13101_v22 }
 0x4dc   :  { %v1044_v21 = vpop.f32.mrb[24].mxu1 }
 0x4dd   :  { %v1050_v24 = vadd.f32 %v1044_v21, %v875_v43  ;;  %v11404_v25 = vpop.f32.mrb[25].mxu1  ;;  %v12379_v21 = vld [vmem:[%s15884_s3 + $0xe8] sm:$0xff]  }
 0x4de   :  { %v1047_v26 = vpop.f32.mrb[26].mxu1  ;;  %v12380_v25 = vld [vmem:[%s15884_s3 + $0xf0] sm:$0xff]  }
 0x4df   :  { %v11405_v27 = vpop.f32.mrb[27].mxu1 }
 0x4fc   :  { %v9993_v28 = vpop.f32.mrb[28].mxu1 }
 0x4fd   :  { %v9994_v29 = vpop.f32.mrb[29].mxu1 }
 0x4fe   :  { %v9995_v30 = vadd.f32 %v9994_v29, %v9993_v28  ;;  %v9996_v31 = vpop.f32.mrb[30].mxu1  ;;  %v12381_v29 = vld [vmem:[%s15884_s3 + $0xf8] sm:$0xff]  }
 0x4ff   :  { %v9997_v32 = vpop.f32.mrb[31].mxu1 }
 0x500   :  { %v1102_v33 = vadd.f32 %v9995_v30, %v12960_v41  ;;  %v12384_v30 = vld [vmem:[%s15883_s0 + $0x68] ss:$0 sps:$4 sm:$0xff]  }
 0x502   :  { %v1142_v34 = vadd.f32 %v1141_v62, %v1102_v33 }
 0x504   :  { %v1147_v36 = vmax.f32 %v1142_v34, 0.0  ;;  %v1316_v43 = vpop.f32.mrb[32].mxu1 }
 0x505   :  { %v11432_v45 = vpop.f32.mrb[33].mxu1 }
 0x506   :  { %v1148_v38 = vpack.c.bf16 %v1147_v36, %v1147_v36  ;;  %v1319_v46 = vpop.f32.mrb[34].mxu1 }
 0x507   :  { %v11433_v47 = vpop.f32.mrb[35].mxu1  ;;  %v9041_v46 = vcombine.high %v9038_v44, %v9038_v44 }
 0x508   :  { %11423 = vmatmul.mubr.msk.bf16.vlgmr.msra.gmra.mrb[36].mxu0 %vm415_vm2, %v1148_v38 }
 0x509   :  { %10008 = vmatpush3.bf16.msra.mxu0 %v12982_v1  ;;  %1274 = vmatprep.mubr.bf16.mxu0 %v9003_v37 }
 0x50a   :  { %10009 = vmatprep.subr.bf16.mxu0 %v12988_v2 }
 0x50d   :  { %10010 = vmatpush3.bf16.msra.mxu0 %v12996_v3 }
 0x50e   :  { %10011 = vmatprep.subr.bf16.mxu0 %v13002_v4 }
 0x511   :  { %10012 = vmatpush3.bf16.msra.mxu0 %v13008_v5 }
 0x512   :  { %10013 = vmatprep.subr.bf16.mxu0 %v13014_v6 }
 0x515   :  { %10014 = vmatpush3.bf16.msra.mxu0 %v13020_v7 }
 0x516   :  { %10015 = vmatprep.subr.bf16.mxu0 %v13026_v8 }
 0x519   :  { %10016 = vmatpush3.bf16.msra.mxu0 %v13032_v9 }
 0x51a   :  { %10017 = vmatprep.subr.bf16.mxu0 %v13038_v10 }
 0x51d   :  { %10018 = vmatpush3.bf16.msra.mxu0 %v13044_v11 }
 0x51e   :  { %10019 = vmatprep.subr.bf16.mxu0 %v13050_v12 }
 0x521   :  { %10020 = vmatpush3.bf16.msra.mxu0 %v13056_v13 }
 0x522   :  { %10021 = vmatprep.subr.bf16.mxu0 %v13062_v14 }
 0x525   :  { %10022 = vmatpush3.bf16.msra.mxu0 %v13068_v16 }
 0x526   :  { %11446 = vmatprep.subr.bf16.mxu0 %v12789_v23 }
 0x528   :  { %1275 = vmatmul.mubr.bf16.vlgmr.msra.gmra.mrb[40].mxu0 %v9002_v39 }
 0x529   :  { %11447 = vmatpush3.bf16.msra.mxu0 %v13075_v17  ;;  %11450 = vmatprep.mubr.msk.bf16.mxu0 %vm12790_vm0, %v12789_v23 }
 0x52a   :  { %11448 = vmatprep.subr.bf16.mxu0 %v12789_v23 }
 0x52d   :  { %11449 = vmatpush3.bf16.msra.mxu0 %v13140_v51 }
 0x52e   :  { %11454 = vmatprep.subr.bf16.mxu0 %v12789_v23 }
 0x530   :  { %11451 = vmatmul.mubr.msk.bf16.vlgmr.msra.gmra.mrb[44].mxu0 %vm190_vm1, %v12377_v49  ;;  %v12385_v49 = vld [vmem:[%s15884_s3 + $0x100] sm:$0xff]  }
 0x531   :  { %11462 = vmatprep.mubr.msk.bf16.mxu0 %vm12790_vm0, %v12789_v23  ;;  %11455 = vmatpush3.bf16.msra.mxu0 %v12378_v20 }
 0x532   :  { %11456 = vmatprep.subr.bf16.mxu0 %v12789_v23 }
 0x535   :  { %11457 = vmatpush3.bf16.msra.mxu0 %v12379_v21 }
 0x536   :  { %11458 = vmatprep.subr.bf16.mxu0 %v12789_v23 }
 0x539   :  { %11459 = vmatpush3.bf16.msra.mxu0 %v12380_v25  ;;  %v9057_v25 = vld [vmem:[%s15883_s0 + $0x6c] sm:$0xff] }
 0x53a   :  { %11460 = vmatprep.subr.bf16.mxu0 %v12789_v23 }
 0x53d   :  { %11461 = vmatpush3.bf16.msra.mxu0 %v12381_v29  ;;  %v12392_v29 = vld [vmem:[%s15884_s3 + $0x120] sm:$0xff]  }
 0x53e   :  { %10067 = vmatprep.subr.bf16.mxu0 %v13101_v22 }
 0x5db   :  { %v1219_v50 = vpop.f32.mrb[36].mxu0 }
 0x5dc   :  { %v1225_v52 = vadd.f32 %v1219_v50, %v1050_v24  ;;  %v11424_v53 = vpop.f32.mrb[37].mxu0  ;;  %v12386_v50 = vld [vmem:[%s15884_s3 + $0x108] sm:$0xff]  }
 0x5dd   :  { %v1222_v54 = vpop.f32.mrb[38].mxu0  ;;  %v12387_v53 = vld [vmem:[%s15884_s3 + $0x110] sm:$0xff]  }
 0x5de   :  { %v11425_v55 = vpop.f32.mrb[39].mxu0 }
 0x5fb   :  { %v10023_v56 = vpop.f32.mrb[40].mxu0 }
 0x5fc   :  { %v10024_v57 = vpop.f32.mrb[41].mxu0 }
 0x5fd   :  { %v10025_v58 = vadd.f32 %v10024_v57, %v10023_v56  ;;  %v10026_v59 = vpop.f32.mrb[42].mxu0  ;;  %v12388_v57 = vld [vmem:[%s15884_s3 + $0x118] sm:$0xff]  }
 0x5fe   :  { %v10027_v60 = vpop.f32.mrb[43].mxu0 }
 0x5ff   :  { %v1277_v61 = vadd.f32 %v10025_v58, %v12960_v41  ;;  %v12391_v58 = vld [vmem:[%s15883_s0 + $0x74] ss:$0 sps:$4 sm:$0xff]  }
 0x601   :  { %v1317_v62 = vadd.f32 %v1316_v43, %v1277_v61 }
 0x603   :  { %v1322_v0 = vmax.f32 %v1317_v62, 0.0  ;;  %v1491_v24 = vpop.f32.mrb[44].mxu0 }
 0x604   :  { %v11452_v26 = vpop.f32.mrb[45].mxu0 }
 0x605   :  { %v1323_v18 = vpack.c.bf16 %v1322_v0, %v1322_v0  ;;  %v1494_v27 = vpop.f32.mrb[46].mxu0 }
 0x606   :  { %v11453_v28 = vpop.f32.mrb[47].mxu0  ;;  %v9060_v27 = vcombine.high %v9057_v25, %v9057_v25 }
 0x607   :  { %11443 = vmatmul.mubr.msk.bf16.vlgmr.msra.gmra.mrb[36].mxu1 %vm415_vm2, %v1323_v18 }
 0x608   :  { %10038 = vmatpush3.bf16.msra.mxu1 %v12982_v1  ;;  %1449 = vmatprep.mubr.bf16.mxu1 %v9022_v15 }
 0x609   :  { %10039 = vmatprep.subr.bf16.mxu1 %v12988_v2 }
 0x60c   :  { %10040 = vmatpush3.bf16.msra.mxu1 %v12996_v3 }
 0x60d   :  { %10041 = vmatprep.subr.bf16.mxu1 %v13002_v4 }
 0x610   :  { %10042 = vmatpush3.bf16.msra.mxu1 %v13008_v5 }
 0x611   :  { %10043 = vmatprep.subr.bf16.mxu1 %v13014_v6 }
 0x614   :  { %10044 = vmatpush3.bf16.msra.mxu1 %v13020_v7 }
 0x615   :  { %10045 = vmatprep.subr.bf16.mxu1 %v13026_v8 }
 0x618   :  { %10046 = vmatpush3.bf16.msra.mxu1 %v13032_v9 }
 0x619   :  { %10047 = vmatprep.subr.bf16.mxu1 %v13038_v10 }
 0x61c   :  { %10048 = vmatpush3.bf16.msra.mxu1 %v13044_v11 }
 0x61d   :  { %10049 = vmatprep.subr.bf16.mxu1 %v13050_v12 }
 0x620   :  { %10050 = vmatpush3.bf16.msra.mxu1 %v13056_v13 }
 0x621   :  { %10051 = vmatprep.subr.bf16.mxu1 %v13062_v14 }
 0x624   :  { %10052 = vmatpush3.bf16.msra.mxu1 %v13068_v16 }
 0x625   :  { %11466 = vmatprep.subr.bf16.mxu1 %v12789_v23 }
 0x627   :  { %1450 = vmatmul.mubr.bf16.vlgmr.msra.gmra.mrb[40].mxu1 %v9021_v19 }
 0x628   :  { %11467 = vmatpush3.bf16.msra.mxu1 %v13075_v17  ;;  %11470 = vmatprep.mubr.msk.bf16.mxu1 %vm12790_vm0, %v12789_v23 }
 0x629   :  { %11468 = vmatprep.subr.bf16.mxu1 %v12789_v23 }
 0x62c   :  { %11469 = vmatpush3.bf16.msra.mxu1 %v13140_v51 }
 0x62d   :  { %11474 = vmatprep.subr.bf16.mxu1 %v12789_v23 }
 0x62f   :  { %11471 = vmatmul.mubr.msk.bf16.vlgmr.msra.gmra.mrb[44].mxu1 %vm190_vm1, %v12384_v30  ;;  %v12393_v30 = vld [vmem:[%s15884_s3 + $0x128] sm:$0xff]  }
 0x630   :  { %11482 = vmatprep.mubr.msk.bf16.mxu1 %vm12790_vm0, %v12789_v23  ;;  %11475 = vmatpush3.bf16.msra.mxu1 %v12385_v49  ;;  %v13464_v49 = vld [vmem:[%s15885_s2] ss:$0 sm:$0xff] }
 0x631   :  { %11476 = vmatprep.subr.bf16.mxu1 %v12789_v23 }
 0x634   :  { %11477 = vmatpush3.bf16.msra.mxu1 %v12386_v50 }
 0x635   :  { %11478 = vmatprep.subr.bf16.mxu1 %v12789_v23 }
 0x638   :  { %11479 = vmatpush3.bf16.msra.mxu1 %v12387_v53  ;;  %v9076_v53 = vld [vmem:[%s15883_s0 + $0x78] sm:$0xff] }
 0x639   :  { %11480 = vmatprep.subr.bf16.mxu1 %v12789_v23 }
 0x63c   :  { %11481 = vmatpush3.bf16.msra.mxu1 %v12388_v57 }
 0x63d   :  { %10097 = vmatprep.subr.bf16.mxu1 %v13101_v22 }
 0x6da   :  { %v1394_v31 = vpop.f32.mrb[36].mxu1 }
 0x6db   :  { %v1400_v32 = vadd.f32 %v1394_v31, %v1225_v52  ;;  %v11444_v33 = vpop.f32.mrb[37].mxu1 }
 0x6dc   :  { %v1397_v34 = vpop.f32.mrb[38].mxu1 }
 0x6dd   :  { %v11445_v35 = vpop.f32.mrb[39].mxu1 }
 0x6fa   :  { %v10053_v36 = vpop.f32.mrb[40].mxu1 }
 0x6fb   :  { %v10054_v37 = vpop.f32.mrb[41].mxu1 }
 0x6fc   :  { %v10055_v38 = vadd.f32 %v10054_v37, %v10053_v36  ;;  %v10056_v39 = vpop.f32.mrb[42].mxu1  ;;  %v12395_v36 = vld [vmem:[%s15884_s3 + $0x138] sm:$0xff]   ;;  %v12398_v37 = vld [vmem:[%s15883_s0 + $0x80] ss:$0 sps:$4 sm:$0xff]  }
 0x6fd   :  { %v10057_v40 = vpop.f32.mrb[43].mxu1 }
 0x6fe   :  { %v1452_v42 = vadd.f32 %v10055_v38, %v12960_v41 }
 0x700   :  { %v1492_v43 = vadd.f32 %v1491_v24, %v1452_v42 }
 0x702   :  { %v1497_v45 = vmax.f32 %v1492_v43, 0.0  ;;  %v1666_v52 = vpop.f32.mrb[44].mxu1 }
 0x703   :  { %v11472_v54 = vpop.f32.mrb[45].mxu1 }
 0x704   :  { %v1498_v47 = vpack.c.bf16 %v1497_v45, %v1497_v45  ;;  %v1669_v55 = vpop.f32.mrb[46].mxu1 }
 0x705   :  { %v11473_v56 = vpop.f32.mrb[47].mxu1  ;;  %v9079_v55 = vcombine.high %v9076_v53, %v9076_v53 }
 0x706   :  { %11463 = vmatmul.mubr.msk.bf16.vlgmr.msra.gmra.mrb[48].mxu0 %vm415_vm2, %v1498_v47 }
 0x707   :  { %10068 = vmatpush3.bf16.msra.mxu0 %v12982_v1  ;;  %1624 = vmatprep.mubr.bf16.mxu0 %v9041_v46 }
 0x708   :  { %10069 = vmatprep.subr.bf16.mxu0 %v12988_v2 }
 0x70b   :  { %10070 = vmatpush3.bf16.msra.mxu0 %v12996_v3 }
 0x70c   :  { %10071 = vmatprep.subr.bf16.mxu0 %v13002_v4 }
 0x70f   :  { %10072 = vmatpush3.bf16.msra.mxu0 %v13008_v5 }
 0x710   :  { %10073 = vmatprep.subr.bf16.mxu0 %v13014_v6 }
 0x713   :  { %10074 = vmatpush3.bf16.msra.mxu0 %v13020_v7 }
 0x714   :  { %10075 = vmatprep.subr.bf16.mxu0 %v13026_v8 }
 0x717   :  { %10076 = vmatpush3.bf16.msra.mxu0 %v13032_v9 }
 0x718   :  { %10077 = vmatprep.subr.bf16.mxu0 %v13038_v10 }
 0x71b   :  { %10078 = vmatpush3.bf16.msra.mxu0 %v13044_v11 }
 0x71c   :  { %10079 = vmatprep.subr.bf16.mxu0 %v13050_v12 }
 0x71f   :  { %10080 = vmatpush3.bf16.msra.mxu0 %v13056_v13 }
 0x720   :  { %10081 = vmatprep.subr.bf16.mxu0 %v13062_v14 }
 0x723   :  { %10082 = vmatpush3.bf16.msra.mxu0 %v13068_v16 }
 0x724   :  { %11486 = vmatprep.subr.bf16.mxu0 %v12789_v23 }
 0x726   :  { %1625 = vmatmul.mubr.bf16.vlgmr.msra.gmra.mrb[52].mxu0 %v9040_v48 }
 0x727   :  { %11487 = vmatpush3.bf16.msra.mxu0 %v13075_v17  ;;  %11490 = vmatprep.mubr.msk.bf16.mxu0 %vm12790_vm0, %v12789_v23 }
 0x728   :  { %11488 = vmatprep.subr.bf16.mxu0 %v12789_v23 }
 0x72b   :  { %11489 = vmatpush3.bf16.msra.mxu0 %v13140_v51 }
 0x72c   :  { %11494 = vmatprep.subr.bf16.mxu0 %v12789_v23 }
 0x72e   :  { %11491 = vmatmul.mubr.msk.bf16.vlgmr.msra.gmra.mrb[56].mxu0 %vm190_vm1, %v12391_v58 }
 0x72f   :  { %11502 = vmatprep.mubr.msk.bf16.mxu0 %vm12790_vm0, %v12789_v23  ;;  %11495 = vmatpush3.bf16.msra.mxu0 %v12392_v29  ;;  %v13585_v29 = vld [vmem:[%s15882_s1 + $0x28] sm:$0xff]  }
 0x730   :  { %11496 = vmatprep.subr.bf16.mxu0 %v12789_v23 }
 0x733   :  { %11497 = vmatpush3.bf16.msra.mxu0 %v12393_v30  ;;  %v13591_v30 = vld [vmem:[%s15882_s1 + $0x70] sm:$0xff]  }
 0x734   :  { %11498 = vmatprep.subr.bf16.mxu0 %v12789_v23 }
 0x7d9   :  { %v1569_v59 = vpop.f32.mrb[48].mxu0 }
 0x7da   :  { %v1575_v60 = vadd.f32 %v1569_v59, %v1400_v32  ;;  %v11464_v61 = vpop.f32.mrb[49].mxu0  ;;  %v12394_v32 = vld [vmem:[%s15884_s3 + $0x130] sm:$0xff]  }
 0x7db   :  { %v1572_v62 = vpop.f32.mrb[50].mxu0  ;;  %11499 = vmatpush3.bf16.msra.mxu0 %v12394_v32  ;;  %v13603_v32 = vld [vmem:[%s15882_s1 + $0x78] sm:$0xff]  }
 0x7dc   :  { %v11465_v63 = vpop.f32.mrb[51].mxu0  ;;  %11500 = vmatprep.subr.bf16.mxu0 %v12789_v23  ;;  %v9095_v62 = vld [vmem:[%s15883_s0 + $0x84] sm:$0xff] }
 0x7df   :  { %11501 = vmatpush3.bf16.msra.mxu0 %v12395_v36  ;;  %v12406_v36 = vld [vmem:[%s15884_s3 + $0x160] sm:$0xff]  }
 0x7e0   :  { %10127 = vmatprep.subr.bf16.mxu0 %v13101_v22 }
 0x7f9   :  { %v10083_v0 = vpop.f32.mrb[52].mxu0 }
 0x7fa   :  { %v10084_v15 = vpop.f32.mrb[53].mxu0 }
 0x7fb   :  { %v10085_v18 = vadd.f32 %v10084_v15, %v10083_v0  ;;  %v10086_v19 = vpop.f32.mrb[54].mxu0  ;;  %v9098_v0 = vcombine.high %v9095_v62, %v9095_v62 }
 0x7fc   :  { %v10087_v20 = vpop.f32.mrb[55].mxu0  ;;  %v13531_v19 = vld [vmem:[%s15882_s1 + $0x48] sm:$0xff]  }
 0x7fd   :  { %v1627_v21 = vadd.f32 %v10085_v18, %v12960_v41  ;;  %v9059_v41 = vcombine.low %v9057_v25, %v9057_v25  ;;  %v13525_v18 = vld [vmem:[%s15882_s1] sm:$0xff]   ;;  %v13537_v20 = vld [vmem:[%s15882_s1 + $0x8] sm:$0xff]   ;;  %v13555_v25 = vld [vmem:[%s15882_s1 + $0x58] sm:$0xff]  }
 0x7ff   :  { %v1667_v24 = vadd.f32 %v1666_v52, %v1627_v21  ;;  %v13543_v21 = vld [vmem:[%s15882_s1 + $0x50] sm:$0xff]  }
 0x801   :  { %v1672_v26 = vmax.f32 %v1667_v24, 0.0  ;;  %v1841_v31 = vpop.f32.mrb[56].mxu0  ;;  %v13549_v24 = vld [vmem:[%s15882_s1 + $0x10] sm:$0xff]  }
 0x802   :  { %v11492_v33 = vpop.f32.mrb[57].mxu0 }
 0x803   :  { %v1673_v28 = vpack.c.bf16 %v1672_v26, %v1672_v26  ;;  %v1844_v34 = vpop.f32.mrb[58].mxu0  ;;  %v13561_v26 = vld [vmem:[%s15882_s1 + $0x18] sm:$0xff]   ;;  %v9097_v33 = vcombine.low %v9095_v62, %v9095_v62 }
 0x804   :  { %v11493_v35 = vpop.f32.mrb[59].mxu0  ;;  %v13609_v34 = vld [vmem:[%s15882_s1 + $0x38] sm:$0xff]  }
 0x805   :  { %11483 = vmatmul.mubr.msk.bf16.vlgmr.msra.gmra.mrb[48].mxu1 %vm415_vm2, %v1673_v28  ;;  %v13573_v28 = vld [vmem:[%s15882_s1 + $0x20] sm:$0xff]  }
 0x806   :  { %10098 = vmatpush3.bf16.msra.mxu1 %v12982_v1  ;;  %1799 = vmatprep.mubr.bf16.mxu1 %v9060_v27  ;;  %v13567_v27 = vld [vmem:[%s15882_s1 + $0x60] sm:$0xff]  }
 0x807   :  { %10099 = vmatprep.subr.bf16.mxu1 %v12988_v2  ;;  %v13616_v35 = vld [vmem:[%s15882_s1 + $0x80] sm:$0xff]  }
 0x80a   :  { %10100 = vmatpush3.bf16.msra.mxu1 %v12996_v3 }
 0x80b   :  { %10101 = vmatprep.subr.bf16.mxu1 %v13002_v4 }
 0x80e   :  { %10102 = vmatpush3.bf16.msra.mxu1 %v13008_v5 }
 0x80f   :  { %10103 = vmatprep.subr.bf16.mxu1 %v13014_v6 }
 0x812   :  { %10104 = vmatpush3.bf16.msra.mxu1 %v13020_v7 }
 0x813   :  { %10105 = vmatprep.subr.bf16.mxu1 %v13026_v8 }
 0x816   :  { %10106 = vmatpush3.bf16.msra.mxu1 %v13032_v9 }
 0x817   :  { %10107 = vmatprep.subr.bf16.mxu1 %v13038_v10 }
 0x81a   :  { %10108 = vmatpush3.bf16.msra.mxu1 %v13044_v11 }
 0x81b   :  { %10109 = vmatprep.subr.bf16.mxu1 %v13050_v12 }
 0x81e   :  { %10110 = vmatpush3.bf16.msra.mxu1 %v13056_v13 }
 0x81f   :  { %10111 = vmatprep.subr.bf16.mxu1 %v13062_v14 }
 0x822   :  { %10112 = vmatpush3.bf16.msra.mxu1 %v13068_v16 }
 0x823   :  { %11506 = vmatprep.subr.bf16.mxu1 %v12789_v23 }
 0x825   :  { %1800 = vmatmul.mubr.bf16.vlgmr.msra.gmra.mrb[52].mxu1 %v9059_v41  ;;  %v13579_v41 = vld [vmem:[%s15882_s1 + $0x68] sm:$0xff]  }
 0x826   :  { %11507 = vmatpush3.bf16.msra.mxu1 %v13075_v17  ;;  %11510 = vmatprep.mubr.msk.bf16.mxu1 %vm12790_vm0, %v12789_v23 }
 0x827   :  { %11508 = vmatprep.subr.bf16.mxu1 %v12789_v23 }
 0x82a   :  { %11509 = vmatpush3.bf16.msra.mxu1 %v13140_v51 }
 0x82b   :  { %11514 = vmatprep.subr.bf16.mxu1 %v12789_v23 }
 0x82d   :  { %11511 = vmatmul.mubr.msk.bf16.vlgmr.msra.gmra.mrb[56].mxu1 %vm190_vm1, %v12398_v37  ;;  %v12407_v37 = vld [vmem:[%s15884_s3 + $0x168] sm:$0xff]  }
 0x82e   :  { %11522 = vmatprep.mubr.msk.bf16.mxu1 %vm12790_vm0, %v12789_v23 }
 0x8d8   :  { %v1744_v38 = vpop.f32.mrb[48].mxu1 }
 0x8d9   :  { %v1750_v39 = vadd.f32 %v1744_v38, %v1575_v60  ;;  %v11484_v40 = vpop.f32.mrb[49].mxu1 }
 0x8da   :  { %v1747_v42 = vpop.f32.mrb[50].mxu1 }
 0x8db   :  { %v11485_v43 = vpop.f32.mrb[51].mxu1 }
 0x8dc   :  { %v12409_v43 = vld [vmem:[%s15884_s3 + $0x178] sm:$0xff]  }
 0x8f8   :  { %v10113_v44 = vpop.f32.mrb[52].mxu1 }
 0x8f9   :  { %v10114_v45 = vpop.f32.mrb[53].mxu1 }
 0x8fa   :  { %v10115_v46 = vadd.f32 %v10114_v45, %v10113_v44  ;;  %v10116_v47 = vpop.f32.mrb[54].mxu1  ;;  %v13642_v44 = vld [vmem:[%s15882_s1 + $0x40] sm:$0xff]   ;;  %v12412_v45 = vld [vmem:[%s15883_s0 + $0x98] ss:$0 sps:$4 sm:$0xff]  }
 0x8fb   :  { %v10117_v48 = vpop.f32.mrb[55].mxu1 }
 0x8fc   :  { %v1802_v50 = vadd.f32 %v13464_v49, %v10115_v46 }
 0x8fe   :  { %v1842_v52 = vadd.f32 %v1841_v31, %v1802_v50  ;;  %v13597_v31 = vld [vmem:[%s15882_s1 + $0x30] sm:$0xff]  }
 0x900   :  { %v1847_v54 = vmax.f32 %v1842_v52, 0.0 }
 0x902   :  { %v1848_v56 = vpack.c.bf16 %v1847_v54, %v1847_v54 }
 0x904   :  { %11503 = vmatmul.mubr.msk.bf16.vlgmr.msra.gmra.mrb[60].mxu0 %vm415_vm2, %v1848_v56 }
 0x905   :  { %10128 = vmatpush3.bf16.msra.mxu0 %v12982_v1  ;;  %1974 = vmatprep.mubr.bf16.mxu0 %v9079_v55  ;;  %v9078_v1 = vcombine.low %v9076_v53, %v9076_v53 }
 0x906   :  { %10129 = vmatprep.subr.bf16.mxu0 %v12988_v2  ;;  %v12399_v2 = vld [vmem:[%s15884_s3 + $0x140] sm:$0xff]  }
 0x907   :  { %11515 = vmatpush3.bf16.msra.mxu1 %v12399_v2 }
 0x908   :  { %11516 = vmatprep.subr.bf16.mxu1 %v12789_v23 }
 0x909   :  { %10130 = vmatpush3.bf16.msra.mxu0 %v12996_v3  ;;  %v12400_v3 = vld [vmem:[%s15884_s3 + $0x148] sm:$0xff]  }
 0x90a   :  { %10131 = vmatprep.subr.bf16.mxu0 %v13002_v4  ;;  %v2016_v4 = vpop.f32.mrb[56].mxu1 }
 0x90b   :  { %11517 = vmatpush3.bf16.msra.mxu1 %v12400_v3 }
 0x90c   :  { %11518 = vmatprep.subr.bf16.mxu1 %v12789_v23 }
 0x90d   :  { %10132 = vmatpush3.bf16.msra.mxu0 %v13008_v5  ;;  %v12401_v5 = vld [vmem:[%s15884_s3 + $0x150] sm:$0xff]  }
 0x90e   :  { %10133 = vmatprep.subr.bf16.mxu0 %v13014_v6  ;;  %v11512_v6 = vpop.f32.mrb[57].mxu1 }
 0x90f   :  { %11519 = vmatpush3.bf16.msra.mxu1 %v12401_v5 }
 0x910   :  { %11520 = vmatprep.subr.bf16.mxu1 %v12789_v23 }
 0x911   :  { %10134 = vmatpush3.bf16.msra.mxu0 %v13020_v7  ;;  %v2019_v7 = vpop.f32.mrb[58].mxu1 }
 0x912   :  { %10135 = vmatprep.subr.bf16.mxu0 %v13026_v8  ;;  %v11513_v8 = vpop.f32.mrb[59].mxu1 }
 0x915   :  { %10136 = vmatpush3.bf16.msra.mxu0 %v13032_v9  ;;  %v12402_v9 = vld [vmem:[%s15884_s3 + $0x158] sm:$0xff]  }
 0x916   :  { %10137 = vmatprep.subr.bf16.mxu0 %v13038_v10  ;;  %11521 = vmatpush3.bf16.msra.mxu1 %v12402_v9  ;;  %v12405_v10 = vld [vmem:[%s15883_s0 + $0x8c] ss:$0 sps:$4 sm:$0xff]  }
 0x917   :  { %10157 = vmatprep.subr.bf16.mxu1 %v13101_v22  ;;  %v13680_v9 = vld [vmem:[%s15882_s1 + $0x88] sm:$0xff]  }
 0x919   :  { %10138 = vmatpush3.bf16.msra.mxu0 %v13044_v11 }
 0x91a   :  { %10139 = vmatprep.subr.bf16.mxu0 %v13050_v12 }
 0x91d   :  { %10140 = vmatpush3.bf16.msra.mxu0 %v13056_v13 }
 0x91e   :  { %10141 = vmatprep.subr.bf16.mxu0 %v13062_v14 }
 0x921   :  { %10142 = vmatpush3.bf16.msra.mxu0 %v13068_v16 }
 0x922   :  { %11526 = vmatprep.subr.bf16.mxu0 %v12789_v23 }
 0x924   :  { %1975 = vmatmul.mubr.bf16.vlgmr.msra.gmra.mrb[64].mxu0 %v9078_v1 }
 0x925   :  { %11527 = vmatpush3.bf16.msra.mxu0 %v13075_v17  ;;  %11530 = vmatprep.mubr.msk.bf16.mxu0 %vm12790_vm0, %v12789_v23 }
 0x926   :  { %11528 = vmatprep.subr.bf16.mxu0 %v12789_v23 }
 0x929   :  { %11529 = vmatpush3.bf16.msra.mxu0 %v13140_v51 }
 0x92a   :  { %11534 = vmatprep.subr.bf16.mxu0 %v12789_v23 }
 0x92c   :  { %11531 = vmatmul.mubr.msk.bf16.vlgmr.msra.gmra.mrb[68].mxu0 %vm190_vm1, %v12405_v10  ;;  %v12413_v10 = vld [vmem:[%s15884_s3 + $0x180] sm:$0xff]  }
 0x92d   :  { %11542 = vmatprep.mubr.msk.bf16.mxu0 %vm12790_vm0, %v12789_v23  ;;  %11535 = vmatpush3.bf16.msra.mxu0 %v12406_v36 }
 0x92e   :  { %11536 = vmatprep.subr.bf16.mxu0 %v12789_v23 }
 0x931   :  { %11537 = vmatpush3.bf16.msra.mxu0 %v12407_v37 }
 0x932   :  { %11538 = vmatprep.subr.bf16.mxu0 %v12789_v23 }
 0x9d7   :  { %v1919_v11 = vpop.f32.mrb[60].mxu0 }
 0x9d8   :  { %v13515_v12 = vadd.f32 %v1919_v11, %v1750_v39  ;;  %v11504_v13 = vpop.f32.mrb[61].mxu0  ;;  %v12414_v11 = vld [vmem:[%s15884_s3 + $0x188] sm:$0xff]  }
 0x9d9   :  { %v1922_v14 = vpop.f32.mrb[62].mxu0  ;;  %v12415_v13 = vld [vmem:[%s15884_s3 + $0x190] sm:$0xff]  }
 0x9da   :  { %v11505_v16 = vpop.f32.mrb[63].mxu0 }
 0x9f7   :  { %v10143_v17 = vpop.f32.mrb[64].mxu0 }
 0x9f8   :  { %v10144_v57 = vpop.f32.mrb[65].mxu0 }
 0x9f9   :  { %v10145_v58 = vadd.f32 %v10144_v57, %v10143_v17  ;;  %v10146_v59 = vpop.f32.mrb[66].mxu0  ;;  %v12416_v57 = vld [vmem:[%s15884_s3 + $0x198] sm:$0xff]  }
 0x9fa   :  { %v10147_v22 = vpop.f32.mrb[67].mxu0 }
 0x9fb   :  { %v1977_v60 = vadd.f32 %v13464_v49, %v10145_v58  ;;  %v12419_v58 = vld [vmem:[%s15883_s0 + $0xa4] ss:$0 sps:$4 sm:$0xff]  }
 0x9fd   :  { %v2017_v61 = vadd.f32 %v2016_v4, %v1977_v60  ;;  %v9114_v4 = vld [vmem:[%s15883_s0 + $0x90] sm:$0xff] }
 0x9fe   :  { %v9117_v6 = vcombine.high %v9114_v4, %v9114_v4  ;;  %v9116_v8 = vcombine.low %v9114_v4, %v9114_v4 }
 0x9ff   :  { %v2022_v63 = vmax.f32 %v2017_v61, 0.0  ;;  %v2191_v38 = vpop.f32.mrb[68].mxu0 }
 0xa00   :  { %v11532_v39 = vpop.f32.mrb[69].mxu0 }
 0xa01   :  { %v2023_v15 = vpack.c.bf16 %v2022_v63, %v2022_v63  ;;  %v2194_v40 = vpop.f32.mrb[70].mxu0 }
 0xa02   :  { %v11533_v42 = vpop.f32.mrb[71].mxu0 }
 0xa03   :  { %11523 = vmatmul.mubr.msk.bf16.vlgmr.msra.gmra.mrb[60].mxu1 %vm415_vm2, %v2023_v15 }
 0xa04   :  { %10158 = vmatpush3.bf16.msra.mxu1 %v13525_v18  ;;  %2149 = vmatprep.mubr.bf16.mxu1 %v9098_v0 }
 0xa05   :  { %10159 = vmatprep.subr.bf16.mxu1 %v13531_v19 }
 0xa08   :  { %10160 = vmatpush3.bf16.msra.mxu1 %v13537_v20 }
 0xa09   :  { %10161 = vmatprep.subr.bf16.mxu1 %v13543_v21 }
 0xa0c   :  { %10162 = vmatpush3.bf16.msra.mxu1 %v13549_v24 }
 0xa0d   :  { %10163 = vmatprep.subr.bf16.mxu1 %v13555_v25 }
 0xa10   :  { %10164 = vmatpush3.bf16.msra.mxu1 %v13561_v26 }
 0xa11   :  { %10165 = vmatprep.subr.bf16.mxu1 %v13567_v27 }
 0xa14   :  { %10166 = vmatpush3.bf16.msra.mxu1 %v13573_v28 }
 0xa15   :  { %10167 = vmatprep.subr.bf16.mxu1 %v13579_v41 }
 0xa18   :  { %10168 = vmatpush3.bf16.msra.mxu1 %v13585_v29 }
 0xa19   :  { %10169 = vmatprep.subr.bf16.mxu1 %v13591_v30 }
 0xa1c   :  { %10170 = vmatpush3.bf16.msra.mxu1 %v13597_v31 }
 0xa1d   :  { %10171 = vmatprep.subr.bf16.mxu1 %v13603_v32 }
 0xa20   :  { %10172 = vmatpush3.bf16.msra.mxu1 %v13609_v34 }
 0xa21   :  { %11546 = vmatprep.subr.bf16.mxu1 %v12789_v23 }
 0xa23   :  { %2150 = vmatmul.mubr.bf16.vlgmr.msra.gmra.mrb[64].mxu1 %v9097_v33 }
 0xa24   :  { %11547 = vmatpush3.bf16.msra.mxu1 %v13616_v35  ;;  %11550 = vmatprep.mubr.msk.bf16.mxu1 %vm12790_vm0, %v12789_v23 }
 0xa25   :  { %11548 = vmatprep.subr.bf16.mxu1 %v12789_v23 }
 0xa28   :  { %11549 = vmatpush3.bf16.msra.mxu1 %v13140_v51  ;;  %v12408_v51 = vld [vmem:[%s15884_s3 + $0x170] sm:$0xff]  }
 0xa29   :  { %11554 = vmatprep.subr.bf16.mxu1 %v12789_v23  ;;  %11539 = vmatpush3.bf16.msra.mxu0 %v12408_v51  ;;  %v9133_v51 = vld [vmem:[%s15883_s0 + $0x9c] sm:$0xff] }
 0xa2a   :  { %11540 = vmatprep.subr.bf16.mxu0 %v12789_v23  ;;  %v9136_v40 = vcombine.high %v9133_v51, %v9133_v51 }
 0xa2b   :  { %11551 = vmatmul.mubr.msk.bf16.vlgmr.msra.gmra.mrb[68].mxu1 %vm190_vm1, %v12412_v45  ;;  %v12420_v45 = vld [vmem:[%s15884_s3 + $0x1a0] sm:$0xff]  }
 0xa2c   :  { %11562 = vmatprep.mubr.msk.bf16.mxu1 %vm12790_vm0, %v12789_v23  ;;  %11555 = vmatpush3.bf16.msra.mxu1 %v12413_v10 }
 0xa2d   :  { %11541 = vmatpush3.bf16.msra.mxu0 %v12409_v43  ;;  %11556 = vmatprep.subr.bf16.mxu1 %v12789_v23  ;;  %v9135_v43 = vcombine.low %v9133_v51, %v9133_v51 }
 0xa2e   :  { %10187 = vmatprep.subr.bf16.mxu0 %v13642_v44 }
 0xa30   :  { %11557 = vmatpush3.bf16.msra.mxu1 %v12414_v11 }
 0xa31   :  { %11558 = vmatprep.subr.bf16.mxu1 %v12789_v23 }
 0xa34   :  { %11559 = vmatpush3.bf16.msra.mxu1 %v12415_v13  ;;  %v9152_v13 = vld [vmem:[%s15883_s0 + $0xa8] sm:$0xff] }
 0xa35   :  { %11560 = vmatprep.subr.bf16.mxu1 %v12789_v23 }
 0xa38   :  { %11561 = vmatpush3.bf16.msra.mxu1 %v12416_v57  ;;  %v9154_v57 = vcombine.low %v9152_v13, %v9152_v13 }
 0xa39   :  { %10217 = vmatprep.subr.bf16.mxu1 %v13642_v44 }
 0xad6   :  { %v2094_v46 = vpop.f32.mrb[60].mxu1 }
 0xad7   :  { %v2100_v47 = vadd.f32 %v2094_v46, %v13515_v12  ;;  %v11524_v48 = vpop.f32.mrb[61].mxu1  ;;  %v12421_v46 = vld [vmem:[%s15884_s3 + $0x1a8] sm:$0xff]  }
 0xad8   :  { %v2097_v50 = vpop.f32.mrb[62].mxu1  ;;  %v12422_v48 = vld [vmem:[%s15884_s3 + $0x1b0] sm:$0xff]  }
 0xad9   :  { %v11525_v52 = vpop.f32.mrb[63].mxu1 }
 0xaf6   :  { %v10173_v53 = vpop.f32.mrb[64].mxu1 }
 0xaf7   :  { %v10174_v54 = vpop.f32.mrb[65].mxu1 }
 0xaf8   :  { %v10175_v55 = vadd.f32 %v10174_v54, %v10173_v53  ;;  %v10176_v56 = vpop.f32.mrb[66].mxu1  ;;  %v12423_v54 = vld [vmem:[%s15884_s3 + $0x1b8] sm:$0xff]  }
 0xaf9   :  { %v10177_v1 = vpop.f32.mrb[67].mxu1 }
 0xafa   :  { %v2152_v2 = vadd.f32 %v13464_v49, %v10175_v55  ;;  %v12426_v55 = vld [vmem:[%s15883_s0 + $0xb0] ss:$0 sps:$4 sm:$0xff]  }
 0xafc   :  { %v2192_v3 = vadd.f32 %v2191_v38, %v2152_v2 }
 0xafe   :  { %v2197_v5 = vmax.f32 %v2192_v3, 0.0  ;;  %v2366_v12 = vpop.f32.mrb[68].mxu1 }
 0xaff   :  { %v11552_v14 = vpop.f32.mrb[69].mxu1 }
 0xb00   :  { %v2198_v7 = vpack.c.bf16 %v2197_v5, %v2197_v5  ;;  %v2369_v16 = vpop.f32.mrb[70].mxu1 }
 0xb01   :  { %v11553_v17 = vpop.f32.mrb[71].mxu1  ;;  %v9155_v16 = vcombine.high %v9152_v13, %v9152_v13 }
 0xb02   :  { %11543 = vmatmul.mubr.msk.bf16.vlgmr.msra.gmra.mrb[72].mxu0 %vm415_vm2, %v2198_v7 }
 0xb03   :  { %10188 = vmatpush3.bf16.msra.mxu0 %v13525_v18  ;;  %2324 = vmatprep.mubr.bf16.mxu0 %v9117_v6 }
 0xb04   :  { %10189 = vmatprep.subr.bf16.mxu0 %v13531_v19 }
 0xb07   :  { %10190 = vmatpush3.bf16.msra.mxu0 %v13537_v20 }
 0xb08   :  { %10191 = vmatprep.subr.bf16.mxu0 %v13543_v21 }
 0xb0b   :  { %10192 = vmatpush3.bf16.msra.mxu0 %v13549_v24 }
 0xb0c   :  { %10193 = vmatprep.subr.bf16.mxu0 %v13555_v25 }
 0xb0f   :  { %10194 = vmatpush3.bf16.msra.mxu0 %v13561_v26 }
 0xb10   :  { %10195 = vmatprep.subr.bf16.mxu0 %v13567_v27 }
 0xb13   :  { %10196 = vmatpush3.bf16.msra.mxu0 %v13573_v28 }
 0xb14   :  { %10197 = vmatprep.subr.bf16.mxu0 %v13579_v41 }
 0xb17   :  { %10198 = vmatpush3.bf16.msra.mxu0 %v13585_v29 }
 0xb18   :  { %10199 = vmatprep.subr.bf16.mxu0 %v13591_v30 }
 0xb1b   :  { %10200 = vmatpush3.bf16.msra.mxu0 %v13597_v31 }
 0xb1c   :  { %10201 = vmatprep.subr.bf16.mxu0 %v13603_v32 }
 0xb1f   :  { %10202 = vmatpush3.bf16.msra.mxu0 %v13609_v34 }
 0xb20   :  { %11566 = vmatprep.subr.bf16.mxu0 %v12789_v23 }
 0xb22   :  { %2325 = vmatmul.mubr.bf16.vlgmr.msra.gmra.mrb[76].mxu0 %v9116_v8 }
 0xb23   :  { %11567 = vmatpush3.bf16.msra.mxu0 %v13616_v35  ;;  %11570 = vmatprep.mubr.msk.bf16.mxu0 %vm12790_vm0, %v12789_v23 }
 0xb24   :  { %11568 = vmatprep.subr.bf16.mxu0 %v12789_v23 }
 0xb27   :  { %11569 = vmatpush3.bf16.msra.mxu0 %v13680_v9 }
 0xb28   :  { %11574 = vmatprep.subr.bf16.mxu0 %v12789_v23 }
 0xb2a   :  { %11571 = vmatmul.mubr.msk.bf16.vlgmr.msra.gmra.mrb[80].mxu0 %vm190_vm1, %v12419_v58  ;;  %v12427_v58 = vld [vmem:[%s15884_s3 + $0x1c0] sm:$0xff]  }
 0xb2b   :  { %11582 = vmatprep.mubr.msk.bf16.mxu0 %vm12790_vm0, %v12789_v23  ;;  %11575 = vmatpush3.bf16.msra.mxu0 %v12420_v45 }
 0xb2c   :  { %11576 = vmatprep.subr.bf16.mxu0 %v12789_v23 }
 0xb2f   :  { %11577 = vmatpush3.bf16.msra.mxu0 %v12421_v46 }
 0xb30   :  { %11578 = vmatprep.subr.bf16.mxu0 %v12789_v23 }
 0xb33   :  { %11579 = vmatpush3.bf16.msra.mxu0 %v12422_v48  ;;  %v9171_v48 = vld [vmem:[%s15883_s0 + $0xb4] sm:$0xff] }
 0xb34   :  { %11580 = vmatprep.subr.bf16.mxu0 %v12789_v23 }
 0xb37   :  { %11581 = vmatpush3.bf16.msra.mxu0 %v12423_v54  ;;  %v9173_v54 = vcombine.low %v9171_v48, %v9171_v48 }
 0xb38   :  { %10247 = vmatprep.subr.bf16.mxu0 %v13642_v44 }
 0xbd5   :  { %v2269_v59 = vpop.f32.mrb[72].mxu0 }
 0xbd6   :  { %v2275_v22 = vadd.f32 %v2269_v59, %v2100_v47  ;;  %v11544_v60 = vpop.f32.mrb[73].mxu0  ;;  %v12428_v59 = vld [vmem:[%s15884_s3 + $0x1c8] sm:$0xff]  }
 0xbd7   :  { %v2272_v61 = vpop.f32.mrb[74].mxu0  ;;  %v12429_v60 = vld [vmem:[%s15884_s3 + $0x1d0] sm:$0xff]  }
 0xbd8   :  { %v11545_v62 = vpop.f32.mrb[75].mxu0 }
 0xbf5   :  { %v10203_v63 = vpop.f32.mrb[76].mxu0 }
 0xbf6   :  { %v10204_v0 = vpop.f32.mrb[77].mxu0 }
 0xbf7   :  { %v10205_v15 = vadd.f32 %v10204_v0, %v10203_v63  ;;  %v10206_v33 = vpop.f32.mrb[78].mxu0  ;;  %v12430_v0 = vld [vmem:[%s15884_s3 + $0x1d8] sm:$0xff]  }
 0xbf8   :  { %v10207_v36 = vpop.f32.mrb[79].mxu0 }
 0xbf9   :  { %v2327_v37 = vadd.f32 %v13464_v49, %v10205_v15  ;;  %v12433_v15 = vld [vmem:[%s15883_s0 + $0xbc] ss:$0 sps:$4 sm:$0xff]  }
 0xbfb   :  { %v2367_v38 = vadd.f32 %v2366_v12, %v2327_v37 }
 0xbfd   :  { %v2372_v39 = vmax.f32 %v2367_v38, 0.0  ;;  %v2541_v47 = vpop.f32.mrb[80].mxu0 }
 0xbfe   :  { %v11572_v50 = vpop.f32.mrb[81].mxu0 }
 0xbff   :  { %v2373_v42 = vpack.c.bf16 %v2372_v39, %v2372_v39  ;;  %v2544_v52 = vpop.f32.mrb[82].mxu0 }
 0xc00   :  { %v11573_v53 = vpop.f32.mrb[83].mxu0  ;;  %v9174_v52 = vcombine.high %v9171_v48, %v9171_v48 }
 0xc01   :  { %11563 = vmatmul.mubr.msk.bf16.vlgmr.msra.gmra.mrb[72].mxu1 %vm415_vm2, %v2373_v42 }
 0xc02   :  { %10218 = vmatpush3.bf16.msra.mxu1 %v13525_v18  ;;  %2499 = vmatprep.mubr.bf16.mxu1 %v9136_v40 }
 0xc03   :  { %10219 = vmatprep.subr.bf16.mxu1 %v13531_v19 }
 0xc06   :  { %10220 = vmatpush3.bf16.msra.mxu1 %v13537_v20 }
 0xc07   :  { %10221 = vmatprep.subr.bf16.mxu1 %v13543_v21 }
 0xc0a   :  { %10222 = vmatpush3.bf16.msra.mxu1 %v13549_v24 }
 0xc0b   :  { %10223 = vmatprep.subr.bf16.mxu1 %v13555_v25 }
 0xc0e   :  { %10224 = vmatpush3.bf16.msra.mxu1 %v13561_v26 }
 0xc0f   :  { %10225 = vmatprep.subr.bf16.mxu1 %v13567_v27 }
 0xc12   :  { %10226 = vmatpush3.bf16.msra.mxu1 %v13573_v28 }
 0xc13   :  { %10227 = vmatprep.subr.bf16.mxu1 %v13579_v41 }
 0xc16   :  { %10228 = vmatpush3.bf16.msra.mxu1 %v13585_v29 }
 0xc17   :  { %10229 = vmatprep.subr.bf16.mxu1 %v13591_v30 }
 0xc1a   :  { %10230 = vmatpush3.bf16.msra.mxu1 %v13597_v31 }
 0xc1b   :  { %10231 = vmatprep.subr.bf16.mxu1 %v13603_v32 }
 0xc1e   :  { %10232 = vmatpush3.bf16.msra.mxu1 %v13609_v34 }
 0xc1f   :  { %11586 = vmatprep.subr.bf16.mxu1 %v12789_v23 }
 0xc21   :  { %2500 = vmatmul.mubr.bf16.vlgmr.msra.gmra.mrb[76].mxu1 %v9135_v43 }
 0xc22   :  { %11587 = vmatpush3.bf16.msra.mxu1 %v13616_v35  ;;  %11590 = vmatprep.mubr.msk.bf16.mxu1 %vm12790_vm0, %v12789_v23 }
 0xc23   :  { %11588 = vmatprep.subr.bf16.mxu1 %v12789_v23 }
 0xc26   :  { %11589 = vmatpush3.bf16.msra.mxu1 %v13680_v9 }
 0xc27   :  { %11594 = vmatprep.subr.bf16.mxu1 %v12789_v23 }
 0xc29   :  { %11591 = vmatmul.mubr.msk.bf16.vlgmr.msra.gmra.mrb[80].mxu1 %vm190_vm1, %v12426_v55  ;;  %v12434_v55 = vld [vmem:[%s15884_s3 + $0x1e0] sm:$0xff]  }
 0xc2a   :  { %11602 = vmatprep.mubr.msk.bf16.mxu1 %vm12790_vm0, %v12789_v23  ;;  %11595 = vmatpush3.bf16.msra.mxu1 %v12427_v58 }
 0xc2b   :  { %11596 = vmatprep.subr.bf16.mxu1 %v12789_v23 }
 0xc2e   :  { %11597 = vmatpush3.bf16.msra.mxu1 %v12428_v59 }
 0xc2f   :  { %11598 = vmatprep.subr.bf16.mxu1 %v12789_v23 }
 0xc32   :  { %11599 = vmatpush3.bf16.msra.mxu1 %v12429_v60  ;;  %v9190_v60 = vld [vmem:[%s15883_s0 + $0xc0] sm:$0xff] }
 0xc33   :  { %11600 = vmatprep.subr.bf16.mxu1 %v12789_v23 }
 0xc36   :  { %11601 = vmatpush3.bf16.msra.mxu1 %v12430_v0  ;;  %v9192_v0 = vcombine.low %v9190_v60, %v9190_v60 }
 0xc37   :  { %10277 = vmatprep.subr.bf16.mxu1 %v13642_v44 }
 0xcd4   :  { %v2444_v56 = vpop.f32.mrb[72].mxu1 }
 0xcd5   :  { %v2450_v1 = vadd.f32 %v2444_v56, %v2275_v22  ;;  %v11564_v2 = vpop.f32.mrb[73].mxu1  ;;  %v12435_v56 = vld [vmem:[%s15884_s3 + $0x1e8] sm:$0xff]  }
 0xcd6   :  { %v2447_v3 = vpop.f32.mrb[74].mxu1  ;;  %v12436_v2 = vld [vmem:[%s15884_s3 + $0x1f0] sm:$0xff]  }
 0xcd7   :  { %v11565_v4 = vpop.f32.mrb[75].mxu1 }
 0xcf4   :  { %v10233_v5 = vpop.f32.mrb[76].mxu1 }
 0xcf5   :  { %v10234_v6 = vpop.f32.mrb[77].mxu1 }
 0xcf6   :  { %v10235_v7 = vadd.f32 %v10234_v6, %v10233_v5  ;;  %v10236_v8 = vpop.f32.mrb[78].mxu1  ;;  %v12437_v6 = vld [vmem:[%s15884_s3 + $0x1f8] sm:$0xff]  }
 0xcf7   :  { %v10237_v10 = vpop.f32.mrb[79].mxu1 }
 0xcf8   :  { %v2502_v11 = vadd.f32 %v13464_v49, %v10235_v7  ;;  %v12440_v7 = vld [vmem:[%s15883_s0 + $0xc8] ss:$0 sps:$4 sm:$0xff]  }
 0xcfa   :  { %v2542_v12 = vadd.f32 %v2541_v47, %v2502_v11 }
 0xcfc   :  { %v2547_v14 = vmax.f32 %v2542_v12, 0.0  ;;  %v2716_v22 = vpop.f32.mrb[80].mxu1 }
 0xcfd   :  { %v11592_v61 = vpop.f32.mrb[81].mxu1 }
 0xcfe   :  { %v2548_v17 = vpack.c.bf16 %v2547_v14, %v2547_v14  ;;  %v2719_v62 = vpop.f32.mrb[82].mxu1 }
 0xcff   :  { %v11593_v63 = vpop.f32.mrb[83].mxu1  ;;  %v9193_v62 = vcombine.high %v9190_v60, %v9190_v60 }
 0xd00   :  { %11583 = vmatmul.mubr.msk.bf16.vlgmr.msra.gmra.mrb[84].mxu0 %vm415_vm2, %v2548_v17 }
 0xd01   :  { %10248 = vmatpush3.bf16.msra.mxu0 %v13525_v18  ;;  %2674 = vmatprep.mubr.bf16.mxu0 %v9155_v16 }
 0xd02   :  { %10249 = vmatprep.subr.bf16.mxu0 %v13531_v19 }
 0xd05   :  { %10250 = vmatpush3.bf16.msra.mxu0 %v13537_v20 }
 0xd06   :  { %10251 = vmatprep.subr.bf16.mxu0 %v13543_v21 }
 0xd09   :  { %10252 = vmatpush3.bf16.msra.mxu0 %v13549_v24 }
 0xd0a   :  { %10253 = vmatprep.subr.bf16.mxu0 %v13555_v25 }
 0xd0d   :  { %10254 = vmatpush3.bf16.msra.mxu0 %v13561_v26 }
 0xd0e   :  { %10255 = vmatprep.subr.bf16.mxu0 %v13567_v27 }
 0xd11   :  { %10256 = vmatpush3.bf16.msra.mxu0 %v13573_v28 }
 0xd12   :  { %10257 = vmatprep.subr.bf16.mxu0 %v13579_v41 }
 0xd15   :  { %10258 = vmatpush3.bf16.msra.mxu0 %v13585_v29 }
 0xd16   :  { %10259 = vmatprep.subr.bf16.mxu0 %v13591_v30 }
 0xd19   :  { %10260 = vmatpush3.bf16.msra.mxu0 %v13597_v31 }
 0xd1a   :  { %10261 = vmatprep.subr.bf16.mxu0 %v13603_v32 }
 0xd1d   :  { %10262 = vmatpush3.bf16.msra.mxu0 %v13609_v34 }
 0xd1e   :  { %11606 = vmatprep.subr.bf16.mxu0 %v12789_v23 }
 0xd20   :  { %2675 = vmatmul.mubr.bf16.vlgmr.msra.gmra.mrb[88].mxu0 %v9154_v57 }
 0xd21   :  { %11607 = vmatpush3.bf16.msra.mxu0 %v13616_v35  ;;  %11610 = vmatprep.mubr.msk.bf16.mxu0 %vm12790_vm0, %v12789_v23 }
 0xd22   :  { %11608 = vmatprep.subr.bf16.mxu0 %v12789_v23 }
 0xd25   :  { %11609 = vmatpush3.bf16.msra.mxu0 %v13680_v9 }
 0xd26   :  { %11614 = vmatprep.subr.bf16.mxu0 %v12789_v23 }
 0xd28   :  { %11611 = vmatmul.mubr.msk.bf16.vlgmr.msra.gmra.mrb[92].mxu0 %vm190_vm1, %v12433_v15  ;;  %v12441_v15 = vld [vmem:[%s15884_s3 + $0x200] sm:$0xff]  }
 0xd29   :  { %11622 = vmatprep.mubr.msk.bf16.mxu0 %vm12790_vm0, %v12789_v23  ;;  %11615 = vmatpush3.bf16.msra.mxu0 %v12434_v55 }
 0xd2a   :  { %11616 = vmatprep.subr.bf16.mxu0 %v12789_v23 }
 0xd2d   :  { %11617 = vmatpush3.bf16.msra.mxu0 %v12435_v56 }
 0xd2e   :  { %11618 = vmatprep.subr.bf16.mxu0 %v12789_v23 }
 0xd31   :  { %11619 = vmatpush3.bf16.msra.mxu0 %v12436_v2  ;;  %v9209_v2 = vld [vmem:[%s15883_s0 + $0xcc] sm:$0xff] }
 0xd32   :  { %11620 = vmatprep.subr.bf16.mxu0 %v12789_v23 }
 0xd35   :  { %11621 = vmatpush3.bf16.msra.mxu0 %v12437_v6  ;;  %v9211_v6 = vcombine.low %v9209_v2, %v9209_v2 }
 0xd36   :  { %10307 = vmatprep.subr.bf16.mxu0 %v13642_v44 }
 0xdd3   :  { %v2619_v33 = vpop.f32.mrb[84].mxu0 }
 0xdd4   :  { %v2625_v36 = vadd.f32 %v2619_v33, %v2450_v1  ;;  %v11584_v37 = vpop.f32.mrb[85].mxu0  ;;  %v12442_v33 = vld [vmem:[%s15884_s3 + $0x208] sm:$0xff]  }
 0xdd5   :  { %v2622_v38 = vpop.f32.mrb[86].mxu0  ;;  %v12443_v37 = vld [vmem:[%s15884_s3 + $0x210] sm:$0xff]  }
 0xdd6   :  { %v11585_v51 = vpop.f32.mrb[87].mxu0 }
 0xdf3   :  { %v10263_v39 = vpop.f32.mrb[88].mxu0 }
 0xdf4   :  { %v10264_v40 = vpop.f32.mrb[89].mxu0 }
 0xdf5   :  { %v10265_v42 = vadd.f32 %v10264_v40, %v10263_v39  ;;  %v10266_v43 = vpop.f32.mrb[90].mxu0  ;;  %v12444_v40 = vld [vmem:[%s15884_s3 + $0x218] sm:$0xff]  }
 0xdf6   :  { %v10267_v45 = vpop.f32.mrb[91].mxu0 }
 0xdf7   :  { %v2677_v46 = vadd.f32 %v13464_v49, %v10265_v42  ;;  %v12447_v42 = vld [vmem:[%s15883_s0 + $0xd4] ss:$0 sps:$4 sm:$0xff]  }
 0xdf9   :  { %v2717_v47 = vadd.f32 %v2716_v22, %v2677_v46 }
 0xdfb   :  { %v2722_v50 = vmax.f32 %v2717_v47, 0.0  ;;  %v2891_v1 = vpop.f32.mrb[92].mxu0 }
 0xdfc   :  { %v11612_v3 = vpop.f32.mrb[93].mxu0 }
 0xdfd   :  { %v2723_v53 = vpack.c.bf16 %v2722_v50, %v2722_v50  ;;  %v2894_v4 = vpop.f32.mrb[94].mxu0 }
 0xdfe   :  { %v11613_v5 = vpop.f32.mrb[95].mxu0  ;;  %v9212_v4 = vcombine.high %v9209_v2, %v9209_v2 }
 0xdff   :  { %11603 = vmatmul.mubr.msk.bf16.vlgmr.msra.gmra.mrb[84].mxu1 %vm415_vm2, %v2723_v53 }
 0xe00   :  { %10278 = vmatpush3.bf16.msra.mxu1 %v13525_v18  ;;  %2849 = vmatprep.mubr.bf16.mxu1 %v9174_v52 }
 0xe01   :  { %10279 = vmatprep.subr.bf16.mxu1 %v13531_v19 }
 0xe04   :  { %10280 = vmatpush3.bf16.msra.mxu1 %v13537_v20 }
 0xe05   :  { %10281 = vmatprep.subr.bf16.mxu1 %v13543_v21 }
 0xe08   :  { %10282 = vmatpush3.bf16.msra.mxu1 %v13549_v24 }
 0xe09   :  { %10283 = vmatprep.subr.bf16.mxu1 %v13555_v25 }
 0xe0c   :  { %10284 = vmatpush3.bf16.msra.mxu1 %v13561_v26 }
 0xe0d   :  { %10285 = vmatprep.subr.bf16.mxu1 %v13567_v27 }
 0xe10   :  { %10286 = vmatpush3.bf16.msra.mxu1 %v13573_v28 }
 0xe11   :  { %10287 = vmatprep.subr.bf16.mxu1 %v13579_v41 }
 0xe14   :  { %10288 = vmatpush3.bf16.msra.mxu1 %v13585_v29 }
 0xe15   :  { %10289 = vmatprep.subr.bf16.mxu1 %v13591_v30 }
 0xe18   :  { %10290 = vmatpush3.bf16.msra.mxu1 %v13597_v31 }
 0xe19   :  { %10291 = vmatprep.subr.bf16.mxu1 %v13603_v32 }
 0xe1c   :  { %10292 = vmatpush3.bf16.msra.mxu1 %v13609_v34 }
 0xe1d   :  { %11626 = vmatprep.subr.bf16.mxu1 %v12789_v23 }
 0xe1f   :  { %2850 = vmatmul.mubr.bf16.vlgmr.msra.gmra.mrb[88].mxu1 %v9173_v54 }
 0xe20   :  { %11627 = vmatpush3.bf16.msra.mxu1 %v13616_v35  ;;  %11630 = vmatprep.mubr.msk.bf16.mxu1 %vm12790_vm0, %v12789_v23 }
 0xe21   :  { %11628 = vmatprep.subr.bf16.mxu1 %v12789_v23 }
 0xe24   :  { %11629 = vmatpush3.bf16.msra.mxu1 %v13680_v9 }
 0xe25   :  { %11634 = vmatprep.subr.bf16.mxu1 %v12789_v23 }
 0xe27   :  { %11631 = vmatmul.mubr.msk.bf16.vlgmr.msra.gmra.mrb[92].mxu1 %vm190_vm1, %v12440_v7  ;;  %v12448_v7 = vld [vmem:[%s15884_s3 + $0x220] sm:$0xff]  }
 0xe28   :  { %11642 = vmatprep.mubr.msk.bf16.mxu1 %vm12790_vm0, %v12789_v23  ;;  %11635 = vmatpush3.bf16.msra.mxu1 %v12441_v15 }
 0xe29   :  { %11636 = vmatprep.subr.bf16.mxu1 %v12789_v23 }
 0xe2c   :  { %11637 = vmatpush3.bf16.msra.mxu1 %v12442_v33 }
 0xe2d   :  { %11638 = vmatprep.subr.bf16.mxu1 %v12789_v23 }
 0xe30   :  { %11639 = vmatpush3.bf16.msra.mxu1 %v12443_v37  ;;  %v9228_v37 = vld [vmem:[%s15883_s0 + $0xd8] sm:$0xff] }
 0xe31   :  { %11640 = vmatprep.subr.bf16.mxu1 %v12789_v23 }
 0xe34   :  { %11641 = vmatpush3.bf16.msra.mxu1 %v12444_v40  ;;  %v12455_v40 = vld [vmem:[%s15884_s3 + $0x240] sm:$0xff]  }
 0xe35   :  { %10337 = vmatprep.subr.bf16.mxu1 %v13642_v44 }
 0xed2   :  { %v2794_v8 = vpop.f32.mrb[84].mxu1 }
 0xed3   :  { %v2800_v10 = vadd.f32 %v2794_v8, %v2625_v36  ;;  %v11604_v11 = vpop.f32.mrb[85].mxu1  ;;  %v12449_v8 = vld [vmem:[%s15884_s3 + $0x228] sm:$0xff]  }
 0xed4   :  { %v2797_v12 = vpop.f32.mrb[86].mxu1  ;;  %v12450_v11 = vld [vmem:[%s15884_s3 + $0x230] sm:$0xff]  }
 0xed5   :  { %v11605_v13 = vpop.f32.mrb[87].mxu1 }
 0xef2   :  { %v10293_v14 = vpop.f32.mrb[88].mxu1 }
 0xef3   :  { %v10294_v16 = vpop.f32.mrb[89].mxu1 }
 0xef4   :  { %v10295_v17 = vadd.f32 %v10294_v16, %v10293_v14  ;;  %v10296_v57 = vpop.f32.mrb[90].mxu1  ;;  %v12451_v16 = vld [vmem:[%s15884_s3 + $0x238] sm:$0xff]  }
 0xef5   :  { %v10297_v58 = vpop.f32.mrb[91].mxu1 }
 0xef6   :  { %v2852_v59 = vadd.f32 %v13464_v49, %v10295_v17  ;;  %v12454_v17 = vld [vmem:[%s15883_s0 + $0xe0] ss:$0 sps:$4 sm:$0xff]  }
 0xef8   :  { %v2892_v22 = vadd.f32 %v2891_v1, %v2852_v59 }
 0xefa   :  { %v2897_v61 = vmax.f32 %v2892_v22, 0.0  ;;  %v3066_v36 = vpop.f32.mrb[92].mxu1 }
 0xefb   :  { %v11632_v38 = vpop.f32.mrb[93].mxu1 }
 0xefc   :  { %v2898_v63 = vpack.c.bf16 %v2897_v61, %v2897_v61  ;;  %v3069_v51 = vpop.f32.mrb[94].mxu1 }
 0xefd   :  { %v11633_v39 = vpop.f32.mrb[95].mxu1  ;;  %v9231_v51 = vcombine.high %v9228_v37, %v9228_v37 }
 0xefe   :  { %11623 = vmatmul.mubr.msk.bf16.vlgmr.msra.gmra.mrb[96].mxu0 %vm415_vm2, %v2898_v63 }
 0xeff   :  { %10308 = vmatpush3.bf16.msra.mxu0 %v13525_v18  ;;  %3024 = vmatprep.mubr.bf16.mxu0 %v9193_v62 }
 0xf00   :  { %10309 = vmatprep.subr.bf16.mxu0 %v13531_v19 }
 0xf03   :  { %10310 = vmatpush3.bf16.msra.mxu0 %v13537_v20 }
 0xf04   :  { %10311 = vmatprep.subr.bf16.mxu0 %v13543_v21 }
 0xf07   :  { %10312 = vmatpush3.bf16.msra.mxu0 %v13549_v24 }
 0xf08   :  { %10313 = vmatprep.subr.bf16.mxu0 %v13555_v25 }
 0xf0b   :  { %10314 = vmatpush3.bf16.msra.mxu0 %v13561_v26 }
 0xf0c   :  { %10315 = vmatprep.subr.bf16.mxu0 %v13567_v27 }
 0xf0f   :  { %10316 = vmatpush3.bf16.msra.mxu0 %v13573_v28 }
 0xf10   :  { %10317 = vmatprep.subr.bf16.mxu0 %v13579_v41 }
 0xf13   :  { %10318 = vmatpush3.bf16.msra.mxu0 %v13585_v29 }
 0xf14   :  { %10319 = vmatprep.subr.bf16.mxu0 %v13591_v30 }
 0xf17   :  { %10320 = vmatpush3.bf16.msra.mxu0 %v13597_v31 }
 0xf18   :  { %10321 = vmatprep.subr.bf16.mxu0 %v13603_v32 }
 0xf1b   :  { %10322 = vmatpush3.bf16.msra.mxu0 %v13609_v34 }
 0xf1c   :  { %11646 = vmatprep.subr.bf16.mxu0 %v12789_v23 }
 0xf1e   :  { %3025 = vmatmul.mubr.bf16.vlgmr.msra.gmra.mrb[100].mxu0 %v9192_v0 }
 0xf1f   :  { %11647 = vmatpush3.bf16.msra.mxu0 %v13616_v35  ;;  %11650 = vmatprep.mubr.msk.bf16.mxu0 %vm12790_vm0, %v12789_v23 }
 0xf20   :  { %11648 = vmatprep.subr.bf16.mxu0 %v12789_v23 }
 0xf23   :  { %11649 = vmatpush3.bf16.msra.mxu0 %v13680_v9 }
 0xf24   :  { %11654 = vmatprep.subr.bf16.mxu0 %v12789_v23 }
 0xf26   :  { %11651 = vmatmul.mubr.msk.bf16.vlgmr.msra.gmra.mrb[104].mxu0 %vm190_vm1, %v12447_v42  ;;  %v12456_v42 = vld [vmem:[%s15884_s3 + $0x248] sm:$0xff]  }
 0xf27   :  { %11662 = vmatprep.mubr.msk.bf16.mxu0 %vm12790_vm0, %v12789_v23  ;;  %11655 = vmatpush3.bf16.msra.mxu0 %v12448_v7  ;;  %v14003_v7 = vld [vmem:[%s15885_s2] ss:$0 sm:$0xff] }
 0xf28   :  { %11656 = vmatprep.subr.bf16.mxu0 %v12789_v23 }
 0xf2b   :  { %11657 = vmatpush3.bf16.msra.mxu0 %v12449_v8 }
 0xf2c   :  { %11658 = vmatprep.subr.bf16.mxu0 %v12789_v23 }
 0xf2f   :  { %11659 = vmatpush3.bf16.msra.mxu0 %v12450_v11  ;;  %v9247_v11 = vld [vmem:[%s15883_s0 + $0xe4] sm:$0xff] }
 0xf30   :  { %11660 = vmatprep.subr.bf16.mxu0 %v12789_v23 }
 0xf33   :  { %11661 = vmatpush3.bf16.msra.mxu0 %v12451_v16 }
 0xf34   :  { %10367 = vmatprep.subr.bf16.mxu0 %v13642_v44 }
 0xfd1   :  { %v2969_v43 = vpop.f32.mrb[96].mxu0 }
 0xfd2   :  { %v2975_v45 = vadd.f32 %v2969_v43, %v2800_v10  ;;  %v11624_v46 = vpop.f32.mrb[97].mxu0 }
 0xfd3   :  { %v2972_v47 = vpop.f32.mrb[98].mxu0 }
 0xfd4   :  { %v11625_v48 = vpop.f32.mrb[99].mxu0 }
 0xff1   :  { %v10323_v50 = vpop.f32.mrb[100].mxu0 }
 0xff2   :  { %v10324_v52 = vpop.f32.mrb[101].mxu0 }
 0xff3   :  { %v10325_v53 = vadd.f32 %v10324_v52, %v10323_v50  ;;  %v10326_v54 = vpop.f32.mrb[102].mxu0  ;;  %v12458_v50 = vld [vmem:[%s15884_s3 + $0x258] sm:$0xff]   ;;  %v12461_v52 = vld [vmem:[%s15883_s0 + $0xec] ss:$0 sps:$4 sm:$0xff]  }
 0xff4   :  { %v10327_v55 = vpop.f32.mrb[103].mxu0 }
 0xff5   :  { %v3027_v56 = vadd.f32 %v13464_v49, %v10325_v53 }
 0xff7   :  { %v3067_v1 = vadd.f32 %v3066_v36, %v3027_v56 }
 0xff9   :  { %v3072_v3 = vmax.f32 %v3067_v1, 0.0  ;;  %v3241_v10 = vpop.f32.mrb[104].mxu0 }
 0xffa   :  { %v11652_v12 = vpop.f32.mrb[105].mxu0 }
 0xffb   :  { %v3073_v5 = vpack.c.bf16 %v3072_v3, %v3072_v3  ;;  %v3244_v13 = vpop.f32.mrb[106].mxu0 }
 0xffc   :  { %v11653_v14 = vpop.f32.mrb[107].mxu0  ;;  %v9250_v13 = vcombine.high %v9247_v11, %v9247_v11 }
 0xffd   :  { %11643 = vmatmul.mubr.msk.bf16.vlgmr.msra.gmra.mrb[96].mxu1 %vm415_vm2, %v3073_v5 }
 0xffe   :  { %10338 = vmatpush3.bf16.msra.mxu1 %v13525_v18  ;;  %3199 = vmatprep.mubr.bf16.mxu1 %v9212_v4 }
 0xfff   :  { %10339 = vmatprep.subr.bf16.mxu1 %v13531_v19 }
0x1002   :  { %10340 = vmatpush3.bf16.msra.mxu1 %v13537_v20 }
0x1003   :  { %10341 = vmatprep.subr.bf16.mxu1 %v13543_v21 }
0x1006   :  { %10342 = vmatpush3.bf16.msra.mxu1 %v13549_v24 }
0x1007   :  { %10343 = vmatprep.subr.bf16.mxu1 %v13555_v25 }
0x100a   :  { %10344 = vmatpush3.bf16.msra.mxu1 %v13561_v26 }
0x100b   :  { %10345 = vmatprep.subr.bf16.mxu1 %v13567_v27 }
0x100e   :  { %10346 = vmatpush3.bf16.msra.mxu1 %v13573_v28 }
0x100f   :  { %10347 = vmatprep.subr.bf16.mxu1 %v13579_v41 }
0x1012   :  { %10348 = vmatpush3.bf16.msra.mxu1 %v13585_v29 }
0x1013   :  { %10349 = vmatprep.subr.bf16.mxu1 %v13591_v30 }
0x1016   :  { %10350 = vmatpush3.bf16.msra.mxu1 %v13597_v31 }
0x1017   :  { %10351 = vmatprep.subr.bf16.mxu1 %v13603_v32 }
0x101a   :  { %10352 = vmatpush3.bf16.msra.mxu1 %v13609_v34 }
0x101b   :  { %11666 = vmatprep.subr.bf16.mxu1 %v12789_v23 }
0x101d   :  { %3200 = vmatmul.mubr.bf16.vlgmr.msra.gmra.mrb[100].mxu1 %v9211_v6 }
0x101e   :  { %11667 = vmatpush3.bf16.msra.mxu1 %v13616_v35  ;;  %11670 = vmatprep.mubr.msk.bf16.mxu1 %vm12790_vm0, %v12789_v23 }
0x101f   :  { %11668 = vmatprep.subr.bf16.mxu1 %v12789_v23 }
0x1022   :  { %11669 = vmatpush3.bf16.msra.mxu1 %v13680_v9 }
0x1023   :  { %11674 = vmatprep.subr.bf16.mxu1 %v12789_v23 }
0x1025   :  { %11671 = vmatmul.mubr.msk.bf16.vlgmr.msra.gmra.mrb[104].mxu1 %vm190_vm1, %v12454_v17 }
0x1026   :  { %11682 = vmatprep.mubr.msk.bf16.mxu1 %vm12790_vm0, %v12789_v23  ;;  %11675 = vmatpush3.bf16.msra.mxu1 %v12455_v40  ;;  %v14124_v40 = vld [vmem:[%s15882_s1 + $0x28] sm:$0xff]  }
0x1027   :  { %11676 = vmatprep.subr.bf16.mxu1 %v12789_v23 }
0x102a   :  { %11677 = vmatpush3.bf16.msra.mxu1 %v12456_v42  ;;  %v14130_v42 = vld [vmem:[%s15882_s1 + $0x70] sm:$0xff]  }
0x102b   :  { %11678 = vmatprep.subr.bf16.mxu1 %v12789_v23 }
0x10d0   :  { %v3144_v57 = vpop.f32.mrb[96].mxu1 }
0x10d1   :  { %v3150_v58 = vadd.f32 %v3144_v57, %v2975_v45  ;;  %v11644_v59 = vpop.f32.mrb[97].mxu1  ;;  %v12457_v45 = vld [vmem:[%s15884_s3 + $0x250] sm:$0xff]  }
0x10d2   :  { %v3147_v22 = vpop.f32.mrb[98].mxu1  ;;  %11679 = vmatpush3.bf16.msra.mxu1 %v12457_v45  ;;  %v14142_v45 = vld [vmem:[%s15882_s1 + $0x78] sm:$0xff]  }
0x10d3   :  { %v11645_v60 = vpop.f32.mrb[99].mxu1  ;;  %11680 = vmatprep.subr.bf16.mxu1 %v12789_v23  ;;  %v9266_v22 = vld [vmem:[%s15883_s0 + $0xf0] sm:$0xff] }
0x10d6   :  { %11681 = vmatpush3.bf16.msra.mxu1 %v12458_v50  ;;  %v12469_v50 = vld [vmem:[%s15884_s3 + $0x280] sm:$0xff]  }
0x10d7   :  { %10397 = vmatprep.subr.bf16.mxu1 %v13642_v44 }
0x10f0   :  { %v10353_v61 = vpop.f32.mrb[100].mxu1 }
0x10f1   :  { %v10354_v62 = vpop.f32.mrb[101].mxu1 }
0x10f2   :  { %v10355_v63 = vadd.f32 %v10354_v62, %v10353_v61  ;;  %v10356_v0 = vpop.f32.mrb[102].mxu1  ;;  %v9269_v61 = vcombine.high %v9266_v22, %v9266_v22 }
0x10f3   :  { %v10357_v15 = vpop.f32.mrb[103].mxu1  ;;  %v14070_v0 = vld [vmem:[%s15882_s1 + $0x48] sm:$0xff]  }
0x10f4   :  { %v3202_v33 = vadd.f32 %v13464_v49, %v10355_v63  ;;  %v9230_v49 = vcombine.low %v9228_v37, %v9228_v37  ;;  %v14064_v63 = vld [vmem:[%s15882_s1] sm:$0xff]   ;;  %v14076_v15 = vld [vmem:[%s15882_s1 + $0x8] sm:$0xff]   ;;  %v14094_v37 = vld [vmem:[%s15882_s1 + $0x58] sm:$0xff]  }
0x10f6   :  { %v3242_v36 = vadd.f32 %v3241_v10, %v3202_v33  ;;  %v14082_v33 = vld [vmem:[%s15882_s1 + $0x50] sm:$0xff]  }
0x10f8   :  { %v3247_v38 = vmax.f32 %v3242_v36, 0.0  ;;  %v3416_v43 = vpop.f32.mrb[104].mxu1  ;;  %v14088_v36 = vld [vmem:[%s15882_s1 + $0x10] sm:$0xff]  }
0x10f9   :  { %v11672_v46 = vpop.f32.mrb[105].mxu1 }
0x10fa   :  { %v3248_v39 = vpack.c.bf16 %v3247_v38, %v3247_v38  ;;  %v3419_v47 = vpop.f32.mrb[106].mxu1  ;;  %v14100_v38 = vld [vmem:[%s15882_s1 + $0x18] sm:$0xff]   ;;  %v9268_v46 = vcombine.low %v9266_v22, %v9266_v22 }
0x10fb   :  { %v11673_v48 = vpop.f32.mrb[107].mxu1  ;;  %v14148_v47 = vld [vmem:[%s15882_s1 + $0x38] sm:$0xff]  }
0x10fc   :  { %11663 = vmatmul.mubr.msk.bf16.vlgmr.msra.gmra.mrb[108].mxu0 %vm415_vm2, %v3248_v39  ;;  %v14112_v39 = vld [vmem:[%s15882_s1 + $0x20] sm:$0xff]  }
0x10fd   :  { %10368 = vmatpush3.bf16.msra.mxu0 %v13525_v18  ;;  %3374 = vmatprep.mubr.bf16.mxu0 %v9231_v51  ;;  %v14106_v51 = vld [vmem:[%s15882_s1 + $0x60] sm:$0xff]  }
0x10fe   :  { %10369 = vmatprep.subr.bf16.mxu0 %v13531_v19  ;;  %v14155_v48 = vld [vmem:[%s15882_s1 + $0x80] sm:$0xff]  }
0x1101   :  { %10370 = vmatpush3.bf16.msra.mxu0 %v13537_v20 }
0x1102   :  { %10371 = vmatprep.subr.bf16.mxu0 %v13543_v21 }
0x1105   :  { %10372 = vmatpush3.bf16.msra.mxu0 %v13549_v24 }
0x1106   :  { %10373 = vmatprep.subr.bf16.mxu0 %v13555_v25 }
0x1109   :  { %10374 = vmatpush3.bf16.msra.mxu0 %v13561_v26 }
0x110a   :  { %10375 = vmatprep.subr.bf16.mxu0 %v13567_v27 }
0x110d   :  { %10376 = vmatpush3.bf16.msra.mxu0 %v13573_v28 }
0x110e   :  { %10377 = vmatprep.subr.bf16.mxu0 %v13579_v41 }
0x1111   :  { %10378 = vmatpush3.bf16.msra.mxu0 %v13585_v29 }
0x1112   :  { %10379 = vmatprep.subr.bf16.mxu0 %v13591_v30 }
0x1115   :  { %10380 = vmatpush3.bf16.msra.mxu0 %v13597_v31 }
0x1116   :  { %10381 = vmatprep.subr.bf16.mxu0 %v13603_v32 }
0x1119   :  { %10382 = vmatpush3.bf16.msra.mxu0 %v13609_v34 }
0x111a   :  { %11686 = vmatprep.subr.bf16.mxu0 %v12789_v23 }
0x111c   :  { %3375 = vmatmul.mubr.bf16.vlgmr.msra.gmra.mrb[112].mxu0 %v9230_v49  ;;  %v14118_v49 = vld [vmem:[%s15882_s1 + $0x68] sm:$0xff]  }
0x111d   :  { %11687 = vmatpush3.bf16.msra.mxu0 %v13616_v35  ;;  %11690 = vmatprep.mubr.msk.bf16.mxu0 %vm12790_vm0, %v12789_v23 }
0x111e   :  { %11688 = vmatprep.subr.bf16.mxu0 %v12789_v23 }
0x1121   :  { %11689 = vmatpush3.bf16.msra.mxu0 %v13680_v9 }
0x1122   :  { %11694 = vmatprep.subr.bf16.mxu0 %v12789_v23 }
0x1124   :  { %11691 = vmatmul.mubr.msk.bf16.vlgmr.msra.gmra.mrb[116].mxu0 %vm190_vm1, %v12461_v52  ;;  %v12470_v52 = vld [vmem:[%s15884_s3 + $0x288] sm:$0xff]  }
0x1125   :  { %11702 = vmatprep.mubr.msk.bf16.mxu0 %vm12790_vm0, %v12789_v23 }
0x11cf   :  { %v3319_v53 = vpop.f32.mrb[108].mxu0 }
0x11d0   :  { %v3325_v54 = vadd.f32 %v3319_v53, %v3150_v58  ;;  %v11664_v55 = vpop.f32.mrb[109].mxu0 }
0x11d1   :  { %v3322_v56 = vpop.f32.mrb[110].mxu0 }
0x11d2   :  { %v11665_v1 = vpop.f32.mrb[111].mxu0 }
0x11d3   :  { %v12472_v1 = vld [vmem:[%s15884_s3 + $0x298] sm:$0xff]  }
0x11ef   :  { %v10383_v2 = vpop.f32.mrb[112].mxu0 }
0x11f0   :  { %v10384_v3 = vpop.f32.mrb[113].mxu0 }
0x11f1   :  { %v10385_v4 = vadd.f32 %v10384_v3, %v10383_v2  ;;  %v10386_v5 = vpop.f32.mrb[114].mxu0  ;;  %v14181_v2 = vld [vmem:[%s15882_s1 + $0x40] sm:$0xff]  }
0x11f2   :  { %v10387_v6 = vpop.f32.mrb[115].mxu0  ;;  %v12475_v3 = vld [vmem:[%s15883_s0 + $0x104] ss:$0 sps:$4 sm:$0xff]  }
0x11f3   :  { %v3377_v8 = vadd.f32 %v14003_v7, %v10385_v4 }
0x11f5   :  { %v3417_v10 = vadd.f32 %v3416_v43, %v3377_v8  ;;  %v14136_v43 = vld [vmem:[%s15882_s1 + $0x30] sm:$0xff]  }
0x11f7   :  { %v3422_v12 = vmax.f32 %v3417_v10, 0.0 }
0x11f9   :  { %v3423_v14 = vpack.c.bf16 %v3422_v12, %v3422_v12 }
0x11fb   :  { %11683 = vmatmul.mubr.msk.bf16.vlgmr.msra.gmra.mrb[108].mxu1 %vm415_vm2, %v3423_v14 }
0x11fc   :  { %10398 = vmatpush3.bf16.msra.mxu1 %v13525_v18  ;;  %3549 = vmatprep.mubr.bf16.mxu1 %v9250_v13  ;;  %v9249_v18 = vcombine.low %v9247_v11, %v9247_v11 }
0x11fd   :  { %10399 = vmatprep.subr.bf16.mxu1 %v13531_v19  ;;  %v12462_v19 = vld [vmem:[%s15884_s3 + $0x260] sm:$0xff]  }
0x11fe   :  { %11695 = vmatpush3.bf16.msra.mxu0 %v12462_v19 }
0x11ff   :  { %11696 = vmatprep.subr.bf16.mxu0 %v12789_v23 }
0x1200   :  { %10400 = vmatpush3.bf16.msra.mxu1 %v13537_v20  ;;  %v12463_v20 = vld [vmem:[%s15884_s3 + $0x268] sm:$0xff]  }
0x1201   :  { %10401 = vmatprep.subr.bf16.mxu1 %v13543_v21  ;;  %v3591_v21 = vpop.f32.mrb[116].mxu0 }
0x1202   :  { %11697 = vmatpush3.bf16.msra.mxu0 %v12463_v20 }
0x1203   :  { %11698 = vmatprep.subr.bf16.mxu0 %v12789_v23 }
0x1204   :  { %10402 = vmatpush3.bf16.msra.mxu1 %v13549_v24  ;;  %v12464_v24 = vld [vmem:[%s15884_s3 + $0x270] sm:$0xff]  }
0x1205   :  { %10403 = vmatprep.subr.bf16.mxu1 %v13555_v25  ;;  %v11692_v25 = vpop.f32.mrb[117].mxu0 }
0x1206   :  { %11699 = vmatpush3.bf16.msra.mxu0 %v12464_v24 }
0x1207   :  { %11700 = vmatprep.subr.bf16.mxu0 %v12789_v23 }
0x1208   :  { %10404 = vmatpush3.bf16.msra.mxu1 %v13561_v26  ;;  %v3594_v26 = vpop.f32.mrb[118].mxu0 }
0x1209   :  { %10405 = vmatprep.subr.bf16.mxu1 %v13567_v27  ;;  %v11693_v27 = vpop.f32.mrb[119].mxu0 }
0x120c   :  { %10406 = vmatpush3.bf16.msra.mxu1 %v13573_v28  ;;  %v12465_v28 = vld [vmem:[%s15884_s3 + $0x278] sm:$0xff]  }
0x120d   :  { %10407 = vmatprep.subr.bf16.mxu1 %v13579_v41  ;;  %11701 = vmatpush3.bf16.msra.mxu0 %v12465_v28  ;;  %v12468_v41 = vld [vmem:[%s15883_s0 + $0xf8] ss:$0 sps:$4 sm:$0xff]   ;;  %v14219_v28 = vld [vmem:[%s15882_s1 + $0x88] sm:$0xff]  }
0x120e   :  { %10427 = vmatprep.subr.bf16.mxu0 %v13642_v44 }
0x1210   :  { %10408 = vmatpush3.bf16.msra.mxu1 %v13585_v29 }
0x1211   :  { %10409 = vmatprep.subr.bf16.mxu1 %v13591_v30 }
0x1214   :  { %10410 = vmatpush3.bf16.msra.mxu1 %v13597_v31 }
0x1215   :  { %10411 = vmatprep.subr.bf16.mxu1 %v13603_v32 }
0x1218   :  { %10412 = vmatpush3.bf16.msra.mxu1 %v13609_v34 }
0x1219   :  { %11706 = vmatprep.subr.bf16.mxu1 %v12789_v23 }
0x121b   :  { %3550 = vmatmul.mubr.bf16.vlgmr.msra.gmra.mrb[112].mxu1 %v9249_v18 }
0x121c   :  { %11707 = vmatpush3.bf16.msra.mxu1 %v13616_v35  ;;  %11710 = vmatprep.mubr.msk.bf16.mxu1 %vm12790_vm0, %v12789_v23 }
0x121d   :  { %11708 = vmatprep.subr.bf16.mxu1 %v12789_v23 }
0x1220   :  { %11709 = vmatpush3.bf16.msra.mxu1 %v13680_v9 }
0x1221   :  { %11714 = vmatprep.subr.bf16.mxu1 %v12789_v23 }
0x1223   :  { %11711 = vmatmul.mubr.msk.bf16.vlgmr.msra.gmra.mrb[116].mxu1 %vm190_vm1, %v12468_v41  ;;  %v12476_v41 = vld [vmem:[%s15884_s3 + $0x2a0] sm:$0xff]  }
0x1224   :  { %11722 = vmatprep.mubr.msk.bf16.mxu1 %vm12790_vm0, %v12789_v23  ;;  %11715 = vmatpush3.bf16.msra.mxu1 %v12469_v50 }
0x1225   :  { %11716 = vmatprep.subr.bf16.mxu1 %v12789_v23 }
0x1228   :  { %11717 = vmatpush3.bf16.msra.mxu1 %v12470_v52 }
0x1229   :  { %11718 = vmatprep.subr.bf16.mxu1 %v12789_v23 }
0x12ce   :  { %v3494_v29 = vpop.f32.mrb[108].mxu1 }
0x12cf   :  { %v14054_v30 = vadd.f32 %v3494_v29, %v3325_v54  ;;  %v11684_v31 = vpop.f32.mrb[109].mxu1  ;;  %v12477_v29 = vld [vmem:[%s15884_s3 + $0x2a8] sm:$0xff]  }
0x12d0   :  { %v3497_v32 = vpop.f32.mrb[110].mxu1  ;;  %v12478_v31 = vld [vmem:[%s15884_s3 + $0x2b0] sm:$0xff]  }
0x12d1   :  { %v11685_v34 = vpop.f32.mrb[111].mxu1 }
0x12ee   :  { %v10413_v35 = vpop.f32.mrb[112].mxu1 }
0x12ef   :  { %v10414_v16 = vpop.f32.mrb[113].mxu1 }
0x12f0   :  { %v10415_v17 = vadd.f32 %v10414_v16, %v10413_v35  ;;  %v10416_v57 = vpop.f32.mrb[114].mxu1  ;;  %v12479_v16 = vld [vmem:[%s15884_s3 + $0x2b8] sm:$0xff]  }
0x12f1   :  { %v10417_v44 = vpop.f32.mrb[115].mxu1 }
0x12f2   :  { %v3552_v58 = vadd.f32 %v14003_v7, %v10415_v17  ;;  %v12482_v17 = vld [vmem:[%s15883_s0 + $0x110] ss:$0 sps:$4 sm:$0xff]  }
0x12f4   :  { %v3592_v59 = vadd.f32 %v3591_v21, %v3552_v58  ;;  %v9285_v21 = vld [vmem:[%s15883_s0 + $0xfc] sm:$0xff] }
0x12f5   :  { %v9288_v25 = vcombine.high %v9285_v21, %v9285_v21  ;;  %v9287_v27 = vcombine.low %v9285_v21, %v9285_v21 }
0x12f6   :  { %v3597_v60 = vmax.f32 %v3592_v59, 0.0  ;;  %v3766_v53 = vpop.f32.mrb[116].mxu1 }
0x12f7   :  { %v11712_v54 = vpop.f32.mrb[117].mxu1 }
0x12f8   :  { %v3598_v62 = vpack.c.bf16 %v3597_v60, %v3597_v60  ;;  %v3769_v55 = vpop.f32.mrb[118].mxu1 }
0x12f9   :  { %v11713_v56 = vpop.f32.mrb[119].mxu1 }
0x12fa   :  { %11703 = vmatmul.mubr.msk.bf16.vlgmr.msra.gmra.mrb[120].mxu0 %vm415_vm2, %v3598_v62 }
0x12fb   :  { %10428 = vmatpush3.bf16.msra.mxu0 %v14064_v63  ;;  %3724 = vmatprep.mubr.bf16.mxu0 %v9269_v61 }
0x12fc   :  { %10429 = vmatprep.subr.bf16.mxu0 %v14070_v0 }
0x12ff   :  { %10430 = vmatpush3.bf16.msra.mxu0 %v14076_v15 }
0x1300   :  { %10431 = vmatprep.subr.bf16.mxu0 %v14082_v33 }
0x1303   :  { %10432 = vmatpush3.bf16.msra.mxu0 %v14088_v36 }
0x1304   :  { %10433 = vmatprep.subr.bf16.mxu0 %v14094_v37 }
0x1307   :  { %10434 = vmatpush3.bf16.msra.mxu0 %v14100_v38 }
0x1308   :  { %10435 = vmatprep.subr.bf16.mxu0 %v14106_v51 }
0x130b   :  { %10436 = vmatpush3.bf16.msra.mxu0 %v14112_v39 }
0x130c   :  { %10437 = vmatprep.subr.bf16.mxu0 %v14118_v49 }
0x130f   :  { %10438 = vmatpush3.bf16.msra.mxu0 %v14124_v40 }
0x1310   :  { %10439 = vmatprep.subr.bf16.mxu0 %v14130_v42 }
0x1313   :  { %10440 = vmatpush3.bf16.msra.mxu0 %v14136_v43 }
0x1314   :  { %10441 = vmatprep.subr.bf16.mxu0 %v14142_v45 }
0x1317   :  { %10442 = vmatpush3.bf16.msra.mxu0 %v14148_v47 }
0x1318   :  { %11726 = vmatprep.subr.bf16.mxu0 %v12789_v23 }
0x131a   :  { %3725 = vmatmul.mubr.bf16.vlgmr.msra.gmra.mrb[124].mxu0 %v9268_v46 }
0x131b   :  { %11727 = vmatpush3.bf16.msra.mxu0 %v14155_v48  ;;  %11730 = vmatprep.mubr.msk.bf16.mxu0 %vm12790_vm0, %v12789_v23 }
0x131c   :  { %11728 = vmatprep.subr.bf16.mxu0 %v12789_v23 }
0x131f   :  { %11729 = vmatpush3.bf16.msra.mxu0 %v13680_v9  ;;  %v12471_v9 = vld [vmem:[%s15884_s3 + $0x290] sm:$0xff]  }
0x1320   :  { %11734 = vmatprep.subr.bf16.mxu0 %v12789_v23  ;;  %11719 = vmatpush3.bf16.msra.mxu1 %v12471_v9  ;;  %v9304_v9 = vld [vmem:[%s15883_s0 + $0x108] sm:$0xff] }
0x1321   :  { %11720 = vmatprep.subr.bf16.mxu1 %v12789_v23  ;;  %v9307_v55 = vcombine.high %v9304_v9, %v9304_v9 }
0x1322   :  { %11731 = vmatmul.mubr.msk.bf16.vlgmr.msra.gmra.mrb[128].mxu0 %vm190_vm1, %v12475_v3  ;;  %v12483_v3 = vld [vmem:[%s15884_s3 + $0x2c0] sm:$0xff]  }
0x1323   :  { %11742 = vmatprep.mubr.msk.bf16.mxu0 %vm12790_vm0, %v12789_v23  ;;  %11735 = vmatpush3.bf16.msra.mxu0 %v12476_v41 }
0x1324   :  { %11721 = vmatpush3.bf16.msra.mxu1 %v12472_v1  ;;  %11736 = vmatprep.subr.bf16.mxu0 %v12789_v23  ;;  %v9306_v1 = vcombine.low %v9304_v9, %v9304_v9 }
0x1325   :  { %10457 = vmatprep.subr.bf16.mxu1 %v14181_v2 }
0x1327   :  { %11737 = vmatpush3.bf16.msra.mxu0 %v12477_v29 }
0x1328   :  { %11738 = vmatprep.subr.bf16.mxu0 %v12789_v23 }
0x132b   :  { %11739 = vmatpush3.bf16.msra.mxu0 %v12478_v31  ;;  %v9323_v31 = vld [vmem:[%s15883_s0 + $0x114] sm:$0xff] }
0x132c   :  { %11740 = vmatprep.subr.bf16.mxu0 %v12789_v23 }
0x132f   :  { %11741 = vmatpush3.bf16.msra.mxu0 %v12479_v16  ;;  %v9325_v16 = vcombine.low %v9323_v31, %v9323_v31 }
0x1330   :  { %10487 = vmatprep.subr.bf16.mxu0 %v14181_v2 }
0x13cd   :  { %v3669_v4 = vpop.f32.mrb[120].mxu0 }
0x13ce   :  { %v3675_v5 = vadd.f32 %v3669_v4, %v14054_v30  ;;  %v11704_v6 = vpop.f32.mrb[121].mxu0  ;;  %v12484_v4 = vld [vmem:[%s15884_s3 + $0x2c8] sm:$0xff]  }
0x13cf   :  { %v3672_v8 = vpop.f32.mrb[122].mxu0  ;;  %v12485_v6 = vld [vmem:[%s15884_s3 + $0x2d0] sm:$0xff]  }
0x13d0   :  { %v11705_v10 = vpop.f32.mrb[123].mxu0 }
0x13ed   :  { %v10443_v11 = vpop.f32.mrb[124].mxu0 }
0x13ee   :  { %v10444_v12 = vpop.f32.mrb[125].mxu0 }
0x13ef   :  { %v10445_v13 = vadd.f32 %v10444_v12, %v10443_v11  ;;  %v10446_v14 = vpop.f32.mrb[126].mxu0  ;;  %v12486_v12 = vld [vmem:[%s15884_s3 + $0x2d8] sm:$0xff]  }
0x13f0   :  { %v10447_v18 = vpop.f32.mrb[127].mxu0 }
0x13f1   :  { %v3727_v19 = vadd.f32 %v14003_v7, %v10445_v13  ;;  %v12489_v13 = vld [vmem:[%s15883_s0 + $0x11c] ss:$0 sps:$4 sm:$0xff]  }
0x13f3   :  { %v3767_v20 = vadd.f32 %v3766_v53, %v3727_v19 }
0x13f5   :  { %v3772_v24 = vmax.f32 %v3767_v20, 0.0  ;;  %v3941_v30 = vpop.f32.mrb[128].mxu0 }
0x13f6   :  { %v11732_v32 = vpop.f32.mrb[129].mxu0 }
0x13f7   :  { %v3773_v26 = vpack.c.bf16 %v3772_v24, %v3772_v24  ;;  %v3944_v34 = vpop.f32.mrb[130].mxu0 }
0x13f8   :  { %v11733_v35 = vpop.f32.mrb[131].mxu0  ;;  %v9326_v34 = vcombine.high %v9323_v31, %v9323_v31 }
0x13f9   :  { %11723 = vmatmul.mubr.msk.bf16.vlgmr.msra.gmra.mrb[120].mxu1 %vm415_vm2, %v3773_v26 }
0x13fa   :  { %10458 = vmatpush3.bf16.msra.mxu1 %v14064_v63  ;;  %3899 = vmatprep.mubr.bf16.mxu1 %v9288_v25 }
0x13fb   :  { %10459 = vmatprep.subr.bf16.mxu1 %v14070_v0 }
0x13fe   :  { %10460 = vmatpush3.bf16.msra.mxu1 %v14076_v15 }
0x13ff   :  { %10461 = vmatprep.subr.bf16.mxu1 %v14082_v33 }
0x1402   :  { %10462 = vmatpush3.bf16.msra.mxu1 %v14088_v36 }
0x1403   :  { %10463 = vmatprep.subr.bf16.mxu1 %v14094_v37 }
0x1406   :  { %10464 = vmatpush3.bf16.msra.mxu1 %v14100_v38 }
0x1407   :  { %10465 = vmatprep.subr.bf16.mxu1 %v14106_v51 }
0x140a   :  { %10466 = vmatpush3.bf16.msra.mxu1 %v14112_v39 }
0x140b   :  { %10467 = vmatprep.subr.bf16.mxu1 %v14118_v49 }
0x140e   :  { %10468 = vmatpush3.bf16.msra.mxu1 %v14124_v40 }
0x140f   :  { %10469 = vmatprep.subr.bf16.mxu1 %v14130_v42 }
0x1412   :  { %10470 = vmatpush3.bf16.msra.mxu1 %v14136_v43 }
0x1413   :  { %10471 = vmatprep.subr.bf16.mxu1 %v14142_v45 }
0x1416   :  { %10472 = vmatpush3.bf16.msra.mxu1 %v14148_v47 }
0x1417   :  { %11746 = vmatprep.subr.bf16.mxu1 %v12789_v23 }
0x1419   :  { %3900 = vmatmul.mubr.bf16.vlgmr.msra.gmra.mrb[124].mxu1 %v9287_v27 }
0x141a   :  { %11747 = vmatpush3.bf16.msra.mxu1 %v14155_v48  ;;  %11750 = vmatprep.mubr.msk.bf16.mxu1 %vm12790_vm0, %v12789_v23 }
0x141b   :  { %11748 = vmatprep.subr.bf16.mxu1 %v12789_v23 }
0x141e   :  { %11749 = vmatpush3.bf16.msra.mxu1 %v14219_v28 }
0x141f   :  { %11754 = vmatprep.subr.bf16.mxu1 %v12789_v23 }
0x1421   :  { %11751 = vmatmul.mubr.msk.bf16.vlgmr.msra.gmra.mrb[128].mxu1 %vm190_vm1, %v12482_v17  ;;  %v12490_v17 = vld [vmem:[%s15884_s3 + $0x2e0] sm:$0xff]  }
0x1422   :  { %11762 = vmatprep.mubr.msk.bf16.mxu1 %vm12790_vm0, %v12789_v23  ;;  %11755 = vmatpush3.bf16.msra.mxu1 %v12483_v3 }
0x1423   :  { %11756 = vmatprep.subr.bf16.mxu1 %v12789_v23 }
0x1426   :  { %11757 = vmatpush3.bf16.msra.mxu1 %v12484_v4 }
0x1427   :  { %11758 = vmatprep.subr.bf16.mxu1 %v12789_v23 }
0x142a   :  { %11759 = vmatpush3.bf16.msra.mxu1 %v12485_v6  ;;  %v9342_v6 = vld [vmem:[%s15883_s0 + $0x120] sm:$0xff] }
0x142b   :  { %11760 = vmatprep.subr.bf16.mxu1 %v12789_v23 }
0x142e   :  { %11761 = vmatpush3.bf16.msra.mxu1 %v12486_v12  ;;  %v9344_v12 = vcombine.low %v9342_v6, %v9342_v6 }
0x142f   :  { %10517 = vmatprep.subr.bf16.mxu1 %v14181_v2 }
0x14cc   :  { %v3844_v57 = vpop.f32.mrb[120].mxu1 }
0x14cd   :  { %v3850_v44 = vadd.f32 %v3844_v57, %v3675_v5  ;;  %v11724_v58 = vpop.f32.mrb[121].mxu1  ;;  %v12491_v57 = vld [vmem:[%s15884_s3 + $0x2e8] sm:$0xff]  }
0x14ce   :  { %v3847_v59 = vpop.f32.mrb[122].mxu1  ;;  %v12492_v58 = vld [vmem:[%s15884_s3 + $0x2f0] sm:$0xff]  }
0x14cf   :  { %v11725_v22 = vpop.f32.mrb[123].mxu1 }
0x14ec   :  { %v10473_v60 = vpop.f32.mrb[124].mxu1 }
0x14ed   :  { %v10474_v61 = vpop.f32.mrb[125].mxu1 }
0x14ee   :  { %v10475_v62 = vadd.f32 %v10474_v61, %v10473_v60  ;;  %v10476_v46 = vpop.f32.mrb[126].mxu1  ;;  %v12493_v61 = vld [vmem:[%s15884_s3 + $0x2f8] sm:$0xff]  }
0x14ef   :  { %v10477_v50 = vpop.f32.mrb[127].mxu1 }
0x14f0   :  { %v3902_v52 = vadd.f32 %v14003_v7, %v10475_v62  ;;  %v12496_v62 = vld [vmem:[%s15883_s0 + $0x128] ss:$0 sps:$4 sm:$0xff]  }
0x14f2   :  { %v3942_v53 = vadd.f32 %v3941_v30, %v3902_v52 }
0x14f4   :  { %v3947_v54 = vmax.f32 %v3942_v53, 0.0  ;;  %v4116_v5 = vpop.f32.mrb[128].mxu1 }
0x14f5   :  { %v11752_v8 = vpop.f32.mrb[129].mxu1 }
0x14f6   :  { %v3948_v56 = vpack.c.bf16 %v3947_v54, %v3947_v54  ;;  %v4119_v10 = vpop.f32.mrb[130].mxu1 }
0x14f7   :  { %v11753_v11 = vpop.f32.mrb[131].mxu1  ;;  %v9345_v10 = vcombine.high %v9342_v6, %v9342_v6 }
0x14f8   :  { %11743 = vmatmul.mubr.msk.bf16.vlgmr.msra.gmra.mrb[132].mxu0 %vm415_vm2, %v3948_v56 }
0x14f9   :  { %10488 = vmatpush3.bf16.msra.mxu0 %v14064_v63  ;;  %4074 = vmatprep.mubr.bf16.mxu0 %v9307_v55 }
0x14fa   :  { %10489 = vmatprep.subr.bf16.mxu0 %v14070_v0 }
0x14fd   :  { %10490 = vmatpush3.bf16.msra.mxu0 %v14076_v15 }
0x14fe   :  { %10491 = vmatprep.subr.bf16.mxu0 %v14082_v33 }
0x1501   :  { %10492 = vmatpush3.bf16.msra.mxu0 %v14088_v36 }
0x1502   :  { %10493 = vmatprep.subr.bf16.mxu0 %v14094_v37 }
0x1505   :  { %10494 = vmatpush3.bf16.msra.mxu0 %v14100_v38 }
0x1506   :  { %10495 = vmatprep.subr.bf16.mxu0 %v14106_v51 }
0x1509   :  { %10496 = vmatpush3.bf16.msra.mxu0 %v14112_v39 }
0x150a   :  { %10497 = vmatprep.subr.bf16.mxu0 %v14118_v49 }
0x150d   :  { %10498 = vmatpush3.bf16.msra.mxu0 %v14124_v40 }
0x150e   :  { %10499 = vmatprep.subr.bf16.mxu0 %v14130_v42 }
0x1511   :  { %10500 = vmatpush3.bf16.msra.mxu0 %v14136_v43 }
0x1512   :  { %10501 = vmatprep.subr.bf16.mxu0 %v14142_v45 }
0x1515   :  { %10502 = vmatpush3.bf16.msra.mxu0 %v14148_v47 }
0x1516   :  { %11766 = vmatprep.subr.bf16.mxu0 %v12789_v23 }
0x1518   :  { %4075 = vmatmul.mubr.bf16.vlgmr.msra.gmra.mrb[136].mxu0 %v9306_v1 }
0x1519   :  { %11767 = vmatpush3.bf16.msra.mxu0 %v14155_v48  ;;  %11770 = vmatprep.mubr.msk.bf16.mxu0 %vm12790_vm0, %v12789_v23 }
0x151a   :  { %11768 = vmatprep.subr.bf16.mxu0 %v12789_v23 }
0x151d   :  { %11769 = vmatpush3.bf16.msra.mxu0 %v14219_v28 }
0x151e   :  { %11774 = vmatprep.subr.bf16.mxu0 %v12789_v23 }
0x1520   :  { %11771 = vmatmul.mubr.msk.bf16.vlgmr.msra.gmra.mrb[140].mxu0 %vm190_vm1, %v12489_v13  ;;  %v12497_v13 = vld [vmem:[%s15884_s3 + $0x300] sm:$0xff]  }
0x1521   :  { %11782 = vmatprep.mubr.msk.bf16.mxu0 %vm12790_vm0, %v12789_v23  ;;  %11775 = vmatpush3.bf16.msra.mxu0 %v12490_v17 }
0x1522   :  { %11776 = vmatprep.subr.bf16.mxu0 %v12789_v23 }
0x1525   :  { %11777 = vmatpush3.bf16.msra.mxu0 %v12491_v57 }
0x1526   :  { %11778 = vmatprep.subr.bf16.mxu0 %v12789_v23 }
0x1529   :  { %11779 = vmatpush3.bf16.msra.mxu0 %v12492_v58  ;;  %v9361_v58 = vld [vmem:[%s15883_s0 + $0x12c] sm:$0xff] }
0x152a   :  { %11780 = vmatprep.subr.bf16.mxu0 %v12789_v23 }
0x152d   :  { %11781 = vmatpush3.bf16.msra.mxu0 %v12493_v61  ;;  %v9363_v61 = vcombine.low %v9361_v58, %v9361_v58 }
0x152e   :  { %10547 = vmatprep.subr.bf16.mxu0 %v14181_v2 }
0x15cb   :  { %v4019_v14 = vpop.f32.mrb[132].mxu0 }
0x15cc   :  { %v4025_v18 = vadd.f32 %v4019_v14, %v3850_v44  ;;  %v11744_v19 = vpop.f32.mrb[133].mxu0  ;;  %v12498_v14 = vld [vmem:[%s15884_s3 + $0x308] sm:$0xff]  }
0x15cd   :  { %v4022_v20 = vpop.f32.mrb[134].mxu0  ;;  %v12499_v19 = vld [vmem:[%s15884_s3 + $0x310] sm:$0xff]  }
0x15ce   :  { %v11745_v21 = vpop.f32.mrb[135].mxu0 }
0x15eb   :  { %v10503_v24 = vpop.f32.mrb[136].mxu0 }
0x15ec   :  { %v10504_v25 = vpop.f32.mrb[137].mxu0 }
0x15ed   :  { %v10505_v26 = vadd.f32 %v10504_v25, %v10503_v24  ;;  %v10506_v27 = vpop.f32.mrb[138].mxu0  ;;  %v12500_v25 = vld [vmem:[%s15884_s3 + $0x318] sm:$0xff]  }
0x15ee   :  { %v10507_v41 = vpop.f32.mrb[139].mxu0 }
0x15ef   :  { %v4077_v29 = vadd.f32 %v14003_v7, %v10505_v26  ;;  %v12503_v26 = vld [vmem:[%s15883_s0 + $0x134] ss:$0 sps:$4 sm:$0xff]  }
0x15f1   :  { %v4117_v30 = vadd.f32 %v4116_v5, %v4077_v29 }
0x15f3   :  { %v4122_v32 = vmax.f32 %v4117_v30, 0.0  ;;  %v4291_v44 = vpop.f32.mrb[140].mxu0 }
0x15f4   :  { %v11772_v59 = vpop.f32.mrb[141].mxu0 }
0x15f5   :  { %v4123_v35 = vpack.c.bf16 %v4122_v32, %v4122_v32  ;;  %v4294_v22 = vpop.f32.mrb[142].mxu0 }
0x15f6   :  { %v11773_v60 = vpop.f32.mrb[143].mxu0  ;;  %v9364_v22 = vcombine.high %v9361_v58, %v9361_v58 }
0x15f7   :  { %11763 = vmatmul.mubr.msk.bf16.vlgmr.msra.gmra.mrb[132].mxu1 %vm415_vm2, %v4123_v35 }
0x15f8   :  { %10518 = vmatpush3.bf16.msra.mxu1 %v14064_v63  ;;  %4249 = vmatprep.mubr.bf16.mxu1 %v9326_v34 }
0x15f9   :  { %10519 = vmatprep.subr.bf16.mxu1 %v14070_v0 }
0x15fc   :  { %10520 = vmatpush3.bf16.msra.mxu1 %v14076_v15 }
0x15fd   :  { %10521 = vmatprep.subr.bf16.mxu1 %v14082_v33 }
0x1600   :  { %10522 = vmatpush3.bf16.msra.mxu1 %v14088_v36 }
0x1601   :  { %10523 = vmatprep.subr.bf16.mxu1 %v14094_v37 }
0x1604   :  { %10524 = vmatpush3.bf16.msra.mxu1 %v14100_v38 }
0x1605   :  { %10525 = vmatprep.subr.bf16.mxu1 %v14106_v51 }
0x1608   :  { %10526 = vmatpush3.bf16.msra.mxu1 %v14112_v39 }
0x1609   :  { %10527 = vmatprep.subr.bf16.mxu1 %v14118_v49 }
0x160c   :  { %10528 = vmatpush3.bf16.msra.mxu1 %v14124_v40 }
0x160d   :  { %10529 = vmatprep.subr.bf16.mxu1 %v14130_v42 }
0x1610   :  { %10530 = vmatpush3.bf16.msra.mxu1 %v14136_v43 }
0x1611   :  { %10531 = vmatprep.subr.bf16.mxu1 %v14142_v45 }
0x1614   :  { %10532 = vmatpush3.bf16.msra.mxu1 %v14148_v47 }
0x1615   :  { %11786 = vmatprep.subr.bf16.mxu1 %v12789_v23 }
0x1617   :  { %4250 = vmatmul.mubr.bf16.vlgmr.msra.gmra.mrb[136].mxu1 %v9325_v16 }
0x1618   :  { %11787 = vmatpush3.bf16.msra.mxu1 %v14155_v48  ;;  %11790 = vmatprep.mubr.msk.bf16.mxu1 %vm12790_vm0, %v12789_v23 }
0x1619   :  { %11788 = vmatprep.subr.bf16.mxu1 %v12789_v23 }
0x161c   :  { %11789 = vmatpush3.bf16.msra.mxu1 %v14219_v28 }
0x161d   :  { %11794 = vmatprep.subr.bf16.mxu1 %v12789_v23 }
0x161f   :  { %11791 = vmatmul.mubr.msk.bf16.vlgmr.msra.gmra.mrb[140].mxu1 %vm190_vm1, %v12496_v62  ;;  %v12504_v62 = vld [vmem:[%s15884_s3 + $0x320] sm:$0xff]  }
0x1620   :  { %11802 = vmatprep.mubr.msk.bf16.mxu1 %vm12790_vm0, %v12789_v23  ;;  %11795 = vmatpush3.bf16.msra.mxu1 %v12497_v13 }
0x1621   :  { %11796 = vmatprep.subr.bf16.mxu1 %v12789_v23 }
0x1624   :  { %11797 = vmatpush3.bf16.msra.mxu1 %v12498_v14 }
0x1625   :  { %11798 = vmatprep.subr.bf16.mxu1 %v12789_v23 }
0x1628   :  { %11799 = vmatpush3.bf16.msra.mxu1 %v12499_v19  ;;  %v9380_v19 = vld [vmem:[%s15883_s0 + $0x138] sm:$0xff] }
0x1629   :  { %11800 = vmatprep.subr.bf16.mxu1 %v12789_v23 }
0x162c   :  { %11801 = vmatpush3.bf16.msra.mxu1 %v12500_v25  ;;  %v9382_v25 = vcombine.low %v9380_v19, %v9380_v19 }
0x162d   :  { %10577 = vmatprep.subr.bf16.mxu1 %v14181_v2 }
0x16ca   :  { %v4194_v46 = vpop.f32.mrb[132].mxu1 }
0x16cb   :  { %v4200_v50 = vadd.f32 %v4194_v46, %v4025_v18  ;;  %v11764_v52 = vpop.f32.mrb[133].mxu1  ;;  %v12505_v46 = vld [vmem:[%s15884_s3 + $0x328] sm:$0xff]  }
0x16cc   :  { %v4197_v53 = vpop.f32.mrb[134].mxu1  ;;  %v12506_v52 = vld [vmem:[%s15884_s3 + $0x330] sm:$0xff]  }
0x16cd   :  { %v11765_v9 = vpop.f32.mrb[135].mxu1 }
0x16ea   :  { %v10533_v54 = vpop.f32.mrb[136].mxu1 }
0x16eb   :  { %v10534_v55 = vpop.f32.mrb[137].mxu1 }
0x16ec   :  { %v10535_v56 = vadd.f32 %v10534_v55, %v10533_v54  ;;  %v10536_v1 = vpop.f32.mrb[138].mxu1  ;;  %v12507_v55 = vld [vmem:[%s15884_s3 + $0x338] sm:$0xff]  }
0x16ed   :  { %v10537_v3 = vpop.f32.mrb[139].mxu1 }
0x16ee   :  { %v4252_v4 = vadd.f32 %v14003_v7, %v10535_v56  ;;  %v12510_v56 = vld [vmem:[%s15883_s0 + $0x140] ss:$0 sps:$4 sm:$0xff]  }
0x16f0   :  { %v4292_v5 = vadd.f32 %v4291_v44, %v4252_v4 }
0x16f2   :  { %v4297_v8 = vmax.f32 %v4292_v5, 0.0  ;;  %v4466_v18 = vpop.f32.mrb[140].mxu1 }
0x16f3   :  { %v11792_v20 = vpop.f32.mrb[141].mxu1 }
0x16f4   :  { %v4298_v11 = vpack.c.bf16 %v4297_v8, %v4297_v8  ;;  %v4469_v21 = vpop.f32.mrb[142].mxu1 }
0x16f5   :  { %v11793_v24 = vpop.f32.mrb[143].mxu1  ;;  %v9383_v21 = vcombine.high %v9380_v19, %v9380_v19 }
0x16f6   :  { %11783 = vmatmul.mubr.msk.bf16.vlgmr.msra.gmra.mrb[144].mxu0 %vm415_vm2, %v4298_v11 }
0x16f7   :  { %10548 = vmatpush3.bf16.msra.mxu0 %v14064_v63  ;;  %4424 = vmatprep.mubr.bf16.mxu0 %v9345_v10 }
0x16f8   :  { %10549 = vmatprep.subr.bf16.mxu0 %v14070_v0 }
0x16fb   :  { %10550 = vmatpush3.bf16.msra.mxu0 %v14076_v15 }
0x16fc   :  { %10551 = vmatprep.subr.bf16.mxu0 %v14082_v33 }
0x16ff   :  { %10552 = vmatpush3.bf16.msra.mxu0 %v14088_v36 }
0x1700   :  { %10553 = vmatprep.subr.bf16.mxu0 %v14094_v37 }
0x1703   :  { %10554 = vmatpush3.bf16.msra.mxu0 %v14100_v38 }
0x1704   :  { %10555 = vmatprep.subr.bf16.mxu0 %v14106_v51 }
0x1707   :  { %10556 = vmatpush3.bf16.msra.mxu0 %v14112_v39 }
0x1708   :  { %10557 = vmatprep.subr.bf16.mxu0 %v14118_v49 }
0x170b   :  { %10558 = vmatpush3.bf16.msra.mxu0 %v14124_v40 }
0x170c   :  { %10559 = vmatprep.subr.bf16.mxu0 %v14130_v42 }
0x170f   :  { %10560 = vmatpush3.bf16.msra.mxu0 %v14136_v43 }
0x1710   :  { %10561 = vmatprep.subr.bf16.mxu0 %v14142_v45 }
0x1713   :  { %10562 = vmatpush3.bf16.msra.mxu0 %v14148_v47 }
0x1714   :  { %11806 = vmatprep.subr.bf16.mxu0 %v12789_v23 }
0x1716   :  { %4425 = vmatmul.mubr.bf16.vlgmr.msra.gmra.mrb[148].mxu0 %v9344_v12 }
0x1717   :  { %11807 = vmatpush3.bf16.msra.mxu0 %v14155_v48  ;;  %11810 = vmatprep.mubr.msk.bf16.mxu0 %vm12790_vm0, %v12789_v23 }
0x1718   :  { %11808 = vmatprep.subr.bf16.mxu0 %v12789_v23 }
0x171b   :  { %11809 = vmatpush3.bf16.msra.mxu0 %v14219_v28 }
0x171c   :  { %11814 = vmatprep.subr.bf16.mxu0 %v12789_v23 }
0x171e   :  { %11811 = vmatmul.mubr.msk.bf16.vlgmr.msra.gmra.mrb[152].mxu0 %vm190_vm1, %v12503_v26  ;;  %v12511_v26 = vld [vmem:[%s15884_s3 + $0x340] sm:$0xff]  }
0x171f   :  { %11822 = vmatprep.mubr.msk.bf16.mxu0 %vm12790_vm0, %v12789_v23  ;;  %11815 = vmatpush3.bf16.msra.mxu0 %v12504_v62 }
0x1720   :  { %11816 = vmatprep.subr.bf16.mxu0 %v12789_v23 }
0x1723   :  { %11817 = vmatpush3.bf16.msra.mxu0 %v12505_v46 }
0x1724   :  { %11818 = vmatprep.subr.bf16.mxu0 %v12789_v23 }
0x1727   :  { %11819 = vmatpush3.bf16.msra.mxu0 %v12506_v52  ;;  %v9399_v52 = vld [vmem:[%s15883_s0 + $0x144] sm:$0xff] }
0x1728   :  { %11820 = vmatprep.subr.bf16.mxu0 %v12789_v23 }
0x172b   :  { %11821 = vmatpush3.bf16.msra.mxu0 %v12507_v55  ;;  %v12518_v55 = vld [vmem:[%s15884_s3 + $0x360] sm:$0xff]  }
0x172c   :  { %10607 = vmatprep.subr.bf16.mxu0 %v14181_v2 }
0x17c9   :  { %v4369_v27 = vpop.f32.mrb[144].mxu0 }
0x17ca   :  { %v4375_v41 = vadd.f32 %v4369_v27, %v4200_v50  ;;  %v11784_v29 = vpop.f32.mrb[145].mxu0  ;;  %v12512_v27 = vld [vmem:[%s15884_s3 + $0x348] sm:$0xff]  }
0x17cb   :  { %v4372_v30 = vpop.f32.mrb[146].mxu0  ;;  %v12513_v29 = vld [vmem:[%s15884_s3 + $0x350] sm:$0xff]  }
0x17cc   :  { %v11785_v31 = vpop.f32.mrb[147].mxu0 }
0x17e9   :  { %v10563_v32 = vpop.f32.mrb[148].mxu0 }
0x17ea   :  { %v10564_v34 = vpop.f32.mrb[149].mxu0 }
0x17eb   :  { %v10565_v35 = vadd.f32 %v10564_v34, %v10563_v32  ;;  %v10566_v16 = vpop.f32.mrb[150].mxu0  ;;  %v12514_v34 = vld [vmem:[%s15884_s3 + $0x358] sm:$0xff]  }
0x17ec   :  { %v10567_v17 = vpop.f32.mrb[151].mxu0 }
0x17ed   :  { %v4427_v57 = vadd.f32 %v14003_v7, %v10565_v35  ;;  %v12517_v35 = vld [vmem:[%s15883_s0 + $0x14c] ss:$0 sps:$4 sm:$0xff]  }
0x17ef   :  { %v4467_v44 = vadd.f32 %v4466_v18, %v4427_v57 }
0x17f1   :  { %v4472_v59 = vmax.f32 %v4467_v44, 0.0  ;;  %v4641_v50 = vpop.f32.mrb[152].mxu0 }
0x17f2   :  { %v11812_v53 = vpop.f32.mrb[153].mxu0 }
0x17f3   :  { %v4473_v60 = vpack.c.bf16 %v4472_v59, %v4472_v59  ;;  %v4644_v9 = vpop.f32.mrb[154].mxu0 }
0x17f4   :  { %v11813_v54 = vpop.f32.mrb[155].mxu0  ;;  %v9402_v9 = vcombine.high %v9399_v52, %v9399_v52 }
0x17f5   :  { %11803 = vmatmul.mubr.msk.bf16.vlgmr.msra.gmra.mrb[144].mxu1 %vm415_vm2, %v4473_v60 }
0x17f6   :  { %10578 = vmatpush3.bf16.msra.mxu1 %v14064_v63  ;;  %4599 = vmatprep.mubr.bf16.mxu1 %v9364_v22 }
0x17f7   :  { %10579 = vmatprep.subr.bf16.mxu1 %v14070_v0 }
0x17fa   :  { %10580 = vmatpush3.bf16.msra.mxu1 %v14076_v15 }
0x17fb   :  { %10581 = vmatprep.subr.bf16.mxu1 %v14082_v33 }
0x17fe   :  { %10582 = vmatpush3.bf16.msra.mxu1 %v14088_v36 }
0x17ff   :  { %10583 = vmatprep.subr.bf16.mxu1 %v14094_v37 }
0x1802   :  { %10584 = vmatpush3.bf16.msra.mxu1 %v14100_v38 }
0x1803   :  { %10585 = vmatprep.subr.bf16.mxu1 %v14106_v51 }
0x1806   :  { %10586 = vmatpush3.bf16.msra.mxu1 %v14112_v39 }
0x1807   :  { %10587 = vmatprep.subr.bf16.mxu1 %v14118_v49 }
0x180a   :  { %10588 = vmatpush3.bf16.msra.mxu1 %v14124_v40 }
0x180b   :  { %10589 = vmatprep.subr.bf16.mxu1 %v14130_v42 }
0x180e   :  { %10590 = vmatpush3.bf16.msra.mxu1 %v14136_v43 }
0x180f   :  { %10591 = vmatprep.subr.bf16.mxu1 %v14142_v45 }
0x1812   :  { %10592 = vmatpush3.bf16.msra.mxu1 %v14148_v47 }
0x1813   :  { %11826 = vmatprep.subr.bf16.mxu1 %v12789_v23 }
0x1815   :  { %4600 = vmatmul.mubr.bf16.vlgmr.msra.gmra.mrb[148].mxu1 %v9363_v61 }
0x1816   :  { %11827 = vmatpush3.bf16.msra.mxu1 %v14155_v48  ;;  %11830 = vmatprep.mubr.msk.bf16.mxu1 %vm12790_vm0, %v12789_v23 }
0x1817   :  { %11828 = vmatprep.subr.bf16.mxu1 %v12789_v23 }
0x181a   :  { %11829 = vmatpush3.bf16.msra.mxu1 %v14219_v28 }
0x181b   :  { %11834 = vmatprep.subr.bf16.mxu1 %v12789_v23 }
0x181d   :  { %11831 = vmatmul.mubr.msk.bf16.vlgmr.msra.gmra.mrb[152].mxu1 %vm190_vm1, %v12510_v56  ;;  %v12519_v56 = vld [vmem:[%s15884_s3 + $0x368] sm:$0xff]  }
0x181e   :  { %11842 = vmatprep.mubr.msk.bf16.mxu1 %vm12790_vm0, %v12789_v23  ;;  %11835 = vmatpush3.bf16.msra.mxu1 %v12511_v26  ;;  %v14542_v26 = vld [vmem:[%s15885_s2] ss:$0 sm:$0xff] }
0x181f   :  { %11836 = vmatprep.subr.bf16.mxu1 %v12789_v23 }
0x1822   :  { %11837 = vmatpush3.bf16.msra.mxu1 %v12512_v27 }
0x1823   :  { %11838 = vmatprep.subr.bf16.mxu1 %v12789_v23 }
0x1826   :  { %11839 = vmatpush3.bf16.msra.mxu1 %v12513_v29  ;;  %v9418_v29 = vld [vmem:[%s15883_s0 + $0x150] sm:$0xff] }
0x1827   :  { %11840 = vmatprep.subr.bf16.mxu1 %v12789_v23 }
0x182a   :  { %11841 = vmatpush3.bf16.msra.mxu1 %v12514_v34 }
0x182b   :  { %10637 = vmatprep.subr.bf16.mxu1 %v14181_v2 }
0x18c8   :  { %v4544_v1 = vpop.f32.mrb[144].mxu1 }
0x18c9   :  { %v4550_v3 = vadd.f32 %v4544_v1, %v4375_v41  ;;  %v11804_v4 = vpop.f32.mrb[145].mxu1 }
0x18ca   :  { %v4547_v5 = vpop.f32.mrb[146].mxu1 }
0x18cb   :  { %v11805_v6 = vpop.f32.mrb[147].mxu1 }
0x18e8   :  { %v10593_v8 = vpop.f32.mrb[148].mxu1 }
0x18e9   :  { %v10594_v10 = vpop.f32.mrb[149].mxu1 }
0x18ea   :  { %v10595_v11 = vadd.f32 %v10594_v10, %v10593_v8  ;;  %v10596_v12 = vpop.f32.mrb[150].mxu1  ;;  %v12521_v8 = vld [vmem:[%s15884_s3 + $0x378] sm:$0xff]  }
0x18eb   :  { %v10597_v13 = vpop.f32.mrb[151].mxu1  ;;  %v12524_v10 = vld [vmem:[%s15883_s0 + $0x158] ss:$0 sps:$4 sm:$0xff]  }
0x18ec   :  { %v4602_v14 = vadd.f32 %v14003_v7, %v10595_v11 }
0x18ee   :  { %v4642_v18 = vadd.f32 %v4641_v50, %v4602_v14 }
0x18f0   :  { %v4647_v20 = vmax.f32 %v4642_v18, 0.0  ;;  %v4816_v41 = vpop.f32.mrb[152].mxu1 }
0x18f1   :  { %v11832_v30 = vpop.f32.mrb[153].mxu1 }
0x18f2   :  { %v4648_v24 = vpack.c.bf16 %v4647_v20, %v4647_v20  ;;  %v4819_v31 = vpop.f32.mrb[154].mxu1 }
0x18f3   :  { %v11833_v32 = vpop.f32.mrb[155].mxu1  ;;  %v9421_v31 = vcombine.high %v9418_v29, %v9418_v29 }
0x18f4   :  { %11823 = vmatmul.mubr.msk.bf16.vlgmr.msra.gmra.mrb[156].mxu0 %vm415_vm2, %v4648_v24 }
0x18f5   :  { %10608 = vmatpush3.bf16.msra.mxu0 %v14064_v63  ;;  %4774 = vmatprep.mubr.bf16.mxu0 %v9383_v21 }
0x18f6   :  { %10609 = vmatprep.subr.bf16.mxu0 %v14070_v0 }
0x18f9   :  { %10610 = vmatpush3.bf16.msra.mxu0 %v14076_v15 }
0x18fa   :  { %10611 = vmatprep.subr.bf16.mxu0 %v14082_v33 }
0x18fd   :  { %10612 = vmatpush3.bf16.msra.mxu0 %v14088_v36 }
0x18fe   :  { %10613 = vmatprep.subr.bf16.mxu0 %v14094_v37 }
0x1901   :  { %10614 = vmatpush3.bf16.msra.mxu0 %v14100_v38 }
0x1902   :  { %10615 = vmatprep.subr.bf16.mxu0 %v14106_v51 }
0x1905   :  { %10616 = vmatpush3.bf16.msra.mxu0 %v14112_v39 }
0x1906   :  { %10617 = vmatprep.subr.bf16.mxu0 %v14118_v49 }
0x1909   :  { %10618 = vmatpush3.bf16.msra.mxu0 %v14124_v40 }
0x190a   :  { %10619 = vmatprep.subr.bf16.mxu0 %v14130_v42 }
0x190d   :  { %10620 = vmatpush3.bf16.msra.mxu0 %v14136_v43 }
0x190e   :  { %10621 = vmatprep.subr.bf16.mxu0 %v14142_v45 }
0x1911   :  { %10622 = vmatpush3.bf16.msra.mxu0 %v14148_v47 }
0x1912   :  { %11846 = vmatprep.subr.bf16.mxu0 %v12789_v23 }
0x1914   :  { %4775 = vmatmul.mubr.bf16.vlgmr.msra.gmra.mrb[160].mxu0 %v9382_v25 }
0x1915   :  { %11847 = vmatpush3.bf16.msra.mxu0 %v14155_v48  ;;  %11850 = vmatprep.mubr.msk.bf16.mxu0 %vm12790_vm0, %v12789_v23 }
0x1916   :  { %11848 = vmatprep.subr.bf16.mxu0 %v12789_v23 }
0x1919   :  { %11849 = vmatpush3.bf16.msra.mxu0 %v14219_v28 }
0x191a   :  { %11854 = vmatprep.subr.bf16.mxu0 %v12789_v23 }
0x191c   :  { %11851 = vmatmul.mubr.msk.bf16.vlgmr.msra.gmra.mrb[164].mxu0 %vm190_vm1, %v12517_v35 }
0x191d   :  { %11862 = vmatprep.mubr.msk.bf16.mxu0 %vm12790_vm0, %v12789_v23  ;;  %11855 = vmatpush3.bf16.msra.mxu0 %v12518_v55  ;;  %v14663_v55 = vld [vmem:[%s15882_s1 + $0x28] sm:$0xff]  }
0x191e   :  { %11856 = vmatprep.subr.bf16.mxu0 %v12789_v23 }
0x1921   :  { %11857 = vmatpush3.bf16.msra.mxu0 %v12519_v56  ;;  %v14669_v56 = vld [vmem:[%s15882_s1 + $0x70] sm:$0xff]  }
0x1922   :  { %11858 = vmatprep.subr.bf16.mxu0 %v12789_v23 }
0x19c7   :  { %v4719_v16 = vpop.f32.mrb[156].mxu0 }
0x19c8   :  { %v4725_v17 = vadd.f32 %v4719_v16, %v4550_v3  ;;  %v11824_v57 = vpop.f32.mrb[157].mxu0  ;;  %v12520_v3 = vld [vmem:[%s15884_s3 + $0x370] sm:$0xff]  }
0x19c9   :  { %v4722_v44 = vpop.f32.mrb[158].mxu0  ;;  %11859 = vmatpush3.bf16.msra.mxu0 %v12520_v3  ;;  %v14681_v3 = vld [vmem:[%s15882_s1 + $0x78] sm:$0xff]  }
0x19ca   :  { %v11825_v58 = vpop.f32.mrb[159].mxu0  ;;  %11860 = vmatprep.subr.bf16.mxu0 %v12789_v23  ;;  %v9437_v44 = vld [vmem:[%s15883_s0 + $0x15c] sm:$0xff] }
0x19cd   :  { %11861 = vmatpush3.bf16.msra.mxu0 %v12521_v8  ;;  %v12532_v8 = vld [vmem:[%s15884_s3 + $0x3a0] sm:$0xff]  }
0x19ce   :  { %10667 = vmatprep.subr.bf16.mxu0 %v14181_v2 }
0x19e7   :  { %v10623_v59 = vpop.f32.mrb[160].mxu0 }
0x19e8   :  { %v10624_v22 = vpop.f32.mrb[161].mxu0 }
0x19e9   :  { %v10625_v60 = vadd.f32 %v10624_v22, %v10623_v59  ;;  %v10626_v61 = vpop.f32.mrb[162].mxu0  ;;  %v9440_v59 = vcombine.high %v9437_v44, %v9437_v44 }
0x19ea   :  { %v10627_v62 = vpop.f32.mrb[163].mxu0  ;;  %v14609_v61 = vld [vmem:[%s15882_s1 + $0x48] sm:$0xff]  }
0x19eb   :  { %v4777_v46 = vadd.f32 %v14003_v7, %v10625_v60  ;;  %v9401_v7 = vcombine.low %v9399_v52, %v9399_v52  ;;  %v14603_v60 = vld [vmem:[%s15882_s1] sm:$0xff]   ;;  %v14615_v62 = vld [vmem:[%s15882_s1 + $0x8] sm:$0xff]   ;;  %v14633_v52 = vld [vmem:[%s15882_s1 + $0x58] sm:$0xff]  }
0x19ed   :  { %v4817_v50 = vadd.f32 %v4816_v41, %v4777_v46  ;;  %v14621_v46 = vld [vmem:[%s15882_s1 + $0x50] sm:$0xff]  }
0x19ef   :  { %v4822_v53 = vmax.f32 %v4817_v50, 0.0  ;;  %v4991_v1 = vpop.f32.mrb[164].mxu0  ;;  %v14627_v50 = vld [vmem:[%s15882_s1 + $0x10] sm:$0xff]  }
0x19f0   :  { %v11852_v4 = vpop.f32.mrb[165].mxu0 }
0x19f1   :  { %v4823_v54 = vpack.c.bf16 %v4822_v53, %v4822_v53  ;;  %v4994_v5 = vpop.f32.mrb[166].mxu0  ;;  %v14639_v53 = vld [vmem:[%s15882_s1 + $0x18] sm:$0xff]   ;;  %v9439_v4 = vcombine.low %v9437_v44, %v9437_v44 }
0x19f2   :  { %v11853_v6 = vpop.f32.mrb[167].mxu0  ;;  %v14687_v5 = vld [vmem:[%s15882_s1 + $0x38] sm:$0xff]  }
0x19f3   :  { %11843 = vmatmul.mubr.msk.bf16.vlgmr.msra.gmra.mrb[156].mxu1 %vm415_vm2, %v4823_v54  ;;  %v14651_v54 = vld [vmem:[%s15882_s1 + $0x20] sm:$0xff]  }
0x19f4   :  { %10638 = vmatpush3.bf16.msra.mxu1 %v14064_v63  ;;  %4949 = vmatprep.mubr.bf16.mxu1 %v9402_v9  ;;  %v14645_v9 = vld [vmem:[%s15882_s1 + $0x60] sm:$0xff]  }
0x19f5   :  { %10639 = vmatprep.subr.bf16.mxu1 %v14070_v0  ;;  %v14694_v6 = vld [vmem:[%s15882_s1 + $0x80] sm:$0xff]  }
0x19f8   :  { %10640 = vmatpush3.bf16.msra.mxu1 %v14076_v15 }
0x19f9   :  { %10641 = vmatprep.subr.bf16.mxu1 %v14082_v33 }
0x19fc   :  { %10642 = vmatpush3.bf16.msra.mxu1 %v14088_v36 }
0x19fd   :  { %10643 = vmatprep.subr.bf16.mxu1 %v14094_v37 }
0x1a00   :  { %10644 = vmatpush3.bf16.msra.mxu1 %v14100_v38 }
0x1a01   :  { %10645 = vmatprep.subr.bf16.mxu1 %v14106_v51 }
0x1a04   :  { %10646 = vmatpush3.bf16.msra.mxu1 %v14112_v39 }
0x1a05   :  { %10647 = vmatprep.subr.bf16.mxu1 %v14118_v49 }
0x1a08   :  { %10648 = vmatpush3.bf16.msra.mxu1 %v14124_v40 }
0x1a09   :  { %10649 = vmatprep.subr.bf16.mxu1 %v14130_v42 }
0x1a0c   :  { %10650 = vmatpush3.bf16.msra.mxu1 %v14136_v43 }
0x1a0d   :  { %10651 = vmatprep.subr.bf16.mxu1 %v14142_v45 }
0x1a10   :  { %10652 = vmatpush3.bf16.msra.mxu1 %v14148_v47 }
0x1a11   :  { %11866 = vmatprep.subr.bf16.mxu1 %v12789_v23 }
0x1a13   :  { %4950 = vmatmul.mubr.bf16.vlgmr.msra.gmra.mrb[160].mxu1 %v9401_v7  ;;  %v14657_v7 = vld [vmem:[%s15882_s1 + $0x68] sm:$0xff]  }
0x1a14   :  { %11867 = vmatpush3.bf16.msra.mxu1 %v14155_v48  ;;  %11870 = vmatprep.mubr.msk.bf16.mxu1 %vm12790_vm0, %v12789_v23 }
0x1a15   :  { %11868 = vmatprep.subr.bf16.mxu1 %v12789_v23 }
0x1a18   :  { %11869 = vmatpush3.bf16.msra.mxu1 %v14219_v28 }
0x1a19   :  { %11874 = vmatprep.subr.bf16.mxu1 %v12789_v23 }
0x1a1b   :  { %11871 = vmatmul.mubr.msk.bf16.vlgmr.msra.gmra.mrb[164].mxu1 %vm190_vm1, %v12524_v10  ;;  %v12533_v10 = vld [vmem:[%s15884_s3 + $0x3a8] sm:$0xff]  }
0x1a1c   :  { %11882 = vmatprep.mubr.msk.bf16.mxu1 %vm12790_vm0, %v12789_v23 }
0x1ac6   :  { %v4894_v11 = vpop.f32.mrb[156].mxu1 }
0x1ac7   :  { %v4900_v12 = vadd.f32 %v4894_v11, %v4725_v17  ;;  %v11844_v13 = vpop.f32.mrb[157].mxu1 }
0x1ac8   :  { %v4897_v14 = vpop.f32.mrb[158].mxu1 }
0x1ac9   :  { %v11845_v18 = vpop.f32.mrb[159].mxu1 }
0x1aca   :  { %v12535_v18 = vld [vmem:[%s15884_s3 + $0x3b8] sm:$0xff]  }
0x1ae6   :  { %v10653_v19 = vpop.f32.mrb[160].mxu1 }
0x1ae7   :  { %v10654_v20 = vpop.f32.mrb[161].mxu1 }
0x1ae8   :  { %v10655_v21 = vadd.f32 %v10654_v20, %v10653_v19  ;;  %v10656_v24 = vpop.f32.mrb[162].mxu1  ;;  %v14720_v19 = vld [vmem:[%s15882_s1 + $0x40] sm:$0xff]   ;;  %v12538_v20 = vld [vmem:[%s15883_s0 + $0x170] ss:$0 sps:$4 sm:$0xff]  }
0x1ae9   :  { %v10657_v25 = vpop.f32.mrb[163].mxu1 }
0x1aea   :  { %v4952_v27 = vadd.f32 %v14542_v26, %v10655_v21 }
0x1aec   :  { %v4992_v41 = vadd.f32 %v4991_v1, %v4952_v27  ;;  %v14675_v1 = vld [vmem:[%s15882_s1 + $0x30] sm:$0xff]  }
0x1aee   :  { %v4997_v30 = vmax.f32 %v4992_v41, 0.0 }
0x1af0   :  { %v4998_v32 = vpack.c.bf16 %v4997_v30, %v4997_v30 }
0x1af2   :  { %11863 = vmatmul.mubr.msk.bf16.vlgmr.msra.gmra.mrb[168].mxu0 %vm415_vm2, %v4998_v32 }
0x1af3   :  { %10668 = vmatpush3.bf16.msra.mxu0 %v14064_v63  ;;  %5124 = vmatprep.mubr.bf16.mxu0 %v9421_v31  ;;  %v9420_v63 = vcombine.low %v9418_v29, %v9418_v29 }
0x1af4   :  { %10669 = vmatprep.subr.bf16.mxu0 %v14070_v0  ;;  %v12525_v0 = vld [vmem:[%s15884_s3 + $0x380] sm:$0xff]  }
0x1af5   :  { %11875 = vmatpush3.bf16.msra.mxu1 %v12525_v0 }
0x1af6   :  { %11876 = vmatprep.subr.bf16.mxu1 %v12789_v23 }
0x1af7   :  { %10670 = vmatpush3.bf16.msra.mxu0 %v14076_v15  ;;  %v12526_v15 = vld [vmem:[%s15884_s3 + $0x388] sm:$0xff]  }
0x1af8   :  { %10671 = vmatprep.subr.bf16.mxu0 %v14082_v33  ;;  %v5166_v33 = vpop.f32.mrb[164].mxu1 }
0x1af9   :  { %11877 = vmatpush3.bf16.msra.mxu1 %v12526_v15 }
0x1afa   :  { %11878 = vmatprep.subr.bf16.mxu1 %v12789_v23 }
0x1afb   :  { %10672 = vmatpush3.bf16.msra.mxu0 %v14088_v36  ;;  %v12527_v36 = vld [vmem:[%s15884_s3 + $0x390] sm:$0xff]  }
0x1afc   :  { %10673 = vmatprep.subr.bf16.mxu0 %v14094_v37  ;;  %v11872_v37 = vpop.f32.mrb[165].mxu1 }
0x1afd   :  { %11879 = vmatpush3.bf16.msra.mxu1 %v12527_v36 }
0x1afe   :  { %11880 = vmatprep.subr.bf16.mxu1 %v12789_v23 }
0x1aff   :  { %10674 = vmatpush3.bf16.msra.mxu0 %v14100_v38  ;;  %v5169_v38 = vpop.f32.mrb[166].mxu1 }
0x1b00   :  { %10675 = vmatprep.subr.bf16.mxu0 %v14106_v51  ;;  %v11873_v51 = vpop.f32.mrb[167].mxu1 }
0x1b03   :  { %10676 = vmatpush3.bf16.msra.mxu0 %v14112_v39  ;;  %v12528_v39 = vld [vmem:[%s15884_s3 + $0x398] sm:$0xff]  }
0x1b04   :  { %10677 = vmatprep.subr.bf16.mxu0 %v14118_v49  ;;  %11881 = vmatpush3.bf16.msra.mxu1 %v12528_v39  ;;  %v12531_v49 = vld [vmem:[%s15883_s0 + $0x164] ss:$0 sps:$4 sm:$0xff]   ;;  %v14758_v39 = vld [vmem:[%s15882_s1 + $0x88] sm:$0xff]  }
0x1b05   :  { %10697 = vmatprep.subr.bf16.mxu1 %v14181_v2 }
0x1b07   :  { %10678 = vmatpush3.bf16.msra.mxu0 %v14124_v40 }
0x1b08   :  { %10679 = vmatprep.subr.bf16.mxu0 %v14130_v42 }
0x1b0b   :  { %10680 = vmatpush3.bf16.msra.mxu0 %v14136_v43 }
0x1b0c   :  { %10681 = vmatprep.subr.bf16.mxu0 %v14142_v45 }
0x1b0f   :  { %10682 = vmatpush3.bf16.msra.mxu0 %v14148_v47 }
0x1b10   :  { %11886 = vmatprep.subr.bf16.mxu0 %v12789_v23 }
0x1b12   :  { %5125 = vmatmul.mubr.bf16.vlgmr.msra.gmra.mrb[172].mxu0 %v9420_v63 }
0x1b13   :  { %11887 = vmatpush3.bf16.msra.mxu0 %v14155_v48  ;;  %11890 = vmatprep.mubr.msk.bf16.mxu0 %vm12790_vm0, %v12789_v23 }
0x1b14   :  { %11888 = vmatprep.subr.bf16.mxu0 %v12789_v23 }
0x1b17   :  { %11889 = vmatpush3.bf16.msra.mxu0 %v14219_v28 }
0x1b18   :  { %11894 = vmatprep.subr.bf16.mxu0 %v12789_v23 }
0x1b1a   :  { %11891 = vmatmul.mubr.msk.bf16.vlgmr.msra.gmra.mrb[176].mxu0 %vm190_vm1, %v12531_v49  ;;  %v12539_v49 = vld [vmem:[%s15884_s3 + $0x3c0] sm:$0xff]  }
0x1b1b   :  { %11902 = vmatprep.mubr.msk.bf16.mxu0 %vm12790_vm0, %v12789_v23  ;;  %11895 = vmatpush3.bf16.msra.mxu0 %v12532_v8 }
0x1b1c   :  { %11896 = vmatprep.subr.bf16.mxu0 %v12789_v23 }
0x1b1f   :  { %11897 = vmatpush3.bf16.msra.mxu0 %v12533_v10 }
0x1b20   :  { %11898 = vmatprep.subr.bf16.mxu0 %v12789_v23 }
0x1bc5   :  { %v5069_v40 = vpop.f32.mrb[168].mxu0 }
0x1bc6   :  { %v14593_v42 = vadd.f32 %v5069_v40, %v4900_v12  ;;  %v11864_v43 = vpop.f32.mrb[169].mxu0  ;;  %v12540_v40 = vld [vmem:[%s15884_s3 + $0x3c8] sm:$0xff]  }
0x1bc7   :  { %v5072_v45 = vpop.f32.mrb[170].mxu0  ;;  %v12541_v43 = vld [vmem:[%s15884_s3 + $0x3d0] sm:$0xff]  }
0x1bc8   :  { %v11865_v47 = vpop.f32.mrb[171].mxu0 }
0x1be5   :  { %v10683_v48 = vpop.f32.mrb[172].mxu0 }
0x1be6   :  { %v10684_v34 = vpop.f32.mrb[173].mxu0 }
0x1be7   :  { %v10685_v35 = vadd.f32 %v10684_v34, %v10683_v48  ;;  %v10686_v16 = vpop.f32.mrb[174].mxu0  ;;  %v12542_v34 = vld [vmem:[%s15884_s3 + $0x3d8] sm:$0xff]  }
0x1be8   :  { %v10687_v2 = vpop.f32.mrb[175].mxu0 }
0x1be9   :  { %v5127_v17 = vadd.f32 %v14542_v26, %v10685_v35  ;;  %v12545_v35 = vld [vmem:[%s15883_s0 + $0x17c] ss:$0 sps:$4 sm:$0xff]  }
0x1beb   :  { %v5167_v57 = vadd.f32 %v5166_v33, %v5127_v17  ;;  %v9456_v33 = vld [vmem:[%s15883_s0 + $0x168] sm:$0xff] }
0x1bec   :  { %v9459_v37 = vcombine.high %v9456_v33, %v9456_v33  ;;  %v9458_v51 = vcombine.low %v9456_v33, %v9456_v33 }
0x1bed   :  { %v5172_v58 = vmax.f32 %v5167_v57, 0.0  ;;  %v5341_v11 = vpop.f32.mrb[176].mxu0 }
0x1bee   :  { %v11892_v12 = vpop.f32.mrb[177].mxu0 }
0x1bef   :  { %v5173_v22 = vpack.c.bf16 %v5172_v58, %v5172_v58  ;;  %v5344_v13 = vpop.f32.mrb[178].mxu0 }
0x1bf0   :  { %v11893_v14 = vpop.f32.mrb[179].mxu0 }
0x1bf1   :  { %11883 = vmatmul.mubr.msk.bf16.vlgmr.msra.gmra.mrb[168].mxu1 %vm415_vm2, %v5173_v22 }
0x1bf2   :  { %10698 = vmatpush3.bf16.msra.mxu1 %v14603_v60  ;;  %5299 = vmatprep.mubr.bf16.mxu1 %v9440_v59 }
0x1bf3   :  { %10699 = vmatprep.subr.bf16.mxu1 %v14609_v61 }
0x1bf6   :  { %10700 = vmatpush3.bf16.msra.mxu1 %v14615_v62 }
0x1bf7   :  { %10701 = vmatprep.subr.bf16.mxu1 %v14621_v46 }
0x1bfa   :  { %10702 = vmatpush3.bf16.msra.mxu1 %v14627_v50 }
0x1bfb   :  { %10703 = vmatprep.subr.bf16.mxu1 %v14633_v52 }
0x1bfe   :  { %10704 = vmatpush3.bf16.msra.mxu1 %v14639_v53 }
0x1bff   :  { %10705 = vmatprep.subr.bf16.mxu1 %v14645_v9 }
0x1c02   :  { %10706 = vmatpush3.bf16.msra.mxu1 %v14651_v54 }
0x1c03   :  { %10707 = vmatprep.subr.bf16.mxu1 %v14657_v7 }
0x1c06   :  { %10708 = vmatpush3.bf16.msra.mxu1 %v14663_v55 }
0x1c07   :  { %10709 = vmatprep.subr.bf16.mxu1 %v14669_v56 }
0x1c0a   :  { %10710 = vmatpush3.bf16.msra.mxu1 %v14675_v1 }
0x1c0b   :  { %10711 = vmatprep.subr.bf16.mxu1 %v14681_v3 }
0x1c0e   :  { %10712 = vmatpush3.bf16.msra.mxu1 %v14687_v5 }
0x1c0f   :  { %11906 = vmatprep.subr.bf16.mxu1 %v12789_v23 }
0x1c11   :  { %5300 = vmatmul.mubr.bf16.vlgmr.msra.gmra.mrb[172].mxu1 %v9439_v4 }
0x1c12   :  { %11907 = vmatpush3.bf16.msra.mxu1 %v14694_v6  ;;  %11910 = vmatprep.mubr.msk.bf16.mxu1 %vm12790_vm0, %v12789_v23 }
0x1c13   :  { %11908 = vmatprep.subr.bf16.mxu1 %v12789_v23 }
0x1c16   :  { %11909 = vmatpush3.bf16.msra.mxu1 %v14219_v28  ;;  %v12534_v28 = vld [vmem:[%s15884_s3 + $0x3b0] sm:$0xff]  }
0x1c17   :  { %11914 = vmatprep.subr.bf16.mxu1 %v12789_v23  ;;  %11899 = vmatpush3.bf16.msra.mxu0 %v12534_v28  ;;  %v9475_v28 = vld [vmem:[%s15883_s0 + $0x174] sm:$0xff] }
0x1c18   :  { %11900 = vmatprep.subr.bf16.mxu0 %v12789_v23  ;;  %v9478_v13 = vcombine.high %v9475_v28, %v9475_v28 }
0x1c19   :  { %11911 = vmatmul.mubr.msk.bf16.vlgmr.msra.gmra.mrb[176].mxu1 %vm190_vm1, %v12538_v20  ;;  %v12546_v20 = vld [vmem:[%s15884_s3 + $0x3e0] sm:$0xff]  }
0x1c1a   :  { %11922 = vmatprep.mubr.msk.bf16.mxu1 %vm12790_vm0, %v12789_v23  ;;  %11915 = vmatpush3.bf16.msra.mxu1 %v12539_v49 }
0x1c1b   :  { %11901 = vmatpush3.bf16.msra.mxu0 %v12535_v18  ;;  %11916 = vmatprep.subr.bf16.mxu1 %v12789_v23  ;;  %v9477_v18 = vcombine.low %v9475_v28, %v9475_v28 }
0x1c1c   :  { %10727 = vmatprep.subr.bf16.mxu0 %v14720_v19 }
0x1c1e   :  { %11917 = vmatpush3.bf16.msra.mxu1 %v12540_v40 }
0x1c1f   :  { %11918 = vmatprep.subr.bf16.mxu1 %v12789_v23 }
0x1c22   :  { %11919 = vmatpush3.bf16.msra.mxu1 %v12541_v43  ;;  %v9494_v43 = vld [vmem:[%s15883_s0 + $0x180] sm:$0xff] }
0x1c23   :  { %11920 = vmatprep.subr.bf16.mxu1 %v12789_v23 }
0x1c26   :  { %11921 = vmatpush3.bf16.msra.mxu1 %v12542_v34  ;;  %v9496_v34 = vcombine.low %v9494_v43, %v9494_v43 }
0x1c27   :  { %10757 = vmatprep.subr.bf16.mxu1 %v14720_v19 }
0x1cc4   :  { %v5244_v21 = vpop.f32.mrb[168].mxu1 }
0x1cc5   :  { %v5250_v24 = vadd.f32 %v5244_v21, %v14593_v42  ;;  %v11884_v25 = vpop.f32.mrb[169].mxu1  ;;  %v12547_v21 = vld [vmem:[%s15884_s3 + $0x3e8] sm:$0xff]  }
0x1cc6   :  { %v5247_v27 = vpop.f32.mrb[170].mxu1  ;;  %v12548_v25 = vld [vmem:[%s15884_s3 + $0x3f0] sm:$0xff]  }
0x1cc7   :  { %v11885_v41 = vpop.f32.mrb[171].mxu1 }
0x1ce4   :  { %v10713_v29 = vpop.f32.mrb[172].mxu1 }
0x1ce5   :  { %v10714_v30 = vpop.f32.mrb[173].mxu1 }
0x1ce6   :  { %v10715_v31 = vadd.f32 %v10714_v30, %v10713_v29  ;;  %v10716_v32 = vpop.f32.mrb[174].mxu1  ;;  %v12549_v30 = vld [vmem:[%s15884_s3 + $0x3f8] sm:$0xff]  }
0x1ce7   :  { %v10717_v63 = vpop.f32.mrb[175].mxu1 }
0x1ce8   :  { %v5302_v0 = vadd.f32 %v14542_v26, %v10715_v31  ;;  %v12552_v31 = vld [vmem:[%s15883_s0 + $0x188] ss:$0 sps:$4 sm:$0xff]  }
0x1cea   :  { %v5342_v15 = vadd.f32 %v5341_v11, %v5302_v0 }
0x1cec   :  { %v5347_v36 = vmax.f32 %v5342_v15, 0.0  ;;  %v5516_v42 = vpop.f32.mrb[176].mxu1 }
0x1ced   :  { %v11912_v45 = vpop.f32.mrb[177].mxu1 }
0x1cee   :  { %v5348_v38 = vpack.c.bf16 %v5347_v36, %v5347_v36  ;;  %v5519_v47 = vpop.f32.mrb[178].mxu1 }
0x1cef   :  { %v11913_v48 = vpop.f32.mrb[179].mxu1  ;;  %v9497_v47 = vcombine.high %v9494_v43, %v9494_v43 }
0x1cf0   :  { %11903 = vmatmul.mubr.msk.bf16.vlgmr.msra.gmra.mrb[180].mxu0 %vm415_vm2, %v5348_v38 }
0x1cf1   :  { %10728 = vmatpush3.bf16.msra.mxu0 %v14603_v60  ;;  %5474 = vmatprep.mubr.bf16.mxu0 %v9459_v37 }
0x1cf2   :  { %10729 = vmatprep.subr.bf16.mxu0 %v14609_v61 }
0x1cf5   :  { %10730 = vmatpush3.bf16.msra.mxu0 %v14615_v62 }
0x1cf6   :  { %10731 = vmatprep.subr.bf16.mxu0 %v14621_v46 }
0x1cf9   :  { %10732 = vmatpush3.bf16.msra.mxu0 %v14627_v50 }
0x1cfa   :  { %10733 = vmatprep.subr.bf16.mxu0 %v14633_v52 }
0x1cfd   :  { %10734 = vmatpush3.bf16.msra.mxu0 %v14639_v53 }
0x1cfe   :  { %10735 = vmatprep.subr.bf16.mxu0 %v14645_v9 }
0x1d01   :  { %10736 = vmatpush3.bf16.msra.mxu0 %v14651_v54 }
0x1d02   :  { %10737 = vmatprep.subr.bf16.mxu0 %v14657_v7 }
0x1d05   :  { %10738 = vmatpush3.bf16.msra.mxu0 %v14663_v55 }
0x1d06   :  { %10739 = vmatprep.subr.bf16.mxu0 %v14669_v56 }
0x1d09   :  { %10740 = vmatpush3.bf16.msra.mxu0 %v14675_v1 }
0x1d0a   :  { %10741 = vmatprep.subr.bf16.mxu0 %v14681_v3 }
0x1d0d   :  { %10742 = vmatpush3.bf16.msra.mxu0 %v14687_v5 }
0x1d0e   :  { %11926 = vmatprep.subr.bf16.mxu0 %v12789_v23 }
0x1d10   :  { %5475 = vmatmul.mubr.bf16.vlgmr.msra.gmra.mrb[184].mxu0 %v9458_v51 }
0x1d11   :  { %11927 = vmatpush3.bf16.msra.mxu0 %v14694_v6  ;;  %11930 = vmatprep.mubr.msk.bf16.mxu0 %vm12790_vm0, %v12789_v23 }
0x1d12   :  { %11928 = vmatprep.subr.bf16.mxu0 %v12789_v23 }
0x1d15   :  { %11929 = vmatpush3.bf16.msra.mxu0 %v14758_v39 }
0x1d16   :  { %11934 = vmatprep.subr.bf16.mxu0 %v12789_v23 }
0x1d18   :  { %11931 = vmatmul.mubr.msk.bf16.vlgmr.msra.gmra.mrb[188].mxu0 %vm190_vm1, %v12545_v35  ;;  %v12553_v35 = vld [vmem:[%s15884_s3 + $0x400] sm:$0xff]  }
0x1d19   :  { %11942 = vmatprep.mubr.msk.bf16.mxu0 %vm12790_vm0, %v12789_v23  ;;  %11935 = vmatpush3.bf16.msra.mxu0 %v12546_v20 }
0x1d1a   :  { %11936 = vmatprep.subr.bf16.mxu0 %v12789_v23 }
0x1d1d   :  { %11937 = vmatpush3.bf16.msra.mxu0 %v12547_v21 }
0x1d1e   :  { %11938 = vmatprep.subr.bf16.mxu0 %v12789_v23 }
0x1d21   :  { %11939 = vmatpush3.bf16.msra.mxu0 %v12548_v25  ;;  %v9513_v25 = vld [vmem:[%s15883_s0 + $0x18c] sm:$0xff] }
0x1d22   :  { %11940 = vmatprep.subr.bf16.mxu0 %v12789_v23 }
0x1d25   :  { %11941 = vmatpush3.bf16.msra.mxu0 %v12549_v30  ;;  %v9515_v30 = vcombine.low %v9513_v25, %v9513_v25 }
0x1d26   :  { %10787 = vmatprep.subr.bf16.mxu0 %v14720_v19 }
0x1dc3   :  { %v5419_v16 = vpop.f32.mrb[180].mxu0 }
0x1dc4   :  { %v5425_v2 = vadd.f32 %v5419_v16, %v5250_v24  ;;  %v11904_v17 = vpop.f32.mrb[181].mxu0  ;;  %v12554_v16 = vld [vmem:[%s15884_s3 + $0x408] sm:$0xff]  }
0x1dc5   :  { %v5422_v57 = vpop.f32.mrb[182].mxu0  ;;  %v12555_v17 = vld [vmem:[%s15884_s3 + $0x410] sm:$0xff]  }
0x1dc6   :  { %v11905_v44 = vpop.f32.mrb[183].mxu0 }
0x1de3   :  { %v10743_v58 = vpop.f32.mrb[184].mxu0 }
0x1de4   :  { %v10744_v59 = vpop.f32.mrb[185].mxu0 }
0x1de5   :  { %v10745_v22 = vadd.f32 %v10744_v59, %v10743_v58  ;;  %v10746_v4 = vpop.f32.mrb[186].mxu0  ;;  %v12556_v59 = vld [vmem:[%s15884_s3 + $0x418] sm:$0xff]  }
0x1de6   :  { %v10747_v8 = vpop.f32.mrb[187].mxu0 }
0x1de7   :  { %v5477_v10 = vadd.f32 %v14542_v26, %v10745_v22  ;;  %v12559_v22 = vld [vmem:[%s15883_s0 + $0x194] ss:$0 sps:$4 sm:$0xff]  }
0x1de9   :  { %v5517_v11 = vadd.f32 %v5516_v42, %v5477_v10 }
0x1deb   :  { %v5522_v12 = vmax.f32 %v5517_v11, 0.0  ;;  %v5691_v24 = vpop.f32.mrb[188].mxu0 }
0x1dec   :  { %v11932_v27 = vpop.f32.mrb[189].mxu0 }
0x1ded   :  { %v5523_v14 = vpack.c.bf16 %v5522_v12, %v5522_v12  ;;  %v5694_v41 = vpop.f32.mrb[190].mxu0 }
0x1dee   :  { %v11933_v29 = vpop.f32.mrb[191].mxu0  ;;  %v9516_v41 = vcombine.high %v9513_v25, %v9513_v25 }
0x1def   :  { %11923 = vmatmul.mubr.msk.bf16.vlgmr.msra.gmra.mrb[180].mxu1 %vm415_vm2, %v5523_v14 }
0x1df0   :  { %10758 = vmatpush3.bf16.msra.mxu1 %v14603_v60  ;;  %5649 = vmatprep.mubr.bf16.mxu1 %v9478_v13 }
0x1df1   :  { %10759 = vmatprep.subr.bf16.mxu1 %v14609_v61 }
0x1df4   :  { %10760 = vmatpush3.bf16.msra.mxu1 %v14615_v62 }
0x1df5   :  { %10761 = vmatprep.subr.bf16.mxu1 %v14621_v46 }
0x1df8   :  { %10762 = vmatpush3.bf16.msra.mxu1 %v14627_v50 }
0x1df9   :  { %10763 = vmatprep.subr.bf16.mxu1 %v14633_v52 }
0x1dfc   :  { %10764 = vmatpush3.bf16.msra.mxu1 %v14639_v53 }
0x1dfd   :  { %10765 = vmatprep.subr.bf16.mxu1 %v14645_v9 }
0x1e00   :  { %10766 = vmatpush3.bf16.msra.mxu1 %v14651_v54 }
0x1e01   :  { %10767 = vmatprep.subr.bf16.mxu1 %v14657_v7 }
0x1e04   :  { %10768 = vmatpush3.bf16.msra.mxu1 %v14663_v55 }
0x1e05   :  { %10769 = vmatprep.subr.bf16.mxu1 %v14669_v56 }
0x1e08   :  { %10770 = vmatpush3.bf16.msra.mxu1 %v14675_v1 }
0x1e09   :  { %10771 = vmatprep.subr.bf16.mxu1 %v14681_v3 }
0x1e0c   :  { %10772 = vmatpush3.bf16.msra.mxu1 %v14687_v5 }
0x1e0d   :  { %11946 = vmatprep.subr.bf16.mxu1 %v12789_v23 }
0x1e0f   :  { %5650 = vmatmul.mubr.bf16.vlgmr.msra.gmra.mrb[184].mxu1 %v9477_v18 }
0x1e10   :  { %11947 = vmatpush3.bf16.msra.mxu1 %v14694_v6  ;;  %11950 = vmatprep.mubr.msk.bf16.mxu1 %vm12790_vm0, %v12789_v23 }
0x1e11   :  { %11948 = vmatprep.subr.bf16.mxu1 %v12789_v23 }
0x1e14   :  { %11949 = vmatpush3.bf16.msra.mxu1 %v14758_v39 }
0x1e15   :  { %11954 = vmatprep.subr.bf16.mxu1 %v12789_v23 }
0x1e17   :  { %11951 = vmatmul.mubr.msk.bf16.vlgmr.msra.gmra.mrb[188].mxu1 %vm190_vm1, %v12552_v31  ;;  %v12560_v31 = vld [vmem:[%s15884_s3 + $0x420] sm:$0xff]  }
0x1e18   :  { %11962 = vmatprep.mubr.msk.bf16.mxu1 %vm12790_vm0, %v12789_v23  ;;  %11955 = vmatpush3.bf16.msra.mxu1 %v12553_v35 }
0x1e19   :  { %11956 = vmatprep.subr.bf16.mxu1 %v12789_v23 }
0x1e1c   :  { %11957 = vmatpush3.bf16.msra.mxu1 %v12554_v16 }
0x1e1d   :  { %11958 = vmatprep.subr.bf16.mxu1 %v12789_v23 }
0x1e20   :  { %11959 = vmatpush3.bf16.msra.mxu1 %v12555_v17  ;;  %v9532_v17 = vld [vmem:[%s15883_s0 + $0x198] sm:$0xff] }
0x1e21   :  { %11960 = vmatprep.subr.bf16.mxu1 %v12789_v23 }
0x1e24   :  { %11961 = vmatpush3.bf16.msra.mxu1 %v12556_v59  ;;  %v9534_v59 = vcombine.low %v9532_v17, %v9532_v17 }
0x1e25   :  { %10817 = vmatprep.subr.bf16.mxu1 %v14720_v19 }
0x1ec2   :  { %v5594_v32 = vpop.f32.mrb[180].mxu1 }
0x1ec3   :  { %v5600_v63 = vadd.f32 %v5594_v32, %v5425_v2  ;;  %v11924_v0 = vpop.f32.mrb[181].mxu1  ;;  %v12561_v32 = vld [vmem:[%s15884_s3 + $0x428] sm:$0xff]  }
0x1ec4   :  { %v5597_v15 = vpop.f32.mrb[182].mxu1  ;;  %v12562_v0 = vld [vmem:[%s15884_s3 + $0x430] sm:$0xff]  }
0x1ec5   :  { %v11925_v33 = vpop.f32.mrb[183].mxu1 }
0x1ee2   :  { %v10773_v36 = vpop.f32.mrb[184].mxu1 }
0x1ee3   :  { %v10774_v37 = vpop.f32.mrb[185].mxu1 }
0x1ee4   :  { %v10775_v38 = vadd.f32 %v10774_v37, %v10773_v36  ;;  %v10776_v51 = vpop.f32.mrb[186].mxu1  ;;  %v12563_v37 = vld [vmem:[%s15884_s3 + $0x438] sm:$0xff]  }
0x1ee5   :  { %v10777_v49 = vpop.f32.mrb[187].mxu1 }
0x1ee6   :  { %v5652_v40 = vadd.f32 %v14542_v26, %v10775_v38  ;;  %v12566_v38 = vld [vmem:[%s15883_s0 + $0x1a0] ss:$0 sps:$4 sm:$0xff]  }
0x1ee8   :  { %v5692_v42 = vadd.f32 %v5691_v24, %v5652_v40 }
0x1eea   :  { %v5697_v45 = vmax.f32 %v5692_v42, 0.0  ;;  %v5866_v2 = vpop.f32.mrb[188].mxu1 }
0x1eeb   :  { %v11952_v57 = vpop.f32.mrb[189].mxu1 }
0x1eec   :  { %v5698_v48 = vpack.c.bf16 %v5697_v45, %v5697_v45  ;;  %v5869_v44 = vpop.f32.mrb[190].mxu1 }
0x1eed   :  { %v11953_v58 = vpop.f32.mrb[191].mxu1  ;;  %v9535_v44 = vcombine.high %v9532_v17, %v9532_v17 }
0x1eee   :  { %11943 = vmatmul.mubr.msk.bf16.vlgmr.msra.gmra.mrb[192].mxu0 %vm415_vm2, %v5698_v48 }
0x1eef   :  { %10788 = vmatpush3.bf16.msra.mxu0 %v14603_v60  ;;  %5824 = vmatprep.mubr.bf16.mxu0 %v9497_v47 }
0x1ef0   :  { %10789 = vmatprep.subr.bf16.mxu0 %v14609_v61 }
0x1ef3   :  { %10790 = vmatpush3.bf16.msra.mxu0 %v14615_v62 }
0x1ef4   :  { %10791 = vmatprep.subr.bf16.mxu0 %v14621_v46 }
0x1ef7   :  { %10792 = vmatpush3.bf16.msra.mxu0 %v14627_v50 }
0x1ef8   :  { %10793 = vmatprep.subr.bf16.mxu0 %v14633_v52 }
0x1efb   :  { %10794 = vmatpush3.bf16.msra.mxu0 %v14639_v53 }
0x1efc   :  { %10795 = vmatprep.subr.bf16.mxu0 %v14645_v9 }
0x1eff   :  { %10796 = vmatpush3.bf16.msra.mxu0 %v14651_v54 }
0x1f00   :  { %10797 = vmatprep.subr.bf16.mxu0 %v14657_v7 }
0x1f03   :  { %10798 = vmatpush3.bf16.msra.mxu0 %v14663_v55 }
0x1f04   :  { %10799 = vmatprep.subr.bf16.mxu0 %v14669_v56 }
0x1f07   :  { %10800 = vmatpush3.bf16.msra.mxu0 %v14675_v1 }
0x1f08   :  { %10801 = vmatprep.subr.bf16.mxu0 %v14681_v3 }
0x1f0b   :  { %10802 = vmatpush3.bf16.msra.mxu0 %v14687_v5 }
0x1f0c   :  { %11966 = vmatprep.subr.bf16.mxu0 %v12789_v23 }
0x1f0e   :  { %5825 = vmatmul.mubr.bf16.vlgmr.msra.gmra.mrb[196].mxu0 %v9496_v34 }
0x1f0f   :  { %11967 = vmatpush3.bf16.msra.mxu0 %v14694_v6  ;;  %11970 = vmatprep.mubr.msk.bf16.mxu0 %vm12790_vm0, %v12789_v23 }
0x1f10   :  { %11968 = vmatprep.subr.bf16.mxu0 %v12789_v23 }
0x1f13   :  { %11969 = vmatpush3.bf16.msra.mxu0 %v14758_v39 }
0x1f14   :  { %11974 = vmatprep.subr.bf16.mxu0 %v12789_v23 }
0x1f16   :  { %11971 = vmatmul.mubr.msk.bf16.vlgmr.msra.gmra.mrb[200].mxu0 %vm190_vm1, %v12559_v22  ;;  %v12567_v22 = vld [vmem:[%s15884_s3 + $0x440] sm:$0xff]  }
0x1f17   :  { %11982 = vmatprep.mubr.msk.bf16.mxu0 %vm12790_vm0, %v12789_v23  ;;  %11975 = vmatpush3.bf16.msra.mxu0 %v12560_v31 }
0x1f18   :  { %11976 = vmatprep.subr.bf16.mxu0 %v12789_v23 }
0x1f1b   :  { %11977 = vmatpush3.bf16.msra.mxu0 %v12561_v32 }
0x1f1c   :  { %11978 = vmatprep.subr.bf16.mxu0 %v12789_v23 }
0x1f1f   :  { %11979 = vmatpush3.bf16.msra.mxu0 %v12562_v0  ;;  %v9551_v0 = vld [vmem:[%s15883_s0 + $0x1a4] sm:$0xff] }
0x1f20   :  { %11980 = vmatprep.subr.bf16.mxu0 %v12789_v23 }
0x1f23   :  { %11981 = vmatpush3.bf16.msra.mxu0 %v12563_v37  ;;  %v9553_v37 = vcombine.low %v9551_v0, %v9551_v0 }
0x1f24   :  { %10847 = vmatprep.subr.bf16.mxu0 %v14720_v19 }
0x1fc1   :  { %v5769_v4 = vpop.f32.mrb[192].mxu0 }
0x1fc2   :  { %v5775_v8 = vadd.f32 %v5769_v4, %v5600_v63  ;;  %v11944_v10 = vpop.f32.mrb[193].mxu0  ;;  %v12568_v4 = vld [vmem:[%s15884_s3 + $0x448] sm:$0xff]  }
0x1fc3   :  { %v5772_v11 = vpop.f32.mrb[194].mxu0  ;;  %v12569_v10 = vld [vmem:[%s15884_s3 + $0x450] sm:$0xff]  }
0x1fc4   :  { %v11945_v28 = vpop.f32.mrb[195].mxu0 }
0x1fe1   :  { %v10803_v12 = vpop.f32.mrb[196].mxu0 }
0x1fe2   :  { %v10804_v13 = vpop.f32.mrb[197].mxu0 }
0x1fe3   :  { %v10805_v14 = vadd.f32 %v10804_v13, %v10803_v12  ;;  %v10806_v18 = vpop.f32.mrb[198].mxu0  ;;  %v12570_v13 = vld [vmem:[%s15884_s3 + $0x458] sm:$0xff]  }
0x1fe4   :  { %v10807_v20 = vpop.f32.mrb[199].mxu0 }
0x1fe5   :  { %v5827_v21 = vadd.f32 %v14542_v26, %v10805_v14  ;;  %v12573_v14 = vld [vmem:[%s15883_s0 + $0x1ac] ss:$0 sps:$4 sm:$0xff]  }
0x1fe7   :  { %v5867_v24 = vadd.f32 %v5866_v2, %v5827_v21 }
0x1fe9   :  { %v5872_v27 = vmax.f32 %v5867_v24, 0.0  ;;  %v6041_v63 = vpop.f32.mrb[200].mxu0 }
0x1fea   :  { %v11972_v15 = vpop.f32.mrb[201].mxu0 }
0x1feb   :  { %v5873_v29 = vpack.c.bf16 %v5872_v27, %v5872_v27  ;;  %v6044_v33 = vpop.f32.mrb[202].mxu0 }
0x1fec   :  { %v11973_v36 = vpop.f32.mrb[203].mxu0  ;;  %v9554_v33 = vcombine.high %v9551_v0, %v9551_v0 }
0x1fed   :  { %11963 = vmatmul.mubr.msk.bf16.vlgmr.msra.gmra.mrb[192].mxu1 %vm415_vm2, %v5873_v29 }
0x1fee   :  { %10818 = vmatpush3.bf16.msra.mxu1 %v14603_v60  ;;  %5999 = vmatprep.mubr.bf16.mxu1 %v9516_v41 }
0x1fef   :  { %10819 = vmatprep.subr.bf16.mxu1 %v14609_v61 }
0x1ff2   :  { %10820 = vmatpush3.bf16.msra.mxu1 %v14615_v62 }
0x1ff3   :  { %10821 = vmatprep.subr.bf16.mxu1 %v14621_v46 }
0x1ff6   :  { %10822 = vmatpush3.bf16.msra.mxu1 %v14627_v50 }
0x1ff7   :  { %10823 = vmatprep.subr.bf16.mxu1 %v14633_v52 }
0x1ffa   :  { %10824 = vmatpush3.bf16.msra.mxu1 %v14639_v53 }
0x1ffb   :  { %10825 = vmatprep.subr.bf16.mxu1 %v14645_v9 }
0x1ffe   :  { %10826 = vmatpush3.bf16.msra.mxu1 %v14651_v54 }
0x1fff   :  { %10827 = vmatprep.subr.bf16.mxu1 %v14657_v7 }
0x2002   :  { %10828 = vmatpush3.bf16.msra.mxu1 %v14663_v55 }
0x2003   :  { %10829 = vmatprep.subr.bf16.mxu1 %v14669_v56 }
0x2006   :  { %10830 = vmatpush3.bf16.msra.mxu1 %v14675_v1 }
0x2007   :  { %10831 = vmatprep.subr.bf16.mxu1 %v14681_v3 }
0x200a   :  { %10832 = vmatpush3.bf16.msra.mxu1 %v14687_v5 }
0x200b   :  { %11986 = vmatprep.subr.bf16.mxu1 %v12789_v23 }
0x200d   :  { %6000 = vmatmul.mubr.bf16.vlgmr.msra.gmra.mrb[196].mxu1 %v9515_v30 }
0x200e   :  { %11987 = vmatpush3.bf16.msra.mxu1 %v14694_v6  ;;  %11990 = vmatprep.mubr.msk.bf16.mxu1 %vm12790_vm0, %v12789_v23 }
0x200f   :  { %11988 = vmatprep.subr.bf16.mxu1 %v12789_v23 }
0x2012   :  { %11989 = vmatpush3.bf16.msra.mxu1 %v14758_v39 }
0x2013   :  { %11994 = vmatprep.subr.bf16.mxu1 %v12789_v23 }
0x2015   :  { %11991 = vmatmul.mubr.msk.bf16.vlgmr.msra.gmra.mrb[200].mxu1 %vm190_vm1, %v12566_v38  ;;  %v12574_v38 = vld [vmem:[%s15884_s3 + $0x460] sm:$0xff]  }
0x2016   :  { %12002 = vmatprep.mubr.msk.bf16.mxu1 %vm12790_vm0, %v12789_v23  ;;  %11995 = vmatpush3.bf16.msra.mxu1 %v12567_v22 }
0x2017   :  { %11996 = vmatprep.subr.bf16.mxu1 %v12789_v23 }
0x201a   :  { %11997 = vmatpush3.bf16.msra.mxu1 %v12568_v4 }
0x201b   :  { %11998 = vmatprep.subr.bf16.mxu1 %v12789_v23 }
0x201e   :  { %11999 = vmatpush3.bf16.msra.mxu1 %v12569_v10  ;;  %v9570_v10 = vld [vmem:[%s15883_s0 + $0x1b0] sm:$0xff] }
0x201f   :  { %12000 = vmatprep.subr.bf16.mxu1 %v12789_v23 }
0x2022   :  { %12001 = vmatpush3.bf16.msra.mxu1 %v12570_v13  ;;  %v12581_v13 = vld [vmem:[%s15884_s3 + $0x480] sm:$0xff]  }
0x2023   :  { %10877 = vmatprep.subr.bf16.mxu1 %v14720_v19 }
0x20c0   :  { %v5944_v51 = vpop.f32.mrb[192].mxu1 }
0x20c1   :  { %v5950_v49 = vadd.f32 %v5944_v51, %v5775_v8  ;;  %v11964_v40 = vpop.f32.mrb[193].mxu1  ;;  %v12575_v51 = vld [vmem:[%s15884_s3 + $0x468] sm:$0xff]  }
0x20c2   :  { %v5947_v42 = vpop.f32.mrb[194].mxu1  ;;  %v12576_v40 = vld [vmem:[%s15884_s3 + $0x470] sm:$0xff]  }
0x20c3   :  { %v11965_v43 = vpop.f32.mrb[195].mxu1 }
0x20e0   :  { %v10833_v45 = vpop.f32.mrb[196].mxu1 }
0x20e1   :  { %v10834_v47 = vpop.f32.mrb[197].mxu1 }
0x20e2   :  { %v10835_v48 = vadd.f32 %v10834_v47, %v10833_v45  ;;  %v10836_v34 = vpop.f32.mrb[198].mxu1  ;;  %v12577_v47 = vld [vmem:[%s15884_s3 + $0x478] sm:$0xff]  }
0x20e3   :  { %v10837_v35 = vpop.f32.mrb[199].mxu1 }
0x20e4   :  { %v6002_v16 = vadd.f32 %v14542_v26, %v10835_v48  ;;  %v12580_v48 = vld [vmem:[%s15883_s0 + $0x1b8] ss:$0 sps:$4 sm:$0xff]  }
0x20e6   :  { %v6042_v2 = vadd.f32 %v6041_v63, %v6002_v16 }
0x20e8   :  { %v6047_v57 = vmax.f32 %v6042_v2, 0.0  ;;  %v6216_v8 = vpop.f32.mrb[200].mxu1 }
0x20e9   :  { %v11992_v11 = vpop.f32.mrb[201].mxu1 }
0x20ea   :  { %v6048_v58 = vpack.c.bf16 %v6047_v57, %v6047_v57  ;;  %v6219_v28 = vpop.f32.mrb[202].mxu1 }
0x20eb   :  { %v11993_v12 = vpop.f32.mrb[203].mxu1  ;;  %v9573_v28 = vcombine.high %v9570_v10, %v9570_v10 }
0x20ec   :  { %11983 = vmatmul.mubr.msk.bf16.vlgmr.msra.gmra.mrb[204].mxu0 %vm415_vm2, %v6048_v58 }
0x20ed   :  { %10848 = vmatpush3.bf16.msra.mxu0 %v14603_v60  ;;  %6174 = vmatprep.mubr.bf16.mxu0 %v9535_v44 }
0x20ee   :  { %10849 = vmatprep.subr.bf16.mxu0 %v14609_v61 }
0x20f1   :  { %10850 = vmatpush3.bf16.msra.mxu0 %v14615_v62 }
0x20f2   :  { %10851 = vmatprep.subr.bf16.mxu0 %v14621_v46 }
0x20f5   :  { %10852 = vmatpush3.bf16.msra.mxu0 %v14627_v50 }
0x20f6   :  { %10853 = vmatprep.subr.bf16.mxu0 %v14633_v52 }
0x20f9   :  { %10854 = vmatpush3.bf16.msra.mxu0 %v14639_v53 }
0x20fa   :  { %10855 = vmatprep.subr.bf16.mxu0 %v14645_v9 }
0x20fd   :  { %10856 = vmatpush3.bf16.msra.mxu0 %v14651_v54 }
0x20fe   :  { %10857 = vmatprep.subr.bf16.mxu0 %v14657_v7 }
0x2101   :  { %10858 = vmatpush3.bf16.msra.mxu0 %v14663_v55 }
0x2102   :  { %10859 = vmatprep.subr.bf16.mxu0 %v14669_v56 }
0x2105   :  { %10860 = vmatpush3.bf16.msra.mxu0 %v14675_v1 }
0x2106   :  { %10861 = vmatprep.subr.bf16.mxu0 %v14681_v3 }
0x2109   :  { %10862 = vmatpush3.bf16.msra.mxu0 %v14687_v5 }
0x210a   :  { %12006 = vmatprep.subr.bf16.mxu0 %v12789_v23 }
0x210c   :  { %6175 = vmatmul.mubr.bf16.vlgmr.msra.gmra.mrb[208].mxu0 %v9534_v59 }
0x210d   :  { %12007 = vmatpush3.bf16.msra.mxu0 %v14694_v6  ;;  %12010 = vmatprep.mubr.msk.bf16.mxu0 %vm12790_vm0, %v12789_v23 }
0x210e   :  { %12008 = vmatprep.subr.bf16.mxu0 %v12789_v23 }
0x2111   :  { %12009 = vmatpush3.bf16.msra.mxu0 %v14758_v39 }
0x2112   :  { %12014 = vmatprep.subr.bf16.mxu0 %v12789_v23 }
0x2114   :  { %12011 = vmatmul.mubr.msk.bf16.vlgmr.msra.gmra.mrb[212].mxu0 %vm190_vm1, %v12573_v14  ;;  %v12582_v14 = vld [vmem:[%s15884_s3 + $0x488] sm:$0xff]  }
0x2115   :  { %12022 = vmatprep.mubr.msk.bf16.mxu0 %vm12790_vm0, %v12789_v23  ;;  %12015 = vmatpush3.bf16.msra.mxu0 %v12574_v38  ;;  %v15081_v38 = vld [vmem:[%s15885_s2] ss:$0 sm:$0xff] }
0x2116   :  { %12016 = vmatprep.subr.bf16.mxu0 %v12789_v23 }
0x2119   :  { %12017 = vmatpush3.bf16.msra.mxu0 %v12575_v51 }
0x211a   :  { %12018 = vmatprep.subr.bf16.mxu0 %v12789_v23 }
0x211d   :  { %12019 = vmatpush3.bf16.msra.mxu0 %v12576_v40  ;;  %v9589_v40 = vld [vmem:[%s15883_s0 + $0x1bc] sm:$0xff] }
0x211e   :  { %12020 = vmatprep.subr.bf16.mxu0 %v12789_v23 }
0x2121   :  { %12021 = vmatpush3.bf16.msra.mxu0 %v12577_v47 }
0x2122   :  { %10907 = vmatprep.subr.bf16.mxu0 %v14720_v19 }
0x21bf   :  { %v6119_v18 = vpop.f32.mrb[204].mxu0 }
0x21c0   :  { %v6125_v20 = vadd.f32 %v6119_v18, %v5950_v49  ;;  %v11984_v21 = vpop.f32.mrb[205].mxu0 }
0x21c1   :  { %v6122_v24 = vpop.f32.mrb[206].mxu0 }
0x21c2   :  { %v11985_v25 = vpop.f32.mrb[207].mxu0 }
0x21df   :  { %v10863_v27 = vpop.f32.mrb[208].mxu0 }
0x21e0   :  { %v10864_v41 = vpop.f32.mrb[209].mxu0 }
0x21e1   :  { %v10865_v29 = vadd.f32 %v10864_v41, %v10863_v27  ;;  %v10866_v30 = vpop.f32.mrb[210].mxu0  ;;  %v12584_v27 = vld [vmem:[%s15884_s3 + $0x498] sm:$0xff]   ;;  %v12587_v41 = vld [vmem:[%s15883_s0 + $0x1c4] ss:$0 sps:$4 sm:$0xff]  }
0x21e2   :  { %v10867_v31 = vpop.f32.mrb[211].mxu0 }
0x21e3   :  { %v6177_v32 = vadd.f32 %v14542_v26, %v10865_v29 }
0x21e5   :  { %v6217_v63 = vadd.f32 %v6216_v8, %v6177_v32 }
0x21e7   :  { %v6222_v15 = vmax.f32 %v6217_v63, 0.0  ;;  %v6391_v49 = vpop.f32.mrb[212].mxu0 }
0x21e8   :  { %v12012_v42 = vpop.f32.mrb[213].mxu0 }
0x21e9   :  { %v6223_v36 = vpack.c.bf16 %v6222_v15, %v6222_v15  ;;  %v6394_v43 = vpop.f32.mrb[214].mxu0 }
0x21ea   :  { %v12013_v45 = vpop.f32.mrb[215].mxu0  ;;  %v9592_v43 = vcombine.high %v9589_v40, %v9589_v40 }
0x21eb   :  { %12003 = vmatmul.mubr.msk.bf16.vlgmr.msra.gmra.mrb[204].mxu1 %vm415_vm2, %v6223_v36 }
0x21ec   :  { %10878 = vmatpush3.bf16.msra.mxu1 %v14603_v60  ;;  %6349 = vmatprep.mubr.bf16.mxu1 %v9554_v33 }
0x21ed   :  { %10879 = vmatprep.subr.bf16.mxu1 %v14609_v61 }
0x21f0   :  { %10880 = vmatpush3.bf16.msra.mxu1 %v14615_v62 }
0x21f1   :  { %10881 = vmatprep.subr.bf16.mxu1 %v14621_v46 }
0x21f4   :  { %10882 = vmatpush3.bf16.msra.mxu1 %v14627_v50 }
0x21f5   :  { %10883 = vmatprep.subr.bf16.mxu1 %v14633_v52 }
0x21f8   :  { %10884 = vmatpush3.bf16.msra.mxu1 %v14639_v53 }
0x21f9   :  { %10885 = vmatprep.subr.bf16.mxu1 %v14645_v9 }
0x21fc   :  { %10886 = vmatpush3.bf16.msra.mxu1 %v14651_v54 }
0x21fd   :  { %10887 = vmatprep.subr.bf16.mxu1 %v14657_v7 }
0x2200   :  { %10888 = vmatpush3.bf16.msra.mxu1 %v14663_v55 }
0x2201   :  { %10889 = vmatprep.subr.bf16.mxu1 %v14669_v56 }
0x2204   :  { %10890 = vmatpush3.bf16.msra.mxu1 %v14675_v1 }
0x2205   :  { %10891 = vmatprep.subr.bf16.mxu1 %v14681_v3 }
0x2208   :  { %10892 = vmatpush3.bf16.msra.mxu1 %v14687_v5 }
0x2209   :  { %12026 = vmatprep.subr.bf16.mxu1 %v12789_v23 }
0x220b   :  { %6350 = vmatmul.mubr.bf16.vlgmr.msra.gmra.mrb[208].mxu1 %v9553_v37 }
0x220c   :  { %12027 = vmatpush3.bf16.msra.mxu1 %v14694_v6  ;;  %12030 = vmatprep.mubr.msk.bf16.mxu1 %vm12790_vm0, %v12789_v23 }
0x220d   :  { %12028 = vmatprep.subr.bf16.mxu1 %v12789_v23 }
0x2210   :  { %12029 = vmatpush3.bf16.msra.mxu1 %v14758_v39 }
0x2211   :  { %12034 = vmatprep.subr.bf16.mxu1 %v12789_v23 }
0x2213   :  { %12031 = vmatmul.mubr.msk.bf16.vlgmr.msra.gmra.mrb[212].mxu1 %vm190_vm1, %v12580_v48 }
0x2214   :  { %12042 = vmatprep.mubr.msk.bf16.mxu1 %vm12790_vm0, %v12789_v23  ;;  %12035 = vmatpush3.bf16.msra.mxu1 %v12581_v13  ;;  %v15202_v13 = vld [vmem:[%s15882_s1 + $0x28] sm:$0xff]  }
0x2215   :  { %12036 = vmatprep.subr.bf16.mxu1 %v12789_v23 }
0x2218   :  { %12037 = vmatpush3.bf16.msra.mxu1 %v12582_v14  ;;  %v15208_v14 = vld [vmem:[%s15882_s1 + $0x70] sm:$0xff]  }
0x2219   :  { %12038 = vmatprep.subr.bf16.mxu1 %v12789_v23 }
0x22be   :  { %v6294_v34 = vpop.f32.mrb[204].mxu1 }
0x22bf   :  { %v6300_v35 = vadd.f32 %v6294_v34, %v6125_v20  ;;  %v12004_v16 = vpop.f32.mrb[205].mxu1  ;;  %v12583_v20 = vld [vmem:[%s15884_s3 + $0x490] sm:$0xff]  }
0x22c0   :  { %v6297_v2 = vpop.f32.mrb[206].mxu1  ;;  %12039 = vmatpush3.bf16.msra.mxu1 %v12583_v20  ;;  %v15220_v20 = vld [vmem:[%s15882_s1 + $0x78] sm:$0xff]  }
0x22c1   :  { %v12005_v17 = vpop.f32.mrb[207].mxu1  ;;  %12040 = vmatprep.subr.bf16.mxu1 %v12789_v23  ;;  %v9608_v2 = vld [vmem:[%s15883_s0 + $0x1c8] sm:$0xff] }
0x22c4   :  { %12041 = vmatpush3.bf16.msra.mxu1 %v12584_v27  ;;  %v12595_v27 = vld [vmem:[%s15884_s3 + $0x4c0] sm:$0xff]  }
0x22c5   :  { %10937 = vmatprep.subr.bf16.mxu1 %v14720_v19 }
0x22de   :  { %v10893_v57 = vpop.f32.mrb[208].mxu1 }
0x22df   :  { %v10894_v44 = vpop.f32.mrb[209].mxu1 }
0x22e0   :  { %v10895_v58 = vadd.f32 %v10894_v44, %v10893_v57  ;;  %v10896_v59 = vpop.f32.mrb[210].mxu1  ;;  %v9611_v57 = vcombine.high %v9608_v2, %v9608_v2 }
0x22e1   :  { %v10897_v22 = vpop.f32.mrb[211].mxu1  ;;  %v15148_v59 = vld [vmem:[%s15882_s1 + $0x48] sm:$0xff]  }
0x22e2   :  { %v6352_v4 = vadd.f32 %v14542_v26, %v10895_v58  ;;  %v9572_v26 = vcombine.low %v9570_v10, %v9570_v10  ;;  %v15142_v58 = vld [vmem:[%s15882_s1] sm:$0xff]   ;;  %v15154_v22 = vld [vmem:[%s15882_s1 + $0x8] sm:$0xff]   ;;  %v15172_v10 = vld [vmem:[%s15882_s1 + $0x58] sm:$0xff]  }
0x22e4   :  { %v6392_v8 = vadd.f32 %v6391_v49, %v6352_v4  ;;  %v15160_v4 = vld [vmem:[%s15882_s1 + $0x50] sm:$0xff]  }
0x22e6   :  { %v6397_v11 = vmax.f32 %v6392_v8, 0.0  ;;  %v6566_v18 = vpop.f32.mrb[212].mxu1  ;;  %v15166_v8 = vld [vmem:[%s15882_s1 + $0x10] sm:$0xff]  }
0x22e7   :  { %v12032_v21 = vpop.f32.mrb[213].mxu1 }
0x22e8   :  { %v6398_v12 = vpack.c.bf16 %v6397_v11, %v6397_v11  ;;  %v6569_v24 = vpop.f32.mrb[214].mxu1  ;;  %v15178_v11 = vld [vmem:[%s15882_s1 + $0x18] sm:$0xff]   ;;  %v9610_v21 = vcombine.low %v9608_v2, %v9608_v2 }
0x22e9   :  { %v12033_v25 = vpop.f32.mrb[215].mxu1  ;;  %v15226_v24 = vld [vmem:[%s15882_s1 + $0x38] sm:$0xff]  }
0x22ea   :  { %12023 = vmatmul.mubr.msk.bf16.vlgmr.msra.gmra.mrb[216].mxu0 %vm415_vm2, %v6398_v12  ;;  %v15190_v12 = vld [vmem:[%s15882_s1 + $0x20] sm:$0xff]  }
0x22eb   :  { %10908 = vmatpush3.bf16.msra.mxu0 %v14603_v60  ;;  %6524 = vmatprep.mubr.bf16.mxu0 %v9573_v28  ;;  %v15184_v28 = vld [vmem:[%s15882_s1 + $0x60] sm:$0xff]  }
0x22ec   :  { %10909 = vmatprep.subr.bf16.mxu0 %v14609_v61  ;;  %v15233_v25 = vld [vmem:[%s15882_s1 + $0x80] sm:$0xff]  }
0x22ef   :  { %10910 = vmatpush3.bf16.msra.mxu0 %v14615_v62 }
0x22f0   :  { %10911 = vmatprep.subr.bf16.mxu0 %v14621_v46 }
0x22f3   :  { %10912 = vmatpush3.bf16.msra.mxu0 %v14627_v50 }
0x22f4   :  { %10913 = vmatprep.subr.bf16.mxu0 %v14633_v52 }
0x22f7   :  { %10914 = vmatpush3.bf16.msra.mxu0 %v14639_v53 }
0x22f8   :  { %10915 = vmatprep.subr.bf16.mxu0 %v14645_v9 }
0x22fb   :  { %10916 = vmatpush3.bf16.msra.mxu0 %v14651_v54 }
0x22fc   :  { %10917 = vmatprep.subr.bf16.mxu0 %v14657_v7 }
0x22ff   :  { %10918 = vmatpush3.bf16.msra.mxu0 %v14663_v55 }
0x2300   :  { %10919 = vmatprep.subr.bf16.mxu0 %v14669_v56 }
0x2303   :  { %10920 = vmatpush3.bf16.msra.mxu0 %v14675_v1 }
0x2304   :  { %10921 = vmatprep.subr.bf16.mxu0 %v14681_v3 }
0x2307   :  { %10922 = vmatpush3.bf16.msra.mxu0 %v14687_v5 }
0x2308   :  { %12046 = vmatprep.subr.bf16.mxu0 %v12789_v23 }
0x230a   :  { %6525 = vmatmul.mubr.bf16.vlgmr.msra.gmra.mrb[220].mxu0 %v9572_v26  ;;  %v15196_v26 = vld [vmem:[%s15882_s1 + $0x68] sm:$0xff]  }
0x230b   :  { %12047 = vmatpush3.bf16.msra.mxu0 %v14694_v6  ;;  %12050 = vmatprep.mubr.msk.bf16.mxu0 %vm12790_vm0, %v12789_v23 }
0x230c   :  { %12048 = vmatprep.subr.bf16.mxu0 %v12789_v23 }
0x230f   :  { %12049 = vmatpush3.bf16.msra.mxu0 %v14758_v39 }
0x2310   :  { %12054 = vmatprep.subr.bf16.mxu0 %v12789_v23 }
0x2312   :  { %12051 = vmatmul.mubr.msk.bf16.vlgmr.msra.gmra.mrb[224].mxu0 %vm190_vm1, %v12587_v41  ;;  %v12596_v41 = vld [vmem:[%s15884_s3 + $0x4c8] sm:$0xff]  }
0x2313   :  { %12062 = vmatprep.mubr.msk.bf16.mxu0 %vm12790_vm0, %v12789_v23 }
0x23bd   :  { %v6469_v29 = vpop.f32.mrb[216].mxu0 }
0x23be   :  { %v6475_v30 = vadd.f32 %v6469_v29, %v6300_v35  ;;  %v12024_v31 = vpop.f32.mrb[217].mxu0 }
0x23bf   :  { %v6472_v32 = vpop.f32.mrb[218].mxu0 }
0x23c0   :  { %v12025_v63 = vpop.f32.mrb[219].mxu0 }
0x23c1   :  { %v12598_v63 = vld [vmem:[%s15884_s3 + $0x4d8] sm:$0xff]  }
0x23dd   :  { %v10923_v0 = vpop.f32.mrb[220].mxu0 }
0x23de   :  { %v10924_v15 = vpop.f32.mrb[221].mxu0 }
0x23df   :  { %v10925_v33 = vadd.f32 %v10924_v15, %v10923_v0  ;;  %v10926_v36 = vpop.f32.mrb[222].mxu0  ;;  %v15259_v0 = vld [vmem:[%s15882_s1 + $0x40] sm:$0xff]   ;;  %v12601_v15 = vld [vmem:[%s15883_s0 + $0x1dc] ss:$0 sps:$4 sm:$0xff]  }
0x23e0   :  { %v10927_v37 = vpop.f32.mrb[223].mxu0 }
0x23e1   :  { %v6527_v51 = vadd.f32 %v15081_v38, %v10925_v33 }
0x23e3   :  { %v6567_v49 = vadd.f32 %v6566_v18, %v6527_v51  ;;  %v15214_v18 = vld [vmem:[%s15882_s1 + $0x30] sm:$0xff]  }
0x23e5   :  { %v6572_v42 = vmax.f32 %v6567_v49, 0.0 }
0x23e7   :  { %v6573_v45 = vpack.c.bf16 %v6572_v42, %v6572_v42 }
0x23e9   :  { %12043 = vmatmul.mubr.msk.bf16.vlgmr.msra.gmra.mrb[216].mxu1 %vm415_vm2, %v6573_v45 }
0x23ea   :  { %10938 = vmatpush3.bf16.msra.mxu1 %v14603_v60  ;;  %6699 = vmatprep.mubr.bf16.mxu1 %v9592_v43  ;;  %v9591_v60 = vcombine.low %v9589_v40, %v9589_v40 }
0x23eb   :  { %10939 = vmatprep.subr.bf16.mxu1 %v14609_v61  ;;  %v12588_v61 = vld [vmem:[%s15884_s3 + $0x4a0] sm:$0xff]  }
0x23ec   :  { %12055 = vmatpush3.bf16.msra.mxu0 %v12588_v61 }
0x23ed   :  { %12056 = vmatprep.subr.bf16.mxu0 %v12789_v23 }
0x23ee   :  { %10940 = vmatpush3.bf16.msra.mxu1 %v14615_v62  ;;  %v12589_v62 = vld [vmem:[%s15884_s3 + $0x4a8] sm:$0xff]  }
0x23ef   :  { %10941 = vmatprep.subr.bf16.mxu1 %v14621_v46  ;;  %v6741_v46 = vpop.f32.mrb[224].mxu0 }
0x23f0   :  { %12057 = vmatpush3.bf16.msra.mxu0 %v12589_v62 }
0x23f1   :  { %12058 = vmatprep.subr.bf16.mxu0 %v12789_v23 }
0x23f2   :  { %10942 = vmatpush3.bf16.msra.mxu1 %v14627_v50  ;;  %v12590_v50 = vld [vmem:[%s15884_s3 + $0x4b0] sm:$0xff]  }
0x23f3   :  { %10943 = vmatprep.subr.bf16.mxu1 %v14633_v52  ;;  %v12052_v52 = vpop.f32.mrb[225].mxu0 }
0x23f4   :  { %12059 = vmatpush3.bf16.msra.mxu0 %v12590_v50 }
0x23f5   :  { %12060 = vmatprep.subr.bf16.mxu0 %v12789_v23 }
0x23f6   :  { %10944 = vmatpush3.bf16.msra.mxu1 %v14639_v53  ;;  %v6744_v53 = vpop.f32.mrb[226].mxu0 }
0x23f7   :  { %10945 = vmatprep.subr.bf16.mxu1 %v14645_v9  ;;  %v12053_v9 = vpop.f32.mrb[227].mxu0 }
0x23fa   :  { %10946 = vmatpush3.bf16.msra.mxu1 %v14651_v54  ;;  %v12591_v54 = vld [vmem:[%s15884_s3 + $0x4b8] sm:$0xff]  }
0x23fb   :  { %10947 = vmatprep.subr.bf16.mxu1 %v14657_v7  ;;  %12061 = vmatpush3.bf16.msra.mxu0 %v12591_v54  ;;  %v12594_v7 = vld [vmem:[%s15883_s0 + $0x1d0] ss:$0 sps:$4 sm:$0xff]   ;;  %v15297_v54 = vld [vmem:[%s15882_s1 + $0x88] sm:$0xff]  }
0x23fc   :  { %10967 = vmatprep.subr.bf16.mxu0 %v14720_v19 }
0x23fe   :  { %10948 = vmatpush3.bf16.msra.mxu1 %v14663_v55 }
0x23ff   :  { %10949 = vmatprep.subr.bf16.mxu1 %v14669_v56 }
0x2402   :  { %10950 = vmatpush3.bf16.msra.mxu1 %v14675_v1 }
0x2403   :  { %10951 = vmatprep.subr.bf16.mxu1 %v14681_v3 }
0x2406   :  { %10952 = vmatpush3.bf16.msra.mxu1 %v14687_v5 }
0x2407   :  { %12066 = vmatprep.subr.bf16.mxu1 %v12789_v23 }
0x2409   :  { %6700 = vmatmul.mubr.bf16.vlgmr.msra.gmra.mrb[220].mxu1 %v9591_v60 }
0x240a   :  { %12067 = vmatpush3.bf16.msra.mxu1 %v14694_v6  ;;  %12070 = vmatprep.mubr.msk.bf16.mxu1 %vm12790_vm0, %v12789_v23 }
0x240b   :  { %12068 = vmatprep.subr.bf16.mxu1 %v12789_v23 }
0x240e   :  { %12069 = vmatpush3.bf16.msra.mxu1 %v14758_v39 }
0x240f   :  { %12074 = vmatprep.subr.bf16.mxu1 %v12789_v23 }
0x2411   :  { %12071 = vmatmul.mubr.msk.bf16.vlgmr.msra.gmra.mrb[224].mxu1 %vm190_vm1, %v12594_v7  ;;  %v12602_v7 = vld [vmem:[%s15884_s3 + $0x4e0] sm:$0xff]  }
0x2412   :  { %12082 = vmatprep.mubr.msk.bf16.mxu1 %vm12790_vm0, %v12789_v23  ;;  %12075 = vmatpush3.bf16.msra.mxu1 %v12595_v27 }
0x2413   :  { %12076 = vmatprep.subr.bf16.mxu1 %v12789_v23 }
0x2416   :  { %12077 = vmatpush3.bf16.msra.mxu1 %v12596_v41 }
0x2417   :  { %12078 = vmatprep.subr.bf16.mxu1 %v12789_v23 }
0x24bc   :  { %v6644_v55 = vpop.f32.mrb[216].mxu1 }
0x24bd   :  { %v15132_v56 = vadd.f32 %v6644_v55, %v6475_v30  ;;  %v12044_v1 = vpop.f32.mrb[217].mxu1  ;;  %v12603_v55 = vld [vmem:[%s15884_s3 + $0x4e8] sm:$0xff]  }
0x24be   :  { %v6647_v3 = vpop.f32.mrb[218].mxu1  ;;  %v12604_v1 = vld [vmem:[%s15884_s3 + $0x4f0] sm:$0xff]  }
0x24bf   :  { %v12045_v5 = vpop.f32.mrb[219].mxu1 }
0x24dc   :  { %v10953_v6 = vpop.f32.mrb[220].mxu1 }
0x24dd   :  { %v10954_v47 = vpop.f32.mrb[221].mxu1 }
0x24de   :  { %v10955_v48 = vadd.f32 %v10954_v47, %v10953_v6  ;;  %v10956_v34 = vpop.f32.mrb[222].mxu1  ;;  %v12605_v47 = vld [vmem:[%s15884_s3 + $0x4f8] sm:$0xff]  }
0x24df   :  { %v10957_v19 = vpop.f32.mrb[223].mxu1 }
0x24e0   :  { %v6702_v35 = vadd.f32 %v15081_v38, %v10955_v48  ;;  %v12608_v48 = vld [vmem:[%s15883_s0 + $0x1e8] ss:$0 sps:$4 sm:$0xff]  }
0x24e2   :  { %v6742_v16 = vadd.f32 %v6741_v46, %v6702_v35  ;;  %v9627_v46 = vld [vmem:[%s15883_s0 + $0x1d4] sm:$0xff] }
0x24e3   :  { %v9630_v52 = vcombine.high %v9627_v46, %v9627_v46  ;;  %v9629_v9 = vcombine.low %v9627_v46, %v9627_v46 }
0x24e4   :  { %v6747_v17 = vmax.f32 %v6742_v16, 0.0  ;;  %v6916_v29 = vpop.f32.mrb[224].mxu1 }
0x24e5   :  { %v12072_v30 = vpop.f32.mrb[225].mxu1 }
0x24e6   :  { %v6748_v44 = vpack.c.bf16 %v6747_v17, %v6747_v17  ;;  %v6919_v31 = vpop.f32.mrb[226].mxu1 }
0x24e7   :  { %v12073_v32 = vpop.f32.mrb[227].mxu1 }
0x24e8   :  { %12063 = vmatmul.mubr.msk.bf16.vlgmr.msra.gmra.mrb[228].mxu0 %vm415_vm2, %v6748_v44 }
0x24e9   :  { %10968 = vmatpush3.bf16.msra.mxu0 %v15142_v58  ;;  %6874 = vmatprep.mubr.bf16.mxu0 %v9611_v57 }
0x24ea   :  { %10969 = vmatprep.subr.bf16.mxu0 %v15148_v59 }
0x24ed   :  { %10970 = vmatpush3.bf16.msra.mxu0 %v15154_v22 }
0x24ee   :  { %10971 = vmatprep.subr.bf16.mxu0 %v15160_v4 }
0x24f1   :  { %10972 = vmatpush3.bf16.msra.mxu0 %v15166_v8 }
0x24f2   :  { %10973 = vmatprep.subr.bf16.mxu0 %v15172_v10 }
0x24f5   :  { %10974 = vmatpush3.bf16.msra.mxu0 %v15178_v11 }
0x24f6   :  { %10975 = vmatprep.subr.bf16.mxu0 %v15184_v28 }
0x24f9   :  { %10976 = vmatpush3.bf16.msra.mxu0 %v15190_v12 }
0x24fa   :  { %10977 = vmatprep.subr.bf16.mxu0 %v15196_v26 }
0x24fd   :  { %10978 = vmatpush3.bf16.msra.mxu0 %v15202_v13 }
0x24fe   :  { %10979 = vmatprep.subr.bf16.mxu0 %v15208_v14 }
0x2501   :  { %10980 = vmatpush3.bf16.msra.mxu0 %v15214_v18 }
0x2502   :  { %10981 = vmatprep.subr.bf16.mxu0 %v15220_v20 }
0x2505   :  { %10982 = vmatpush3.bf16.msra.mxu0 %v15226_v24 }
0x2506   :  { %12086 = vmatprep.subr.bf16.mxu0 %v12789_v23 }
0x2508   :  { %6875 = vmatmul.mubr.bf16.vlgmr.msra.gmra.mrb[232].mxu0 %v9610_v21 }
0x2509   :  { %12087 = vmatpush3.bf16.msra.mxu0 %v15233_v25  ;;  %12090 = vmatprep.mubr.msk.bf16.mxu0 %vm12790_vm0, %v12789_v23 }
0x250a   :  { %12088 = vmatprep.subr.bf16.mxu0 %v12789_v23 }
0x250d   :  { %12089 = vmatpush3.bf16.msra.mxu0 %v14758_v39  ;;  %v12597_v39 = vld [vmem:[%s15884_s3 + $0x4d0] sm:$0xff]  }
0x250e   :  { %12094 = vmatprep.subr.bf16.mxu0 %v12789_v23  ;;  %12079 = vmatpush3.bf16.msra.mxu1 %v12597_v39  ;;  %v9646_v39 = vld [vmem:[%s15883_s0 + $0x1e0] sm:$0xff] }
0x250f   :  { %12080 = vmatprep.subr.bf16.mxu1 %v12789_v23  ;;  %v9649_v31 = vcombine.high %v9646_v39, %v9646_v39 }
0x2510   :  { %12091 = vmatmul.mubr.msk.bf16.vlgmr.msra.gmra.mrb[236].mxu0 %vm190_vm1, %v12601_v15  ;;  %v12609_v15 = vld [vmem:[%s15884_s3 + $0x500] sm:$0xff]  }
0x2511   :  { %12102 = vmatprep.mubr.msk.bf16.mxu0 %vm12790_vm0, %v12789_v23  ;;  %12095 = vmatpush3.bf16.msra.mxu0 %v12602_v7 }
0x2512   :  { %12081 = vmatpush3.bf16.msra.mxu1 %v12598_v63  ;;  %12096 = vmatprep.subr.bf16.mxu0 %v12789_v23  ;;  %v9648_v63 = vcombine.low %v9646_v39, %v9646_v39 }
0x2513   :  { %10997 = vmatprep.subr.bf16.mxu1 %v15259_v0 }
0x2515   :  { %12097 = vmatpush3.bf16.msra.mxu0 %v12603_v55 }
0x2516   :  { %12098 = vmatprep.subr.bf16.mxu0 %v12789_v23 }
0x2519   :  { %12099 = vmatpush3.bf16.msra.mxu0 %v12604_v1  ;;  %v9665_v1 = vld [vmem:[%s15883_s0 + $0x1ec] sm:$0xff] }
0x251a   :  { %12100 = vmatprep.subr.bf16.mxu0 %v12789_v23 }
0x251d   :  { %12101 = vmatpush3.bf16.msra.mxu0 %v12605_v47  ;;  %v9667_v47 = vcombine.low %v9665_v1, %v9665_v1 }
0x251e   :  { %11027 = vmatprep.subr.bf16.mxu0 %v15259_v0 }
0x25bb   :  { %v6819_v33 = vpop.f32.mrb[228].mxu0 }
0x25bc   :  { %v6825_v36 = vadd.f32 %v6819_v33, %v15132_v56  ;;  %v12064_v37 = vpop.f32.mrb[229].mxu0  ;;  %v12610_v33 = vld [vmem:[%s15884_s3 + $0x508] sm:$0xff]  }
0x25bd   :  { %v6822_v51 = vpop.f32.mrb[230].mxu0  ;;  %v12611_v37 = vld [vmem:[%s15884_s3 + $0x510] sm:$0xff]  }
0x25be   :  { %v12065_v49 = vpop.f32.mrb[231].mxu0 }
0x25db   :  { %v10983_v40 = vpop.f32.mrb[232].mxu0 }
0x25dc   :  { %v10984_v42 = vpop.f32.mrb[233].mxu0 }
0x25dd   :  { %v10985_v43 = vadd.f32 %v10984_v42, %v10983_v40  ;;  %v10986_v45 = vpop.f32.mrb[234].mxu0  ;;  %v12612_v42 = vld [vmem:[%s15884_s3 + $0x518] sm:$0xff]  }
0x25de   :  { %v10987_v60 = vpop.f32.mrb[235].mxu0 }
0x25df   :  { %v6877_v61 = vadd.f32 %v15081_v38, %v10985_v43  ;;  %v12615_v43 = vld [vmem:[%s15883_s0 + $0x1f4] ss:$0 sps:$4 sm:$0xff]  }
0x25e1   :  { %v6917_v62 = vadd.f32 %v6916_v29, %v6877_v61 }
0x25e3   :  { %v6922_v50 = vmax.f32 %v6917_v62, 0.0  ;;  %v7091_v56 = vpop.f32.mrb[236].mxu0 }
0x25e4   :  { %v12092_v3 = vpop.f32.mrb[237].mxu0 }
0x25e5   :  { %v6923_v53 = vpack.c.bf16 %v6922_v50, %v6922_v50  ;;  %v7094_v5 = vpop.f32.mrb[238].mxu0 }
0x25e6   :  { %v12093_v6 = vpop.f32.mrb[239].mxu0  ;;  %v9668_v5 = vcombine.high %v9665_v1, %v9665_v1 }
0x25e7   :  { %12083 = vmatmul.mubr.msk.bf16.vlgmr.msra.gmra.mrb[228].mxu1 %vm415_vm2, %v6923_v53 }
0x25e8   :  { %10998 = vmatpush3.bf16.msra.mxu1 %v15142_v58  ;;  %7049 = vmatprep.mubr.bf16.mxu1 %v9630_v52 }
0x25e9   :  { %10999 = vmatprep.subr.bf16.mxu1 %v15148_v59 }
0x25ec   :  { %11000 = vmatpush3.bf16.msra.mxu1 %v15154_v22 }
0x25ed   :  { %11001 = vmatprep.subr.bf16.mxu1 %v15160_v4 }
0x25f0   :  { %11002 = vmatpush3.bf16.msra.mxu1 %v15166_v8 }
0x25f1   :  { %11003 = vmatprep.subr.bf16.mxu1 %v15172_v10 }
0x25f4   :  { %11004 = vmatpush3.bf16.msra.mxu1 %v15178_v11 }
0x25f5   :  { %11005 = vmatprep.subr.bf16.mxu1 %v15184_v28 }
0x25f8   :  { %11006 = vmatpush3.bf16.msra.mxu1 %v15190_v12 }
0x25f9   :  { %11007 = vmatprep.subr.bf16.mxu1 %v15196_v26 }
0x25fc   :  { %11008 = vmatpush3.bf16.msra.mxu1 %v15202_v13 }
0x25fd   :  { %11009 = vmatprep.subr.bf16.mxu1 %v15208_v14 }
0x2600   :  { %11010 = vmatpush3.bf16.msra.mxu1 %v15214_v18 }
0x2601   :  { %11011 = vmatprep.subr.bf16.mxu1 %v15220_v20 }
0x2604   :  { %11012 = vmatpush3.bf16.msra.mxu1 %v15226_v24 }
0x2605   :  { %12106 = vmatprep.subr.bf16.mxu1 %v12789_v23 }
0x2607   :  { %7050 = vmatmul.mubr.bf16.vlgmr.msra.gmra.mrb[232].mxu1 %v9629_v9 }
0x2608   :  { %12107 = vmatpush3.bf16.msra.mxu1 %v15233_v25  ;;  %12110 = vmatprep.mubr.msk.bf16.mxu1 %vm12790_vm0, %v12789_v23 }
0x2609   :  { %12108 = vmatprep.subr.bf16.mxu1 %v12789_v23 }
0x260c   :  { %12109 = vmatpush3.bf16.msra.mxu1 %v15297_v54 }
0x260d   :  { %12114 = vmatprep.subr.bf16.mxu1 %v12789_v23 }
0x260f   :  { %12111 = vmatmul.mubr.msk.bf16.vlgmr.msra.gmra.mrb[236].mxu1 %vm190_vm1, %v12608_v48  ;;  %v12616_v48 = vld [vmem:[%s15884_s3 + $0x520] sm:$0xff]  }
0x2610   :  { %12122 = vmatprep.mubr.msk.bf16.mxu1 %vm12790_vm0, %v12789_v23  ;;  %12115 = vmatpush3.bf16.msra.mxu1 %v12609_v15 }
0x2611   :  { %12116 = vmatprep.subr.bf16.mxu1 %v12789_v23 }
0x2614   :  { %12117 = vmatpush3.bf16.msra.mxu1 %v12610_v33 }
0x2615   :  { %12118 = vmatprep.subr.bf16.mxu1 %v12789_v23 }
0x2618   :  { %12119 = vmatpush3.bf16.msra.mxu1 %v12611_v37  ;;  %v9684_v37 = vld [vmem:[%s15883_s0 + $0x1f8] sm:$0xff] }
0x2619   :  { %12120 = vmatprep.subr.bf16.mxu1 %v12789_v23 }
0x261c   :  { %12121 = vmatpush3.bf16.msra.mxu1 %v12612_v42  ;;  %v9686_v42 = vcombine.low %v9684_v37, %v9684_v37 }
0x261d   :  { %11057 = vmatprep.subr.bf16.mxu1 %v15259_v0 }
0x26ba   :  { %v6994_v34 = vpop.f32.mrb[228].mxu1 }
0x26bb   :  { %v7000_v19 = vadd.f32 %v6994_v34, %v6825_v36  ;;  %v12084_v35 = vpop.f32.mrb[229].mxu1  ;;  %v12617_v34 = vld [vmem:[%s15884_s3 + $0x528] sm:$0xff]  }
0x26bc   :  { %v6997_v16 = vpop.f32.mrb[230].mxu1  ;;  %v12618_v35 = vld [vmem:[%s15884_s3 + $0x530] sm:$0xff]  }
0x26bd   :  { %v12085_v2 = vpop.f32.mrb[231].mxu1 }
0x26da   :  { %v11013_v17 = vpop.f32.mrb[232].mxu1 }
0x26db   :  { %v11014_v57 = vpop.f32.mrb[233].mxu1 }
0x26dc   :  { %v11015_v44 = vadd.f32 %v11014_v57, %v11013_v17  ;;  %v11016_v21 = vpop.f32.mrb[234].mxu1  ;;  %v12619_v57 = vld [vmem:[%s15884_s3 + $0x538] sm:$0xff]  }
0x26dd   :  { %v11017_v27 = vpop.f32.mrb[235].mxu1 }
0x26de   :  { %v7052_v41 = vadd.f32 %v15081_v38, %v11015_v44  ;;  %v12622_v44 = vld [vmem:[%s15883_s0 + $0x200] ss:$0 sps:$4 sm:$0xff]  }
0x26e0   :  { %v7092_v29 = vadd.f32 %v7091_v56, %v7052_v41 }
0x26e2   :  { %v7097_v30 = vmax.f32 %v7092_v29, 0.0  ;;  %v7266_v36 = vpop.f32.mrb[236].mxu1 }
0x26e3   :  { %v12112_v51 = vpop.f32.mrb[237].mxu1 }
0x26e4   :  { %v7098_v32 = vpack.c.bf16 %v7097_v30, %v7097_v30  ;;  %v7269_v49 = vpop.f32.mrb[238].mxu1 }
0x26e5   :  { %v12113_v40 = vpop.f32.mrb[239].mxu1  ;;  %v9687_v49 = vcombine.high %v9684_v37, %v9684_v37 }
0x26e6   :  { %12103 = vmatmul.mubr.msk.bf16.vlgmr.msra.gmra.mrb[240].mxu0 %vm415_vm2, %v7098_v32 }
0x26e7   :  { %11028 = vmatpush3.bf16.msra.mxu0 %v15142_v58  ;;  %7224 = vmatprep.mubr.bf16.mxu0 %v9649_v31 }
0x26e8   :  { %11029 = vmatprep.subr.bf16.mxu0 %v15148_v59 }
0x26eb   :  { %11030 = vmatpush3.bf16.msra.mxu0 %v15154_v22 }
0x26ec   :  { %11031 = vmatprep.subr.bf16.mxu0 %v15160_v4 }
0x26ef   :  { %11032 = vmatpush3.bf16.msra.mxu0 %v15166_v8 }
0x26f0   :  { %11033 = vmatprep.subr.bf16.mxu0 %v15172_v10 }
0x26f3   :  { %11034 = vmatpush3.bf16.msra.mxu0 %v15178_v11 }
0x26f4   :  { %11035 = vmatprep.subr.bf16.mxu0 %v15184_v28 }
0x26f7   :  { %11036 = vmatpush3.bf16.msra.mxu0 %v15190_v12 }
0x26f8   :  { %11037 = vmatprep.subr.bf16.mxu0 %v15196_v26 }
0x26fb   :  { %11038 = vmatpush3.bf16.msra.mxu0 %v15202_v13 }
0x26fc   :  { %11039 = vmatprep.subr.bf16.mxu0 %v15208_v14 }
0x26ff   :  { %11040 = vmatpush3.bf16.msra.mxu0 %v15214_v18 }
0x2700   :  { %11041 = vmatprep.subr.bf16.mxu0 %v15220_v20 }
0x2703   :  { %11042 = vmatpush3.bf16.msra.mxu0 %v15226_v24 }
0x2704   :  { %12126 = vmatprep.subr.bf16.mxu0 %v12789_v23 }
0x2706   :  { %7225 = vmatmul.mubr.bf16.vlgmr.msra.gmra.mrb[244].mxu0 %v9648_v63 }
0x2707   :  { %12127 = vmatpush3.bf16.msra.mxu0 %v15233_v25  ;;  %12130 = vmatprep.mubr.msk.bf16.mxu0 %vm12790_vm0, %v12789_v23 }
0x2708   :  { %12128 = vmatprep.subr.bf16.mxu0 %v12789_v23 }
0x270b   :  { %12129 = vmatpush3.bf16.msra.mxu0 %v15297_v54 }
0x270c   :  { %12134 = vmatprep.subr.bf16.mxu0 %v12789_v23 }
0x270e   :  { %12131 = vmatmul.mubr.msk.bf16.vlgmr.msra.gmra.mrb[248].mxu0 %vm190_vm1, %v12615_v43  ;;  %v12623_v43 = vld [vmem:[%s15884_s3 + $0x540] sm:$0xff]  }
0x270f   :  { %12142 = vmatprep.mubr.msk.bf16.mxu0 %vm12790_vm0, %v12789_v23  ;;  %12135 = vmatpush3.bf16.msra.mxu0 %v12616_v48 }
0x2710   :  { %12136 = vmatprep.subr.bf16.mxu0 %v12789_v23 }
0x2713   :  { %12137 = vmatpush3.bf16.msra.mxu0 %v12617_v34 }
0x2714   :  { %12138 = vmatprep.subr.bf16.mxu0 %v12789_v23 }
0x2717   :  { %12139 = vmatpush3.bf16.msra.mxu0 %v12618_v35  ;;  %v9703_v35 = vld [vmem:[%s15883_s0 + $0x204] sm:$0xff] }
0x2718   :  { %12140 = vmatprep.subr.bf16.mxu0 %v12789_v23 }
0x271b   :  { %12141 = vmatpush3.bf16.msra.mxu0 %v12619_v57  ;;  %v9705_v57 = vcombine.low %v9703_v35, %v9703_v35 }
0x271c   :  { %11087 = vmatprep.subr.bf16.mxu0 %v15259_v0 }
0x27b9   :  { %v7169_v45 = vpop.f32.mrb[240].mxu0 }
0x27ba   :  { %v7175_v60 = vadd.f32 %v7169_v45, %v7000_v19  ;;  %v12104_v61 = vpop.f32.mrb[241].mxu0  ;;  %v12624_v45 = vld [vmem:[%s15884_s3 + $0x548] sm:$0xff]  }
0x27bb   :  { %v7172_v62 = vpop.f32.mrb[242].mxu0  ;;  %v12625_v61 = vld [vmem:[%s15884_s3 + $0x550] sm:$0xff]  }
0x27bc   :  { %v12105_v46 = vpop.f32.mrb[243].mxu0 }
0x27d9   :  { %v11043_v50 = vpop.f32.mrb[244].mxu0 }
0x27da   :  { %v11044_v52 = vpop.f32.mrb[245].mxu0 }
0x27db   :  { %v11045_v53 = vadd.f32 %v11044_v52, %v11043_v50  ;;  %v11046_v9 = vpop.f32.mrb[246].mxu0  ;;  %v12626_v52 = vld [vmem:[%s15884_s3 + $0x558] sm:$0xff]  }
0x27dc   :  { %v11047_v7 = vpop.f32.mrb[247].mxu0 }
0x27dd   :  { %v7227_v55 = vadd.f32 %v15081_v38, %v11045_v53  ;;  %v12629_v53 = vld [vmem:[%s15883_s0 + $0x20c] ss:$0 sps:$4 sm:$0xff]  }
0x27df   :  { %v7267_v56 = vadd.f32 %v7266_v36, %v7227_v55 }
0x27e1   :  { %v7272_v3 = vmax.f32 %v7267_v56, 0.0  ;;  %v7441_v19 = vpop.f32.mrb[248].mxu0 }
0x27e2   :  { %v12132_v16 = vpop.f32.mrb[249].mxu0 }
0x27e3   :  { %v7273_v6 = vpack.c.bf16 %v7272_v3, %v7272_v3  ;;  %v7444_v2 = vpop.f32.mrb[250].mxu0 }
0x27e4   :  { %v12133_v17 = vpop.f32.mrb[251].mxu0  ;;  %v9706_v2 = vcombine.high %v9703_v35, %v9703_v35 }
0x27e5   :  { %12123 = vmatmul.mubr.msk.bf16.vlgmr.msra.gmra.mrb[240].mxu1 %vm415_vm2, %v7273_v6 }
0x27e6   :  { %11058 = vmatpush3.bf16.msra.mxu1 %v15142_v58  ;;  %7399 = vmatprep.mubr.bf16.mxu1 %v9668_v5 }
0x27e7   :  { %11059 = vmatprep.subr.bf16.mxu1 %v15148_v59 }
0x27ea   :  { %11060 = vmatpush3.bf16.msra.mxu1 %v15154_v22 }
0x27eb   :  { %11061 = vmatprep.subr.bf16.mxu1 %v15160_v4 }
0x27ee   :  { %11062 = vmatpush3.bf16.msra.mxu1 %v15166_v8 }
0x27ef   :  { %11063 = vmatprep.subr.bf16.mxu1 %v15172_v10 }
0x27f2   :  { %11064 = vmatpush3.bf16.msra.mxu1 %v15178_v11 }
0x27f3   :  { %11065 = vmatprep.subr.bf16.mxu1 %v15184_v28 }
0x27f6   :  { %11066 = vmatpush3.bf16.msra.mxu1 %v15190_v12 }
0x27f7   :  { %11067 = vmatprep.subr.bf16.mxu1 %v15196_v26 }
0x27fa   :  { %11068 = vmatpush3.bf16.msra.mxu1 %v15202_v13 }
0x27fb   :  { %11069 = vmatprep.subr.bf16.mxu1 %v15208_v14 }
0x27fe   :  { %11070 = vmatpush3.bf16.msra.mxu1 %v15214_v18 }
0x27ff   :  { %11071 = vmatprep.subr.bf16.mxu1 %v15220_v20 }
0x2802   :  { %11072 = vmatpush3.bf16.msra.mxu1 %v15226_v24 }
0x2803   :  { %12146 = vmatprep.subr.bf16.mxu1 %v12789_v23 }
0x2805   :  { %7400 = vmatmul.mubr.bf16.vlgmr.msra.gmra.mrb[244].mxu1 %v9667_v47 }
0x2806   :  { %12147 = vmatpush3.bf16.msra.mxu1 %v15233_v25  ;;  %12150 = vmatprep.mubr.msk.bf16.mxu1 %vm12790_vm0, %v12789_v23 }
0x2807   :  { %12148 = vmatprep.subr.bf16.mxu1 %v12789_v23 }
0x280a   :  { %12149 = vmatpush3.bf16.msra.mxu1 %v15297_v54 }
0x280b   :  { %12154 = vmatprep.subr.bf16.mxu1 %v12789_v23 }
0x280d   :  { %12151 = vmatmul.mubr.msk.bf16.vlgmr.msra.gmra.mrb[248].mxu1 %vm190_vm1, %v12622_v44  ;;  %v12630_v44 = vld [vmem:[%s15884_s3 + $0x560] sm:$0xff]  }
0x280e   :  { %12162 = vmatprep.mubr.msk.bf16.mxu1 %vm12790_vm0, %v12789_v23  ;;  %12155 = vmatpush3.bf16.msra.mxu1 %v12623_v43 }
0x280f   :  { %12156 = vmatprep.subr.bf16.mxu1 %v12789_v23 }
0x2812   :  { %12157 = vmatpush3.bf16.msra.mxu1 %v12624_v45 }
0x2813   :  { %12158 = vmatprep.subr.bf16.mxu1 %v12789_v23 }
0x2816   :  { %12159 = vmatpush3.bf16.msra.mxu1 %v12625_v61  ;;  %v9722_v61 = vld [vmem:[%s15883_s0 + $0x210] sm:$0xff] }
0x2817   :  { %12160 = vmatprep.subr.bf16.mxu1 %v12789_v23 }
0x281a   :  { %12161 = vmatpush3.bf16.msra.mxu1 %v12626_v52  ;;  %v9724_v52 = vcombine.low %v9722_v61, %v9722_v61 }
0x281b   :  { %11117 = vmatprep.subr.bf16.mxu1 %v15259_v0 }
0x28b8   :  { %v7344_v21 = vpop.f32.mrb[240].mxu1 }
0x28b9   :  { %v7350_v27 = vadd.f32 %v7344_v21, %v7175_v60  ;;  %v12124_v41 = vpop.f32.mrb[241].mxu1  ;;  %v12631_v21 = vld [vmem:[%s15884_s3 + $0x568] sm:$0xff]  }
0x28ba   :  { %v7347_v29 = vpop.f32.mrb[242].mxu1  ;;  %v12632_v41 = vld [vmem:[%s15884_s3 + $0x570] sm:$0xff]  }
0x28bb   :  { %v12125_v39 = vpop.f32.mrb[243].mxu1 }
0x28d8   :  { %v11073_v30 = vpop.f32.mrb[244].mxu1 }
0x28d9   :  { %v11074_v31 = vpop.f32.mrb[245].mxu1 }
0x28da   :  { %v11075_v32 = vadd.f32 %v11074_v31, %v11073_v30  ;;  %v11076_v63 = vpop.f32.mrb[246].mxu1  ;;  %v12633_v31 = vld [vmem:[%s15884_s3 + $0x578] sm:$0xff]  }
0x28db   :  { %v11077_v15 = vpop.f32.mrb[247].mxu1 }
0x28dc   :  { %v7402_v33 = vadd.f32 %v15081_v38, %v11075_v32  ;;  %v12636_v32 = vld [vmem:[%s15883_s0 + $0x218] ss:$0 sps:$4 sm:$0xff]  }
0x28de   :  { %v7442_v36 = vadd.f32 %v7441_v19, %v7402_v33 }
0x28e0   :  { %v7447_v51 = vmax.f32 %v7442_v36, 0.0  ;;  %v7616_v60 = vpop.f32.mrb[248].mxu1 }
0x28e1   :  { %v12152_v62 = vpop.f32.mrb[249].mxu1 }
0x28e2   :  { %v7448_v40 = vpack.c.bf16 %v7447_v51, %v7447_v51  ;;  %v7619_v46 = vpop.f32.mrb[250].mxu1 }
0x28e3   :  { %v12153_v50 = vpop.f32.mrb[251].mxu1  ;;  %v9725_v46 = vcombine.high %v9722_v61, %v9722_v61 }
0x28e4   :  { %12143 = vmatmul.mubr.msk.bf16.vlgmr.msra.gmra.mrb[252].mxu0 %vm415_vm2, %v7448_v40 }
0x28e5   :  { %11088 = vmatpush3.bf16.msra.mxu0 %v15142_v58  ;;  %7574 = vmatprep.mubr.bf16.mxu0 %v9687_v49 }
0x28e6   :  { %11089 = vmatprep.subr.bf16.mxu0 %v15148_v59 }
0x28e9   :  { %11090 = vmatpush3.bf16.msra.mxu0 %v15154_v22 }
0x28ea   :  { %11091 = vmatprep.subr.bf16.mxu0 %v15160_v4 }
0x28ed   :  { %11092 = vmatpush3.bf16.msra.mxu0 %v15166_v8 }
0x28ee   :  { %11093 = vmatprep.subr.bf16.mxu0 %v15172_v10 }
0x28f1   :  { %11094 = vmatpush3.bf16.msra.mxu0 %v15178_v11 }
0x28f2   :  { %11095 = vmatprep.subr.bf16.mxu0 %v15184_v28 }
0x28f5   :  { %11096 = vmatpush3.bf16.msra.mxu0 %v15190_v12 }
0x28f6   :  { %11097 = vmatprep.subr.bf16.mxu0 %v15196_v26 }
0x28f9   :  { %11098 = vmatpush3.bf16.msra.mxu0 %v15202_v13 }
0x28fa   :  { %11099 = vmatprep.subr.bf16.mxu0 %v15208_v14 }
0x28fd   :  { %11100 = vmatpush3.bf16.msra.mxu0 %v15214_v18 }
0x28fe   :  { %11101 = vmatprep.subr.bf16.mxu0 %v15220_v20 }
0x2901   :  { %11102 = vmatpush3.bf16.msra.mxu0 %v15226_v24 }
0x2902   :  { %12166 = vmatprep.subr.bf16.mxu0 %v12789_v23 }
0x2904   :  { %7575 = vmatmul.mubr.bf16.vlgmr.msra.gmra.mrb[0].mxu0 %v9686_v42 }
0x2905   :  { %12167 = vmatpush3.bf16.msra.mxu0 %v15233_v25  ;;  %12170 = vmatprep.mubr.msk.bf16.mxu0 %vm12790_vm0, %v12789_v23 }
0x2906   :  { %12168 = vmatprep.subr.bf16.mxu0 %v12789_v23 }
0x2909   :  { %12169 = vmatpush3.bf16.msra.mxu0 %v15297_v54 }
0x290a   :  { %12174 = vmatprep.subr.bf16.mxu0 %v12789_v23 }
0x290c   :  { %12171 = vmatmul.mubr.msk.bf16.vlgmr.msra.gmra.mrb[4].mxu0 %vm190_vm1, %v12629_v53  ;;  %v12637_v53 = vld [vmem:[%s15884_s3 + $0x580] sm:$0xff]  }
0x290d   :  { %12182 = vmatprep.mubr.msk.bf16.mxu0 %vm12790_vm0, %v12789_v23  ;;  %12175 = vmatpush3.bf16.msra.mxu0 %v12630_v44 }
0x290e   :  { %12176 = vmatprep.subr.bf16.mxu0 %v12789_v23 }
0x2911   :  { %12177 = vmatpush3.bf16.msra.mxu0 %v12631_v21 }
0x2912   :  { %12178 = vmatprep.subr.bf16.mxu0 %v12789_v23 }
0x2915   :  { %12179 = vmatpush3.bf16.msra.mxu0 %v12632_v41  ;;  %v9741_v41 = vld [vmem:[%s15883_s0 + $0x21c] sm:$0xff] }
0x2916   :  { %12180 = vmatprep.subr.bf16.mxu0 %v12789_v23 }
0x2919   :  { %12181 = vmatpush3.bf16.msra.mxu0 %v12633_v31  ;;  %v12644_v31 = vld [vmem:[%s15884_s3 + $0x5a0] sm:$0xff]  }
0x291a   :  { %11147 = vmatprep.subr.bf16.mxu0 %v15259_v0 }
0x29b7   :  { %v7519_v9 = vpop.f32.mrb[252].mxu0 }
0x29b8   :  { %v7525_v7 = vadd.f32 %v7519_v9, %v7350_v27  ;;  %v12144_v55 = vpop.f32.mrb[253].mxu0  ;;  %v12638_v9 = vld [vmem:[%s15884_s3 + $0x588] sm:$0xff]  }
0x29b9   :  { %v7522_v56 = vpop.f32.mrb[254].mxu0  ;;  %v12639_v55 = vld [vmem:[%s15884_s3 + $0x590] sm:$0xff]  }
0x29ba   :  { %v12145_v1 = vpop.f32.mrb[255].mxu0 }
0x29d7   :  { %v11103_v3 = vpop.f32.mrb[0].mxu0 }
0x29d8   :  { %v11104_v5 = vpop.f32.mrb[1].mxu0 }
0x29d9   :  { %v11105_v6 = vadd.f32 %v11104_v5, %v11103_v3  ;;  %v11106_v47 = vpop.f32.mrb[2].mxu0  ;;  %v12640_v5 = vld [vmem:[%s15884_s3 + $0x598] sm:$0xff]  }
0x29da   :  { %v11107_v48 = vpop.f32.mrb[3].mxu0 }
0x29db   :  { %v7577_v34 = vadd.f32 %v15081_v38, %v11105_v6  ;;  %v12643_v6 = vld [vmem:[%s15883_s0 + $0x224] ss:$0 sps:$4 sm:$0xff]  }
0x29dd   :  { %v7617_v19 = vadd.f32 %v7616_v60, %v7577_v34 }
0x29df   :  { %v7622_v16 = vmax.f32 %v7617_v19, 0.0  ;;  %v7791_v27 = vpop.f32.mrb[4].mxu0 }
0x29e0   :  { %v12172_v29 = vpop.f32.mrb[5].mxu0 }
0x29e1   :  { %v7623_v17 = vpack.c.bf16 %v7622_v16, %v7622_v16  ;;  %v7794_v39 = vpop.f32.mrb[6].mxu0 }
0x29e2   :  { %v12173_v30 = vpop.f32.mrb[7].mxu0  ;;  %v9744_v39 = vcombine.high %v9741_v41, %v9741_v41 }
0x29e3   :  { %12163 = vmatmul.mubr.msk.bf16.vlgmr.msra.gmra.mrb[252].mxu1 %vm415_vm2, %v7623_v17 }
0x29e4   :  { %11118 = vmatpush3.bf16.msra.mxu1 %v15142_v58  ;;  %7749 = vmatprep.mubr.bf16.mxu1 %v9706_v2 }
0x29e5   :  { %11119 = vmatprep.subr.bf16.mxu1 %v15148_v59 }
0x29e8   :  { %11120 = vmatpush3.bf16.msra.mxu1 %v15154_v22 }
0x29e9   :  { %11121 = vmatprep.subr.bf16.mxu1 %v15160_v4 }
0x29ec   :  { %11122 = vmatpush3.bf16.msra.mxu1 %v15166_v8 }
0x29ed   :  { %11123 = vmatprep.subr.bf16.mxu1 %v15172_v10 }
0x29f0   :  { %11124 = vmatpush3.bf16.msra.mxu1 %v15178_v11 }
0x29f1   :  { %11125 = vmatprep.subr.bf16.mxu1 %v15184_v28 }
0x29f4   :  { %11126 = vmatpush3.bf16.msra.mxu1 %v15190_v12 }
0x29f5   :  { %11127 = vmatprep.subr.bf16.mxu1 %v15196_v26 }
0x29f8   :  { %11128 = vmatpush3.bf16.msra.mxu1 %v15202_v13 }
0x29f9   :  { %11129 = vmatprep.subr.bf16.mxu1 %v15208_v14 }
0x29fc   :  { %11130 = vmatpush3.bf16.msra.mxu1 %v15214_v18 }
0x29fd   :  { %11131 = vmatprep.subr.bf16.mxu1 %v15220_v20 }
0x2a00   :  { %11132 = vmatpush3.bf16.msra.mxu1 %v15226_v24 }
0x2a01   :  { %12186 = vmatprep.subr.bf16.mxu1 %v12789_v23 }
0x2a03   :  { %7750 = vmatmul.mubr.bf16.vlgmr.msra.gmra.mrb[0].mxu1 %v9705_v57 }
0x2a04   :  { %12187 = vmatpush3.bf16.msra.mxu1 %v15233_v25  ;;  %12190 = vmatprep.mubr.msk.bf16.mxu1 %vm12790_vm0, %v12789_v23 }
0x2a05   :  { %12188 = vmatprep.subr.bf16.mxu1 %v12789_v23 }
0x2a08   :  { %12189 = vmatpush3.bf16.msra.mxu1 %v15297_v54 }
0x2a09   :  { %12194 = vmatprep.subr.bf16.mxu1 %v12789_v23 }
0x2a0b   :  { %12191 = vmatmul.mubr.msk.bf16.vlgmr.msra.gmra.mrb[4].mxu1 %vm190_vm1, %v12636_v32  ;;  %v12645_v32 = vld [vmem:[%s15884_s3 + $0x5a8] sm:$0xff]  }
0x2a0c   :  { %12202 = vmatprep.mubr.msk.bf16.mxu1 %vm12790_vm0, %v12789_v23  ;;  %12195 = vmatpush3.bf16.msra.mxu1 %v12637_v53  ;;  %v15620_v53 = vld [vmem:[%s15885_s2] ss:$0 sm:$0xff] }
0x2a0d   :  { %12196 = vmatprep.subr.bf16.mxu1 %v12789_v23 }
0x2a10   :  { %12197 = vmatpush3.bf16.msra.mxu1 %v12638_v9 }
0x2a11   :  { %12198 = vmatprep.subr.bf16.mxu1 %v12789_v23 }
0x2a14   :  { %12199 = vmatpush3.bf16.msra.mxu1 %v12639_v55  ;;  %v9760_v55 = vld [vmem:[%s15883_s0 + $0x228] sm:$0xff] }
0x2a15   :  { %12200 = vmatprep.subr.bf16.mxu1 %v12789_v23 }
0x2a18   :  { %12201 = vmatpush3.bf16.msra.mxu1 %v12640_v5 }
0x2a19   :  { %11177 = vmatprep.subr.bf16.mxu1 %v15259_v0 }
0x2ab6   :  { %v7694_v63 = vpop.f32.mrb[252].mxu1 }
0x2ab7   :  { %v7700_v15 = vadd.f32 %v7694_v63, %v7525_v7  ;;  %v12164_v33 = vpop.f32.mrb[253].mxu1 }
0x2ab8   :  { %v7697_v36 = vpop.f32.mrb[254].mxu1 }
0x2ab9   :  { %v12165_v37 = vpop.f32.mrb[255].mxu1 }
0x2ad6   :  { %v11133_v51 = vpop.f32.mrb[0].mxu1 }
0x2ad7   :  { %v11134_v49 = vpop.f32.mrb[1].mxu1 }
0x2ad8   :  { %v11135_v40 = vadd.f32 %v11134_v49, %v11133_v51  ;;  %v11136_v42 = vpop.f32.mrb[2].mxu1  ;;  %v12647_v51 = vld [vmem:[%s15884_s3 + $0x5b8] sm:$0xff]   ;;  %v12650_v49 = vld [vmem:[%s15883_s0 + $0x230] ss:$0 sps:$4 sm:$0xff]  }
0x2ad9   :  { %v11137_v43 = vpop.f32.mrb[3].mxu1 }
0x2ada   :  { %v7752_v45 = vadd.f32 %v15081_v38, %v11135_v40 }
0x2adc   :  { %v7792_v60 = vadd.f32 %v7791_v27, %v7752_v45 }
0x2ade   :  { %v7797_v62 = vmax.f32 %v7792_v60, 0.0  ;;  %v7966_v7 = vpop.f32.mrb[4].mxu1 }
0x2adf   :  { %v12192_v56 = vpop.f32.mrb[5].mxu1 }
0x2ae0   :  { %v7798_v50 = vpack.c.bf16 %v7797_v62, %v7797_v62  ;;  %v7969_v1 = vpop.f32.mrb[6].mxu1 }
0x2ae1   :  { %v12193_v3 = vpop.f32.mrb[7].mxu1  ;;  %v9763_v1 = vcombine.high %v9760_v55, %v9760_v55 }
0x2ae2   :  { %12183 = vmatmul.mubr.msk.bf16.vlgmr.msra.gmra.mrb[8].mxu0 %vm415_vm2, %v7798_v50 }
0x2ae3   :  { %11148 = vmatpush3.bf16.msra.mxu0 %v15142_v58  ;;  %7924 = vmatprep.mubr.bf16.mxu0 %v9725_v46 }
0x2ae4   :  { %11149 = vmatprep.subr.bf16.mxu0 %v15148_v59 }
0x2ae7   :  { %11150 = vmatpush3.bf16.msra.mxu0 %v15154_v22 }
0x2ae8   :  { %11151 = vmatprep.subr.bf16.mxu0 %v15160_v4 }
0x2aeb   :  { %11152 = vmatpush3.bf16.msra.mxu0 %v15166_v8 }
0x2aec   :  { %11153 = vmatprep.subr.bf16.mxu0 %v15172_v10 }
0x2aef   :  { %11154 = vmatpush3.bf16.msra.mxu0 %v15178_v11 }
0x2af0   :  { %11155 = vmatprep.subr.bf16.mxu0 %v15184_v28 }
0x2af3   :  { %11156 = vmatpush3.bf16.msra.mxu0 %v15190_v12 }
0x2af4   :  { %11157 = vmatprep.subr.bf16.mxu0 %v15196_v26 }
0x2af7   :  { %11158 = vmatpush3.bf16.msra.mxu0 %v15202_v13 }
0x2af8   :  { %11159 = vmatprep.subr.bf16.mxu0 %v15208_v14 }
0x2afb   :  { %11160 = vmatpush3.bf16.msra.mxu0 %v15214_v18 }
0x2afc   :  { %11161 = vmatprep.subr.bf16.mxu0 %v15220_v20 }
0x2aff   :  { %11162 = vmatpush3.bf16.msra.mxu0 %v15226_v24 }
0x2b00   :  { %12206 = vmatprep.subr.bf16.mxu0 %v12789_v23 }
0x2b02   :  { %7925 = vmatmul.mubr.bf16.vlgmr.msra.gmra.mrb[12].mxu0 %v9724_v52 }
0x2b03   :  { %12207 = vmatpush3.bf16.msra.mxu0 %v15233_v25  ;;  %12210 = vmatprep.mubr.msk.bf16.mxu0 %vm12790_vm0, %v12789_v23 }
0x2b04   :  { %12208 = vmatprep.subr.bf16.mxu0 %v12789_v23 }
0x2b07   :  { %12209 = vmatpush3.bf16.msra.mxu0 %v15297_v54 }
0x2b08   :  { %12214 = vmatprep.subr.bf16.mxu0 %v12789_v23 }
0x2b0a   :  { %12211 = vmatmul.mubr.msk.bf16.vlgmr.msra.gmra.mrb[16].mxu0 %vm190_vm1, %v12643_v6 }
0x2b0b   :  { %12222 = vmatprep.mubr.msk.bf16.mxu0 %vm12790_vm0, %v12789_v23  ;;  %12215 = vmatpush3.bf16.msra.mxu0 %v12644_v31  ;;  %v15741_v31 = vld [vmem:[%s15882_s1 + $0x28] sm:$0xff]  }
0x2b0c   :  { %12216 = vmatprep.subr.bf16.mxu0 %v12789_v23 }
0x2b0f   :  { %12217 = vmatpush3.bf16.msra.mxu0 %v12645_v32  ;;  %v15747_v32 = vld [vmem:[%s15882_s1 + $0x70] sm:$0xff]  }
0x2b10   :  { %12218 = vmatprep.subr.bf16.mxu0 %v12789_v23 }
0x2bb5   :  { %v7869_v47 = vpop.f32.mrb[8].mxu0 }
0x2bb6   :  { %v7875_v48 = vadd.f32 %v7869_v47, %v7700_v15  ;;  %v12184_v34 = vpop.f32.mrb[9].mxu0  ;;  %v12646_v15 = vld [vmem:[%s15884_s3 + $0x5b0] sm:$0xff]  }
0x2bb7   :  { %v7872_v19 = vpop.f32.mrb[10].mxu0  ;;  %12219 = vmatpush3.bf16.msra.mxu0 %v12646_v15  ;;  %v15759_v15 = vld [vmem:[%s15882_s1 + $0x78] sm:$0xff]  }
0x2bb8   :  { %v12185_v35 = vpop.f32.mrb[11].mxu0  ;;  %12220 = vmatprep.subr.bf16.mxu0 %v12789_v23  ;;  %v9779_v19 = vld [vmem:[%s15883_s0 + $0x234] sm:$0xff] }
0x2bbb   :  { %12221 = vmatpush3.bf16.msra.mxu0 %v12647_v51  ;;  %v12658_v51 = vld [vmem:[%s15884_s3 + $0x5e0] sm:$0xff]  }
0x2bbc   :  { %11207 = vmatprep.subr.bf16.mxu0 %v15259_v0 }
0x2bd5   :  { %v11163_v16 = vpop.f32.mrb[12].mxu0 }
0x2bd6   :  { %v11164_v2 = vpop.f32.mrb[13].mxu0 }
0x2bd7   :  { %v11165_v17 = vadd.f32 %v11164_v2, %v11163_v16  ;;  %v11166_v57 = vpop.f32.mrb[14].mxu0  ;;  %v9782_v16 = vcombine.high %v9779_v19, %v9779_v19 }
0x2bd8   :  { %v11167_v44 = vpop.f32.mrb[15].mxu0  ;;  %v15687_v57 = vld [vmem:[%s15882_s1 + $0x48] sm:$0xff]  }
0x2bd9   :  { %v7927_v21 = vadd.f32 %v15081_v38, %v11165_v17  ;;  %v9743_v38 = vcombine.low %v9741_v41, %v9741_v41  ;;  %v15681_v17 = vld [vmem:[%s15882_s1] sm:$0xff]   ;;  %v15693_v44 = vld [vmem:[%s15882_s1 + $0x8] sm:$0xff]   ;;  %v15711_v41 = vld [vmem:[%s15882_s1 + $0x58] sm:$0xff]  }
0x2bdb   :  { %v7967_v27 = vadd.f32 %v7966_v7, %v7927_v21  ;;  %v15699_v21 = vld [vmem:[%s15882_s1 + $0x50] sm:$0xff]  }
0x2bdd   :  { %v7972_v29 = vmax.f32 %v7967_v27, 0.0  ;;  %v8141_v63 = vpop.f32.mrb[16].mxu0  ;;  %v15705_v27 = vld [vmem:[%s15882_s1 + $0x10] sm:$0xff]  }
0x2bde   :  { %v12212_v33 = vpop.f32.mrb[17].mxu0 }
0x2bdf   :  { %v7973_v30 = vpack.c.bf16 %v7972_v29, %v7972_v29  ;;  %v8144_v36 = vpop.f32.mrb[18].mxu0  ;;  %v15717_v29 = vld [vmem:[%s15882_s1 + $0x18] sm:$0xff]   ;;  %v9781_v33 = vcombine.low %v9779_v19, %v9779_v19 }
0x2be0   :  { %v12213_v37 = vpop.f32.mrb[19].mxu0  ;;  %v15765_v36 = vld [vmem:[%s15882_s1 + $0x38] sm:$0xff]  }
0x2be1   :  { %12203 = vmatmul.mubr.msk.bf16.vlgmr.msra.gmra.mrb[8].mxu1 %vm415_vm2, %v7973_v30  ;;  %v15729_v30 = vld [vmem:[%s15882_s1 + $0x20] sm:$0xff]  }
0x2be2   :  { %11178 = vmatpush3.bf16.msra.mxu1 %v15142_v58  ;;  %8099 = vmatprep.mubr.bf16.mxu1 %v9744_v39  ;;  %v15723_v39 = vld [vmem:[%s15882_s1 + $0x60] sm:$0xff]  }
0x2be3   :  { %11179 = vmatprep.subr.bf16.mxu1 %v15148_v59  ;;  %v12787_v37 = vld [vmem:[%s15882_s1 + $0x80] sm:$0xff]  }
0x2be6   :  { %11180 = vmatpush3.bf16.msra.mxu1 %v15154_v22 }
0x2be7   :  { %11181 = vmatprep.subr.bf16.mxu1 %v15160_v4 }
0x2bea   :  { %11182 = vmatpush3.bf16.msra.mxu1 %v15166_v8 }
0x2beb   :  { %11183 = vmatprep.subr.bf16.mxu1 %v15172_v10 }
0x2bee   :  { %11184 = vmatpush3.bf16.msra.mxu1 %v15178_v11 }
0x2bef   :  { %11185 = vmatprep.subr.bf16.mxu1 %v15184_v28 }
0x2bf2   :  { %11186 = vmatpush3.bf16.msra.mxu1 %v15190_v12 }
0x2bf3   :  { %11187 = vmatprep.subr.bf16.mxu1 %v15196_v26 }
0x2bf6   :  { %11188 = vmatpush3.bf16.msra.mxu1 %v15202_v13 }
0x2bf7   :  { %11189 = vmatprep.subr.bf16.mxu1 %v15208_v14 }
0x2bfa   :  { %11190 = vmatpush3.bf16.msra.mxu1 %v15214_v18 }
0x2bfb   :  { %11191 = vmatprep.subr.bf16.mxu1 %v15220_v20 }
0x2bfe   :  { %11192 = vmatpush3.bf16.msra.mxu1 %v15226_v24 }
0x2bff   :  { %12226 = vmatprep.subr.bf16.mxu1 %v12789_v23 }
0x2c01   :  { %8100 = vmatmul.mubr.bf16.vlgmr.msra.gmra.mrb[12].mxu1 %v9743_v38  ;;  %v15735_v38 = vld [vmem:[%s15882_s1 + $0x68] sm:$0xff]  }
0x2c02   :  { %12227 = vmatpush3.bf16.msra.mxu1 %v15233_v25  ;;  %12230 = vmatprep.mubr.msk.bf16.mxu1 %vm12790_vm0, %v12789_v23 }
0x2c03   :  { %12228 = vmatprep.subr.bf16.mxu1 %v12789_v23 }
0x2c06   :  { %12229 = vmatpush3.bf16.msra.mxu1 %v15297_v54 }
0x2c07   :  { %12234 = vmatprep.subr.bf16.mxu1 %v12789_v23 }
0x2c09   :  { %12231 = vmatmul.mubr.msk.bf16.vlgmr.msra.gmra.mrb[16].mxu1 %vm190_vm1, %v12650_v49  ;;  %v12659_v49 = vld [vmem:[%s15884_s3 + $0x5e8] sm:$0xff]  }
0x2c0a   :  { %12242 = vmatprep.mubr.msk.bf16.mxu1 %vm12790_vm0, %v12789_v23 }
0x2cb4   :  { %v8044_v40 = vpop.f32.mrb[8].mxu1 }
0x2cb5   :  { %v8050_v42 = vadd.f32 %v8044_v40, %v7875_v48  ;;  %v12204_v43 = vpop.f32.mrb[9].mxu1 }
0x2cb6   :  { %v8047_v45 = vpop.f32.mrb[10].mxu1 }
0x2cb7   :  { %v12205_v60 = vpop.f32.mrb[11].mxu1 }
0x2cb8   :  { %v12661_v60 = vld [vmem:[%s15884_s3 + $0x5f8] sm:$0xff]  }
0x2cd4   :  { %v11193_v61 = vpop.f32.mrb[12].mxu1 }
0x2cd5   :  { %v11194_v62 = vpop.f32.mrb[13].mxu1 }
0x2cd6   :  { %v11195_v46 = vadd.f32 %v11194_v62, %v11193_v61  ;;  %v11196_v50 = vpop.f32.mrb[14].mxu1  ;;  %v12788_v61 = vld [vmem:[%s15882_s1 + $0x40] sm:$0xff]   ;;  %v12664_v62 = vld [vmem:[%s15883_s0 + $0x248] ss:$0 sps:$4 sm:$0xff]  }
0x2cd7   :  { %v11197_v52 = vpop.f32.mrb[15].mxu1 }
0x2cd8   :  { %v8102_v9 = vadd.f32 %v15620_v53, %v11195_v46 }
0x2cda   :  { %v8142_v7 = vadd.f32 %v8141_v63, %v8102_v9  ;;  %v15753_v63 = vld [vmem:[%s15882_s1 + $0x30] sm:$0xff]  }
0x2cdc   :  { %v8147_v56 = vmax.f32 %v8142_v7, 0.0 }
0x2cde   :  { %v8148_v3 = vpack.c.bf16 %v8147_v56, %v8147_v56 }
0x2ce0   :  { %12223 = vmatmul.mubr.msk.bf16.vlgmr.msra.gmra.mrb[20].mxu0 %vm415_vm2, %v8148_v3 }
0x2ce1   :  { %11208 = vmatpush3.bf16.msra.mxu0 %v15142_v58  ;;  %8274 = vmatprep.mubr.bf16.mxu0 %v9763_v1  ;;  %v9762_v58 = vcombine.low %v9760_v55, %v9760_v55 }
0x2ce2   :  { %11209 = vmatprep.subr.bf16.mxu0 %v15148_v59  ;;  %v12651_v59 = vld [vmem:[%s15884_s3 + $0x5c0] sm:$0xff]  }
0x2ce3   :  { %12235 = vmatpush3.bf16.msra.mxu1 %v12651_v59 }
0x2ce4   :  { %12236 = vmatprep.subr.bf16.mxu1 %v12789_v23 }
0x2ce5   :  { %11210 = vmatpush3.bf16.msra.mxu0 %v15154_v22  ;;  %v12652_v22 = vld [vmem:[%s15884_s3 + $0x5c8] sm:$0xff]  }
0x2ce6   :  { %11211 = vmatprep.subr.bf16.mxu0 %v15160_v4  ;;  %v8316_v4 = vpop.f32.mrb[16].mxu1 }
0x2ce7   :  { %12237 = vmatpush3.bf16.msra.mxu1 %v12652_v22 }
0x2ce8   :  { %12238 = vmatprep.subr.bf16.mxu1 %v12789_v23 }
0x2ce9   :  { %11212 = vmatpush3.bf16.msra.mxu0 %v15166_v8  ;;  %v12653_v8 = vld [vmem:[%s15884_s3 + $0x5d0] sm:$0xff]  }
0x2cea   :  { %11213 = vmatprep.subr.bf16.mxu0 %v15172_v10  ;;  %v12232_v10 = vpop.f32.mrb[17].mxu1 }
0x2ceb   :  { %12239 = vmatpush3.bf16.msra.mxu1 %v12653_v8 }
0x2cec   :  { %12240 = vmatprep.subr.bf16.mxu1 %v12789_v23 }
0x2ced   :  { %11214 = vmatpush3.bf16.msra.mxu0 %v15178_v11  ;;  %v8319_v11 = vpop.f32.mrb[18].mxu1 }
0x2cee   :  { %11215 = vmatprep.subr.bf16.mxu0 %v15184_v28  ;;  %v12233_v28 = vpop.f32.mrb[19].mxu1 }
0x2cf1   :  { %11216 = vmatpush3.bf16.msra.mxu0 %v15190_v12  ;;  %v12654_v12 = vld [vmem:[%s15884_s3 + $0x5d8] sm:$0xff]  }
0x2cf2   :  { %11217 = vmatprep.subr.bf16.mxu0 %v15196_v26  ;;  %12241 = vmatpush3.bf16.msra.mxu1 %v12654_v12  ;;  %v12657_v26 = vld [vmem:[%s15883_s0 + $0x23c] ss:$0 sps:$4 sm:$0xff]   ;;  %v12665_v12 = vld [vmem:[%s15884_s3 + $0x600] sm:$0xff]  }
0x2cf3   :  { %11237 = vmatprep.subr.bf16.mxu1 %v15259_v0 }
0x2cf5   :  { %11218 = vmatpush3.bf16.msra.mxu0 %v15202_v13 }
0x2cf6   :  { %11219 = vmatprep.subr.bf16.mxu0 %v15208_v14 }
0x2cf9   :  { %11220 = vmatpush3.bf16.msra.mxu0 %v15214_v18 }
0x2cfa   :  { %11221 = vmatprep.subr.bf16.mxu0 %v15220_v20 }
0x2cfd   :  { %11222 = vmatpush3.bf16.msra.mxu0 %v15226_v24 }
0x2cfe   :  { %12246 = vmatprep.subr.bf16.mxu0 %v12789_v23 }
0x2d00   :  { %8275 = vmatmul.mubr.bf16.vlgmr.msra.gmra.mrb[24].mxu0 %v9762_v58 }
0x2d01   :  { %12247 = vmatpush3.bf16.msra.mxu0 %v15233_v25  ;;  %12250 = vmatprep.mubr.msk.bf16.mxu0 %vm12790_vm0, %v12789_v23 }
0x2d02   :  { %12248 = vmatprep.subr.bf16.mxu0 %v12789_v23 }
0x2d05   :  { %12249 = vmatpush3.bf16.msra.mxu0 %v15297_v54 }
0x2d06   :  { %12254 = vmatprep.subr.bf16.mxu0 %v12789_v23 }
0x2d08   :  { %12251 = vmatmul.mubr.msk.bf16.vlgmr.msra.gmra.mrb[28].mxu0 %vm190_vm1, %v12657_v26  ;;  %v12666_v26 = vld [vmem:[%s15884_s3 + $0x608] sm:$0xff]  }
0x2d09   :  { %12262 = vmatprep.mubr.msk.bf16.mxu0 %vm12790_vm0, %v12789_v23  ;;  %12255 = vmatpush3.bf16.msra.mxu0 %v12658_v51 }
0x2d0a   :  { %12256 = vmatprep.subr.bf16.mxu0 %v12789_v23 }
0x2d0d   :  { %12257 = vmatpush3.bf16.msra.mxu0 %v12659_v49 }
0x2d0e   :  { %12258 = vmatprep.subr.bf16.mxu0 %v12789_v23 }
0x2db3   :  { %v8219_v13 = vpop.f32.mrb[20].mxu0 }
0x2db4   :  { %v15671_v14 = vadd.f32 %v8219_v13, %v8050_v42  ;;  %v12224_v18 = vpop.f32.mrb[21].mxu0 }
0x2db5   :  { %v8222_v20 = vpop.f32.mrb[22].mxu0  ;;  %v12667_v18 = vld [vmem:[%s15884_s3 + $0x610] sm:$0xff]  }
0x2db6   :  { %v12225_v24 = vpop.f32.mrb[23].mxu0 }
0x2dd3   :  { %v11223_v25 = vpop.f32.mrb[24].mxu0 }
0x2dd4   :  { %v11224_v5 = vpop.f32.mrb[25].mxu0 }
0x2dd5   :  { %v11225_v6 = vadd.f32 %v11224_v5, %v11223_v25  ;;  %v11226_v47 = vpop.f32.mrb[26].mxu0  ;;  %v12668_v25 = vld [vmem:[%s15884_s3 + $0x618] sm:$0xff]  }
0x2dd6   :  { %v11227_v0 = vpop.f32.mrb[27].mxu0 }
0x2dd7   :  { %v8277_v48 = vadd.f32 %v15620_v53, %v11225_v6 }
0x2dd9   :  { %v8317_v34 = vadd.f32 %v8316_v4, %v8277_v48  ;;  %v9798_v4 = vld [vmem:[%s15883_s0 + $0x240] sm:$0xff] }
0x2dda   :  { %v9801_v10 = vcombine.high %v9798_v4, %v9798_v4  ;;  %v9800_v28 = vcombine.low %v9798_v4, %v9798_v4 }
0x2ddb   :  { %v8322_v35 = vmax.f32 %v8317_v34, 0.0  ;;  %v8491_v40 = vpop.f32.mrb[28].mxu0 }
0x2ddc   :  { %v12252_v42 = vpop.f32.mrb[29].mxu0 }
0x2ddd   :  { %v8323_v2 = vpack.c.bf16 %v8322_v35, %v8322_v35  ;;  %v8494_v43 = vpop.f32.mrb[30].mxu0 }
0x2dde   :  { %v12253_v45 = vpop.f32.mrb[31].mxu0 }
0x2ddf   :  { %12243 = vmatmul.mubr.msk.bf16.vlgmr.msra.gmra.mrb[20].mxu1 %vm415_vm2, %v8323_v2 }
0x2de0   :  { %11238 = vmatpush3.bf16.msra.mxu1 %v15681_v17  ;;  %8449 = vmatprep.mubr.bf16.mxu1 %v9782_v16 }
0x2de1   :  { %11239 = vmatprep.subr.bf16.mxu1 %v15687_v57 }
0x2de4   :  { %11240 = vmatpush3.bf16.msra.mxu1 %v15693_v44 }
0x2de5   :  { %11241 = vmatprep.subr.bf16.mxu1 %v15699_v21 }
0x2de8   :  { %11242 = vmatpush3.bf16.msra.mxu1 %v15705_v27 }
0x2de9   :  { %11243 = vmatprep.subr.bf16.mxu1 %v15711_v41 }
0x2dec   :  { %11244 = vmatpush3.bf16.msra.mxu1 %v15717_v29 }
0x2ded   :  { %11245 = vmatprep.subr.bf16.mxu1 %v15723_v39 }
0x2df0   :  { %11246 = vmatpush3.bf16.msra.mxu1 %v15729_v30 }
0x2df1   :  { %11247 = vmatprep.subr.bf16.mxu1 %v15735_v38 }
0x2df4   :  { %11248 = vmatpush3.bf16.msra.mxu1 %v15741_v31 }
0x2df5   :  { %11249 = vmatprep.subr.bf16.mxu1 %v15747_v32 }
0x2df8   :  { %11250 = vmatpush3.bf16.msra.mxu1 %v15753_v63 }
0x2df9   :  { %11251 = vmatprep.subr.bf16.mxu1 %v15759_v15 }
0x2dfc   :  { %11252 = vmatpush3.bf16.msra.mxu1 %v15765_v36 }
0x2dfd   :  { %12266 = vmatprep.subr.bf16.mxu1 %v12789_v23 }
0x2dff   :  { %8450 = vmatmul.mubr.bf16.vlgmr.msra.gmra.mrb[24].mxu1 %v9781_v33 }
0x2e00   :  { %12267 = vmatpush3.bf16.msra.mxu1 %v12787_v37  ;;  %12270 = vmatprep.mubr.msk.bf16.mxu1 %vm12790_vm0, %v12789_v23 }
0x2e01   :  { %12268 = vmatprep.subr.bf16.mxu1 %v12789_v23 }
0x2e04   :  { %12269 = vmatpush3.bf16.msra.mxu1 %v15297_v54  ;;  %v12660_v54 = vld [vmem:[%s15884_s3 + $0x5f0] sm:$0xff]  }
0x2e05   :  { %12274 = vmatprep.subr.bf16.mxu1 %v12789_v23  ;;  %12259 = vmatpush3.bf16.msra.mxu0 %v12660_v54 }
0x2e06   :  { %12260 = vmatprep.subr.bf16.mxu0 %v12789_v23 }
0x2e07   :  { %12271 = vmatmul.mubr.msk.bf16.vlgmr.msra.gmra.mrb[28].mxu1 %vm190_vm1, %v12664_v62 }
0x2e08   :  { %12282 = vmatprep.mubr.msk.bf16.mxu1 %vm12790_vm0, %v12789_v23  ;;  %12275 = vmatpush3.bf16.msra.mxu1 %v12665_v12 }
0x2e09   :  { %12261 = vmatpush3.bf16.msra.mxu0 %v12661_v60  ;;  %12276 = vmatprep.subr.bf16.mxu1 %v12789_v23 }
0x2e0a   :  { %11267 = vmatprep.subr.bf16.mxu0 %v12788_v61 }
0x2e0c   :  { %12277 = vmatpush3.bf16.msra.mxu1 %v12666_v26 }
0x2e0d   :  { %12278 = vmatprep.subr.bf16.mxu1 %v12789_v23 }
0x2e10   :  { %12279 = vmatpush3.bf16.msra.mxu1 %v12667_v18 }
0x2e11   :  { %12280 = vmatprep.subr.bf16.mxu1 %v12789_v23 }
0x2e14   :  { %12281 = vmatpush3.bf16.msra.mxu1 %v12668_v25 }
0x2e15   :  { %12286 = vmatprep.subr.bf16.mxu1 %v12789_v23 }
0x2eb2   :  { %v8394_v46 = vpop.f32.mrb[20].mxu1 }
0x2eb3   :  { %v8400_v50 = vadd.f32 %v8394_v46, %v15671_v14  ;;  %v12244_v52 = vpop.f32.mrb[21].mxu1 }
0x2eb4   :  { %v8397_v9 = vpop.f32.mrb[22].mxu1 }
0x2eb5   :  { %v12245_v7 = vpop.f32.mrb[23].mxu1 }
0x2ed2   :  { %v11253_v55 = vpop.f32.mrb[24].mxu1 }
0x2ed3   :  { %v11254_v56 = vpop.f32.mrb[25].mxu1 }
0x2ed4   :  { %v11255_v1 = vadd.f32 %v11254_v56, %v11253_v55  ;;  %v11256_v3 = vpop.f32.mrb[26].mxu1 }
0x2ed5   :  { %v11257_v58 = vpop.f32.mrb[27].mxu1 }
0x2ed6   :  { %v8452_v59 = vadd.f32 %v15620_v53, %v11255_v1 }
0x2ed8   :  { %v8492_v22 = vadd.f32 %v8491_v40, %v8452_v59 }
0x2eda   :  { %v8497_v8 = vmax.f32 %v8492_v22, 0.0  ;;  %v8666_v13 = vpop.f32.mrb[28].mxu1 }
0x2edb   :  { %v12272_v14 = vpop.f32.mrb[29].mxu1 }
0x2edc   :  { %v8498_v11 = vpack.c.bf16 %v8497_v8, %v8497_v8  ;;  %v8669_v20 = vpop.f32.mrb[30].mxu1 }
0x2edd   :  { %v12273_v24 = vpop.f32.mrb[31].mxu1 }
0x2ede   :  { %12263 = vmatmul.mubr.msk.bf16.vlgmr.msra.gmra.mrb[32].mxu0 %vm415_vm2, %v8498_v11 }
0x2edf   :  { %11268 = vmatpush3.bf16.msra.mxu0 %v15681_v17  ;;  %8624 = vmatprep.mubr.bf16.mxu0 %v9801_v10 }
0x2ee0   :  { %11269 = vmatprep.subr.bf16.mxu0 %v15687_v57 }
0x2ee3   :  { %11270 = vmatpush3.bf16.msra.mxu0 %v15693_v44 }
0x2ee4   :  { %11271 = vmatprep.subr.bf16.mxu0 %v15699_v21  ;;  %v12669_v21 = vld [vmem:[%s15886_s5] sm:$0xff]  }
0x2ee7   :  { %11272 = vmatpush3.bf16.msra.mxu0 %v15705_v27 }
0x2ee8   :  { %11273 = vmatprep.subr.bf16.mxu0 %v15711_v41  ;;  %v12670_v41 = vld [vmem:[%s15886_s5 + $0x8] sm:$0xff]  }
0x2eeb   :  { %11274 = vmatpush3.bf16.msra.mxu0 %v15717_v29  ;;  %v12672_v29 = vld [vmem:[%s15886_s5 + $0x18] sm:$0xff]  }
0x2eec   :  { %11275 = vmatprep.subr.bf16.mxu0 %v15723_v39  ;;  %v12673_v39 = vld [vmem:[%s15886_s5 + $0x20] sm:$0xff]  }
0x2eef   :  { %11276 = vmatpush3.bf16.msra.mxu0 %v15729_v30  ;;  %v12674_v30 = vld [vmem:[%s15886_s5 + $0x28] sm:$0xff]  }
0x2ef0   :  { %11277 = vmatprep.subr.bf16.mxu0 %v15735_v38  ;;  %v12675_v38 = vld [vmem:[%s15886_s5 + $0x30] sm:$0xff]  }
0x2ef3   :  { %11278 = vmatpush3.bf16.msra.mxu0 %v15741_v31  ;;  %v12676_v31 = vld [vmem:[%s15886_s5 + $0x38] sm:$0xff]  }
0x2ef4   :  { %11279 = vmatprep.subr.bf16.mxu0 %v15747_v32 }
0x2ef7   :  { %11280 = vmatpush3.bf16.msra.mxu0 %v15753_v63  ;;  %v9817_v63 = vld [vmem:[%s15887_s4] ss:$0 sm:$0xff] }
0x2ef8   :  { %11281 = vmatprep.subr.bf16.mxu0 %v15759_v15 }
0x2efb   :  { %11282 = vmatpush3.bf16.msra.mxu0 %v15765_v36 }
0x2efe   :  { %8625 = vmatmul.mubr.bf16.vlgmr.msra.gmra.mrb[36].mxu0 %v9800_v28 }
0x2fb1   :  { %v8569_v5 = vpop.f32.mrb[32].mxu0 }
0x2fb2   :  { %v8575_v6 = vadd.f32 %v8569_v5, %v8400_v50  ;;  %v12264_v47 = vpop.f32.mrb[33].mxu0 }
0x2fb3   :  { %v8572_v0 = vpop.f32.mrb[34].mxu0 }
0x2fb4   :  { %v12265_v48 = vpop.f32.mrb[35].mxu0 }
0x2fd1   :  { %v11283_v34 = vpop.f32.mrb[36].mxu0 }
0x2fd2   :  { %v11284_v19 = vpop.f32.mrb[37].mxu0 }
0x2fd3   :  { %v11285_v35 = vadd.f32 %v11284_v19, %v11283_v34  ;;  %v11286_v16 = vpop.f32.mrb[38].mxu0 }
0x2fd4   :  { %v11287_v2 = vpop.f32.mrb[39].mxu0 }
0x2fd5   :  { %v8627_v17 = vadd.f32 %v15620_v53, %v11285_v35  ;;  %v12671_v53 = vld [vmem:[%s15886_s5 + $0x10] sm:$0xff]  }
0x2fd7   :  { %v8667_v57 = vadd.f32 %v8666_v13, %v8627_v17 }
0x2fd9   :  { %v8672_v44 = vmax.f32 %v8667_v57, 0.0 }
0x2fdb   :  { %v8673_v27 = vpack.c.bf16 %v8672_v44, %v8672_v44 }
0x2fdd   :  { %12283 = vmatmul.mubr.msk.bf16.vlgmr.msra.gmra.mrb[32].mxu1 %vm415_vm2, %v8673_v27 }
0x2fde   :  { %12287 = vmatpush3.bf16.msra.mxu1 %v12669_v21  ;;  %12302 = vmatprep.mubr.msk.bf16.mxu1 %vm12790_vm0, %v12789_v23 }
0x2fdf   :  { %12288 = vmatprep.subr.bf16.mxu1 %v12789_v23 }
0x2fe2   :  { %12289 = vmatpush3.bf16.msra.mxu1 %v12670_v41 }
0x2fe3   :  { %12290 = vmatprep.subr.bf16.mxu1 %v12789_v23 }
0x2fe6   :  { %12291 = vmatpush3.bf16.msra.mxu1 %v12671_v53 }
0x2fe7   :  { %12292 = vmatprep.subr.bf16.mxu1 %v12789_v23 }
0x2fea   :  { %12293 = vmatpush3.bf16.msra.mxu1 %v12672_v29 }
0x2feb   :  { %12294 = vmatprep.subr.bf16.mxu1 %v12789_v23 }
0x2fee   :  { %12295 = vmatpush3.bf16.msra.mxu1 %v12673_v39 }
0x2fef   :  { %12296 = vmatprep.subr.bf16.mxu1 %v12789_v23 }
0x2ff2   :  { %12297 = vmatpush3.bf16.msra.mxu1 %v12674_v30 }
0x2ff3   :  { %12298 = vmatprep.subr.bf16.mxu1 %v12789_v23 }
0x2ff6   :  { %12299 = vmatpush3.bf16.msra.mxu1 %v12675_v38 }
0x2ff7   :  { %12300 = vmatprep.subr.bf16.mxu1 %v12789_v23  ;;  %v9818_v23 = vld [vmem:[%s15888_s6] ss:$0 sm:$0xff] }
0x2ffa   :  { %12301 = vmatpush3.bf16.msra.mxu1 %v12676_v31 }
0x30b0   :  { %v8744_v32 = vpop.f32.mrb[32].mxu1 }
0x30b1   :  { %v8750_v15 = vadd.f32 %v8744_v32, %v8575_v6  ;;  %v12284_v33 = vpop.f32.mrb[33].mxu1 }
0x30b2   :  { %v8747_v36 = vpop.f32.mrb[34].mxu1 }
0x30b3   :  { %v8758_v37 = vadd.f32 %v9817_v63, %v8750_v15  ;;  %v12285_v51 = vpop.f32.mrb[35].mxu1 }
0x30b5   :  { %v8759_v49 = vmax.f32 %v8758_v37, 0.0 }
0x30b7   :  { %v8760_v40 = vpack.c.bf16 %v8759_v49, %v8759_v49 }
0x30b9   :  { %12303 = vmatmul.mubr.bf16.vlgmr.msra.gmra.mrb[36].mxu1 %v8760_v40 }
0x318c   :  { %v8866_v54 = vpop.f32.mrb[36].mxu1 }
0x318d   :  { %v8867_v42 = vadd.f32 %v9818_v23, %v8866_v54  ;;  %v12304_v43 = vpop.f32.mrb[37].mxu1 }
0x318e   :  { %v8869_v45 = vpop.f32.mrb[38].mxu1 }
0x318f   :  { %8872 = vst [vmem:[%s15889_s7] sm:$0xff] %v8867_v42  ;;  %v12305_v60 = vpop.f32.mrb[39].mxu1 }

</bundles_post_ra>
